<compile_context>
chip_gen: v7x
topology: tpu7x:2x2x1
jax: 0.10.0
libtpu: 0.0.40
codegen_flags: <defaults>
</compile_context>

<pallas_src>
import functools

import jax
import jax.numpy as jnp
import numpy as np
from jax.experimental import pallas as pl
from jax.experimental.pallas import tpu as pltpu


# ----------------------------------------------------------------------------
# Fused InceptionC kernel: one grid step == Nb batch images.
# ----------------------------------------------------------------------------
def _inception_c_kernel(
    x_ref,                           # (Nb, H, W, Cin)          bf16
    wmain_ref, smain_ref,            # (Cin, c1+c2+c3r+c4) bf16 ; (1, .) f32
    w3_ref, s3_ref,                  # (9*c3r, c3)         bf16 ; (1, c3) f32
    w2a_ref, b2a_ref,                # (3*c2, c2a)         bf16 ; (1, c2a) f32
    w2b_ref, b2b_ref,                # (3*c2, c2b)         bf16 ; (1, c2b) f32
    w3a_ref, b3a_ref,                # (3*c3, c3a)         bf16 ; (1, c3a) f32
    w3b_ref, b3b_ref,                # (3*c3, c3b)         bf16 ; (1, c3b) f32
    s4_ref,                          # (1, c4)                    f32
    o_ref,                           # (Nb, H, W, Ctot)           f32
    b2pad_ref, b3rpad_ref, b3pad_ref, b4pad_ref,   # (Nb, H+2, W+2, *) scratch
    *, nb, H, W, c1, c2, c3r, c4):
    f32 = jnp.float32
    Wp = W + 2
    M = nb * H * W
    Cin = x_ref.shape[-1]

    # ---- merged 1x1 reduce convs (+ folded BN): [b1 | b2 | b3r | b4pre] -----
    # Single M x Cin x 128 matmul; b4pre's shift slots in smain are zero and
    # b4pre is taken from the PRE-ReLU result (pool first, then shift + ReLU).
    x2d = x_ref[...].reshape(M, Cin)
    ymain = jnp.dot(x2d, wmain_ref[...], preferred_element_type=f32)
    ymain = ymain + smain_ref[0]
    act = jnp.maximum(ymain, 0.0)
    b1 = act[:, :c1]
    b2 = act[:, c1:c1 + c2]
    b3r = act[:, c1 + c2:c1 + c2 + c3r]
    b4pre = ymain[:, c1 + c2 + c3r:]

    # ---- write an intermediate into its zero-bordered padded scratch --------
    # Only the 1-pixel border strips are zeroed (the interior is fully
    # overwritten).  Done every step (not @pl.when(pid==0)) so it stays correct
    # when the parallel batch axis is sharded across v7x's two TensorCores
    # (scratch is per-core).
    def fill_padded(pad_ref, val2d):
        c = pad_ref.shape[-1]
        zr = jnp.zeros((nb, 1, Wp, c), pad_ref.dtype)
        zc = jnp.zeros((nb, H, 1, c), pad_ref.dtype)
        pad_ref[:, 0:1, :, :] = zr
        pad_ref[:, H + 1:H + 2, :, :] = zr
        pad_ref[:, 1:H + 1, 0:1, :] = zc
        pad_ref[:, 1:H + 1, W + 1:W + 2, :] = zc
        pad_ref[:, 1:H + 1, 1:W + 1, :] = val2d.reshape(nb, H, W, c).astype(pad_ref.dtype)

    # ---- im2col conv: ONE deep-K matmul instead of KH*KW shallow tap matmuls
    def im2col_conv(pad_ref, taps, w_ref, bias_ref):
        c = pad_ref.shape[-1]
        slabs = [pad_ref[:, dh:dh + H, dw:dw + W, :].reshape(M, c) for dh, dw in taps]
        slab = jnp.concatenate(slabs, axis=-1)            # (M, KH*KW*c)
        return jnp.dot(slab, w_ref[...], preferred_element_type=f32) + bias_ref[0]

    TAPS_1X3 = ((1, 0), (1, 1), (1, 2))                   # padding (0, 1)
    TAPS_3X1 = ((0, 1), (1, 1), (2, 1))                   # padding (1, 0)
    TAPS_3X3 = tuple((kh, kw) for kh in range(3) for kw in range(3))

    # ---- branch4: pool(conv1x1(x)) == conv1x1(pool(x)) for a bias-free 1x1 --
    # 3x3 avg-pool (count_include_pad=True) on the 16-channel b4pre slice,
    # then BN shift + ReLU.
    fill_padded(b4pad_ref, b4pre)
    acc = None
    for dh, dw in TAPS_3X3:
        tap = b4pad_ref[:, dh:dh + H, dw:dw + W, :].reshape(M, c4)
        acc = tap if acc is None else acc + tap
    y4 = jnp.maximum(acc * (1.0 / 9.0) + s4_ref[0], 0.0)

    # ---- branch2 tails: 1x3 and 3x1 convs + bias (no BN, no ReLU) -----------
    fill_padded(b2pad_ref, b2)
    y2a = im2col_conv(b2pad_ref, TAPS_1X3, w2a_ref, b2a_ref)
    y2b = im2col_conv(b2pad_ref, TAPS_3X1, w2b_ref, b2b_ref)

    # ---- branch3: 3x3 conv (+BN+ReLU), then its 1x3 / 3x1 tails -------------
    fill_padded(b3rpad_ref, b3r)
    b3 = jnp.maximum(im2col_conv(b3rpad_ref, TAPS_3X3, w3_ref, s3_ref), 0.0)
    fill_padded(b3pad_ref, b3)
    y3a = im2col_conv(b3pad_ref, TAPS_1X3, w3a_ref, b3a_ref)
    y3b = im2col_conv(b3pad_ref, TAPS_3X1, w3b_ref, b3b_ref)

    # ---- single lane-dense store of the whole fused output slab -------------
    out = jnp.concatenate([b1, y2a, y2b, y3a, y3b, y4], axis=-1)   # (M, 176)
    o_ref[...] = out.reshape(nb, H, W, out.shape[-1]).astype(o_ref.dtype)


# ----------------------------------------------------------------------------
# Wrapper: NCHW in / NCHW out, BN folding + weight packing, one pallas_call.
# ----------------------------------------------------------------------------
def _fold_bn(pp, cdt=jnp.bfloat16):
    """Fold BN scale into the conv weight: y = conv(x; w*scale) + shift."""
    w = (pp["w"] * pp["scale"].reshape(1, 1, 1, -1)).astype(cdt)
    return w, pp["shift"].astype(jnp.float32)


def _bcast_spec(a):
    zeros = (0,) * a.ndim
    return pl.BlockSpec(a.shape, lambda n, _z=zeros: _z)


@jax.jit
def inception_c_forward(x_nchw, params):
    p = params
    # NHWC, bf16: halves the kernel's HBM reads and feeds the MXU directly.
    x = jnp.transpose(x_nchw, (0, 2, 3, 1)).astype(jnp.bfloat16)
    N, H, W, Cin = x.shape

    # Fold BN into the weights; merge the three 1x1 reduce convs AND the
    # branch4 1x1 conv along Cout -> (Cin, c1+c2+c3r+c4) main matmul RHS.
    w1, s1 = _fold_bn(p["b1"])
    w2, s2 = _fold_bn(p["b2"])
    w3r, s3r = _fold_bn(p["b3r"])
    w4, s4 = _fold_bn(p["b4"])
    wmain = jnp.concatenate([w1[0, 0], w2[0, 0], w3r[0, 0], w4[0, 0]], axis=-1)
    smain = jnp.concatenate([s1, s2, s3r, jnp.zeros_like(s4)], axis=-1)

    w3, s3 = _fold_bn(p["b3"])
    w2a, b2a = _fold_bn(p["b2a"])
    w2b, b2b = _fold_bn(p["b2b"])
    w3a, b3a = _fold_bn(p["b3a"])
    w3b, b3b = _fold_bn(p["b3b"])

    c1, c2, c3r = w1.shape[-1], w2.shape[-1], w3r.shape[-1]
    c3, c4 = w3.shape[-1], w4.shape[-1]
    ctot = (c1 + w2a.shape[-1] + w2b.shape[-1]
            + w3a.shape[-1] + w3b.shape[-1] + c4)
    Hp, Wp = H + 2, W + 2

    # im2col weight layout: rows ordered (kh, kw, cin) row-major, matching the
    # in-kernel tap concatenation order.
    weights = (
        wmain, smain,
        w3.reshape(-1, c3), s3,
        w2a.reshape(-1, w2a.shape[-1]), b2a,
        w2b.reshape(-1, w2b.shape[-1]), b2b,
        w3a.reshape(-1, w3a.shape[-1]), b3a,
        w3b.reshape(-1, w3b.shape[-1]), b3b,
        s4,
    )

    # Batch-block the grid so each step feeds the MXU with M = Nb*H*W rows
    # (>=128 when possible), with a simple VMEM guard on the input block.
    nb = 1
    for cand in (8, 4, 2):
        if N % cand == 0 and cand * H * W * Cin * 2 <= 8 * 1024 * 1024:
            nb = cand
            break

    kernel = functools.partial(_inception_c_kernel, nb=nb, H=H, W=W,
                               c1=c1, c2=c2, c3r=c3r, c4=c4)

    out = pl.pallas_call(
        kernel,
        out_shape=jax.ShapeDtypeStruct((N, H, W, ctot), jnp.float32),
        grid=(N // nb,),
        in_specs=[pl.BlockSpec((nb, H, W, Cin), lambda n: (n, 0, 0, 0))]
                 + [_bcast_spec(a) for a in weights],
        out_specs=pl.BlockSpec((nb, H, W, ctot), lambda n: (n, 0, 0, 0)),
        scratch_shapes=[
            pltpu.VMEM((nb, Hp, Wp, c2), jnp.bfloat16),
            pltpu.VMEM((nb, Hp, Wp, c3r), jnp.bfloat16),
            pltpu.VMEM((nb, Hp, Wp, c3), jnp.bfloat16),
            pltpu.VMEM((nb, Hp, Wp, c4), jnp.float32),
        ],
        compiler_params=pltpu.CompilerParams(
            dimension_semantics=("parallel",),
            vmem_limit_bytes=64 * 1024 * 1024),
    )(x, *weights)

    return jnp.transpose(out, (0, 3, 1, 2))               # -> NCHW


# ----------------------------------------------------------------------------
# Deterministic parameter construction (inference-mode BN folded into
# per-channel scale/shift: y = conv(x) * scale + shift).
# ----------------------------------------------------------------------------
def make_conv_params(key, cin, cout, kh, kw, use_bn):
    k1, k2, k3, k4, k5, k6 = jax.random.split(key, 6)
    w = jax.random.normal(k1, (kh, kw, cin, cout), jnp.float32) / np.sqrt(cin * kh * kw)
    b = jax.random.normal(k2, (cout,), jnp.float32) * 0.05
    if use_bn:
        gamma = jax.random.uniform(k3, (cout,), jnp.float32, 0.5, 1.5)
        beta = jax.random.normal(k4, (cout,), jnp.float32) * 0.1
        mean = jax.random.normal(k5, (cout,), jnp.float32) * 0.1
        var = jax.random.uniform(k6, (cout,), jnp.float32, 0.5, 1.5)
        scale = gamma / jnp.sqrt(var + 1e-5)
        shift = (b - mean) * scale + beta
    else:                                  # plain conv (branch2a/2b, 3a/3b)
        scale = jnp.ones((cout,), jnp.float32)
        shift = b
    return {"w": w, "scale": scale.reshape(1, cout), "shift": shift.reshape(1, cout)}


def make_inception_c_params(key, cin, c1=32, c2=32, c2a=32, c2b=32,
                            c3r=48, c3=32, c3a=32, c3b=32, c4=16):
    ks = jax.random.split(key, 9)
    return {
        "b1":  make_conv_params(ks[0], cin, c1, 1, 1, True),
        "b2":  make_conv_params(ks[1], cin, c2, 1, 1, True),
        "b2a": make_conv_params(ks[2], c2, c2a, 1, 3, False),
        "b2b": make_conv_params(ks[3], c2, c2b, 3, 1, False),
        "b3r": make_conv_params(ks[4], cin, c3r, 1, 1, True),
        "b3":  make_conv_params(ks[5], c3r, c3, 3, 3, True),
        "b3a": make_conv_params(ks[6], c3, c3a, 1, 3, False),
        "b3b": make_conv_params(ks[7], c3, c3b, 3, 1, False),
        "b4":  make_conv_params(ks[8], cin, c4, 1, 1, True),
    }


# ----------------------------------------------------------------------------
# Pure-JAX reference (lax.conv, f32) for verification.
# ----------------------------------------------------------------------------
def _conv_ref(x, pp, pad, relu):
    y = jax.lax.conv_general_dilated(
        x, pp["w"], (1, 1), ((pad[0], pad[0]), (pad[1], pad[1])),
        dimension_numbers=("NHWC", "HWIO", "NHWC"))
    y = y * pp["scale"].reshape(1, 1, 1, -1) + pp["shift"].reshape(1, 1, 1, -1)
    return jnp.maximum(y, 0.0) if relu else y


def _avgpool3x3_ref(x):
    N, H, W, C = x.shape
    xp = jnp.pad(x, ((0, 0), (1, 1), (1, 1), (0, 0)))
    acc = sum(xp[:, kh:kh + H, kw:kw + W, :] for kh in range(3) for kw in range(3))
    return acc / 9.0


def inception_c_reference(x_nchw, p):
    x = jnp.transpose(x_nchw, (0, 2, 3, 1))
    b1 = _conv_ref(x, p["b1"], (0, 0), True)
    b2 = _conv_ref(x, p["b2"], (0, 0), True)
    b2a = _conv_ref(b2, p["b2a"], (0, 1), False)
    b2b = _conv_ref(b2, p["b2b"], (1, 0), False)
    b3 = _conv_ref(x, p["b3r"], (0, 0), True)
    b3 = _conv_ref(b3, p["b3"], (1, 1), True)
    b3a = _conv_ref(b3, p["b3a"], (0, 1), False)
    b3b = _conv_ref(b3, p["b3b"], (1, 0), False)
    b4 = _conv_ref(_avgpool3x3_ref(x), p["b4"], (0, 0), True)
    out = jnp.concatenate([b1, b2a, b2b, b3a, b3b, b4], axis=-1)
    return jnp.transpose(out, (0, 3, 1, 2))


if __name__ == "__main__":
    key = jax.random.PRNGKey(0)
    k_x, k_p = jax.random.split(key)

    N, Cin, H, W = 2, 16, 8, 8
    x = jax.random.normal(k_x, (N, Cin, H, W), jnp.float32)   # NCHW like PyTorch
    params = make_inception_c_params(k_p, Cin)

    out = inception_c_forward(x, params)
    out = jax.block_until_ready(out)

    expected_c = 32 + (32 + 32) + (32 + 32) + 16
    assert out.shape == (N, expected_c, H, W), out.shape

    ref = inception_c_reference(x, params)
    # bf16 inputs/weights on the MXU with f32 accumulation -> looser tolerance
    # than a pure-f32 reference.
    np.testing.assert_allclose(np.asarray(out), np.asarray(ref), rtol=4e-2, atol=4e-2)

    print("KERNEL_OK")
</pallas_src>

<mosaic_0001>
module attributes {stable_mosaic.version = 11 : i64} {
  func.func @_inception_c_kernel(%arg0: i32, %arg1: memref<2x8x8x16xbf16, #tpu.memory_space<vmem>>, %arg2: memref<16x128xbf16, #tpu.memory_space<vmem>>, %arg3: memref<1x128xf32, #tpu.memory_space<vmem>>, %arg4: memref<432x32xbf16, #tpu.memory_space<vmem>>, %arg5: memref<1x32xf32, #tpu.memory_space<vmem>>, %arg6: memref<96x32xbf16, #tpu.memory_space<vmem>>, %arg7: memref<1x32xf32, #tpu.memory_space<vmem>>, %arg8: memref<96x32xbf16, #tpu.memory_space<vmem>>, %arg9: memref<1x32xf32, #tpu.memory_space<vmem>>, %arg10: memref<96x32xbf16, #tpu.memory_space<vmem>>, %arg11: memref<1x32xf32, #tpu.memory_space<vmem>>, %arg12: memref<96x32xbf16, #tpu.memory_space<vmem>>, %arg13: memref<1x32xf32, #tpu.memory_space<vmem>>, %arg14: memref<1x16xf32, #tpu.memory_space<vmem>>, %arg15: memref<2x8x8x176xf32, #tpu.memory_space<vmem>>, %arg16: memref<2x10x10x32xbf16, #tpu.memory_space<vmem>>, %arg17: memref<2x10x10x48xbf16, #tpu.memory_space<vmem>>, %arg18: memref<2x10x10x32xbf16, #tpu.memory_space<vmem>>, %arg19: memref<2x10x10x16xf32, #tpu.memory_space<vmem>>) attributes {dimension_semantics = [#tpu.dimension_semantics<parallel>], iteration_bounds = array<i64: 1>, scalar_prefetch = 0 : i64, scratch_operands = 4 : i64, tpu.core_type = #tpu.core_type<tc>, window_params = [{transform_indices = @transform_0, window_bounds = array<i64: 2, 8, 8, 16>}, {pipeline_mode = #tpu.pipeline_mode<synchronous>, transform_indices = @transform_1, window_bounds = array<i64: 16, 128>}, {pipeline_mode = #tpu.pipeline_mode<synchronous>, transform_indices = @transform_2, window_bounds = array<i64: 1, 128>}, {pipeline_mode = #tpu.pipeline_mode<synchronous>, transform_indices = @transform_3, window_bounds = array<i64: 432, 32>}, {pipeline_mode = #tpu.pipeline_mode<synchronous>, transform_indices = @transform_4, window_bounds = array<i64: 1, 32>}, {pipeline_mode = #tpu.pipeline_mode<synchronous>, transform_indices = @transform_5, window_bounds = array<i64: 96, 32>}, {pipeline_mode = #tpu.pipeline_mode<synchronous>, transform_indices = @transform_6, window_bounds = array<i64: 1, 32>}, {pipeline_mode = #tpu.pipeline_mode<synchronous>, transform_indices = @transform_7, window_bounds = array<i64: 96, 32>}, {pipeline_mode = #tpu.pipeline_mode<synchronous>, transform_indices = @transform_8, window_bounds = array<i64: 1, 32>}, {pipeline_mode = #tpu.pipeline_mode<synchronous>, transform_indices = @transform_9, window_bounds = array<i64: 96, 32>}, {pipeline_mode = #tpu.pipeline_mode<synchronous>, transform_indices = @transform_10, window_bounds = array<i64: 1, 32>}, {pipeline_mode = #tpu.pipeline_mode<synchronous>, transform_indices = @transform_11, window_bounds = array<i64: 96, 32>}, {pipeline_mode = #tpu.pipeline_mode<synchronous>, transform_indices = @transform_12, window_bounds = array<i64: 1, 32>}, {pipeline_mode = #tpu.pipeline_mode<synchronous>, transform_indices = @transform_13, window_bounds = array<i64: 1, 16>}, {transform_indices = @transform_14, window_bounds = array<i64: 2, 8, 8, 176>}]} {
    %c0 = arith.constant 0 : index
    %c0_0 = arith.constant 0 : index
    %c0_1 = arith.constant 0 : index
    %c0_2 = arith.constant 0 : index
    %0 = vector.load %arg1[%c0, %c0_0, %c0_1, %c0_2] : memref<2x8x8x16xbf16, #tpu.memory_space<vmem>>, vector<2x8x8x16xbf16>
    %1 = vector.shape_cast %0 : vector<2x8x8x16xbf16> to vector<128x16xbf16>
    %c0_3 = arith.constant 0 : index
    %c0_4 = arith.constant 0 : index
    %2 = vector.load %arg2[%c0_3, %c0_4] : memref<16x128xbf16, #tpu.memory_space<vmem>>, vector<16x128xbf16>
    %cst = arith.constant dense<0.000000e+00> : vector<128x128xf32>
    %3 = tpu.matmul %1, %2, %cst {dimension_numbers = #tpu.dot_dimension_numbers<[1], [0], [0], [1], [0, 0, 1, 1], [], []>} : vector<128x16xbf16>, vector<16x128xbf16>, vector<128x128xf32> -> vector<128x128xf32>
    %c0_5 = arith.constant 0 : index
    %c0_6 = arith.constant 0 : index
    %4 = vector.load %arg3[%c0_5, %c0_6] : memref<1x128xf32, #tpu.memory_space<vmem>>, vector<1x128xf32>
    %5 = vector.shape_cast %4 : vector<1x128xf32> to vector<128xf32>
    %6 = vector.shape_cast %5 : vector<128xf32> to vector<1x128xf32>
    %7 = vector.broadcast %6 : vector<1x128xf32> to vector<128x128xf32>
    %8 = arith.addf %3, %7 : vector<128x128xf32>
    %cst_7 = arith.constant 0.000000e+00 : f32
    %9 = vector.broadcast %cst_7 : f32 to vector<128x128xf32>
    %10 = arith.maximumf %8, %9 : vector<128x128xf32>
    %11 = vector.extract_strided_slice %10 {offsets = [0, 0], sizes = [128, 32], strides = [1, 1]} : vector<128x128xf32> to vector<128x32xf32>
    %12 = vector.extract_strided_slice %10 {offsets = [0, 32], sizes = [128, 32], strides = [1, 1]} : vector<128x128xf32> to vector<128x32xf32>
    %13 = vector.extract_strided_slice %10 {offsets = [0, 64], sizes = [128, 48], strides = [1, 1]} : vector<128x128xf32> to vector<128x48xf32>
    %14 = vector.extract_strided_slice %8 {offsets = [0, 112], sizes = [128, 16], strides = [1, 1]} : vector<128x128xf32> to vector<128x16xf32>
    %cst_8 = arith.constant 0.000000e+00 : f32
    %15 = vector.broadcast %cst_8 : f32 to vector<2x1x10x16xf32>
    %cst_9 = arith.constant 0.000000e+00 : f32
    %16 = vector.broadcast %cst_9 : f32 to vector<2x8x1x16xf32>
    %c0_10 = arith.constant 0 : index
    %c0_11 = arith.constant 0 : index
    %c0_12 = arith.constant 0 : index
    %c0_13 = arith.constant 0 : index
    %17 = vector.load %arg19[%c0_10, %c0_11, %c0_12, %c0_13] : memref<2x10x10x16xf32, #tpu.memory_space<vmem>>, vector<2x1x10x16xf32>
    tpu.vector_store %arg19[%c0_10, %c0_11, %c0_12, %c0_13], %15 {strides = array<i32>} : memref<2x10x10x16xf32, #tpu.memory_space<vmem>>, vector<2x1x10x16xf32>,
    %c0_14 = arith.constant 0 : index
    %c9 = arith.constant 9 : index
    %c0_15 = arith.constant 0 : index
    %c0_16 = arith.constant 0 : index
    %18 = vector.load %arg19[%c0_14, %c9, %c0_15, %c0_16] : memref<2x10x10x16xf32, #tpu.memory_space<vmem>>, vector<2x1x10x16xf32>
    tpu.vector_store %arg19[%c0_14, %c9, %c0_15, %c0_16], %15 {strides = array<i32>} : memref<2x10x10x16xf32, #tpu.memory_space<vmem>>, vector<2x1x10x16xf32>,
    %c0_17 = arith.constant 0 : index
    %c1 = arith.constant 1 : index
    %c0_18 = arith.constant 0 : index
    %c0_19 = arith.constant 0 : index
    %19 = vector.load %arg19[%c0_17, %c1, %c0_18, %c0_19] : memref<2x10x10x16xf32, #tpu.memory_space<vmem>>, vector<2x8x1x16xf32>
    tpu.vector_store %arg19[%c0_17, %c1, %c0_18, %c0_19], %16 {strides = array<i32>} : memref<2x10x10x16xf32, #tpu.memory_space<vmem>>, vector<2x8x1x16xf32>,
    %c0_20 = arith.constant 0 : index
    %c1_21 = arith.constant 1 : index
    %c9_22 = arith.constant 9 : index
    %c0_23 = arith.constant 0 : index
    %20 = vector.load %arg19[%c0_20, %c1_21, %c9_22, %c0_23] : memref<2x10x10x16xf32, #tpu.memory_space<vmem>>, vector<2x8x1x16xf32>
    tpu.vector_store %arg19[%c0_20, %c1_21, %c9_22, %c0_23], %16 {strides = array<i32>} : memref<2x10x10x16xf32, #tpu.memory_space<vmem>>, vector<2x8x1x16xf32>,
    %21 = vector.shape_cast %14 : vector<128x16xf32> to vector<2x8x8x16xf32>
    %c0_24 = arith.constant 0 : index
    %c1_25 = arith.constant 1 : index
    %c1_26 = arith.constant 1 : index
    %c0_27 = arith.constant 0 : index
    %22 = vector.load %arg19[%c0_24, %c1_25, %c1_26, %c0_27] : memref<2x10x10x16xf32, #tpu.memory_space<vmem>>, vector<2x8x8x16xf32>
    tpu.vector_store %arg19[%c0_24, %c1_25, %c1_26, %c0_27], %21 {strides = array<i32>} : memref<2x10x10x16xf32, #tpu.memory_space<vmem>>, vector<2x8x8x16xf32>,
    %c0_28 = arith.constant 0 : index
    %c0_29 = arith.constant 0 : index
    %c0_30 = arith.constant 0 : index
    %c0_31 = arith.constant 0 : index
    %23 = vector.load %arg19[%c0_28, %c0_29, %c0_30, %c0_31] : memref<2x10x10x16xf32, #tpu.memory_space<vmem>>, vector<2x8x8x16xf32>
    %24 = vector.shape_cast %23 : vector<2x8x8x16xf32> to vector<128x16xf32>
    %c0_32 = arith.constant 0 : index
    %c0_33 = arith.constant 0 : index
    %c1_34 = arith.constant 1 : index
    %c0_35 = arith.constant 0 : index
    %25 = vector.load %arg19[%c0_32, %c0_33, %c1_34, %c0_35] : memref<2x10x10x16xf32, #tpu.memory_space<vmem>>, vector<2x8x8x16xf32>
    %26 = vector.shape_cast %25 : vector<2x8x8x16xf32> to vector<128x16xf32>
    %27 = arith.addf %24, %26 : vector<128x16xf32>
    %c0_36 = arith.constant 0 : index
    %c0_37 = arith.constant 0 : index
    %c2 = arith.constant 2 : index
    %c0_38 = arith.constant 0 : index
    %28 = vector.load %arg19[%c0_36, %c0_37, %c2, %c0_38] : memref<2x10x10x16xf32, #tpu.memory_space<vmem>>, vector<2x8x8x16xf32>
    %29 = vector.shape_cast %28 : vector<2x8x8x16xf32> to vector<128x16xf32>
    %30 = arith.addf %27, %29 : vector<128x16xf32>
    %c0_39 = arith.constant 0 : index
    %c1_40 = arith.constant 1 : index
    %c0_41 = arith.constant 0 : index
    %c0_42 = arith.constant 0 : index
    %31 = vector.load %arg19[%c0_39, %c1_40, %c0_41, %c0_42] : memref<2x10x10x16xf32, #tpu.memory_space<vmem>>, vector<2x8x8x16xf32>
    %32 = vector.shape_cast %31 : vector<2x8x8x16xf32> to vector<128x16xf32>
    %33 = arith.addf %30, %32 : vector<128x16xf32>
    %c0_43 = arith.constant 0 : index
    %c1_44 = arith.constant 1 : index
    %c1_45 = arith.constant 1 : index
    %c0_46 = arith.constant 0 : index
    %34 = vector.load %arg19[%c0_43, %c1_44, %c1_45, %c0_46] : memref<2x10x10x16xf32, #tpu.memory_space<vmem>>, vector<2x8x8x16xf32>
    %35 = vector.shape_cast %34 : vector<2x8x8x16xf32> to vector<128x16xf32>
    %36 = arith.addf %33, %35 : vector<128x16xf32>
    %c0_47 = arith.constant 0 : index
    %c1_48 = arith.constant 1 : index
    %c2_49 = arith.constant 2 : index
    %c0_50 = arith.constant 0 : index
    %37 = vector.load %arg19[%c0_47, %c1_48, %c2_49, %c0_50] : memref<2x10x10x16xf32, #tpu.memory_space<vmem>>, vector<2x8x8x16xf32>
    %38 = vector.shape_cast %37 : vector<2x8x8x16xf32> to vector<128x16xf32>
    %39 = arith.addf %36, %38 : vector<128x16xf32>
    %c0_51 = arith.constant 0 : index
    %c2_52 = arith.constant 2 : index
    %c0_53 = arith.constant 0 : index
    %c0_54 = arith.constant 0 : index
    %40 = vector.load %arg19[%c0_51, %c2_52, %c0_53, %c0_54] : memref<2x10x10x16xf32, #tpu.memory_space<vmem>>, vector<2x8x8x16xf32>
    %41 = vector.shape_cast %40 : vector<2x8x8x16xf32> to vector<128x16xf32>
    %42 = arith.addf %39, %41 : vector<128x16xf32>
    %c0_55 = arith.constant 0 : index
    %c2_56 = arith.constant 2 : index
    %c1_57 = arith.constant 1 : index
    %c0_58 = arith.constant 0 : index
    %43 = vector.load %arg19[%c0_55, %c2_56, %c1_57, %c0_58] : memref<2x10x10x16xf32, #tpu.memory_space<vmem>>, vector<2x8x8x16xf32>
    %44 = vector.shape_cast %43 : vector<2x8x8x16xf32> to vector<128x16xf32>
    %45 = arith.addf %42, %44 : vector<128x16xf32>
    %c0_59 = arith.constant 0 : index
    %c2_60 = arith.constant 2 : index
    %c2_61 = arith.constant 2 : index
    %c0_62 = arith.constant 0 : index
    %46 = vector.load %arg19[%c0_59, %c2_60, %c2_61, %c0_62] : memref<2x10x10x16xf32, #tpu.memory_space<vmem>>, vector<2x8x8x16xf32>
    %47 = vector.shape_cast %46 : vector<2x8x8x16xf32> to vector<128x16xf32>
    %48 = arith.addf %45, %47 : vector<128x16xf32>
    %cst_63 = arith.constant 0.111111112 : f32
    %49 = vector.broadcast %cst_63 : f32 to vector<128x16xf32>
    %50 = arith.mulf %48, %49 : vector<128x16xf32>
    %c0_64 = arith.constant 0 : index
    %c0_65 = arith.constant 0 : index
    %51 = vector.load %arg14[%c0_64, %c0_65] : memref<1x16xf32, #tpu.memory_space<vmem>>, vector<1x16xf32>
    %52 = vector.shape_cast %51 : vector<1x16xf32> to vector<16xf32>
    %53 = vector.shape_cast %52 : vector<16xf32> to vector<1x16xf32>
    %54 = vector.broadcast %53 : vector<1x16xf32> to vector<128x16xf32>
    %55 = arith.addf %50, %54 : vector<128x16xf32>
    %cst_66 = arith.constant 0.000000e+00 : f32
    %56 = vector.broadcast %cst_66 : f32 to vector<128x16xf32>
    %57 = arith.maximumf %55, %56 : vector<128x16xf32>
    %cst_67 = arith.constant 0.000000e+00 : bf16
    %58 = vector.broadcast %cst_67 : bf16 to vector<2x1x10x32xbf16>
    %cst_68 = arith.constant 0.000000e+00 : bf16
    %59 = vector.broadcast %cst_68 : bf16 to vector<2x8x1x32xbf16>
    %c0_69 = arith.constant 0 : index
    %c0_70 = arith.constant 0 : index
    %c0_71 = arith.constant 0 : index
    %c0_72 = arith.constant 0 : index
    %60 = vector.load %arg16[%c0_69, %c0_70, %c0_71, %c0_72] : memref<2x10x10x32xbf16, #tpu.memory_space<vmem>>, vector<2x1x10x32xbf16>
    tpu.vector_store %arg16[%c0_69, %c0_70, %c0_71, %c0_72], %58 {strides = array<i32>} : memref<2x10x10x32xbf16, #tpu.memory_space<vmem>>, vector<2x1x10x32xbf16>,
    %c0_73 = arith.constant 0 : index
    %c9_74 = arith.constant 9 : index
    %c0_75 = arith.constant 0 : index
    %c0_76 = arith.constant 0 : index
    %61 = vector.load %arg16[%c0_73, %c9_74, %c0_75, %c0_76] : memref<2x10x10x32xbf16, #tpu.memory_space<vmem>>, vector<2x1x10x32xbf16>
    tpu.vector_store %arg16[%c0_73, %c9_74, %c0_75, %c0_76], %58 {strides = array<i32>} : memref<2x10x10x32xbf16, #tpu.memory_space<vmem>>, vector<2x1x10x32xbf16>,
    %c0_77 = arith.constant 0 : index
    %c1_78 = arith.constant 1 : index
    %c0_79 = arith.constant 0 : index
    %c0_80 = arith.constant 0 : index
    %62 = vector.load %arg16[%c0_77, %c1_78, %c0_79, %c0_80] : memref<2x10x10x32xbf16, #tpu.memory_space<vmem>>, vector<2x8x1x32xbf16>
    tpu.vector_store %arg16[%c0_77, %c1_78, %c0_79, %c0_80], %59 {strides = array<i32>} : memref<2x10x10x32xbf16, #tpu.memory_space<vmem>>, vector<2x8x1x32xbf16>,
    %c0_81 = arith.constant 0 : index
    %c1_82 = arith.constant 1 : index
    %c9_83 = arith.constant 9 : index
    %c0_84 = arith.constant 0 : index
    %63 = vector.load %arg16[%c0_81, %c1_82, %c9_83, %c0_84] : memref<2x10x10x32xbf16, #tpu.memory_space<vmem>>, vector<2x8x1x32xbf16>
    tpu.vector_store %arg16[%c0_81, %c1_82, %c9_83, %c0_84], %59 {strides = array<i32>} : memref<2x10x10x32xbf16, #tpu.memory_space<vmem>>, vector<2x8x1x32xbf16>,
    %64 = vector.shape_cast %12 : vector<128x32xf32> to vector<2x8x8x32xf32>
    %65 = arith.truncf %64 : vector<2x8x8x32xf32> to vector<2x8x8x32xbf16>
    %c0_85 = arith.constant 0 : index
    %c1_86 = arith.constant 1 : index
    %c1_87 = arith.constant 1 : index
    %c0_88 = arith.constant 0 : index
    %66 = vector.load %arg16[%c0_85, %c1_86, %c1_87, %c0_88] : memref<2x10x10x32xbf16, #tpu.memory_space<vmem>>, vector<2x8x8x32xbf16>
    tpu.vector_store %arg16[%c0_85, %c1_86, %c1_87, %c0_88], %65 {strides = array<i32>} : memref<2x10x10x32xbf16, #tpu.memory_space<vmem>>, vector<2x8x8x32xbf16>,
    %c0_89 = arith.constant 0 : index
    %c1_90 = arith.constant 1 : index
    %c0_91 = arith.constant 0 : index
    %c0_92 = arith.constant 0 : index
    %67 = vector.load %arg16[%c0_89, %c1_90, %c0_91, %c0_92] : memref<2x10x10x32xbf16, #tpu.memory_space<vmem>>, vector<2x8x8x32xbf16>
    %68 = vector.shape_cast %67 : vector<2x8x8x32xbf16> to vector<128x32xbf16>
    %c0_93 = arith.constant 0 : index
    %c1_94 = arith.constant 1 : index
    %c1_95 = arith.constant 1 : index
    %c0_96 = arith.constant 0 : index
    %69 = vector.load %arg16[%c0_93, %c1_94, %c1_95, %c0_96] : memref<2x10x10x32xbf16, #tpu.memory_space<vmem>>, vector<2x8x8x32xbf16>
    %70 = vector.shape_cast %69 : vector<2x8x8x32xbf16> to vector<128x32xbf16>
    %c0_97 = arith.constant 0 : index
    %c1_98 = arith.constant 1 : index
    %c2_99 = arith.constant 2 : index
    %c0_100 = arith.constant 0 : index
    %71 = vector.load %arg16[%c0_97, %c1_98, %c2_99, %c0_100] : memref<2x10x10x32xbf16, #tpu.memory_space<vmem>>, vector<2x8x8x32xbf16>
    %72 = vector.shape_cast %71 : vector<2x8x8x32xbf16> to vector<128x32xbf16>
    %73 = tpu.concatenate %68, %70, %72 in 1 : vector<128x32xbf16>, vector<128x32xbf16>, vector<128x32xbf16> -> vector<128x96xbf16>
    %c0_101 = arith.constant 0 : index
    %c0_102 = arith.constant 0 : index
    %74 = vector.load %arg6[%c0_101, %c0_102] : memref<96x32xbf16, #tpu.memory_space<vmem>>, vector<96x32xbf16>
    %cst_103 = arith.constant dense<0.000000e+00> : vector<128x32xf32>
    %75 = tpu.matmul %73, %74, %cst_103 {dimension_numbers = #tpu.dot_dimension_numbers<[1], [0], [0], [1], [0, 0, 1, 1], [], []>} : vector<128x96xbf16>, vector<96x32xbf16>, vector<128x32xf32> -> vector<128x32xf32>
    %c0_104 = arith.constant 0 : index
    %c0_105 = arith.constant 0 : index
    %76 = vector.load %arg7[%c0_104, %c0_105] : memref<1x32xf32, #tpu.memory_space<vmem>>, vector<1x32xf32>
    %77 = vector.shape_cast %76 : vector<1x32xf32> to vector<32xf32>
    %78 = vector.shape_cast %77 : vector<32xf32> to vector<1x32xf32>
    %79 = vector.broadcast %78 : vector<1x32xf32> to vector<128x32xf32>
    %80 = arith.addf %75, %79 : vector<128x32xf32>
    %c0_106 = arith.constant 0 : index
    %c0_107 = arith.constant 0 : index
    %c1_108 = arith.constant 1 : index
    %c0_109 = arith.constant 0 : index
    %81 = vector.load %arg16[%c0_106, %c0_107, %c1_108, %c0_109] : memref<2x10x10x32xbf16, #tpu.memory_space<vmem>>, vector<2x8x8x32xbf16>
    %82 = vector.shape_cast %81 : vector<2x8x8x32xbf16> to vector<128x32xbf16>
    %c0_110 = arith.constant 0 : index
    %c1_111 = arith.constant 1 : index
    %c1_112 = arith.constant 1 : index
    %c0_113 = arith.constant 0 : index
    %83 = vector.load %arg16[%c0_110, %c1_111, %c1_112, %c0_113] : memref<2x10x10x32xbf16, #tpu.memory_space<vmem>>, vector<2x8x8x32xbf16>
    %84 = vector.shape_cast %83 : vector<2x8x8x32xbf16> to vector<128x32xbf16>
    %c0_114 = arith.constant 0 : index
    %c2_115 = arith.constant 2 : index
    %c1_116 = arith.constant 1 : index
    %c0_117 = arith.constant 0 : index
    %85 = vector.load %arg16[%c0_114, %c2_115, %c1_116, %c0_117] : memref<2x10x10x32xbf16, #tpu.memory_space<vmem>>, vector<2x8x8x32xbf16>
    %86 = vector.shape_cast %85 : vector<2x8x8x32xbf16> to vector<128x32xbf16>
    %87 = tpu.concatenate %82, %84, %86 in 1 : vector<128x32xbf16>, vector<128x32xbf16>, vector<128x32xbf16> -> vector<128x96xbf16>
    %c0_118 = arith.constant 0 : index
    %c0_119 = arith.constant 0 : index
    %88 = vector.load %arg8[%c0_118, %c0_119] : memref<96x32xbf16, #tpu.memory_space<vmem>>, vector<96x32xbf16>
    %cst_120 = arith.constant dense<0.000000e+00> : vector<128x32xf32>
    %89 = tpu.matmul %87, %88, %cst_120 {dimension_numbers = #tpu.dot_dimension_numbers<[1], [0], [0], [1], [0, 0, 1, 1], [], []>} : vector<128x96xbf16>, vector<96x32xbf16>, vector<128x32xf32> -> vector<128x32xf32>
    %c0_121 = arith.constant 0 : index
    %c0_122 = arith.constant 0 : index
    %90 = vector.load %arg9[%c0_121, %c0_122] : memref<1x32xf32, #tpu.memory_space<vmem>>, vector<1x32xf32>
    %91 = vector.shape_cast %90 : vector<1x32xf32> to vector<32xf32>
    %92 = vector.shape_cast %91 : vector<32xf32> to vector<1x32xf32>
    %93 = vector.broadcast %92 : vector<1x32xf32> to vector<128x32xf32>
    %94 = arith.addf %89, %93 : vector<128x32xf32>
    %cst_123 = arith.constant 0.000000e+00 : bf16
    %95 = vector.broadcast %cst_123 : bf16 to vector<2x1x10x48xbf16>
    %cst_124 = arith.constant 0.000000e+00 : bf16
    %96 = vector.broadcast %cst_124 : bf16 to vector<2x8x1x48xbf16>
    %c0_125 = arith.constant 0 : index
    %c0_126 = arith.constant 0 : index
    %c0_127 = arith.constant 0 : index
    %c0_128 = arith.constant 0 : index
    %97 = vector.load %arg17[%c0_125, %c0_126, %c0_127, %c0_128] : memref<2x10x10x48xbf16, #tpu.memory_space<vmem>>, vector<2x1x10x48xbf16>
    tpu.vector_store %arg17[%c0_125, %c0_126, %c0_127, %c0_128], %95 {strides = array<i32>} : memref<2x10x10x48xbf16, #tpu.memory_space<vmem>>, vector<2x1x10x48xbf16>,
    %c0_129 = arith.constant 0 : index
    %c9_130 = arith.constant 9 : index
    %c0_131 = arith.constant 0 : index
    %c0_132 = arith.constant 0 : index
    %98 = vector.load %arg17[%c0_129, %c9_130, %c0_131, %c0_132] : memref<2x10x10x48xbf16, #tpu.memory_space<vmem>>, vector<2x1x10x48xbf16>
    tpu.vector_store %arg17[%c0_129, %c9_130, %c0_131, %c0_132], %95 {strides = array<i32>} : memref<2x10x10x48xbf16, #tpu.memory_space<vmem>>, vector<2x1x10x48xbf16>,
    %c0_133 = arith.constant 0 : index
    %c1_134 = arith.constant 1 : index
    %c0_135 = arith.constant 0 : index
    %c0_136 = arith.constant 0 : index
    %99 = vector.load %arg17[%c0_133, %c1_134, %c0_135, %c0_136] : memref<2x10x10x48xbf16, #tpu.memory_space<vmem>>, vector<2x8x1x48xbf16>
    tpu.vector_store %arg17[%c0_133, %c1_134, %c0_135, %c0_136], %96 {strides = array<i32>} : memref<2x10x10x48xbf16, #tpu.memory_space<vmem>>, vector<2x8x1x48xbf16>,
    %c0_137 = arith.constant 0 : index
    %c1_138 = arith.constant 1 : index
    %c9_139 = arith.constant 9 : index
    %c0_140 = arith.constant 0 : index
    %100 = vector.load %arg17[%c0_137, %c1_138, %c9_139, %c0_140] : memref<2x10x10x48xbf16, #tpu.memory_space<vmem>>, vector<2x8x1x48xbf16>
    tpu.vector_store %arg17[%c0_137, %c1_138, %c9_139, %c0_140], %96 {strides = array<i32>} : memref<2x10x10x48xbf16, #tpu.memory_space<vmem>>, vector<2x8x1x48xbf16>,
    %101 = vector.shape_cast %13 : vector<128x48xf32> to vector<2x8x8x48xf32>
    %102 = arith.truncf %101 : vector<2x8x8x48xf32> to vector<2x8x8x48xbf16>
    %c0_141 = arith.constant 0 : index
    %c1_142 = arith.constant 1 : index
    %c1_143 = arith.constant 1 : index
    %c0_144 = arith.constant 0 : index
    %103 = vector.load %arg17[%c0_141, %c1_142, %c1_143, %c0_144] : memref<2x10x10x48xbf16, #tpu.memory_space<vmem>>, vector<2x8x8x48xbf16>
    tpu.vector_store %arg17[%c0_141, %c1_142, %c1_143, %c0_144], %102 {strides = array<i32>} : memref<2x10x10x48xbf16, #tpu.memory_space<vmem>>, vector<2x8x8x48xbf16>,
    %c0_145 = arith.constant 0 : index
    %c0_146 = arith.constant 0 : index
    %c0_147 = arith.constant 0 : index
    %c0_148 = arith.constant 0 : index
    %104 = vector.load %arg17[%c0_145, %c0_146, %c0_147, %c0_148] : memref<2x10x10x48xbf16, #tpu.memory_space<vmem>>, vector<2x8x8x48xbf16>
    %105 = vector.shape_cast %104 : vector<2x8x8x48xbf16> to vector<128x48xbf16>
    %c0_149 = arith.constant 0 : index
    %c0_150 = arith.constant 0 : index
    %c1_151 = arith.constant 1 : index
    %c0_152 = arith.constant 0 : index
    %106 = vector.load %arg17[%c0_149, %c0_150, %c1_151, %c0_152] : memref<2x10x10x48xbf16, #tpu.memory_space<vmem>>, vector<2x8x8x48xbf16>
    %107 = vector.shape_cast %106 : vector<2x8x8x48xbf16> to vector<128x48xbf16>
    %c0_153 = arith.constant 0 : index
    %c0_154 = arith.constant 0 : index
    %c2_155 = arith.constant 2 : index
    %c0_156 = arith.constant 0 : index
    %108 = vector.load %arg17[%c0_153, %c0_154, %c2_155, %c0_156] : memref<2x10x10x48xbf16, #tpu.memory_space<vmem>>, vector<2x8x8x48xbf16>
    %109 = vector.shape_cast %108 : vector<2x8x8x48xbf16> to vector<128x48xbf16>
    %c0_157 = arith.constant 0 : index
    %c1_158 = arith.constant 1 : index
    %c0_159 = arith.constant 0 : index
    %c0_160 = arith.constant 0 : index
    %110 = vector.load %arg17[%c0_157, %c1_158, %c0_159, %c0_160] : memref<2x10x10x48xbf16, #tpu.memory_space<vmem>>, vector<2x8x8x48xbf16>
    %111 = vector.shape_cast %110 : vector<2x8x8x48xbf16> to vector<128x48xbf16>
    %c0_161 = arith.constant 0 : index
    %c1_162 = arith.constant 1 : index
    %c1_163 = arith.constant 1 : index
    %c0_164 = arith.constant 0 : index
    %112 = vector.load %arg17[%c0_161, %c1_162, %c1_163, %c0_164] : memref<2x10x10x48xbf16, #tpu.memory_space<vmem>>, vector<2x8x8x48xbf16>
    %113 = vector.shape_cast %112 : vector<2x8x8x48xbf16> to vector<128x48xbf16>
    %c0_165 = arith.constant 0 : index
    %c1_166 = arith.constant 1 : index
    %c2_167 = arith.constant 2 : index
    %c0_168 = arith.constant 0 : index
    %114 = vector.load %arg17[%c0_165, %c1_166, %c2_167, %c0_168] : memref<2x10x10x48xbf16, #tpu.memory_space<vmem>>, vector<2x8x8x48xbf16>
    %115 = vector.shape_cast %114 : vector<2x8x8x48xbf16> to vector<128x48xbf16>
    %c0_169 = arith.constant 0 : index
    %c2_170 = arith.constant 2 : index
    %c0_171 = arith.constant 0 : index
    %c0_172 = arith.constant 0 : index
    %116 = vector.load %arg17[%c0_169, %c2_170, %c0_171, %c0_172] : memref<2x10x10x48xbf16, #tpu.memory_space<vmem>>, vector<2x8x8x48xbf16>
    %117 = vector.shape_cast %116 : vector<2x8x8x48xbf16> to vector<128x48xbf16>
    %c0_173 = arith.constant 0 : index
    %c2_174 = arith.constant 2 : index
    %c1_175 = arith.constant 1 : index
    %c0_176 = arith.constant 0 : index
    %118 = vector.load %arg17[%c0_173, %c2_174, %c1_175, %c0_176] : memref<2x10x10x48xbf16, #tpu.memory_space<vmem>>, vector<2x8x8x48xbf16>
    %119 = vector.shape_cast %118 : vector<2x8x8x48xbf16> to vector<128x48xbf16>
    %c0_177 = arith.constant 0 : index
    %c2_178 = arith.constant 2 : index
    %c2_179 = arith.constant 2 : index
    %c0_180 = arith.constant 0 : index
    %120 = vector.load %arg17[%c0_177, %c2_178, %c2_179, %c0_180] : memref<2x10x10x48xbf16, #tpu.memory_space<vmem>>, vector<2x8x8x48xbf16>
    %121 = vector.shape_cast %120 : vector<2x8x8x48xbf16> to vector<128x48xbf16>
    %122 = tpu.concatenate %105, %107, %109, %111, %113, %115, %117, %119, %121 in 1 : vector<128x48xbf16>, vector<128x48xbf16>, vector<128x48xbf16>, vector<128x48xbf16>, vector<128x48xbf16>, vector<128x48xbf16>, vector<128x48xbf16>, vector<128x48xbf16>, vector<128x48xbf16> -> vector<128x432xbf16>
    %c0_181 = arith.constant 0 : index
    %c0_182 = arith.constant 0 : index
    %123 = vector.load %arg4[%c0_181, %c0_182] : memref<432x32xbf16, #tpu.memory_space<vmem>>, vector<432x32xbf16>
    %cst_183 = arith.constant dense<0.000000e+00> : vector<128x32xf32>
    %124 = tpu.matmul %122, %123, %cst_183 {dimension_numbers = #tpu.dot_dimension_numbers<[1], [0], [0], [1], [0, 0, 1, 1], [], []>} : vector<128x432xbf16>, vector<432x32xbf16>, vector<128x32xf32> -> vector<128x32xf32>
    %c0_184 = arith.constant 0 : index
    %c0_185 = arith.constant 0 : index
    %125 = vector.load %arg5[%c0_184, %c0_185] : memref<1x32xf32, #tpu.memory_space<vmem>>, vector<1x32xf32>
    %126 = vector.shape_cast %125 : vector<1x32xf32> to vector<32xf32>
    %127 = vector.shape_cast %126 : vector<32xf32> to vector<1x32xf32>
    %128 = vector.broadcast %127 : vector<1x32xf32> to vector<128x32xf32>
    %129 = arith.addf %124, %128 : vector<128x32xf32>
    %cst_186 = arith.constant 0.000000e+00 : f32
    %130 = vector.broadcast %cst_186 : f32 to vector<128x32xf32>
    %131 = arith.maximumf %129, %130 : vector<128x32xf32>
    %cst_187 = arith.constant 0.000000e+00 : bf16
    %132 = vector.broadcast %cst_187 : bf16 to vector<2x1x10x32xbf16>
    %cst_188 = arith.constant 0.000000e+00 : bf16
    %133 = vector.broadcast %cst_188 : bf16 to vector<2x8x1x32xbf16>
    %c0_189 = arith.constant 0 : index
    %c0_190 = arith.constant 0 : index
    %c0_191 = arith.constant 0 : index
    %c0_192 = arith.constant 0 : index
    %134 = vector.load %arg18[%c0_189, %c0_190, %c0_191, %c0_192] : memref<2x10x10x32xbf16, #tpu.memory_space<vmem>>, vector<2x1x10x32xbf16>
    tpu.vector_store %arg18[%c0_189, %c0_190, %c0_191, %c0_192], %132 {strides = array<i32>} : memref<2x10x10x32xbf16, #tpu.memory_space<vmem>>, vector<2x1x10x32xbf16>,
    %c0_193 = arith.constant 0 : index
    %c9_194 = arith.constant 9 : index
    %c0_195 = arith.constant 0 : index
    %c0_196 = arith.constant 0 : index
    %135 = vector.load %arg18[%c0_193, %c9_194, %c0_195, %c0_196] : memref<2x10x10x32xbf16, #tpu.memory_space<vmem>>, vector<2x1x10x32xbf16>
    tpu.vector_store %arg18[%c0_193, %c9_194, %c0_195, %c0_196], %132 {strides = array<i32>} : memref<2x10x10x32xbf16, #tpu.memory_space<vmem>>, vector<2x1x10x32xbf16>,
    %c0_197 = arith.constant 0 : index
    %c1_198 = arith.constant 1 : index
    %c0_199 = arith.constant 0 : index
    %c0_200 = arith.constant 0 : index
    %136 = vector.load %arg18[%c0_197, %c1_198, %c0_199, %c0_200] : memref<2x10x10x32xbf16, #tpu.memory_space<vmem>>, vector<2x8x1x32xbf16>
    tpu.vector_store %arg18[%c0_197, %c1_198, %c0_199, %c0_200], %133 {strides = array<i32>} : memref<2x10x10x32xbf16, #tpu.memory_space<vmem>>, vector<2x8x1x32xbf16>,
    %c0_201 = arith.constant 0 : index
    %c1_202 = arith.constant 1 : index
    %c9_203 = arith.constant 9 : index
    %c0_204 = arith.constant 0 : index
    %137 = vector.load %arg18[%c0_201, %c1_202, %c9_203, %c0_204] : memref<2x10x10x32xbf16, #tpu.memory_space<vmem>>, vector<2x8x1x32xbf16>
    tpu.vector_store %arg18[%c0_201, %c1_202, %c9_203, %c0_204], %133 {strides = array<i32>} : memref<2x10x10x32xbf16, #tpu.memory_space<vmem>>, vector<2x8x1x32xbf16>,
    %138 = vector.shape_cast %131 : vector<128x32xf32> to vector<2x8x8x32xf32>
    %139 = arith.truncf %138 : vector<2x8x8x32xf32> to vector<2x8x8x32xbf16>
    %c0_205 = arith.constant 0 : index
    %c1_206 = arith.constant 1 : index
    %c1_207 = arith.constant 1 : index
    %c0_208 = arith.constant 0 : index
    %140 = vector.load %arg18[%c0_205, %c1_206, %c1_207, %c0_208] : memref<2x10x10x32xbf16, #tpu.memory_space<vmem>>, vector<2x8x8x32xbf16>
    tpu.vector_store %arg18[%c0_205, %c1_206, %c1_207, %c0_208], %139 {strides = array<i32>} : memref<2x10x10x32xbf16, #tpu.memory_space<vmem>>, vector<2x8x8x32xbf16>,
    %c0_209 = arith.constant 0 : index
    %c1_210 = arith.constant 1 : index
    %c0_211 = arith.constant 0 : index
    %c0_212 = arith.constant 0 : index
    %141 = vector.load %arg18[%c0_209, %c1_210, %c0_211, %c0_212] : memref<2x10x10x32xbf16, #tpu.memory_space<vmem>>, vector<2x8x8x32xbf16>
    %142 = vector.shape_cast %141 : vector<2x8x8x32xbf16> to vector<128x32xbf16>
    %c0_213 = arith.constant 0 : index
    %c1_214 = arith.constant 1 : index
    %c1_215 = arith.constant 1 : index
    %c0_216 = arith.constant 0 : index
    %143 = vector.load %arg18[%c0_213, %c1_214, %c1_215, %c0_216] : memref<2x10x10x32xbf16, #tpu.memory_space<vmem>>, vector<2x8x8x32xbf16>
    %144 = vector.shape_cast %143 : vector<2x8x8x32xbf16> to vector<128x32xbf16>
    %c0_217 = arith.constant 0 : index
    %c1_218 = arith.constant 1 : index
    %c2_219 = arith.constant 2 : index
    %c0_220 = arith.constant 0 : index
    %145 = vector.load %arg18[%c0_217, %c1_218, %c2_219, %c0_220] : memref<2x10x10x32xbf16, #tpu.memory_space<vmem>>, vector<2x8x8x32xbf16>
    %146 = vector.shape_cast %145 : vector<2x8x8x32xbf16> to vector<128x32xbf16>
    %147 = tpu.concatenate %142, %144, %146 in 1 : vector<128x32xbf16>, vector<128x32xbf16>, vector<128x32xbf16> -> vector<128x96xbf16>
    %c0_221 = arith.constant 0 : index
    %c0_222 = arith.constant 0 : index
    %148 = vector.load %arg10[%c0_221, %c0_222] : memref<96x32xbf16, #tpu.memory_space<vmem>>, vector<96x32xbf16>
    %cst_223 = arith.constant dense<0.000000e+00> : vector<128x32xf32>
    %149 = tpu.matmul %147, %148, %cst_223 {dimension_numbers = #tpu.dot_dimension_numbers<[1], [0], [0], [1], [0, 0, 1, 1], [], []>} : vector<128x96xbf16>, vector<96x32xbf16>, vector<128x32xf32> -> vector<128x32xf32>
    %c0_224 = arith.constant 0 : index
    %c0_225 = arith.constant 0 : index
    %150 = vector.load %arg11[%c0_224, %c0_225] : memref<1x32xf32, #tpu.memory_space<vmem>>, vector<1x32xf32>
    %151 = vector.shape_cast %150 : vector<1x32xf32> to vector<32xf32>
    %152 = vector.shape_cast %151 : vector<32xf32> to vector<1x32xf32>
    %153 = vector.broadcast %152 : vector<1x32xf32> to vector<128x32xf32>
    %154 = arith.addf %149, %153 : vector<128x32xf32>
    %c0_226 = arith.constant 0 : index
    %c0_227 = arith.constant 0 : index
    %c1_228 = arith.constant 1 : index
    %c0_229 = arith.constant 0 : index
    %155 = vector.load %arg18[%c0_226, %c0_227, %c1_228, %c0_229] : memref<2x10x10x32xbf16, #tpu.memory_space<vmem>>, vector<2x8x8x32xbf16>
    %156 = vector.shape_cast %155 : vector<2x8x8x32xbf16> to vector<128x32xbf16>
    %c0_230 = arith.constant 0 : index
    %c1_231 = arith.constant 1 : index
    %c1_232 = arith.constant 1 : index
    %c0_233 = arith.constant 0 : index
    %157 = vector.load %arg18[%c0_230, %c1_231, %c1_232, %c0_233] : memref<2x10x10x32xbf16, #tpu.memory_space<vmem>>, vector<2x8x8x32xbf16>
    %158 = vector.shape_cast %157 : vector<2x8x8x32xbf16> to vector<128x32xbf16>
    %c0_234 = arith.constant 0 : index
    %c2_235 = arith.constant 2 : index
    %c1_236 = arith.constant 1 : index
    %c0_237 = arith.constant 0 : index
    %159 = vector.load %arg18[%c0_234, %c2_235, %c1_236, %c0_237] : memref<2x10x10x32xbf16, #tpu.memory_space<vmem>>, vector<2x8x8x32xbf16>
    %160 = vector.shape_cast %159 : vector<2x8x8x32xbf16> to vector<128x32xbf16>
    %161 = tpu.concatenate %156, %158, %160 in 1 : vector<128x32xbf16>, vector<128x32xbf16>, vector<128x32xbf16> -> vector<128x96xbf16>
    %c0_238 = arith.constant 0 : index
    %c0_239 = arith.constant 0 : index
    %162 = vector.load %arg12[%c0_238, %c0_239] : memref<96x32xbf16, #tpu.memory_space<vmem>>, vector<96x32xbf16>
    %cst_240 = arith.constant dense<0.000000e+00> : vector<128x32xf32>
    %163 = tpu.matmul %161, %162, %cst_240 {dimension_numbers = #tpu.dot_dimension_numbers<[1], [0], [0], [1], [0, 0, 1, 1], [], []>} : vector<128x96xbf16>, vector<96x32xbf16>, vector<128x32xf32> -> vector<128x32xf32>
    %c0_241 = arith.constant 0 : index
    %c0_242 = arith.constant 0 : index
    %164 = vector.load %arg13[%c0_241, %c0_242] : memref<1x32xf32, #tpu.memory_space<vmem>>, vector<1x32xf32>
    %165 = vector.shape_cast %164 : vector<1x32xf32> to vector<32xf32>
    %166 = vector.shape_cast %165 : vector<32xf32> to vector<1x32xf32>
    %167 = vector.broadcast %166 : vector<1x32xf32> to vector<128x32xf32>
    %168 = arith.addf %163, %167 : vector<128x32xf32>
    %169 = tpu.concatenate %11, %80, %94, %154, %168, %57 in 1 : vector<128x32xf32>, vector<128x32xf32>, vector<128x32xf32>, vector<128x32xf32>, vector<128x32xf32>, vector<128x16xf32> -> vector<128x176xf32>
    %170 = vector.shape_cast %169 : vector<128x176xf32> to vector<2x8x8x176xf32>
    %c0_243 = arith.constant 0 : index
    %c0_244 = arith.constant 0 : index
    %c0_245 = arith.constant 0 : index
    %c0_246 = arith.constant 0 : index
    %171 = vector.load %arg15[%c0_243, %c0_244, %c0_245, %c0_246] : memref<2x8x8x176xf32, #tpu.memory_space<vmem>>, vector<2x8x8x176xf32>
    tpu.vector_store %arg15[%c0_243, %c0_244, %c0_245, %c0_246], %170 {strides = array<i32>} : memref<2x8x8x176xf32, #tpu.memory_space<vmem>>, vector<2x8x8x176xf32>,
    return
  }
  func.func @transform_0(%arg0: i32) -> (i32, i32, i32, i32) {
    %c0_i32 = arith.constant 0 : i32
    %c0_i32_0 = arith.constant 0 : i32
    %c0_i32_1 = arith.constant 0 : i32
    %c0_i32_2 = arith.constant 0 : i32
    return %arg0, %c0_i32, %c0_i32_0, %c0_i32_1 : i32, i32, i32, i32
  }
  func.func @transform_1(%arg0: i32) -> (i32, i32) {
    %c0_i32 = arith.constant 0 : i32
    %c0_i32_0 = arith.constant 0 : i32
    %c0_i32_1 = arith.constant 0 : i32
    return %c0_i32, %c0_i32_0 : i32, i32
  }
  func.func @transform_2(%arg0: i32) -> (i32, i32) {
    %c0_i32 = arith.constant 0 : i32
    %c0_i32_0 = arith.constant 0 : i32
    %c0_i32_1 = arith.constant 0 : i32
    return %c0_i32, %c0_i32_0 : i32, i32
  }
  func.func @transform_3(%arg0: i32) -> (i32, i32) {
    %c0_i32 = arith.constant 0 : i32
    %c0_i32_0 = arith.constant 0 : i32
    %c0_i32_1 = arith.constant 0 : i32
    return %c0_i32, %c0_i32_0 : i32, i32
  }
  func.func @transform_4(%arg0: i32) -> (i32, i32) {
    %c0_i32 = arith.constant 0 : i32
    %c0_i32_0 = arith.constant 0 : i32
    %c0_i32_1 = arith.constant 0 : i32
    return %c0_i32, %c0_i32_0 : i32, i32
  }
  func.func @transform_5(%arg0: i32) -> (i32, i32) {
    %c0_i32 = arith.constant 0 : i32
    %c0_i32_0 = arith.constant 0 : i32
    %c0_i32_1 = arith.constant 0 : i32
    return %c0_i32, %c0_i32_0 : i32, i32
  }
  func.func @transform_6(%arg0: i32) -> (i32, i32) {
    %c0_i32 = arith.constant 0 : i32
    %c0_i32_0 = arith.constant 0 : i32
    %c0_i32_1 = arith.constant 0 : i32
    return %c0_i32, %c0_i32_0 : i32, i32
  }
  func.func @transform_7(%arg0: i32) -> (i32, i32) {
    %c0_i32 = arith.constant 0 : i32
    %c0_i32_0 = arith.constant 0 : i32
    %c0_i32_1 = arith.constant 0 : i32
    return %c0_i32, %c0_i32_0 : i32, i32
  }
  func.func @transform_8(%arg0: i32) -> (i32, i32) {
    %c0_i32 = arith.constant 0 : i32
    %c0_i32_0 = arith.constant 0 : i32
    %c0_i32_1 = arith.constant 0 : i32
    return %c0_i32, %c0_i32_0 : i32, i32
  }
  func.func @transform_9(%arg0: i32) -> (i32, i32) {
    %c0_i32 = arith.constant 0 : i32
    %c0_i32_0 = arith.constant 0 : i32
    %c0_i32_1 = arith.constant 0 : i32
    return %c0_i32, %c0_i32_0 : i32, i32
  }
  func.func @transform_10(%arg0: i32) -> (i32, i32) {
    %c0_i32 = arith.constant 0 : i32
    %c0_i32_0 = arith.constant 0 : i32
    %c0_i32_1 = arith.constant 0 : i32
    return %c0_i32, %c0_i32_0 : i32, i32
  }
  func.func @transform_11(%arg0: i32) -> (i32, i32) {
    %c0_i32 = arith.constant 0 : i32
    %c0_i32_0 = arith.constant 0 : i32
    %c0_i32_1 = arith.constant 0 : i32
    return %c0_i32, %c0_i32_0 : i32, i32
  }
  func.func @transform_12(%arg0: i32) -> (i32, i32) {
    %c0_i32 = arith.constant 0 : i32
    %c0_i32_0 = arith.constant 0 : i32
    %c0_i32_1 = arith.constant 0 : i32
    return %c0_i32, %c0_i32_0 : i32, i32
  }
  func.func @transform_13(%arg0: i32) -> (i32, i32) {
    %c0_i32 = arith.constant 0 : i32
    %c0_i32_0 = arith.constant 0 : i32
    %c0_i32_1 = arith.constant 0 : i32
    return %c0_i32, %c0_i32_0 : i32, i32
  }
  func.func @transform_14(%arg0: i32) -> (i32, i32, i32, i32) {
    %c0_i32 = arith.constant 0 : i32
    %c0_i32_0 = arith.constant 0 : i32
    %c0_i32_1 = arith.constant 0 : i32
    %c0_i32_2 = arith.constant 0 : i32
    return %arg0, %c0_i32, %c0_i32_0, %c0_i32_1 : i32, i32, i32, i32
  }
}

</mosaic_0001>

<bundles_post_ra>
// kernel: inception_c_forward.1
= control target key start
LH: loop header
LB: loop body
LE: loop exit
PB: predicated region body
PF: predicated region fallthrough
CT: control target
= control target key end

     0   :  { %19 = vsyncpa [#allocation7], 0  ;;  %s11976_s0 = inlined_call_operand.hbm [shape: bf16[2,8,8,16], index: 0, kind: input, shape index: {}]   ;;  %s11977_s1 = inlined_call_operand.hbm [shape: bf16[16,128], index: 1, kind: input, shape index: {}]   ;;  %s11978_s2 = inlined_call_operand.hbm [shape: f32[1,128], index: 2, kind: input, shape index: {}]   ;;  %s11979_s3 = inlined_call_operand.hbm [shape: bf16[432,32], index: 3, kind: input, shape index: {}]   ;;  %s11980_s4 = inlined_call_operand.hbm [shape: f32[1,32], index: 4, kind: input, shape index: {}]   ;;  %s11981_s5 = inlined_call_operand.hbm [shape: bf16[96,32], index: 5, kind: input, shape index: {}]   ;;  %s11982_s6 = inlined_call_operand.hbm [shape: f32[1,32], index: 6, kind: input, shape index: {}]   ;;  %s11983_s7 = inlined_call_operand.hbm [shape: bf16[96,32], index: 7, kind: input, shape index: {}]   ;;  %s11984_s8 = inlined_call_operand.hbm [shape: f32[1,32], index: 8, kind: input, shape index: {}]   ;;  %s11985_s9 = inlined_call_operand.hbm [shape: bf16[96,32], index: 9, kind: input, shape index: {}]   ;;  %s11986_s10 = inlined_call_operand.hbm [shape: f32[1,32], index: 10, kind: input, shape index: {}]   ;;  %s11987_s11 = inlined_call_operand.hbm [shape: bf16[96,32], index: 11, kind: input, shape index: {}]   ;;  %s11988_s12 = inlined_call_operand.hbm [shape: f32[1,32], index: 12, kind: input, shape index: {}]   ;;  %s11989_s13 = inlined_call_operand.hbm [shape: f32[1,16], index: 13, kind: input, shape index: {}]   ;;  %s11990_s14 = inlined_call_operand.hbm [shape: f32[2,8,8,176], index: 14, kind: output, shape index: {}]  }
   0x1   :  { %20 = vsyncpa [#allocation10], 0 }
   0x2   :  { %21 = vsyncpa [#allocation13], 0 }
   0x3   :  { %22 = vsyncpa [#allocation16], 0 }
   0x4   :  { %23 = vsyncpa [#allocation19], 0 }
   0x5   :  { %24 = vsyncpa [#allocation22], 0 }
   0x6   :  { %25 = vsyncpa [#allocation25], 0 }
   0x7   :  { %26 = vsyncpa [#allocation28], 0 }
   0x8   :  { %27 = vsyncpa [#allocation8], 0  ;;  %s8727_s29 = smov [#allocation9]   ;;  %s8728_s15 = smov [#allocation12]  }
   0x9   :  { %s45_s30 = sshll.u32 %s8727_s29, 4  ;;  %s67_s16 = sshll.u32 %s8728_s15, 4  ;;  %s46_s30 = int_to_ptr.vmem [resolvable:$true] %s45_s30  ;;  %s8828_s16 = int_to_ptr.vmem [resolvable:$true] %s67_s16 }
   0xa   :  { %s8379_s19 = scalar_lea.hbm %s11977_s1, 128 }
   0xb   :  { %p8380_p0 = scmp.ne.s32.totalorder %s11977_s1, %s8379_s19  ;;  %p8383_p1 = scmp.lt.u32.totalorder %s8379_s19, %s11977_s1 }
   0xd   :  { %p8385_p2 = pnand %p8383_p1, %p8380_p0 }
   0xf   :  { %8388 = shalt.err (!%p8385_p2)
}
  0x10   :  { %s8389_s24 = scalar_lea.vmem %s46_s30, 128  ;;  %p8394_p4 = scmp.lt.s32.totalorder %s46_s30, %s46_s30 }
  0x11   :  { %p8390_p3 = scmp.ne.s32.totalorder %s46_s30, %s8389_s24  ;;  %p8395_p5 = scmp.lt.s32.totalorder %s8389_s24, %s8389_s24 }
  0x13   :  { %p8396_p6 = por %p8395_p5, %p8394_p4 }
  0x15   :  { %p8397_p7 = pnand %p8396_p6, %p8390_p3 }
  0x17   :  { %8400 = shalt.err (!%p8397_p7)
}
  0x18   :  { %s8729_s25 = smov 64   ;;  %s8730_s26 = smov 4  }
  0x19   :  { %51 = dma.hbm_to_vmem [thread:$0]  %s11977_s1, 128, %s46_s30, [#allocation10], %s8729_s25, %s8729_s25, %s8730_s26  }
  0x1a   :  { %s8401_s17 = scalar_lea.hbm %s11979_s3, 3456 }
  0x1b   :  { %p8402_p8 = scmp.ne.s32.totalorder %s11979_s3, %s8401_s17  ;;  %p8405_p9 = scmp.lt.u32.totalorder %s8401_s17, %s11979_s3 }
  0x1d   :  { %p8407_p10 = pnand %p8405_p9, %p8402_p8 }
  0x1f   :  { %8410 = shalt.err (!%p8407_p10)
}
  0x20   :  { %s8411_s22 = scalar_lea.vmem %s8828_s16, 3456  ;;  %p8416_p12 = scmp.lt.s32.totalorder %s8828_s16, %s8828_s16 }
  0x21   :  { %p8412_p11 = scmp.ne.s32.totalorder %s8828_s16, %s8411_s22  ;;  %p8417_p13 = scmp.lt.s32.totalorder %s8411_s22, %s8411_s22 }
  0x23   :  { %p8418_p0 = por %p8417_p13, %p8416_p12 }
  0x25   :  { %p8419_p1 = pnand %p8418_p0, %p8412_p11 }
  0x27   :  { %8422 = shalt.err (!%p8419_p1)
}
  0x28   :  { %73 = dma.hbm_to_vmem [thread:$0]  %s11979_s3, 3456, %s8828_s16, [#allocation13], %s8729_s25, %s8729_s25, %s8730_s26  }
  0x29   :  { %s8731_s23 = smov [#allocation15]   ;;  %s8732_s27 = smov [#allocation18]  }
  0x2a   :  { %s89_s24 = sshll.u32 %s8731_s23, 4  ;;  %s111_s28 = sshll.u32 %s8732_s27, 4  ;;  %s90_s24 = int_to_ptr.vmem [resolvable:$true] %s89_s24  ;;  %s8865_s28 = int_to_ptr.vmem [resolvable:$true] %s111_s28 }
  0x2b   :  { %s8423_s17 = scalar_lea.hbm %s11981_s5, 768 }
  0x2c   :  { %p8424_p2 = scmp.ne.s32.totalorder %s11981_s5, %s8423_s17  ;;  %p8427_p3 = scmp.lt.u32.totalorder %s8423_s17, %s11981_s5 }
  0x2e   :  { %p8429_p4 = pnand %p8427_p3, %p8424_p2 }
  0x30   :  { %8432 = shalt.err (!%p8429_p4)
}
  0x31   :  { %s8433_s3 = scalar_lea.vmem %s90_s24, 768  ;;  %p8438_p6 = scmp.lt.s32.totalorder %s90_s24, %s90_s24 }
  0x32   :  { %p8434_p5 = scmp.ne.s32.totalorder %s90_s24, %s8433_s3  ;;  %p8439_p7 = scmp.lt.s32.totalorder %s8433_s3, %s8433_s3 }
  0x34   :  { %p8440_p8 = por %p8439_p7, %p8438_p6 }
  0x36   :  { %p8441_p9 = pnand %p8440_p8, %p8434_p5 }
  0x38   :  { %8444 = shalt.err (!%p8441_p9)
}
  0x39   :  { %95 = dma.hbm_to_vmem [thread:$0]  %s11981_s5, 768, %s90_s24, [#allocation16], %s8729_s25, %s8729_s25, %s8730_s26  }
  0x3a   :  { %s8445_s23 = scalar_lea.hbm %s11983_s7, 768 }
  0x3b   :  { %p8446_p10 = scmp.ne.s32.totalorder %s11983_s7, %s8445_s23  ;;  %p8449_p11 = scmp.lt.u32.totalorder %s8445_s23, %s11983_s7 }
  0x3d   :  { %p8451_p12 = pnand %p8449_p11, %p8446_p10 }
  0x3f   :  { %8454 = shalt.err (!%p8451_p12)
}
  0x40   :  { %s8455_s18 = scalar_lea.vmem %s8865_s28, 768  ;;  %p8460_p0 = scmp.lt.s32.totalorder %s8865_s28, %s8865_s28 }
  0x41   :  { %p8456_p13 = scmp.ne.s32.totalorder %s8865_s28, %s8455_s18  ;;  %p8461_p1 = scmp.lt.s32.totalorder %s8455_s18, %s8455_s18 }
  0x43   :  { %p8462_p2 = por %p8461_p1, %p8460_p0 }
  0x45   :  { %p8463_p3 = pnand %p8462_p2, %p8456_p13 }
  0x47   :  { %8466 = shalt.err (!%p8463_p3)
}
  0x48   :  { %117 = dma.hbm_to_vmem [thread:$0]  %s11983_s7, 768, %s8865_s28, [#allocation19], %s8729_s25, %s8729_s25, %s8730_s26  }
  0x49   :  { %s8733_s19 = smov [#allocation21]   ;;  %s8734_s21 = smov [#allocation24]  }
  0x4a   :  { %s133_s20 = sshll.u32 %s8733_s19, 4  ;;  %s155_s3 = sshll.u32 %s8734_s21, 4  ;;  %s134_s20 = int_to_ptr.vmem [resolvable:$true] %s133_s20  ;;  %s8902_s3 = int_to_ptr.vmem [resolvable:$true] %s155_s3 }
  0x4b   :  { %s8467_s1 = scalar_lea.hbm %s11985_s9, 768 }
  0x4c   :  { %p8468_p4 = scmp.ne.s32.totalorder %s11985_s9, %s8467_s1  ;;  %p8471_p5 = scmp.lt.u32.totalorder %s8467_s1, %s11985_s9 }
  0x4e   :  { %p8473_p6 = pnand %p8471_p5, %p8468_p4 }
  0x50   :  { %8476 = shalt.err (!%p8473_p6)
}
  0x51   :  { %s8477_s7 = scalar_lea.vmem %s134_s20, 768  ;;  %p8482_p8 = scmp.lt.s32.totalorder %s134_s20, %s134_s20 }
  0x52   :  { %p8478_p7 = scmp.ne.s32.totalorder %s134_s20, %s8477_s7  ;;  %p8483_p9 = scmp.lt.s32.totalorder %s8477_s7, %s8477_s7 }
  0x54   :  { %p8484_p10 = por %p8483_p9, %p8482_p8 }
  0x56   :  { %p8485_p11 = pnand %p8484_p10, %p8478_p7 }
  0x58   :  { %8488 = shalt.err (!%p8485_p11)
}
  0x59   :  { %139 = dma.hbm_to_vmem [thread:$0]  %s11985_s9, 768, %s134_s20, [#allocation22], %s8729_s25, %s8729_s25, %s8730_s26  }
  0x5a   :  { %s8489_s5 = scalar_lea.hbm %s11987_s11, 768 }
  0x5b   :  { %p8490_p12 = scmp.ne.s32.totalorder %s11987_s11, %s8489_s5  ;;  %p8493_p13 = scmp.lt.u32.totalorder %s8489_s5, %s11987_s11 }
  0x5d   :  { %p8495_p0 = pnand %p8493_p13, %p8490_p12 }
  0x5f   :  { %8498 = shalt.err (!%p8495_p0)
}
  0x60   :  { %s8499_s22 = scalar_lea.vmem %s8902_s3, 768  ;;  %p8504_p2 = scmp.lt.s32.totalorder %s8902_s3, %s8902_s3 }
  0x61   :  { %p8500_p1 = scmp.ne.s32.totalorder %s8902_s3, %s8499_s22  ;;  %p8505_p3 = scmp.lt.s32.totalorder %s8499_s22, %s8499_s22 }
  0x63   :  { %p8506_p4 = por %p8505_p3, %p8504_p2 }
  0x65   :  { %p8507_p5 = pnand %p8506_p4, %p8500_p1 }
  0x67   :  { %8510 = shalt.err (!%p8507_p5)
}
  0x68   :  { %161 = dma.hbm_to_vmem [thread:$0]  %s11987_s11, 768, %s8902_s3, [#allocation25], %s8729_s25, %s8729_s25, %s8730_s26  }
  0x69   :  { %s8735_s1 = smov [#allocation6]   ;;  %s8736_s23 = smov [#allocation11]  }
  0x6a   :  { %s33_s30 = sshll.u32 %s8735_s1, 4  ;;  %s58_s27 = sshll.u32 %s8736_s23, 4  ;;  %s34_s30 = int_to_ptr.vmem [resolvable:$true] %s33_s30  ;;  %s59_s27 = int_to_ptr.vmem [resolvable:$true] %s58_s27 }
  0x6b   :  { %s8511_s28 = scalar_lea.hbm %s11976_s0, 1024 }
  0x6c   :  { %p8512_p6 = scmp.ne.s32.totalorder %s11976_s0, %s8511_s28  ;;  %p8515_p7 = scmp.lt.u32.totalorder %s8511_s28, %s11976_s0 }
  0x6e   :  { %p8517_p8 = pnand %p8515_p7, %p8512_p6 }
  0x70   :  { %8520 = shalt.err (!%p8517_p8)
}
  0x71   :  { %s8521_s11 = scalar_lea.vmem %s34_s30, 1024  ;;  %p8526_p10 = scmp.lt.s32.totalorder %s34_s30, %s34_s30 }
  0x72   :  { %p8522_p9 = scmp.ne.s32.totalorder %s34_s30, %s8521_s11  ;;  %p8527_p11 = scmp.lt.s32.totalorder %s8521_s11, %s8521_s11 }
  0x74   :  { %p8528_p12 = por %p8527_p11, %p8526_p10 }
  0x76   :  { %p8529_p13 = pnand %p8528_p12, %p8522_p9 }
  0x78   :  { %8532 = shalt.err (!%p8529_p13)
}
  0x79   :  { %39 = dma.hbm_to_vmem [thread:$0]  %s11976_s0, 1024, %s34_s30, [#allocation7], %s8729_s25, %s8729_s25, %s8730_s26  }
  0x7a   :  { %s8533_s16 = scalar_lea.hbm %s11978_s2, 16 }
  0x7b   :  { %p8534_p0 = scmp.ne.s32.totalorder %s11978_s2, %s8533_s16  ;;  %p8537_p1 = scmp.lt.u32.totalorder %s8533_s16, %s11978_s2 }
  0x7d   :  { %p8539_p2 = pnand %p8537_p1, %p8534_p0 }
  0x7f   :  { %8542 = shalt.err (!%p8539_p2)
}
  0x80   :  { %s8543_s23 = scalar_lea.vmem %s59_s27, 16  ;;  %s8547_s29 = scalar_lea.vmem %s59_s27, 32 }
  0x81   :  { %p8544_p3 = scmp.ne.s32.totalorder %s59_s27, %s8543_s23  ;;  %p8548_p4 = scmp.lt.s32.totalorder %s59_s27, %s59_s27 }
  0x82   :  { %p8549_p5 = scmp.lt.s32.totalorder %s8547_s29, %s8543_s23 }
  0x84   :  { %p8550_p6 = por %p8549_p5, %p8548_p4 }
  0x86   :  { %p8551_p7 = pnand %p8550_p6, %p8544_p3 }
  0x88   :  { %8554 = shalt.err (!%p8551_p7)
}
  0x89   :  { %61 = dma.hbm_to_vmem [thread:$0]  %s11978_s2, 16, %s59_s27, [#allocation10]  }
  0x8a   :  { %s8737_s30 = smov [#allocation14]   ;;  %s8738_s28 = smov [#allocation17]  }
  0x8b   :  { %s80_s7 = sshll.u32 %s8737_s30, 4  ;;  %s102_s15 = sshll.u32 %s8738_s28, 4  ;;  %s81_s7 = int_to_ptr.vmem [resolvable:$true] %s80_s7  ;;  %s103_s15 = int_to_ptr.vmem [resolvable:$true] %s102_s15 }
  0x8c   :  { %s8555_s5 = scalar_lea.hbm %s11980_s4, 16 }
  0x8d   :  { %p8556_p8 = scmp.ne.s32.totalorder %s11980_s4, %s8555_s5  ;;  %p8559_p9 = scmp.lt.u32.totalorder %s8555_s5, %s11980_s4 }
  0x8f   :  { %p8561_p10 = pnand %p8559_p9, %p8556_p8 }
  0x91   :  { %8564 = shalt.err (!%p8561_p10)
}
  0x92   :  { %s8565_s2 = scalar_lea.vmem %s81_s7, 16  ;;  %s8569_s27 = scalar_lea.vmem %s81_s7, 32 }
  0x93   :  { %p8566_p11 = scmp.ne.s32.totalorder %s81_s7, %s8565_s2  ;;  %p8570_p12 = scmp.lt.s32.totalorder %s81_s7, %s81_s7 }
  0x94   :  { %p8571_p13 = scmp.lt.s32.totalorder %s8569_s27, %s8565_s2 }
  0x96   :  { %p8572_p0 = por %p8571_p13, %p8570_p12 }
  0x98   :  { %p8573_p1 = pnand %p8572_p0, %p8566_p11 }
  0x9a   :  { %8576 = shalt.err (!%p8573_p1)
}
  0x9b   :  { %83 = dma.hbm_to_vmem [thread:$0]  %s11980_s4, 16, %s81_s7, [#allocation13]  }
  0x9c   :  { %s8577_s20 = scalar_lea.hbm %s11982_s6, 16 }
  0x9d   :  { %p8578_p2 = scmp.ne.s32.totalorder %s11982_s6, %s8577_s20  ;;  %p8581_p3 = scmp.lt.u32.totalorder %s8577_s20, %s11982_s6 }
  0x9f   :  { %p8583_p4 = pnand %p8581_p3, %p8578_p2 }
  0xa1   :  { %8586 = shalt.err (!%p8583_p4)
}
  0xa2   :  { %s8587_s26 = scalar_lea.vmem %s103_s15, 16  ;;  %s8591_s30 = scalar_lea.vmem %s103_s15, 32 }
  0xa3   :  { %p8588_p5 = scmp.ne.s32.totalorder %s103_s15, %s8587_s26  ;;  %p8592_p6 = scmp.lt.s32.totalorder %s103_s15, %s103_s15 }
  0xa4   :  { %p8593_p7 = scmp.lt.s32.totalorder %s8591_s30, %s8587_s26 }
  0xa6   :  { %p8594_p8 = por %p8593_p7, %p8592_p6 }
  0xa8   :  { %p8595_p9 = pnand %p8594_p8, %p8588_p5 }
  0xaa   :  { %8598 = shalt.err (!%p8595_p9)
}
  0xab   :  { %105 = dma.hbm_to_vmem [thread:$0]  %s11982_s6, 16, %s103_s15, [#allocation16]  }
  0xac   :  { %s8739_s28 = smov [#allocation20]   ;;  %s8740_s18 = smov [#allocation23]  }
  0xad   :  { %s124_s17 = sshll.u32 %s8739_s28, 4  ;;  %s146_s5 = sshll.u32 %s8740_s18, 4  ;;  %s125_s17 = int_to_ptr.vmem [resolvable:$true] %s124_s17  ;;  %s147_s5 = int_to_ptr.vmem [resolvable:$true] %s146_s5 }
  0xae   :  { %s8599_s24 = scalar_lea.hbm %s11984_s8, 16 }
  0xaf   :  { %p8600_p10 = scmp.ne.s32.totalorder %s11984_s8, %s8599_s24  ;;  %p8603_p11 = scmp.lt.u32.totalorder %s8599_s24, %s11984_s8 }
  0xb1   :  { %p8605_p12 = pnand %p8603_p11, %p8600_p10 }
  0xb3   :  { %8608 = shalt.err (!%p8605_p12)
}
  0xb4   :  { %s8609_s6 = scalar_lea.vmem %s125_s17, 16  ;;  %s8613_s15 = scalar_lea.vmem %s125_s17, 32 }
  0xb5   :  { %p8610_p13 = scmp.ne.s32.totalorder %s125_s17, %s8609_s6  ;;  %p8614_p0 = scmp.lt.s32.totalorder %s125_s17, %s125_s17 }
  0xb6   :  { %p8615_p1 = scmp.lt.s32.totalorder %s8613_s15, %s8609_s6 }
  0xb8   :  { %p8616_p2 = por %p8615_p1, %p8614_p0 }
  0xba   :  { %p8617_p3 = pnand %p8616_p2, %p8610_p13 }
  0xbc   :  { %8620 = shalt.err (!%p8617_p3)
}
  0xbd   :  { %127 = dma.hbm_to_vmem [thread:$0]  %s11984_s8, 16, %s125_s17, [#allocation19]  }
  0xbe   :  { %s8621_s1 = scalar_lea.hbm %s11986_s10, 16 }
  0xbf   :  { %p8622_p4 = scmp.ne.s32.totalorder %s11986_s10, %s8621_s1  ;;  %p8625_p5 = scmp.lt.u32.totalorder %s8621_s1, %s11986_s10 }
  0xc1   :  { %p8627_p6 = pnand %p8625_p5, %p8622_p4 }
  0xc3   :  { %8630 = shalt.err (!%p8627_p6)
}
  0xc4   :  { %s8631_s30 = scalar_lea.vmem %s147_s5, 16  ;;  %s8635_s4 = scalar_lea.vmem %s147_s5, 32 }
  0xc5   :  { %p8632_p7 = scmp.ne.s32.totalorder %s147_s5, %s8631_s30  ;;  %p8636_p8 = scmp.lt.s32.totalorder %s147_s5, %s147_s5 }
  0xc6   :  { %p8637_p9 = scmp.lt.s32.totalorder %s8635_s4, %s8631_s30 }
  0xc8   :  { %p8638_p10 = por %p8637_p9, %p8636_p8 }
  0xca   :  { %p8639_p11 = pnand %p8638_p10, %p8632_p7 }
  0xcc   :  { %8642 = shalt.err (!%p8639_p11)
}
  0xcd   :  { %149 = dma.hbm_to_vmem [thread:$0]  %s11986_s10, 16, %s147_s5, [#allocation22]  }
  0xce   :  { %s8741_s28 = smov [#allocation26]   ;;  %s8742_s18 = smov [#allocation27]  }
  0xcf   :  { %s168_s17 = sshll.u32 %s8741_s28, 4  ;;  %s178_s11 = sshll.u32 %s8742_s18, 4  ;;  %s169_s17 = int_to_ptr.vmem [resolvable:$true] %s168_s17  ;;  %s179_s11 = int_to_ptr.vmem [resolvable:$true] %s178_s11 }
  0xd0   :  { %s8643_s19 = scalar_lea.hbm %s11988_s12, 16 }
  0xd1   :  { %p8644_p12 = scmp.ne.s32.totalorder %s11988_s12, %s8643_s19  ;;  %p8647_p13 = scmp.lt.u32.totalorder %s8643_s19, %s11988_s12 }
  0xd3   :  { %p8649_p0 = pnand %p8647_p13, %p8644_p12 }
  0xd5   :  { %8652 = shalt.err (!%p8649_p0)
}
  0xd6   :  { %s8653_s10 = scalar_lea.vmem %s169_s17, 16  ;;  %s8657_s5 = scalar_lea.vmem %s169_s17, 32 }
  0xd7   :  { %p8654_p1 = scmp.ne.s32.totalorder %s169_s17, %s8653_s10  ;;  %p8658_p2 = scmp.lt.s32.totalorder %s169_s17, %s169_s17 }
  0xd8   :  { %p8659_p3 = scmp.lt.s32.totalorder %s8657_s5, %s8653_s10 }
  0xda   :  { %p8660_p4 = por %p8659_p3, %p8658_p2 }
  0xdc   :  { %p8661_p5 = pnand %p8660_p4, %p8654_p1 }
  0xde   :  { %8664 = shalt.err (!%p8661_p5)
}
  0xdf   :  { %171 = dma.hbm_to_vmem [thread:$0]  %s11988_s12, 16, %s169_s17, [#allocation25]  }
  0xe0   :  { %s8665_s20 = scalar_lea.hbm %s11989_s13, 16 }
  0xe1   :  { %p8666_p6 = scmp.ne.s32.totalorder %s11989_s13, %s8665_s20  ;;  %p8669_p7 = scmp.lt.u32.totalorder %s8665_s20, %s11989_s13 }
  0xe3   :  { %p8671_p8 = pnand %p8669_p7, %p8666_p6 }
  0xe5   :  { %8674 = shalt.err (!%p8671_p8)
}
  0xe6   :  { %s8675_s26 = scalar_lea.vmem %s179_s11, 16  ;;  %s8679_s30 = scalar_lea.vmem %s179_s11, 32 }
  0xe7   :  { %p8676_p9 = scmp.ne.s32.totalorder %s179_s11, %s8675_s26  ;;  %p8680_p10 = scmp.lt.s32.totalorder %s179_s11, %s179_s11 }
  0xe8   :  { %p8681_p11 = scmp.lt.s32.totalorder %s8679_s30, %s8675_s26 }
  0xea   :  { %p8682_p12 = por %p8681_p11, %p8680_p10 }
  0xec   :  { %p8683_p13 = pnand %p8682_p12, %p8676_p9 }
  0xee   :  { %8686 = shalt.err (!%p8683_p13)
}
  0xef   :  { %181 = dma.hbm_to_vmem [thread:$0]  %s11989_s13, 16, %s179_s11, [#allocation28]  }
  0xf0   :  { %8709 = dma.done.wait [#allocation7], 1024  }
  0xf1   :  { %8710 = vsyncadd [#allocation7], 4294966272 }
  0xf2   :  { %8711 = dma.done.wait [#allocation10], 144  }
  0xf3   :  { %8712 = vsyncadd [#allocation10], 4294967152 }
  0xf4   :  { %8713 = dma.done.wait [#allocation13], 3472  }
  0xf5   :  { %8714 = vsyncadd [#allocation13], 4294963824 }
  0xf6   :  { %8715 = dma.done.wait [#allocation16], 784  }
  0xf7   :  { %8716 = vsyncadd [#allocation16], 4294966512 }
  0xf8   :  { %8717 = dma.done.wait [#allocation19], 784  }
  0xf9   :  { %8718 = vsyncadd [#allocation19], 4294966512 }
  0xfa   :  { %8719 = dma.done.wait [#allocation22], 784  }
  0xfb   :  { %8720 = vsyncadd [#allocation22], 4294966512 }
  0xfc   :  { %8721 = dma.done.wait [#allocation25], 784  }
  0xfd   :  { %8722 = vsyncadd [#allocation25], 4294966512 }
  0xfe   :  { %8723 = dma.done.wait [#allocation28], 16  }
  0xff   :  { %8724 = vsyncadd [#allocation28], 4294967280  ;;  %v8228_v0 = vld [vmem:[#allocation9] sm:$0xff]   ;;  %vm296_vm0 = vcmask 130048   ;;  %v8230_v2 = vld [vmem:[#allocation6 + $0x8] sm:$0xff]   ;;  %vm888_vm1 = vcmask 253952  }
 0x100   :  { %v8229_v1 = vld [vmem:[#allocation6] sm:$0xff]   ;;  %8072 = vmatprep.subr.bf16.mxu1 %v8228_v0  ;;  %v8231_v3 = vld [vmem:[#allocation6 + $0x10] sm:$0xff]   ;;  %v8232_v4 = vld [vmem:[#allocation6 + $0x18] sm:$0xff]   ;;  %vm899_vm2 = vsmask.f32 256  ;;  %vm2869_vm3 = vcmask 385024  }
 0x101   :  { %8073 = vmatpush3.bf16.msra.mxu1 %v8228_v0  ;;  %8074 = vmatprep.mubr.msk.bf16.mxu1 %vm296_vm0, %v8229_v1  ;;  %v8233_v5 = vld [vmem:[#allocation6 + $0x20] sm:$0xff]   ;;  %v8234_v6 = vld [vmem:[#allocation6 + $0x28] sm:$0xff]   ;;  %v8235_v7 = vld [vmem:[#allocation6 + $0x30] sm:$0xff]   ;;  %v12041_v13 = vmov 0  ;;  %vm949_vm6 = vsmask.f32 7938 }
 0x102   :  { %v8236_v8 = vld [vmem:[#allocation6 + $0x38] sm:$0xff]   ;;  %vm9047_vm4 = vmand %vm2869_vm3, %vm899_vm2  ;;  %v12044_v15 = vmov 0  ;;  %vm886_vm8 = vcmask 257024   ;;  %vm2867_vm9 = vcmask 388096   ;;  %v9072_v20 = vld [vmem:[#allocation11] ss:$0 sm:$0xff] }
 0x103   :  { %v2887_v10 = vld [vmem:[#allocation3 + $0x18] sm:$0x1]  ;;  %vm9054_vm5 = vmand %vm888_vm1, %vm899_vm2  ;;  %v2936_v16 = vld [vmem:[#allocation3 + $0x1c] sm:$0x1]  ;;  %v12049_v21 = vmov 0  ;;  %s8743_s13 = smov 96  }
 0x104   :  { %8075 = vmatmul.mubr.msk.bf16.vlgmr.msra.gmra.mrb[0].mxu1 %vm296_vm0, %v8230_v2  ;;  %v907_v11 = vld [vmem:[#allocation2 + $0x18] sm:$0x1]  ;;  %v2888_v12 = vsel %vm9047_vm4, 0, %v2887_v10  ;;  %v12042_v13 = vsel %vm9054_vm5, 4294967295, %v12041_v13  ;;  %vm9061_vm7 = vmand %vm888_vm1, %vm949_vm6  ;;  %v957_v17 = vld [vmem:[#allocation2 + $0x1c] sm:$0x1] }
 0x105   :  { %8078 = vmatprep.mubr.msk.bf16.mxu1 %vm296_vm0, %v8231_v3  ;;  %12043 = vst [vmem:[#allocation39_spill] sm:$0xff] %v12042_v13  ;;  %2889 = vst [vmem:[#allocation3 + $0x18] sm:$0x1] %v2888_v12  ;;  %v908_v14 = vsel %vm9054_vm5, 0, %v907_v11  ;;  %v12045_v15 = vsel %vm9061_vm7, 4294967295, %v12044_v15  ;;  %v958_v19 = vsel %vm9061_vm7, 0, %v957_v17 }
 0x106   :  { %909 = vst [vmem:[#allocation2 + $0x18] sm:$0x1] %v908_v14  ;;  %12046 = vst [vmem:[#allocation40_spill] sm:$0xff] %v12045_v15  ;;  %v951_v25 = vld [vmem:[#allocation2 + $0xc] sm:$0x1]  ;;  %vm1692_vm13 = vcmask 1042432  }
 0x107   :  { %vm9066_vm10 = vmand %vm2869_vm3, %vm949_vm6  ;;  %959 = vst [vmem:[#allocation2 + $0x1c] sm:$0x1] %v958_v19  ;;  %v901_v26 = vld [vmem:[#allocation2 + $0x8] sm:$0x1]  ;;  %v952_v29 = vsel %vm9061_vm7, 0, %v951_v25  ;;  %vm1693_vm14 = vcmask 1046532  }
 0x108   :  { %vm9075_vm11 = vmand %vm886_vm8, %vm949_vm6  ;;  %v2937_v22 = vsel %vm9066_vm10, 0, %v2936_v16  ;;  %v902_v30 = vsel %vm9054_vm5, 0, %v901_v26  ;;  %953 = vst [vmem:[#allocation2 + $0xc] sm:$0x1] %v952_v29  ;;  %v910_v37 = vld [vmem:[#allocation2 + $0x20] sm:$0x1] }
 0x109   :  { %v12050_v21 = vsel %vm9075_vm11, 4294967295, %v12049_v21  ;;  %vm9082_vm12 = vmand %vm2867_vm9, %vm949_vm6  ;;  %2938 = vst [vmem:[#allocation3 + $0x1c] sm:$0x1] %v2937_v22  ;;  %v2881_v38 = vld [vmem:[#allocation3 + $0x8] sm:$0x1]  ;;  %v911_v40 = vsel %vm9054_vm5, 0, %v910_v37 }
 0x10a   :  { %12051 = vst [vmem:[#allocation41_spill] sm:$0xff] %v12050_v21  ;;  %903 = vst [vmem:[#allocation2 + $0x8] sm:$0x1] %v902_v30  ;;  %v2882_v41 = vsel %vm9047_vm4, 0, %v2881_v38  ;;  %v2890_v54 = vld [vmem:[#allocation3 + $0x20] sm:$0x1] }
 0x10b   :  { %912 = vst [vmem:[#allocation2 + $0x20] sm:$0x1] %v911_v40  ;;  %2883 = vst [vmem:[#allocation3 + $0x8] sm:$0x1] %v2882_v41  ;;  %v2930_v55 = vld [vmem:[#allocation3 + $0xc] sm:$0x1] }
 0x10c   :  { %8079 = vmatmul.mubr.msk.bf16.gmra.mrb[4].mxu1 %vm296_vm0, %v8232_v4  ;;  %v2891_v57 = vsel %vm9047_vm4, 0, %v2890_v54  ;;  %v2931_v61 = vsel %vm9066_vm10, 0, %v2930_v55  ;;  %v2939_v16 = vld [vmem:[#allocation3 + $0x24] sm:$0x1]  ;;  %vm1417_vm15 = vsmask.f32 3328  ;;  %vm9501_vm2 = vmor %vm1692_vm13, %vm1693_vm14 }
 0x10d   :  { %8082 = vmatprep.mubr.msk.bf16.mxu1 %vm296_vm0, %v8233_v5  ;;  %2892 = vst [vmem:[#allocation3 + $0x20] sm:$0x1] %v2891_v57  ;;  %2932 = vst [vmem:[#allocation3 + $0xc] sm:$0x1] %v2931_v61  ;;  %v2940_v25 = vsel %vm9066_vm10, 0, %v2939_v16  ;;  %s8745_s8 = smov 16  }
 0x10e   :  { %2941 = vst [vmem:[#allocation3 + $0x24] sm:$0x1] %v2940_v25  ;;  %v960_v40 = vld [vmem:[#allocation2 + $0x24] sm:$0x1]  ;;  %v11991_v25 = vmov 0   ;;  %s8746_s7 = smov 32  }
 0x10f   :  { %2868 = vst.msk [vmem:[#allocation3] sm:$0xf] %vm2867_vm9, %v11991_v25  ;;  %2871 = vst.msk [vmem:[#allocation3 + $0x50] sm:$0xf] %vm2867_vm9, %v11991_v25  ;;  %s8747_s28 = smov 112   ;;  %s8748_s17 = smov 48  }
 0x110   :  { %2870 = vst.msk [vmem:[#allocation3 + $0x4] sm:$0x1] %vm2869_vm3, %v11991_v25  ;;  %2872 = vst.msk [vmem:[#allocation3 + $0x54] sm:$0x1] %vm2869_vm3, %v11991_v25  ;;  %s8749_s18 = smov 80   ;;  %vm1904_vm6 = vcmask 523264  }
 0x111   :  { %887 = vst.msk [vmem:[#allocation2] sm:$0xf] %vm886_vm8, %v11991_v25  ;;  %890 = vst.msk [vmem:[#allocation2 + $0x50] sm:$0xf] %vm886_vm8, %v11991_v25 }
 0x112   :  { %889 = vst.msk [vmem:[#allocation2 + $0x4] sm:$0x1] %vm888_vm1, %v11991_v25  ;;  %891 = vst.msk [vmem:[#allocation2 + $0x54] sm:$0x1] %vm888_vm1, %v11991_v25 }
 0x113   :  { %893 = vst.msk [vmem:[#allocation2 + $0x48] sm:$0xf] %vm886_vm8, %v11991_v25  ;;  %895 = vst.msk [vmem:[#allocation2 + $0x98] sm:$0xf] %vm886_vm8, %v11991_v25 }
 0x114   :  { %8083 = vmatmul.mubr.msk.bf16.gmra.mrb[8].mxu1 %vm296_vm0, %v8234_v6  ;;  %894 = vst.msk [vmem:[#allocation2 + $0x4c] sm:$0x1] %vm888_vm1, %v11991_v25  ;;  %896 = vst.msk [vmem:[#allocation2 + $0x9c] sm:$0x1] %vm888_vm1, %v11991_v25 }
 0x115   :  { %8086 = vmatprep.mubr.msk.bf16.mxu1 %vm296_vm0, %v8235_v7  ;;  %2874 = vst.msk [vmem:[#allocation3 + $0x48] sm:$0xf] %vm2867_vm9, %v11991_v25  ;;  %2876 = vst.msk [vmem:[#allocation3 + $0x98] sm:$0xf] %vm2867_vm9, %v11991_v25  ;;  %vm4734_vm9 = vcmask 916480  }
 0x116   :  { %2875 = vst.msk [vmem:[#allocation3 + $0x4c] sm:$0x1] %vm2869_vm3, %v11991_v25  ;;  %2877 = vst.msk [vmem:[#allocation3 + $0x9c] sm:$0x1] %vm2869_vm3, %v11991_v25 }
 0x117   :  { %5257 = vst.msk [vmem:[#allocation4] sm:$0xf] %vm886_vm8, %v11991_v25  ;;  %5259 = vst.msk [vmem:[#allocation4 + $0x50] sm:$0xf] %vm886_vm8, %v11991_v25 }
 0x118   :  { %5258 = vst.msk [vmem:[#allocation4 + $0x4] sm:$0x1] %vm888_vm1, %v11991_v25  ;;  %5260 = vst.msk [vmem:[#allocation4 + $0x54] sm:$0x1] %vm888_vm1, %v11991_v25 }
 0x119   :  { %5262 = vst.msk [vmem:[#allocation4 + $0x48] sm:$0xf] %vm886_vm8, %v11991_v25  ;;  %5264 = vst.msk [vmem:[#allocation4 + $0x98] sm:$0xf] %vm886_vm8, %v11991_v25  ;;  %vm1976_vm8 = vcmask 785408  }
 0x11a   :  { %5263 = vst.msk [vmem:[#allocation4 + $0x4c] sm:$0x1] %vm888_vm1, %v11991_v25  ;;  %5265 = vst.msk [vmem:[#allocation4 + $0x9c] sm:$0x1] %vm888_vm1, %v11991_v25  ;;  %vm1418_vm1 = vsmask.f32 7440 }
 0x11b   :  { %vm9512_vm3 = vmor %vm1417_vm15, %vm1418_vm1 }
 0x11c   :  { %8087 = vmatmul.mubr.msk.bf16.gmra.mrb[12].mxu1 %vm296_vm0, %v8236_v8 }
 0x1d7   :  { %v8076_v24 = vpop.f32.mrb[0].mxu1 }
 0x1d8   :  { %v9087_v27 = vadd.f32 %v8076_v24, %v9072_v20  ;;  %v355_v28 = vpop.f32.mrb[1].mxu1 }
 0x1d9   :  { %v9094_v31 = vadd.f32 %v9072_v20, %v355_v28  ;;  %v8077_v32 = vpop.f32.mrb[2].mxu1 }
 0x1da   :  { %12054 = vst [vmem:[#allocation42_spill] sm:$0xff] %v9087_v27  ;;  %v9097_v33 = vmax.f32 %v9087_v27, 0.0  ;;  %v9100_v34 = vadd.f32 %v8077_v32, %v9072_v20  ;;  %v358_v35 = vpop.f32.mrb[3].mxu1 }
 0x1db   :  { %12055 = vst [vmem:[#allocation43_spill] sm:$0xff] %v9094_v31  ;;  %v9103_v36 = vmax.f32 %v9094_v31, 0.0  ;;  %v9123_v56 = vadd.f32 %v9072_v20, %v358_v35 }
 0x1dc   :  { %12056 = vst [vmem:[#allocation44_spill] sm:$0xff] %v9097_v33  ;;  %12057 = vst [vmem:[#allocation45_spill] sm:$0xff] %v9100_v34  ;;  %v7913_v39 = vpack.c.bf16 %v9097_v33, %v9097_v33  ;;  %v9114_v43 = vmax.f32 %v9100_v34, 0.0 }
 0x1dd   :  { %12058 = vst [vmem:[#allocation46_spill] sm:$0xff] %v9103_v36  ;;  %v7911_v42 = vpack.c.bf16 %v9103_v36, %v9103_v36  ;;  %12060 = vst [vmem:[#allocation48_spill] sm:$0xff] %v9123_v56  ;;  %v9135_v2 = vmax.f32 %v9123_v56, 0.0 }
 0x1de   :  { %12059 = vst [vmem:[#allocation47_spill] sm:$0xff] %v9114_v43  ;;  %v1080_v44 = vshrl.u32 %v7913_v39, 16  ;;  %v1083_v47 = vshll.u32 %v7913_v39, 16  ;;  %v7914_v50 = vpack.c.bf16 %v9114_v43, %v9114_v43 }
 0x1df   :  { %v8080_v45 = vpop.f32.mrb[4].mxu1  ;;  %v1064_v52 = vshrl.u32 %v7911_v42, 16  ;;  %v1067_v63 = vshll.u32 %v7911_v42, 16  ;;  %12062 = vst [vmem:[#allocation50_spill] sm:$0xff] %v9135_v2  ;;  %v7912_v17 = vpack.c.bf16 %v9135_v2, %v9135_v2 }
 0x1e0   :  { %v1082_v46 = vrot.slane %v1080_v44, 7  ;;  %v371_v48 = vpop.f32.mrb[5].mxu1  ;;  %v1088_v60 = vshrl.u32 %v7914_v50, 16  ;;  %v9138_v3 = vadd.f32 %v8080_v45, %v9072_v20  ;;  %v1091_v12 = vshll.u32 %v7914_v50, 16 }
 0x1e1   :  { %v8081_v49 = vpop.f32.mrb[6].mxu1  ;;  %v1066_v59 = vrot.slane %v1064_v52, 7  ;;  %v1072_v35 = vshrl.u32 %v7912_v17, 16  ;;  %v9174_v39 = vadd.f32 %v9072_v20, %v371_v48  ;;  %v2884_v48 = vld [vmem:[#allocation3 + $0x10] sm:$0x1] }
 0x1e2   :  { %v1085_v51 = vor.u32 %v1083_v47, %v1082_v46  ;;  %v9118_v53 = vpop.f32.mrb[7].mxu1  ;;  %v1086_v58 = vrot.slane %v1082_v46, 4  ;;  %12063 = vst [vmem:[#allocation51_spill] sm:$0xff] %v9138_v3  ;;  %v1090_v8 = vrot.slane %v1088_v60, 7  ;;  %v9154_v22 = vmax.f32 %v9138_v3, 0.0 }
 0x1e3   :  { %v1070_v6 = vrot.slane %v1066_v59, 4  ;;  %v1069_v7 = vor.u32 %v1067_v63, %v1066_v59  ;;  %12071 = vst [vmem:[#allocation59_spill] sm:$0xff] %v9174_v39  ;;  %v9179_v41 = vadd.f32 %v8081_v49, %v9072_v20  ;;  %v9184_v45 = vrot.slane %v1072_v35, 7  ;;  %v2933_v52 = vld [vmem:[#allocation3 + $0x14] sm:$0x1] }
 0x1e4   :  { %2986 = vrot.lane.b32.xlu0 %v1085_v51, %s8729_s25  ;;  %1199 = vrot.lane.b32.xlu1 %v1085_v51, %s8743_s13  ;;  %v1093_v19 = vor.u32 %v1091_v12, %v1090_v8  ;;  %12067 = vst [vmem:[#allocation55_spill] sm:$0xff] %v9154_v22  ;;  %v9168_v32 = vpack.c.bf16 %v9154_v22, %v9154_v22  ;;  %v1094_v44 = vrot.slane %v1090_v8, 4  ;;  %v961_v47 = vsel %vm9061_vm7, 0, %v960_v40  ;;  %v904_v51 = vld [vmem:[#allocation2 + $0x10] sm:$0x1] }
 0x1e5   :  { %12072 = vst [vmem:[#allocation60_spill] sm:$0xff] %v9179_v41  ;;  %v9190_v50 = vmax.f32 %v9174_v39, 0.0  ;;  %962 = vst [vmem:[#allocation2 + $0x24] sm:$0x1] %v961_v47  ;;  %v1075_v49 = vshll.u32 %v7912_v17, 16  ;;  %v9195_v54 = vmax.f32 %v9179_v41, 0.0 }
 0x1e6   :  { %v1112_v46 = vshrl.u32 %v9168_v32, 16  ;;  %v1115_v55 = vshll.u32 %v9168_v32, 16  ;;  %v2885_v57 = vsel %vm9047_vm4, 0, %v2884_v48  ;;  %v905_v60 = vsel %vm9054_vm5, 0, %v904_v51  ;;  %v972_v8 = vld [vmem:[#allocation2 + $0x44] sm:$0x1] }
 0x1e7   :  { %v8084_v62 = vpop.f32.mrb[8].mxu1  ;;  %12074 = vst [vmem:[#allocation62_spill] sm:$0xff] %v9190_v50  ;;  %12075 = vst [vmem:[#allocation63_spill] sm:$0xff] %v9195_v54  ;;  %v2934_v61 = vsel %vm9066_vm10, 0, %v2933_v52  ;;  %v9209_v63 = vpack.c.bf16 %v9190_v50, %v9190_v50  ;;  %v9215_v12 = vpack.c.bf16 %v9195_v54, %v9195_v54  ;;  %v2902_v17 = vld [vmem:[#allocation3 + $0x40] sm:$0x1] }
 0x1e8   :  { %2988 = vrot.lane.b32.xlu0 %v1086_v58, %s8729_s25  ;;  %1201 = vrot.lane.b32.xlu1 %v1086_v58, %s8743_s13  ;;  %v9132_v0 = vadd.f32 %v8084_v62, %v9072_v20  ;;  %v387_v1 = vpop.f32.mrb[9].mxu1  ;;  %v1077_v58 = vor.u32 %v1075_v49, %v9184_v45  ;;  %v9201_v59 = vrot.slane %v1112_v46, 7  ;;  %2886 = vst [vmem:[#allocation3 + $0x10] sm:$0x1] %v2885_v57  ;;  %v954_v62 = vld [vmem:[#allocation2 + $0x14] sm:$0x1] }
 0x1e9   :  { %v9141_v4 = vadd.f32 %v9072_v20, %v387_v1  ;;  %v8085_v5 = vpop.f32.mrb[10].mxu1  ;;  %906 = vst [vmem:[#allocation2 + $0x10] sm:$0x1] %v905_v60  ;;  %2935 = vst [vmem:[#allocation3 + $0x14] sm:$0x1] %v2934_v61  ;;  %v955_v16 = vsel %vm9061_vm7, 0, %v954_v62 }
 0x1ea   :  { %12061 = vst [vmem:[#allocation49_spill] sm:$0xff] %v9132_v0  ;;  %v9144_v10 = vadd.f32 %v8085_v5, %v9072_v20  ;;  %v390_v11 = vpop.f32.mrb[11].mxu1  ;;  %v919_v1 = vld [vmem:[#allocation2 + $0x38] sm:$0x1]  ;;  %v969_v5 = vld [vmem:[#allocation2 + $0x3c] sm:$0x1]  ;;  %v1117_v49 = vor.u32 %v1115_v55, %v9201_v59 }
 0x1eb   :  { %12064 = vst [vmem:[#allocation52_spill] sm:$0xff] %v9141_v4  ;;  %v9149_v14 = vadd.f32 %v9072_v20, %v390_v11  ;;  %v2948_v11 = vld [vmem:[#allocation3 + $0x3c] sm:$0x1]  ;;  %956 = vst [vmem:[#allocation2 + $0x14] sm:$0x1] %v955_v16  ;;  %v1096_v40 = vshrl.u32 %v9209_v63, 16 }
 0x1ec   :  { %12065 = vst [vmem:[#allocation53_spill] sm:$0xff] %v9144_v10  ;;  %1193 = vrot.lane.b32.xlu1 %v1070_v6, %s8743_s13  ;;  %1191 = vrot.lane.b32.xlu0 %v1069_v7, %s8743_s13  ;;  %v2951_v46 = vld [vmem:[#allocation3 + $0x44] sm:$0x1]  ;;  %v2949_v47 = vsel %vm9066_vm10, 0, %v2948_v11  ;;  %v2903_v48 = vsel %vm9047_vm4, 0, %v2902_v17  ;;  %v1120_v61 = vshrl.u32 %v9215_v12, 16 }
 0x1ed   :  { %12066 = vst [vmem:[#allocation54_spill] sm:$0xff] %v9149_v14  ;;  %v2952_v52 = vsel %vm9066_vm10, 0, %v2951_v46  ;;  %2950 = vst [vmem:[#allocation3 + $0x3c] sm:$0x1] %v2949_v47  ;;  %v2893_v57 = vld [vmem:[#allocation3 + $0x28] sm:$0x1] }
 0x1ee   :  { %2904 = vst [vmem:[#allocation3 + $0x40] sm:$0x1] %v2903_v48  ;;  %2953 = vst [vmem:[#allocation3 + $0x44] sm:$0x1] %v2952_v52  ;;  %v1098_v60 = vrot.slane %v1096_v40, 7  ;;  %v2894_v62 = vsel %vm9047_vm4, 0, %v2893_v57 }
 0x1ef   :  { %v8088_v24 = vpop.f32.mrb[12].mxu1  ;;  %2895 = vst [vmem:[#allocation3 + $0x28] sm:$0x1] %v2894_v62  ;;  %v2896_v11 = vld [vmem:[#allocation3 + $0x30] sm:$0x1]  ;;  %v9329_v40 = vmax.f32 %v9144_v10, 0.0 }
 0x1f0   :  { %1203 = vrot.lane.b32.xlu1 %v1093_v19, %s8743_s13  ;;  %2978 = vrot.lane.b32.xlu0 %v1069_v7, %s8729_s25  ;;  %v403_v26 = vpop.f32.mrb[13].mxu1  ;;  %v9161_v28 = vadd.f32 %v8088_v24, %v9072_v20  ;;  %v2899_v7 = vld [vmem:[#allocation3 + $0x38] sm:$0x1]  ;;  %v1078_v24 = vrot.slane %v9184_v45, 4  ;;  %v973_v45 = vsel %vm9061_vm7, 0, %v972_v8 }
 0x1f1   :  { %v9164_v29 = vadd.f32 %v9072_v20, %v403_v26  ;;  %v8089_v30 = vpop.f32.mrb[14].mxu1  ;;  %v920_v26 = vsel %vm9054_vm5, 0, %v919_v1  ;;  %974 = vst [vmem:[#allocation2 + $0x44] sm:$0x1] %v973_v45  ;;  %v1102_v1 = vrot.slane %v1098_v60, 4  ;;  %12079 = vst [vmem:[#allocation67_spill] sm:$0xff] %v9329_v40  ;;  %v7922_v52 = vpack.c.bf16 %v9329_v40, %v9329_v40 }
 0x1f2   :  { %12068 = vst [vmem:[#allocation56_spill] sm:$0xff] %v9161_v28  ;;  %v9171_v37 = vadd.f32 %v8089_v30, %v9072_v20  ;;  %v406_v38 = vpop.f32.mrb[15].mxu1  ;;  %v970_v30 = vsel %vm9061_vm7, 0, %v969_v5  ;;  %921 = vst [vmem:[#allocation2 + $0x38] sm:$0x1] %v920_v26 }
 0x1f3   :  { %12069 = vst [vmem:[#allocation57_spill] sm:$0xff] %v9164_v29  ;;  %v9182_v42 = vadd.f32 %v9072_v20, %v406_v38  ;;  %v1118_v38 = vrot.slane %v9201_v59, 4  ;;  %971 = vst [vmem:[#allocation2 + $0x3c] sm:$0x1] %v970_v30  ;;  %v1123_v59 = vshll.u32 %v9215_v12, 16 }
 0x1f4   :  { %12070 = vst [vmem:[#allocation58_spill] sm:$0xff] %v9171_v37  ;;  %2990 = vrot.lane.b32.xlu1 %v1093_v19, %s8729_s25  ;;  %2980 = vrot.lane.b32.xlu0 %v1070_v6, %s8729_s25  ;;  %v963_v6 = vld [vmem:[#allocation2 + $0x2c] sm:$0x1]  ;;  %v913_v19 = vld [vmem:[#allocation2 + $0x28] sm:$0x1] }
 0x1f5   :  { %12073 = vst [vmem:[#allocation61_spill] sm:$0xff] %v9182_v42  ;;  %v964_v35 = vsel %vm9061_vm7, 0, %v963_v6  ;;  %v914_v51 = vsel %vm9054_vm5, 0, %v913_v19  ;;  %v966_v5 = vld [vmem:[#allocation2 + $0x34] sm:$0x1] }
 0x1f6   :  { %965 = vst [vmem:[#allocation2 + $0x2c] sm:$0x1] %v964_v35  ;;  %915 = vst [vmem:[#allocation2 + $0x28] sm:$0x1] %v914_v51  ;;  %v2942_v6 = vld [vmem:[#allocation3 + $0x2c] sm:$0x1] }
 0x1f7   :  { %v2943_v8 = vsel %vm9066_vm10, 0, %v2942_v6  ;;  %v922_v12 = vld [vmem:[#allocation2 + $0x40] sm:$0x1]  ;;  %v2945_v26 = vld [vmem:[#allocation3 + $0x34] sm:$0x1] }
 0x1f8   :  { %2992 = vrot.lane.b32.xlu1 %v1094_v44, %s8729_s25  ;;  %1205 = vrot.lane.b32.xlu0 %v1094_v44, %s8743_s13  ;;  %v2900_v44 = vsel %vm9047_vm4, 0, %v2899_v7  ;;  %v967_v7 = vsel %vm9061_vm7, 0, %v966_v5  ;;  %2944 = vst [vmem:[#allocation3 + $0x2c] sm:$0x1] %v2943_v8  ;;  %v2946_v35 = vsel %vm9066_vm10, 0, %v2945_v26  ;;  %v9350_v5 = vmax.f32 %v9149_v14, 0.0 }
 0x1f9   :  { %2901 = vst [vmem:[#allocation3 + $0x38] sm:$0x1] %v2900_v44  ;;  %968 = vst [vmem:[#allocation2 + $0x34] sm:$0x1] %v967_v7  ;;  %v916_v45 = vld [vmem:[#allocation2 + $0x30] sm:$0x1] }
 0x1fa   :  { %2947 = vst [vmem:[#allocation3 + $0x34] sm:$0x1] %v2946_v35  ;;  %v934_v46 = vld [vmem:[#allocation2 + $0x70] sm:$0x1]  ;;  %v917_v47 = vsel %vm9054_vm5, 0, %v916_v45  ;;  %12080 = vst [vmem:[#allocation68_spill] sm:$0xff] %v9350_v5  ;;  %v7920_v35 = vpack.c.bf16 %v9350_v5, %v9350_v5 }
 0x1fb   :  { %v935_v48 = vsel %vm9054_vm5, 0, %v934_v46  ;;  %918 = vst [vmem:[#allocation2 + $0x30] sm:$0x1] %v917_v47  ;;  %v2960_v46 = vld [vmem:[#allocation3 + $0x6c] sm:$0x1] }
 0x1fc   :  { %2982 = vrot.lane.b32.xlu1 %v1077_v58, %s8729_s25  ;;  %1195 = vrot.lane.b32.xlu0 %v1077_v58, %s8743_s13  ;;  %v9295_v58 = vadd.f32 %v9072_v20, %v9118_v53  ;;  %v1122_v20 = vrot.slane %v1120_v61, 7  ;;  %v1099_v53 = vshll.u32 %v9209_v63, 16  ;;  %v2897_v63 = vsel %vm9047_vm4, 0, %v2896_v11  ;;  %936 = vst [vmem:[#allocation2 + $0x70] sm:$0x1] %v935_v48 }
 0x1fd   :  { %2898 = vst [vmem:[#allocation3 + $0x30] sm:$0x1] %v2897_v63  ;;  %v984_v61 = vld [vmem:[#allocation2 + $0x74] sm:$0x1]  ;;  %v981_v11 = vld [vmem:[#allocation2 + $0x6c] sm:$0x1] }
 0x1fe   :  { %12076 = vst [vmem:[#allocation64_spill] sm:$0xff] %v9295_v58  ;;  %v9303_v32 = vmax.f32 %v9295_v58, 0.0  ;;  %v1126_v55 = vrot.slane %v1122_v20, 4  ;;  %v1125_v17 = vor.u32 %v1123_v59, %v1122_v20  ;;  %v1101_v19 = vor.u32 %v1099_v53, %v1098_v60  ;;  %v931_v60 = vld [vmem:[#allocation2 + $0x68] sm:$0x1] }
 0x1ff   :  { %v932_v62 = vsel %vm9054_vm5, 0, %v931_v60  ;;  %v985_v20 = vsel %vm9061_vm7, 0, %v984_v61  ;;  %v982_v63 = vsel %vm9061_vm7, 0, %v981_v11  ;;  %v978_v47 = vld [vmem:[#allocation2 + $0x64] sm:$0x1]  ;;  %v2961_v48 = vsel %vm9066_vm10, 0, %v2960_v46 }
 0x200   :  { %2984 = vrot.lane.b32.xlu1 %v1078_v24, %s8729_s25  ;;  %1197 = vrot.lane.b32.xlu0 %v1078_v24, %s8743_s13  ;;  %12077 = vst [vmem:[#allocation65_spill] sm:$0xff] %v9303_v32  ;;  %v7916_v16 = vpack.c.bf16 %v9303_v32, %v9303_v32  ;;  %v923_v24 = vsel %vm9054_vm5, 0, %v922_v12  ;;  %933 = vst [vmem:[#allocation2 + $0x68] sm:$0x1] %v932_v62  ;;  %v1136_v60 = vshrl.u32 %v7920_v35, 16  ;;  %v1139_v62 = vshll.u32 %v7920_v35, 16 }
 0x201   :  { %924 = vst [vmem:[#allocation2 + $0x40] sm:$0x1] %v923_v24  ;;  %986 = vst [vmem:[#allocation2 + $0x74] sm:$0x1] %v985_v20  ;;  %v3097_v32 = vld [vmem:[#allocation3 + $0x24] sm:$0x1] }
 0x202   :  { %v1104_v30 = vshrl.u32 %v7916_v16, 16  ;;  %v1107_v57 = vshll.u32 %v7916_v16, 16  ;;  %v2963_v16 = vld [vmem:[#allocation3 + $0x74] sm:$0x1]  ;;  %983 = vst [vmem:[#allocation2 + $0x6c] sm:$0x1] %v982_v63 }
 0x203   :  { %v2964_v12 = vsel %vm9066_vm10, 0, %v2963_v16  ;;  %2962 = vst [vmem:[#allocation3 + $0x6c] sm:$0x1] %v2961_v48  ;;  %v1138_v61 = vrot.slane %v1136_v60, 7  ;;  %v975_v63 = vld [vmem:[#allocation2 + $0x5c] sm:$0x1] }
 0x204   :  { %1215 = vrot.lane.b32.xlu1 %v1117_v49, %s8743_s13  ;;  %1217 = vrot.lane.b32.xlu0 %v1118_v38, %s8743_s13  ;;  %v1106_v44 = vrot.slane %v1104_v30, 7  ;;  %2965 = vst [vmem:[#allocation3 + $0x74] sm:$0x1] %v2964_v12  ;;  %v9363_v30 = vmax.f32 %v9141_v4, 0.0  ;;  %v2957_v12 = vld [vmem:[#allocation3 + $0x64] sm:$0x1] }
 0x205   :  { %v3082_v36 = vld [vmem:[#allocation3 + $0x10] sm:$0xf] }
 0x206   :  { %v1109_v53 = vor.u32 %v1107_v57, %v1106_v44  ;;  %12081 = vst [vmem:[#allocation69_spill] sm:$0xff] %v9363_v30 }
 0x208   :  { %1209 = vrot.lane.b32.xlu1 %v1102_v1, %s8743_s13  ;;  %3002 = vrot.lane.b32.xlu0 %v1117_v49, %s8729_s25  ;;  %v1110_v49 = vrot.slane %v1106_v44, 4 }
 0x20c   :  { %1221 = vrot.lane.b32.xlu1 %v1126_v55, %s8743_s13  ;;  %3004 = vrot.lane.b32.xlu0 %v1118_v38, %s8729_s25  ;;  %v9326_v38 = vmax.f32 %v9132_v0, 0.0  ;;  %v1298_v0 = vld [vmem:[#allocation2 + $0x14] sm:$0x1] }
 0x20e   :  { %12078 = vst [vmem:[#allocation66_spill] sm:$0xff] %v9326_v38  ;;  %v7921_v51 = vpack.c.bf16 %v9326_v38, %v9326_v38 }
 0x210   :  { %3006 = vrot.lane.b32.xlu1 %v1125_v17, %s8729_s25  ;;  %1207 = vrot.lane.b32.xlu0 %v1101_v19, %s8743_s13  ;;  %v1144_v59 = vshrl.u32 %v7921_v51, 16  ;;  %v1147_v6 = vshll.u32 %v7921_v51, 16  ;;  %v979_v51 = vsel %vm9061_vm7, 0, %v978_v47  ;;  %v9405_v47 = vmax.f32 %v9171_v37, 0.0 }
 0x211   :  { %980 = vst [vmem:[#allocation2 + $0x64] sm:$0x1] %v979_v51 }
 0x212   :  { %v1146_v8 = vrot.slane %v1144_v59, 7  ;;  %v9383_v59 = vmax.f32 %v9161_v28, 0.0  ;;  %12084 = vst [vmem:[#allocation72_spill] sm:$0xff] %v9405_v47 }
 0x214   :  { %3008 = vrot.lane.b32.xlu1 %v1126_v55, %s8729_s25  ;;  %2994 = vrot.lane.b32.xlu0 %v1101_v19, %s8729_s25  ;;  %v1152_v55 = vshrl.u32 %v7922_v52, 16  ;;  %v928_v19 = vld [vmem:[#allocation2 + $0x60] sm:$0x1]  ;;  %v1149_v45 = vor.u32 %v1147_v6, %v1146_v8  ;;  %v1150_v57 = vrot.slane %v1146_v8, 4  ;;  %12082 = vst [vmem:[#allocation70_spill] sm:$0xff] %v9383_v59  ;;  %v7925_v16 = vpack.c.bf16 %v9383_v59, %v9383_v59 }
 0x215   :  { %v929_v26 = vsel %vm9054_vm5, 0, %v928_v19  ;;  %v2958_v19 = vsel %vm9066_vm10, 0, %v2957_v12 }
 0x216   :  { %v1154_v7 = vrot.slane %v1152_v55, 7  ;;  %930 = vst [vmem:[#allocation2 + $0x60] sm:$0x1] %v929_v26  ;;  %v2908_v55 = vld [vmem:[#allocation3 + $0x60] sm:$0x1]  ;;  %v1142_v26 = vrot.slane %v1138_v61, 4 }
 0x217   :  { %v2909_v6 = vsel %vm9047_vm4, 0, %v2908_v55  ;;  %2959 = vst [vmem:[#allocation3 + $0x64] sm:$0x1] %v2958_v19 }
 0x218   :  { %1213 = vrot.lane.b32.xlu1 %v1110_v49, %s8743_s13  ;;  %2996 = vrot.lane.b32.xlu0 %v1102_v1, %s8729_s25  ;;  %v1155_v1 = vshll.u32 %v7922_v52, 16  ;;  %v7919_v52 = vpack.c.bf16 %v9363_v30, %v9363_v30  ;;  %2910 = vst [vmem:[#allocation3 + $0x60] sm:$0x1] %v2909_v6 }
 0x21a   :  { %v9367_v44 = vor.u32 %v1155_v1, %v1154_v7  ;;  %v1128_v20 = vshrl.u32 %v7919_v52, 16  ;;  %v1131_v11 = vshll.u32 %v7919_v52, 16  ;;  %v1179_v52 = vshll.u32 %v7925_v16, 16 }
 0x21c   :  { %2998 = vrot.lane.b32.xlu1 %v1109_v53, %s8729_s25  ;;  %1219 = vrot.lane.b32.xlu0 %v1125_v17, %s8743_s13  ;;  %v2911_v17 = vld [vmem:[#allocation3 + $0x68] sm:$0x1]  ;;  %v1130_v8 = vrot.slane %v1128_v20, 7 }
 0x21d   :  { %v2912_v24 = vsel %vm9047_vm4, 0, %v2911_v17  ;;  %v976_v17 = vsel %vm9061_vm7, 0, %v975_v63 }
 0x21e   :  { %2913 = vst [vmem:[#allocation3 + $0x68] sm:$0x1] %v2912_v24  ;;  %v9398_v24 = vmax.f32 %v9164_v29, 0.0  ;;  %v1133_v35 = vor.u32 %v1131_v11, %v1130_v8  ;;  %977 = vst [vmem:[#allocation2 + $0x5c] sm:$0x1] %v976_v17  ;;  %v1134_v48 = vrot.slane %v1130_v8, 4 }
 0x21f   :  { %v2954_v8 = vld [vmem:[#allocation3 + $0x5c] sm:$0x1]  ;;  %v2917_v17 = vld [vmem:[#allocation3 + $0x78] sm:$0x1] }
 0x220   :  { %3000 = vrot.lane.b32.xlu1 %v1110_v49, %s8729_s25  ;;  %1211 = vrot.lane.b32.xlu0 %v1109_v53, %s8743_s13  ;;  %v1158_v49 = vrot.slane %v1154_v7, 4  ;;  %v925_v53 = vld [vmem:[#allocation2 + $0x58] sm:$0x1]  ;;  %v1141_v7 = vor.u32 %v1139_v62, %v1138_v61  ;;  %12083 = vst [vmem:[#allocation71_spill] sm:$0xff] %v9398_v24  ;;  %v7923_v46 = vpack.c.bf16 %v9398_v24, %v9398_v24  ;;  %v2955_v12 = vsel %vm9066_vm10, 0, %v2954_v8 }
 0x221   :  { %v926_v1 = vsel %vm9054_vm5, 0, %v925_v53  ;;  %v7926_v62 = vpack.c.bf16 %v9405_v47, %v9405_v47  ;;  %2956 = vst [vmem:[#allocation3 + $0x5c] sm:$0x1] %v2955_v12  ;;  %v2918_v19 = vsel %vm9047_vm4, 0, %v2917_v17  ;;  %v1301_v12 = vld [vmem:[#allocation2 + $0x18] sm:$0xf] }
 0x222   :  { %927 = vst [vmem:[#allocation2 + $0x58] sm:$0x1] %v926_v1  ;;  %v1160_v20 = vshrl.u32 %v7923_v46, 16  ;;  %v1163_v1 = vshll.u32 %v7923_v46, 16  ;;  %2919 = vst [vmem:[#allocation3 + $0x78] sm:$0x1] %v2918_v19 }
 0x223   :  { %v1184_v6 = vshrl.u32 %v7926_v62, 16  ;;  %v1187_v63 = vshll.u32 %v7926_v62, 16 }
 0x224   :  { %1235 = vrot.lane.b32.xlu1 %v9367_v44, %s8743_s13  ;;  %1231 = vrot.lane.b32.xlu0 %v1149_v45, %s8743_s13  ;;  %v9417_v55 = vrot.slane %v1160_v20, 7 }
 0x226   :  { %v1165_v11 = vor.u32 %v1163_v1, %v9417_v55 }
 0x228   :  { %1237 = vrot.lane.b32.xlu1 %v1158_v49, %s8743_s13  ;;  %1233 = vrot.lane.b32.xlu0 %v1150_v57, %s8743_s13 }
 0x22c   :  { %3024 = vrot.lane.b32.xlu1 %v1158_v49, %s8729_s25  ;;  %3018 = vrot.lane.b32.xlu0 %v1149_v45, %s8729_s25  ;;  %v1176_v45 = vshrl.u32 %v7925_v16, 16  ;;  %v2905_v49 = vld [vmem:[#allocation3 + $0x58] sm:$0x1]  ;;  %v9425_v16 = vrot.slane %v1184_v6, 7  ;;  %v2361_v6 = vld [vmem:[#allocation2 + $0x48] sm:$0xf] }
 0x22d   :  { %v2906_v60 = vsel %vm9047_vm4, 0, %v2905_v49 }
 0x22e   :  { %v1178_v51 = vrot.slane %v1176_v45, 7  ;;  %2907 = vst [vmem:[#allocation3 + $0x58] sm:$0x1] %v2906_v60  ;;  %v1189_v46 = vor.u32 %v1187_v63, %v9425_v16  ;;  %v943_v60 = vld [vmem:[#allocation2 + $0x88] sm:$0x1] }
 0x22f   :  { %v944_v62 = vsel %vm9054_vm5, 0, %v943_v60  ;;  %v3088_v63 = vld [vmem:[#allocation3 + $0x18] sm:$0xf] }
 0x230   :  { %1227 = vrot.lane.b32.xlu1 %v1141_v7, %s8743_s13  ;;  %3020 = vrot.lane.b32.xlu0 %v1150_v57, %s8729_s25  ;;  %v2923_v57 = vld [vmem:[#allocation3 + $0x88] sm:$0x1]  ;;  %v1181_v53 = vor.u32 %v1179_v52, %v1178_v51  ;;  %v1182_v49 = vrot.slane %v1178_v51, 4  ;;  %945 = vst [vmem:[#allocation2 + $0x88] sm:$0x1] %v944_v62 }
 0x231   :  { %v2924_v61 = vsel %vm9047_vm4, 0, %v2923_v57  ;;  %v3172_v51 = vld [vmem:[#allocation3] sm:$0xf] }
 0x232   :  { %2925 = vst [vmem:[#allocation3 + $0x88] sm:$0x1] %v2924_v61  ;;  %v996_v61 = vld [vmem:[#allocation2 + $0x94] sm:$0x1]  ;;  %v3205_v17 = vshrl.u32 %v3172_v51, 16  ;;  %v3208_v19 = vshll.u32 %v3172_v51, 16 }
 0x233   :  { %v997_v20 = vsel %vm9061_vm7, 0, %v996_v61  ;;  %v1166_v61 = vrot.slane %v9417_v55, 4 }
 0x234   :  { %1229 = vrot.lane.b32.xlu1 %v1142_v26, %s8743_s13  ;;  %1223 = vrot.lane.b32.xlu0 %v1133_v35, %s8743_s13  ;;  %998 = vst [vmem:[#allocation2 + $0x94] sm:$0x1] %v997_v20  ;;  %v1304_v20 = vld [vmem:[#allocation2 + $0x1c] sm:$0x1]  ;;  %v3210_v51 = vrot.slane %v3208_v19, 5 }
 0x238   :  { %3014 = vrot.lane.b32.xlu1 %v1141_v7, %s8729_s25  ;;  %1225 = vrot.lane.b32.xlu0 %v1134_v48, %s8743_s13  ;;  %v9422_v7 = vmax.f32 %v9182_v42, 0.0  ;;  %v1325_v42 = vld [vmem:[#allocation2 + $0x38] sm:$0xf] }
 0x23a   :  { %12085 = vst [vmem:[#allocation73_spill] sm:$0xff] %v9422_v7  ;;  %v7924_v45 = vpack.c.bf16 %v9422_v7, %v9422_v7 }
 0x23c   :  { %3016 = vrot.lane.b32.xlu1 %v1142_v26, %s8729_s25  ;;  %3010 = vrot.lane.b32.xlu0 %v1133_v35, %s8729_s25  ;;  %v2914_v26 = vld [vmem:[#allocation3 + $0x70] sm:$0x1]  ;;  %v1168_v57 = vshrl.u32 %v7924_v45, 16 }
 0x23d   :  { %v946_v35 = vld [vmem:[#allocation2 + $0x90] sm:$0x1] }
 0x23e   :  { %v947_v52 = vsel %vm9054_vm5, 0, %v946_v35  ;;  %v9452_v1 = vrot.slane %v1168_v57, 7  ;;  %v2481_v35 = vshll.u32 %v2361_v6, 16 }
 0x23f   :  { %948 = vst [vmem:[#allocation2 + $0x90] sm:$0x1] %v947_v52 }
 0x240   :  { %3034 = vrot.lane.b32.xlu1 %v1181_v53, %s8729_s25  ;;  %3012 = vrot.lane.b32.xlu0 %v1134_v48, %s8729_s25  ;;  %v2915_v48 = vsel %vm9047_vm4, 0, %v2914_v26  ;;  %v2478_v26 = vshrl.u32 %v2361_v6, 16  ;;  %v1174_v60 = vrot.slane %v9452_v1, 4  ;;  %v3188_v6 = vld [vmem:[#allocation3 + $0x4] sm:$0x1] }
 0x241   :  { %2916 = vst [vmem:[#allocation3 + $0x70] sm:$0x1] %v2915_v48  ;;  %v2926_v48 = vld [vmem:[#allocation3 + $0x90] sm:$0x1] }
 0x242   :  { %v2927_v52 = vsel %vm9047_vm4, 0, %v2926_v48  ;;  %v2480_v55 = vrot.slane %v2478_v26, 4  ;;  %v2362_v48 = vld [vmem:[#allocation2 + $0x4c] sm:$0x1] }
 0x243   :  { %2928 = vst [vmem:[#allocation3 + $0x90] sm:$0x1] %v2927_v52  ;;  %v1292_v26 = vld [vmem:[#allocation2 + $0xc] sm:$0x1] }
 0x244   :  { %3026 = vrot.lane.b32.xlu1 %v1165_v11, %s8729_s25  ;;  %3022 = vrot.lane.b32.xlu0 %v9367_v44, %s8729_s25  ;;  %v1190_v44 = vrot.slane %v9425_v16, 4 }
 0x248   :  { %1251 = vrot.lane.b32.xlu1 %v1189_v46, %s8743_s13  ;;  %1247 = vrot.lane.b32.xlu0 %v1181_v53, %s8743_s13  ;;  %v1171_v53 = vshll.u32 %v7924_v45, 16  ;;  %v993_v45 = vld [vmem:[#allocation2 + $0x8c] sm:$0x1] }
 0x24a   :  { %v1173_v8 = vor.u32 %v1171_v53, %v9452_v1  ;;  %v3207_v53 = vrot.slane %v3205_v17, 4  ;;  %v3091_v1 = vld [vmem:[#allocation3 + $0x1c] sm:$0x1]  ;;  %v3428_v17 = vld [vmem:[#allocation3] sm:$0xe] }
 0x24b   :  { %v7653_v25 = vrot.slane %v3428_v17, 9 }
 0x24c   :  { %1253 = vrot.lane.b32.xlu1 %v1190_v44, %s8743_s13  ;;  %1249 = vrot.lane.b32.xlu0 %v1182_v49, %s8743_s13  ;;  %v3211_v19 = vor.u32 %v3210_v51, %v3207_v53 }
 0x250   :  { %3038 = vrot.lane.b32.xlu1 %v1189_v46, %s8729_s25  ;;  %3036 = vrot.lane.b32.xlu0 %v1182_v49, %s8729_s25  ;;  %v994_v46 = vsel %vm9061_vm7, 0, %v993_v45  ;;  %v2483_v45 = vrot.slane %v2481_v35, 5  ;;  %v1289_v35 = vld [vmem:[#allocation2 + $0x8] sm:$0xf] }
 0x251   :  { %995 = vst [vmem:[#allocation2 + $0x8c] sm:$0x1] %v994_v46 }
 0x254   :  { %1243 = vrot.lane.b32.xlu1 %v1173_v8, %s8743_s13  ;;  %1239 = vrot.lane.b32.xlu0 %v1165_v11, %s8743_s13 }
 0x256   :  { %v2987_v49 = vpop.permute.xlu0 %2986  ;;  %v1200_v57 = vpop.permute.xlu1 %1199 }
 0x257   :  { %v3089_v11 = vsel %vm9082_vm12, %v2987_v49, %v3088_v63  ;;  %v1302_v62 = vsel %vm9075_vm11, %v1200_v57, %v1301_v12  ;;  %v3214_v49 = vshll.u32 %v3188_v6, 16  ;;  %v2484_v57 = vor.u32 %v2483_v45, %v2480_v55 }
 0x258   :  { %3090 = vst [vmem:[#allocation3 + $0x18] sm:$0xf] %v3089_v11  ;;  %1303 = vst [vmem:[#allocation2 + $0x18] sm:$0xf] %v1302_v62  ;;  %1245 = vrot.lane.b32.xlu1 %v1174_v60, %s8743_s13  ;;  %1241 = vrot.lane.b32.xlu0 %v1166_v61, %s8743_s13  ;;  %v2487_v11 = vshll.u32 %v2362_v48, 16  ;;  %v9485_v55 = vrot.slane %v3211_v19, 4 }
 0x259   :  { %v9487_v45 = vrot.slane %v3214_v49, 5 }
 0x25a   :  { %v2989_v46 = vpop.permute.xlu0 %2988  ;;  %v1202_v52 = vpop.permute.xlu1 %1201 }
 0x25b   :  { %v3092_v63 = vsel %vm9047_vm4, %v2989_v46, %v3091_v1  ;;  %v1305_v12 = vsel %vm9054_vm5, %v1202_v52, %v1304_v20  ;;  %v1307_v46 = vld [vmem:[#allocation2 + $0x20] sm:$0xf]  ;;  %v3478_v20 = vrot.slane %v3188_v6, 5  ;;  %v3076_v6 = vld [vmem:[#allocation3 + $0x8] sm:$0xf] }
 0x25c   :  { %3093 = vst [vmem:[#allocation3 + $0x1c] sm:$0x1] %v3092_v63  ;;  %1306 = vst [vmem:[#allocation2 + $0x1c] sm:$0x1] %v1305_v12  ;;  %3030 = vrot.lane.b32.xlu1 %v1173_v8, %s8729_s25  ;;  %3028 = vrot.lane.b32.xlu0 %v1166_v61, %s8729_s25  ;;  %v9495_v63 = vrot.slane %v2484_v57, 4  ;;  %v9497_v12 = vrot.slane %v2487_v11, 5 }
 0x25d   :  { %v9507_v57 = vsel %vm9501_vm2, %v7653_v25, %v3478_v20 }
 0x25e   :  { %v1194_v62 = vpop.permute.xlu1 %1193  ;;  %v1192_v1 = vpop.permute.xlu0 %1191 }
 0x25f   :  { %v1293_v53 = vsel %vm9054_vm5, %v1194_v62, %v1292_v26  ;;  %v1290_v8 = vsel %vm9075_vm11, %v1192_v1, %v1289_v35  ;;  %v9481_v61 = vld [vmem:[#allocation3 + $0x18] sm:$0xf]  ;;  %v3079_v26 = vld [vmem:[#allocation3 + $0xc] sm:$0x1] }
 0x260   :  { %v9483_v51 = vld [vmem:[#allocation3 + $0x18] sm:$0xf]  ;;  %1294 = vst [vmem:[#allocation2 + $0xc] sm:$0x1] %v1293_v53  ;;  %1291 = vst [vmem:[#allocation2 + $0x8] sm:$0xf] %v1290_v8  ;;  %3032 = vrot.lane.b32.xlu1 %v1174_v60, %s8729_s25  ;;  %3040 = vrot.lane.b32.xlu0 %v1190_v44, %s8729_s25 }
 0x261   :  { %v3601_v48 = vshrl.u32 %v9481_v61, 16  ;;  %v3604_v52 = vshll.u32 %v9481_v61, 16  ;;  %v1646_v60 = vld [vmem:[#allocation2 + $0x18] sm:$0xe]  ;;  %v3094_v44 = vld [vmem:[#allocation3 + $0x20] sm:$0xf] }
 0x262   :  { %v1387_v19 = vld [vmem:[#allocation2 + $0x18] sm:$0xf]  ;;  %v1204_v49 = vpop.permute.xlu1 %1203  ;;  %v2979_v16 = vpop.permute.xlu0 %2978  ;;  %v3956_v11 = vshrl.u32 %v9483_v51, 16  ;;  %v7569_v7 = vrot.slane %v1646_v60, 9  ;;  %v3959_v40 = vshll.u32 %v9483_v51, 16 }
 0x263   :  { %v3603_v35 = vrot.slane %v3601_v48, 4  ;;  %v3606_v62 = vrot.slane %v3604_v52, 5  ;;  %v3798_v1 = vld [vmem:[#allocation3 + $0x18] sm:$0xe]  ;;  %v1308_v8 = vsel %vm9075_vm11, %v1204_v49, %v1307_v46  ;;  %v3077_v48 = vsel %vm9082_vm12, %v2979_v16, %v3076_v6  ;;  %v1403_v52 = vld [vmem:[#allocation2 + $0x1c] sm:$0x1] }
 0x264   :  { %v3558_v47 = vld [vmem:[#allocation3 + $0x1c] sm:$0x1]  ;;  %v1449_v20 = vshrl.u32 %v1387_v19, 16  ;;  %1309 = vst [vmem:[#allocation2 + $0x20] sm:$0xf] %v1308_v8  ;;  %v1452_v59 = vshll.u32 %v1387_v19, 16 }
 0x265   :  { %3078 = vst [vmem:[#allocation3 + $0x8] sm:$0xf] %v3077_v48  ;;  %v9525_v5 = vld [vmem:[#allocation3 + $0x1c] sm:$0x1]  ;;  %v7671_v6 = vrot.slane %v3798_v1, 9  ;;  %v3607_v16 = vor.u32 %v3606_v62, %v3603_v35  ;;  %v3610_v54 = vshll.u32 %v3558_v47, 16 }
 0x266   :  { %v1451_v49 = vrot.slane %v1449_v20, 4  ;;  %v2991_v24 = vpop.permute.xlu1 %2990  ;;  %v2981_v25 = vpop.permute.xlu0 %2980  ;;  %v1310_v8 = vld [vmem:[#allocation2 + $0x24] sm:$0x1]  ;;  %v1458_v48 = vshll.u32 %v1403_v52, 16  ;;  %v1705_v60 = vrot.slane %v1403_v52, 5  ;;  %v9531_v38 = vrot.slane %v3956_v11, 4 }
 0x267   :  { %v3431_v43 = vld [vmem:[#allocation3 + $0x18] sm:$0xe]  ;;  %v1454_v30 = vrot.slane %v1452_v59, 5  ;;  %v3095_v19 = vsel %vm9082_vm12, %v2991_v24, %v3094_v44  ;;  %v3080_v46 = vsel %vm9047_vm4, %v2981_v25, %v3079_v26  ;;  %v1401_v1 = vld [vmem:[#allocation2 + $0xc] sm:$0x1]  ;;  %v3854_v35 = vrot.slane %v3558_v47, 5 }
 0x268   :  { %v1644_v20 = vld [vmem:[#allocation2 + $0x8] sm:$0xe]  ;;  %v3490_v62 = vrot.slane %v9525_v5, 5  ;;  %3096 = vst [vmem:[#allocation3 + $0x20] sm:$0xf] %v3095_v19  ;;  %v1430_v2 = vshll.u32 %v1401_v1, 16 }
 0x269   :  { %3081 = vst [vmem:[#allocation3 + $0xc] sm:$0x1] %v3080_v46  ;;  %v7567_v22 = vrot.slane %v1644_v20, 9  ;;  %v1697_v52 = vrot.slane %v1401_v1, 5  ;;  %v1455_v11 = vor.u32 %v1454_v30, %v1451_v49  ;;  %v9538_v50 = vld [vmem:[#allocation2 + $0x8] sm:$0xf]  ;;  %v9550_v46 = vsel %vm9501_vm2, %v7569_v7, %v1705_v60 }
 0x26a   :  { %v9540_v59 = vrot.slane %v3959_v40, 5  ;;  %v7656_v33 = vrot.slane %v3431_v43, 9  ;;  %v9542_v24 = vrot.slane %v3607_v16, 4  ;;  %v9544_v44 = vrot.slane %v3610_v54, 5  ;;  %v9546_v26 = vld [vmem:[#allocation2 + $0x18] sm:$0xf]  ;;  %v2993_v47 = vpop.permute.xlu1 %2992  ;;  %v1206_v25 = vpop.permute.xlu0 %1205 }
 0x26b   :  { %v1295_v19 = vld [vmem:[#allocation2 + $0x10] sm:$0xf]  ;;  %v9552_v30 = vrot.slane %v1458_v48, 5  ;;  %v1421_v40 = vshrl.u32 %v9538_v50, 16  ;;  %v3098_v54 = vsel %vm9047_vm4, %v2993_v47, %v3097_v32  ;;  %v1311_v49 = vsel %vm9054_vm5, %v1206_v25, %v1310_v8  ;;  %v9560_v1 = vld [vmem:[#allocation2 + $0x20] sm:$0xe] }
 0x26c   :  { %v3429_v16 = vld [vmem:[#allocation3 + $0x8] sm:$0xe]  ;;  %v9566_v7 = vsel %vm9501_vm2, %v7671_v6, %v3854_v35  ;;  %v9570_v48 = vsel %vm9501_vm2, %v7656_v33, %v3490_v62  ;;  %3099 = vst [vmem:[#allocation3 + $0x24] sm:$0x1] %v3098_v54  ;;  %1312 = vst [vmem:[#allocation2 + $0x24] sm:$0x1] %v1311_v49  ;;  %v9574_v32 = vsel %vm9501_vm2, %v7567_v22, %v1697_v52 }
 0x26d   :  { %v9562_v20 = vld [vmem:[#allocation3 + $0x8] sm:$0xf]  ;;  %v9578_v60 = vrot.slane %v1455_v11, 4  ;;  %v9580_v47 = vrot.slane %v1430_v2, 5  ;;  %v7654_v6 = vrot.slane %v3429_v16, 9  ;;  %v7570_v2 = vrot.slane %v9560_v1, 9 }
 0x26e   :  { %v9576_v8 = vld [vmem:[#allocation3 + $0x8] sm:$0xe]  ;;  %v2983_v52 = vpop.permute.xlu1 %2982  ;;  %v1196_v54 = vpop.permute.xlu0 %1195  ;;  %v3085_v11 = vld [vmem:[#allocation3 + $0x14] sm:$0x1]  ;;  %v3573_v49 = vshrl.u32 %v9562_v20, 16  ;;  %v3576_v28 = vshll.u32 %v9562_v20, 16 }
 0x26f   :  { %v3173_v35 = vld [vmem:[#allocation3 + $0x8] sm:$0xf]  ;;  %v3083_v43 = vsel %vm9082_vm12, %v2983_v52, %v3082_v36  ;;  %v1296_v33 = vsel %vm9075_vm11, %v1196_v54, %v1295_v19  ;;  %v3543_v37 = vld [vmem:[#allocation3 + $0x20] sm:$0xf]  ;;  %v7669_v22 = vrot.slane %v9576_v8, 9 }
 0x270   :  { %v3219_v25 = vshrl.u32 %v3173_v35, 16  ;;  %v3222_v16 = vshll.u32 %v3173_v35, 16  ;;  %v3189_v62 = vld [vmem:[#allocation3 + $0xc] sm:$0x1]  ;;  %3084 = vst [vmem:[#allocation3 + $0x10] sm:$0xf] %v3083_v43  ;;  %v7726_v1 = vcombine.low %v9481_v61, %v3543_v37 }
 0x271   :  { %1297 = vst [vmem:[#allocation2 + $0x10] sm:$0xf] %v1296_v33  ;;  %v3615_v29 = vshrl.u32 %v3543_v37, 16  ;;  %v3482_v41 = vrot.slane %v3189_v62, 5  ;;  %v9599_v35 = vld [vmem:[#allocation3 + $0xc] sm:$0x1] }
 0x272   :  { %v3618_v19 = vshll.u32 %v3543_v37, 16  ;;  %v3799_v52 = vld [vmem:[#allocation3 + $0x20] sm:$0xe]  ;;  %v3846_v54 = vrot.slane %v9599_v35, 5  ;;  %v3221_v4 = vrot.slane %v3219_v25, 4  ;;  %v3224_v8 = vrot.slane %v3222_v16, 5  ;;  %4439 = vrot.lane.b32.xlu1 %v7726_v1, %s8745_s8  ;;  %v2985_v61 = vpop.permute.xlu1 %2984  ;;  %v1198_v43 = vpop.permute.xlu0 %1197 }
 0x273   :  { %v3483_v33 = vsel %vm9501_vm2, %v7654_v6, %v3482_v41  ;;  %v9609_v58 = vrot.slane %v3573_v49, 4  ;;  %v3228_v10 = vshll.u32 %v3189_v62, 16  ;;  %v9611_v34 = vld [vmem:[#allocation2 + $0x20] sm:$0xf]  ;;  %v9613_v37 = vrot.slane %v1421_v40, 4 }
 0x274   :  { %v3086_v25 = vsel %vm9047_vm4, %v2985_v61, %v3085_v11  ;;  %v1299_v16 = vsel %vm9054_vm5, %v1198_v43, %v1298_v0  ;;  %v7717_v1 = vcombine.low %v9507_v57, %v3483_v33  ;;  %v1404_v36 = vld [vmem:[#allocation2 + $0x24] sm:$0x1]  ;;  %v9620_v14 = vrot.slane %v3576_v28, 5  ;;  %v1328_v6 = vld [vmem:[#allocation2 + $0x3c] sm:$0x1] }
 0x275   :  { %v9622_v41 = vld [vmem:[#allocation3 + $0x24] sm:$0x1]  ;;  %3087 = vst [vmem:[#allocation3 + $0x14] sm:$0x1] %v3086_v25  ;;  %1300 = vst [vmem:[#allocation2 + $0x14] sm:$0x1] %v1299_v16  ;;  %v3225_v56 = vor.u32 %v3224_v8, %v3221_v4  ;;  %v9632_v28 = vsel %vm9501_vm2, %v7669_v22, %v3846_v54 }
 0x276   :  { %v1709_v62 = vrot.slane %v1404_v36, 5  ;;  %v7672_v49 = vrot.slane %v3799_v52, 9  ;;  %v3858_v40 = vrot.slane %v9622_v41, 5  ;;  %v9625_v3 = vrot.slane %v3615_v29, 4  ;;  %4381 = vrot.lane.b32.xlu0 %v7717_v1, %s8743_s13  ;;  %v1216_v57 = vpop.permute.xlu1 %1215  ;;  %v1218_v61 = vpop.permute.xlu0 %1217  ;;  %v1316_v52 = vld [vmem:[#allocation2 + $0x2c] sm:$0x1] }
 0x277   :  { %v9627_v11 = vrot.slane %v3618_v19, 5  ;;  %v1472_v0 = vshll.u32 %v1404_v36, 16  ;;  %v3112_v33 = vld [vmem:[#allocation3 + $0x38] sm:$0xf]  ;;  %v9636_v25 = vrot.slane %v3225_v56, 4  ;;  %v9638_v4 = vrot.slane %v3228_v10, 5 }
 0x278   :  { %v1710_v43 = vsel %vm9501_vm2, %v7570_v2, %v1709_v62  ;;  %v1463_v29 = vshrl.u32 %v9611_v34, 16  ;;  %v9641_v19 = vld [vmem:[#allocation3 + $0x20] sm:$0xf]  ;;  %v1326_v36 = vsel %vm9075_vm11, %v1216_v57, %v1325_v42  ;;  %v1329_v22 = vsel %vm9054_vm5, %v1218_v61, %v1328_v6  ;;  %v3541_v8 = vld [vmem:[#allocation3 + $0x10] sm:$0xf] }
 0x279   :  { %v7600_v54 = vcombine.low %v9550_v46, %v1710_v43  ;;  %v3909_v2 = vld [vmem:[#allocation3 + $0x10] sm:$0xf]  ;;  %v9650_v56 = vsel %vm9501_vm2, %v7672_v49, %v3858_v40  ;;  %1327 = vst [vmem:[#allocation2 + $0x38] sm:$0xf] %v1326_v36  ;;  %1330 = vst [vmem:[#allocation2 + $0x3c] sm:$0x1] %v1329_v22  ;;  %v7725_v62 = vcombine.low %v9562_v20, %v3541_v8 }
 0x27a   :  { %v1645_v16 = vld [vmem:[#allocation2 + $0x10] sm:$0xe]  ;;  %v3587_v10 = vshrl.u32 %v3541_v8, 16  ;;  %v3590_v1 = vshll.u32 %v3541_v8, 16  ;;  %v3942_v39 = vshrl.u32 %v3909_v2, 16  ;;  %v3945_v6 = vshll.u32 %v3909_v2, 16  ;;  %v1210_v43 = vpop.permute.xlu1 %1209  ;;  %v3003_v49 = vpop.permute.xlu0 %3002 }
 0x27b   :  { %v3797_v42 = vld [vmem:[#allocation3 + $0x10] sm:$0xe]  ;;  %1865 = vrot.lane.b32.xlu0 %v7600_v54, %s8729_s25  ;;  %v1466_v46 = vshll.u32 %v9611_v34, 16  ;;  %v9655_v57 = vrot.slane %v1472_v0, 5  ;;  %v3970_v61 = vshrl.u32 %v9641_v19, 16  ;;  %4437 = vrot.lane.b32.xlu1 %v7725_v62, %s8745_s8  ;;  %v7749_v36 = vcombine.low %v3909_v2, %v9483_v51 }
 0x27c   :  { %v1334_v40 = vld [vmem:[#allocation2 + $0x44] sm:$0x1]  ;;  %v3115_v22 = vld [vmem:[#allocation3 + $0x3c] sm:$0x1]  ;;  %v7568_v20 = vrot.slane %v1645_v16, 9  ;;  %v7742_v8 = vcombine.low %v9566_v7, %v9650_v56  ;;  %v7670_v54 = vrot.slane %v3797_v42, 9  ;;  %v1317_v34 = vsel %vm9054_vm5, %v1210_v43, %v1316_v52 }
 0x27d   :  { %v3430_v27 = vld [vmem:[#allocation3 + $0x10] sm:$0xe]  ;;  %v9664_v0 = vrot.slane %v3587_v10, 4  ;;  %v9666_v31 = vrot.slane %v3590_v1, 5  ;;  %v3113_v62 = vsel %vm9082_vm12, %v3003_v49, %v3112_v33  ;;  %v9670_v15 = vld [vmem:[#allocation2 + $0x14] sm:$0x1]  ;;  %v3231_v52 = vsel %vm9512_vm3, %v9636_v25, %v9638_v4 }
 0x27e   :  { %v9672_v51 = vld [vmem:[#allocation3 + $0x14] sm:$0x1]  ;;  %1318 = vst [vmem:[#allocation2 + $0x2c] sm:$0x1] %v1317_v34  ;;  %3114 = vst [vmem:[#allocation3 + $0x38] sm:$0xf] %v3113_v62  ;;  %v1222_v43 = vpop.permute.xlu1 %1221  ;;  %v3621_v4 = vor.u32 %v9627_v11, %v9625_v3  ;;  %v12090_v3 = vsel %vm9512_vm3, %v9485_v55, %v9487_v45 }
 0x27f   :  { %v9674_v2 = vrot.slane %v3942_v39, 4  ;;  %v1701_v7 = vrot.slane %v9670_v15, 5  ;;  %v3850_v16 = vrot.slane %v9672_v51, 5  ;;  %v9682_v56 = vld [vmem:[#allocation3 + $0x14] sm:$0x1]  ;;  %v9684_v33 = vrot.slane %v3945_v6, 5  ;;  %4573 = vrot.lane.b32.xlu1 %v7749_v36, %s8746_s7  ;;  %v3005_v39 = vpop.permute.xlu0 %3004 }
 0x280   :  { %v3486_v10 = vrot.slane %v9682_v56, 5  ;;  %v1465_v1 = vrot.slane %v1463_v29, 4  ;;  %v1468_v42 = vrot.slane %v1466_v46, 5  ;;  %v3973_v25 = vshll.u32 %v9641_v19, 16  ;;  %v1386_v62 = vld [vmem:[#allocation2 + $0x10] sm:$0xf] }
 0x281   :  { %v1702_v49 = vsel %vm9501_vm2, %v7568_v20, %v1701_v7  ;;  %v3851_v34 = vsel %vm9501_vm2, %v7670_v54, %v3850_v16  ;;  %v1335_v29 = vsel %vm9054_vm5, %v1222_v43, %v1334_v40  ;;  %v3116_v6 = vsel %vm9047_vm4, %v3005_v39, %v3115_v22  ;;  %v3118_v54 = vld [vmem:[#allocation3 + $0x40] sm:$0xf]  ;;  %v1313_v7 = vld [vmem:[#allocation2 + $0x28] sm:$0xf]  ;;  %v3121_v45 = vld [vmem:[#allocation3 + $0x44] sm:$0x1] }
 0x282   :  { %v7599_v46 = vcombine.low %v9574_v32, %v1702_v49  ;;  %v7655_v36 = vrot.slane %v3430_v27, 9  ;;  %1336 = vst [vmem:[#allocation2 + $0x44] sm:$0x1] %v1335_v29  ;;  %3117 = vst [vmem:[#allocation3 + $0x3c] sm:$0x1] %v3116_v6  ;;  %v1444_v20 = vshll.u32 %v9670_v15, 16  ;;  %v7709_v11 = vcombine.low %v12090_v3, %v3231_v52  ;;  %v3007_v39 = vpop.permute.xlu1 %3006 }
 0x283   :  { %v1469_v40 = vor.u32 %v1468_v42, %v1465_v1  ;;  %v9706_v16 = vrot.slane %v3970_v61, 4  ;;  %v7741_v27 = vcombine.low %v9632_v28, %v3851_v34  ;;  %v3624_v15 = vshll.u32 %v9622_v41, 16  ;;  %4519 = vrot.lane.b32.xlu1 %v7742_v8, %s8747_s28  ;;  %v1208_v55 = vpop.permute.xlu0 %1207  ;;  %v2347_v28 = vld [vmem:[#allocation2 + $0x10] sm:$0xf] }
 0x284   :  { %1863 = vrot.lane.b32.xlu0 %v7599_v46, %s8729_s25  ;;  %v3487_v32 = vsel %vm9501_vm2, %v7655_v36, %v3486_v10  ;;  %v12091_v22 = vshll.u32 %v9538_v50, 16  ;;  %v9716_v52 = vrot.slane %v3973_v25, 5  ;;  %v3622_v1 = vrot.slane %v3621_v4, 4  ;;  %v3100_v25 = vld [vmem:[#allocation3 + $0x28] sm:$0xf] }
 0x285   :  { %v1470_v61 = vrot.slane %v1469_v40, 4  ;;  %v1435_v42 = vshrl.u32 %v1386_v62, 16  ;;  %v3119_v10 = vsel %vm9082_vm12, %v3007_v39, %v3118_v54  ;;  %v1314_v41 = vsel %vm9075_vm11, %v1208_v55, %v1313_v7  ;;  %v9722_v50 = vld [vmem:[#allocation3 + $0x38] sm:$0xf]  ;;  %v2348_v39 = vld [vmem:[#allocation2 + $0x14] sm:$0x1] }
 0x286   :  { %v1426_v43 = vrot.slane %v12091_v22, 5  ;;  %v3626_v49 = vrot.slane %v3624_v15, 5  ;;  %v9724_v34 = vld [vmem:[#allocation3 + $0x38] sm:$0xf]  ;;  %3120 = vst [vmem:[#allocation3 + $0x40] sm:$0xf] %v3119_v10  ;;  %v7718_v36 = vcombine.low %v3487_v32, %v9570_v48  ;;  %v3009_v3 = vpop.permute.xlu1 %3008 }
 0x287   :  { %1315 = vst [vmem:[#allocation2 + $0x28] sm:$0xf] %v1314_v41  ;;  %v3657_v4 = vshrl.u32 %v9722_v50, 16  ;;  %v1475_v29 = vsel %vm9512_vm3, %v1470_v61, %v9655_v57  ;;  %v4012_v6 = vshrl.u32 %v9724_v34, 16  ;;  %v1438_v46 = vshll.u32 %v1386_v62, 16  ;;  %4341 = vrot.lane.b32.xlu1 %v7709_v11, %s8748_s17  ;;  %v2995_v40 = vpop.permute.xlu0 %2994 }
 0x288   :  { %v1427_v8 = vor.u32 %v1426_v43, %v9613_v37  ;;  %4517 = vrot.lane.b32.xlu0 %v7741_v27, %s8747_s28  ;;  %v4015_v54 = vshll.u32 %v9724_v34, 16  ;;  %v9735_v7 = vrot.slane %v1444_v20, 5  ;;  %v2380_v37 = vshrl.u32 %v2347_v28, 16  ;;  %v1322_v15 = vld [vmem:[#allocation2 + $0x34] sm:$0x1] }
 0x289   :  { %v3660_v57 = vshll.u32 %v9722_v50, 16  ;;  %v12092_v62 = vsel %vm9512_vm3, %v9578_v60, %v9552_v30  ;;  %v3627_v48 = vsel %vm9512_vm3, %v3622_v1, %v3626_v49  ;;  %v4014_v20 = vrot.slane %v4012_v6, 4  ;;  %v2350_v55 = vld [vmem:[#allocation2 + $0x1c] sm:$0x1]  ;;  %v3103_v30 = vld [vmem:[#allocation3 + $0x2c] sm:$0x1] }
 0x28a   :  { %v9744_v27 = vcombine.low %v12092_v62, %v1475_v29  ;;  %v3122_v32 = vsel %vm9047_vm4, %v3009_v3, %v3121_v45  ;;  %v3101_v11 = vsel %vm9082_vm12, %v2995_v40, %v3100_v25  ;;  %v4017_v22 = vrot.slane %v4015_v54, 5  ;;  %v1214_v6 = vpop.permute.xlu1 %1213 }
 0x28b   :  { %v9752_v43 = vrot.slane %v1427_v8, 4  ;;  %3123 = vst [vmem:[#allocation3 + $0x44] sm:$0x1] %v3122_v32  ;;  %3102 = vst [vmem:[#allocation3 + $0x28] sm:$0xf] %v3101_v11  ;;  %v9754_v60 = vrot.slane %v3657_v4, 4  ;;  %v2997_v54 = vpop.permute.xlu0 %2996 }
 0x28c   :  { %v1437_v61 = vrot.slane %v1435_v42, 4  ;;  %v1440_v10 = vrot.slane %v1438_v46, 5  ;;  %v2383_v1 = vshll.u32 %v2347_v28, 16  ;;  %4383 = vrot.lane.b32.xlu0 %v7718_v36, %s8743_s13  ;;  %v4018_v41 = vor.u32 %v4017_v22, %v4014_v20  ;;  %v3106_v20 = vld [vmem:[#allocation3 + $0x30] sm:$0xf] }
 0x28d   :  { %v2382_v45 = vrot.slane %v2380_v37, 4  ;;  %v12093_v49 = vshrl.u32 %v9546_v26, 16  ;;  %v12094_v8 = vshll.u32 %v9546_v26, 16  ;;  %v2389_v62 = vshll.u32 %v2348_v39, 16  ;;  %v3547_v46 = vld [vmem:[#allocation3 + $0x40] sm:$0xf] }
 0x28e   :  { %v1441_v3 = vor.u32 %v1440_v10, %v1437_v61  ;;  %v2385_v40 = vrot.slane %v2383_v1, 5  ;;  %v2403_v4 = vshll.u32 %v2350_v55, 16  ;;  %v1323_v42 = vsel %vm9054_vm5, %v1214_v6, %v1322_v15  ;;  %v1331_v11 = vld [vmem:[#allocation2 + $0x40] sm:$0xf]  ;;  %v3109_v61 = vld [vmem:[#allocation3 + $0x34] sm:$0x1] }
 0x28f   :  { %v2396_v25 = vrot.slane %v12093_v49, 4  ;;  %v2399_v29 = vrot.slane %v12094_v8, 5  ;;  %v3104_v28 = vsel %vm9047_vm4, %v2997_v54, %v3103_v30  ;;  %v9765_v36 = vrot.slane %v3660_v57, 5  ;;  %1324 = vst [vmem:[#allocation2 + $0x34] sm:$0x1] %v1323_v42 }
 0x290   :  { %v12095_v26 = vsel %vm9512_vm3, %v9542_v24, %v9544_v44  ;;  %3105 = vst [vmem:[#allocation3 + $0x2c] sm:$0x1] %v3104_v28  ;;  %v7728_v32 = vcombine.low %v9722_v50, %v3547_v46  ;;  %v1433_v15 = vsel %vm9512_vm3, %v9752_v43, %v9580_v47  ;;  %v1442_v57 = vrot.slane %v1441_v3, 4  ;;  %v1220_v50 = vpop.permute.xlu0 %1219  ;;  %v1349_v28 = vld [vmem:[#allocation2 + $0x68] sm:$0xf] }
 0x291   :  { %v9772_v37 = vcombine.low %v12095_v26, %v3627_v48  ;;  %v3579_v22 = vor.u32 %v9620_v14, %v9609_v58  ;;  %v3671_v39 = vshrl.u32 %v3547_v46, 16  ;;  %v9781_v55 = vrot.slane %v4018_v41, 4  ;;  %v2999_v48 = vpop.permute.xlu1 %2998 }
 0x292   :  { %v2386_v24 = vor.u32 %v2385_v40, %v2382_v45  ;;  %v2400_v44 = vor.u32 %v2399_v29, %v2396_v25  ;;  %v3674_v30 = vshll.u32 %v3547_v46, 16  ;;  %4443 = vrot.lane.b32.xlu1 %v7728_v32, %s8745_s8  ;;  %v1447_v10 = vsel %vm9512_vm3, %v1442_v57, %v9735_v7  ;;  %v3912_v1 = vld [vmem:[#allocation3 + $0x28] sm:$0xf]  ;;  %v1319_v29 = vld [vmem:[#allocation2 + $0x30] sm:$0xf] }
 0x293   :  { %v2391_v47 = vrot.slane %v2389_v62, 5  ;;  %v2405_v43 = vrot.slane %v2403_v4, 5  ;;  %v3107_v14 = vsel %vm9082_vm12, %v2999_v48, %v3106_v20  ;;  %v1332_v58 = vsel %vm9075_vm11, %v1220_v50, %v1331_v11  ;;  %v9791_v41 = vld [vmem:[#allocation3 + $0x28] sm:$0xf]  ;;  %v9812_v32 = vld [vmem:[#allocation3 + $0x24] sm:$0x1] }
 0x294   :  { %v2387_v45 = vrot.slane %v2386_v24, 4  ;;  %v3582_v49 = vshll.u32 %v9599_v35, 16  ;;  %3108 = vst [vmem:[#allocation3 + $0x30] sm:$0xf] %v3107_v14  ;;  %1333 = vst [vmem:[#allocation2 + $0x40] sm:$0xf] %v1332_v58  ;;  %v7750_v25 = vcombine.low %v9641_v19, %v3912_v1  ;;  %v1212_v35 = vpop.permute.xlu0 %1211  ;;  %v9806_v46 = vcombine.low %v1433_v15, %v1447_v10 }
 0x295   :  { %v3984_v8 = vshrl.u32 %v3912_v1, 16  ;;  %v3987_v7 = vshll.u32 %v3912_v1, 16  ;;  %v3629_v6 = vshrl.u32 %v9791_v41, 16  ;;  %v9796_v54 = vrot.slane %v3671_v39, 4  ;;  %v3001_v42 = vpop.permute.xlu1 %3000  ;;  %v1355_v19 = vld [vmem:[#allocation2 + $0x70] sm:$0xf] }
 0x296   :  { %v3632_v3 = vshll.u32 %v9791_v41, 16  ;;  %v2401_v40 = vrot.slane %v2400_v44, 4  ;;  %v9799_v62 = vrot.slane %v3579_v22, 4  ;;  %v9801_v4 = vrot.slane %v3674_v30, 5  ;;  %1825 = vrot.lane.b32.xlu1 %v9744_v27, %s8746_s7  ;;  %4575 = vrot.lane.b32.xlu0 %v7750_v25, %s8746_s7  ;;  %v3432_v11 = vld [vmem:[#allocation3 + $0x20] sm:$0xe] }
 0x297   :  { %v2392_v26 = vsel %vm9512_vm3, %v2387_v45, %v2391_v47  ;;  %v3593_v20 = vor.u32 %v9666_v31, %v9664_v0  ;;  %v3110_v57 = vsel %vm9047_vm4, %v3001_v42, %v3109_v61  ;;  %v9816_v27 = vrot.slane %v3984_v8, 4  ;;  %v9822_v15 = vld [vmem:[#allocation3 + $0x2c] sm:$0x1]  ;;  %v3433_v24 = vld [vmem:[#allocation3 + $0x28] sm:$0xe] }
 0x298   :  { %v1320_v22 = vsel %vm9075_vm11, %v1212_v35, %v1319_v29  ;;  %v9820_v39 = vrot.slane %v3582_v49, 5  ;;  %3111 = vst [vmem:[#allocation3 + $0x34] sm:$0x1] %v3110_v57  ;;  %v9824_v44 = vrot.slane %v3987_v7, 5  ;;  %v9826_v31 = vrot.slane %v3629_v6, 4  ;;  %v1232_v58 = vpop.permute.xlu0 %1231 }
 0x299   :  { %1321 = vst [vmem:[#allocation2 + $0x30] sm:$0xf] %v1320_v22  ;;  %v2406_v0 = vsel %vm9512_vm3, %v2401_v40, %v2405_v43  ;;  %v3596_v48 = vshll.u32 %v9672_v51, 16  ;;  %v3925_v30 = vld [vmem:[#allocation3 + $0x14] sm:$0x1]  ;;  %v9831_v50 = vrot.slane %v3632_v3, 5  ;;  %v1236_v14 = vpop.permute.xlu1 %1235  ;;  %v1350_v8 = vsel %vm9075_vm11, %v1232_v58, %v1349_v28 }
 0x29a   :  { %v9833_v61 = vcombine.low %v2392_v26, %v2406_v0  ;;  %v3594_v10 = vrot.slane %v3593_v20, 4  ;;  %v3498_v47 = vrot.slane %v9822_v15, 5  ;;  %4479 = vrot.lane.b32.xlu1 %v9772_v37, %s8729_s25  ;;  %v1358_v1 = vld [vmem:[#allocation2 + $0x74] sm:$0x1]  ;;  %v7657_v49 = vrot.slane %v3432_v11, 9 }
 0x29b   :  { %v3598_v45 = vrot.slane %v3596_v48, 5  ;;  %v3494_v43 = vrot.slane %v9812_v32, 5  ;;  %v7658_v25 = vrot.slane %v3433_v24, 9  ;;  %v1356_v51 = vsel %vm9075_vm11, %v1236_v14, %v1355_v19  ;;  %v3913_v7 = vld [vmem:[#allocation3 + $0x30] sm:$0xf] }
 0x29c   :  { %v9843_v29 = vld [vmem:[#allocation3 + $0x30] sm:$0xf]  ;;  %v3948_v6 = vor.u32 %v9684_v33, %v9674_v2  ;;  %v3951_v37 = vshll.u32 %v3925_v30, 16  ;;  %1357 = vst [vmem:[#allocation2 + $0x70] sm:$0xf] %v1356_v51  ;;  %v3998_v3 = vshrl.u32 %v3913_v7, 16  ;;  %v7751_v42 = vcombine.low %v3913_v7, %v9724_v34 }
 0x29d   :  { %1351 = vst [vmem:[#allocation2 + $0x68] sm:$0xf] %v1350_v8  ;;  %v4001_v40 = vshll.u32 %v3913_v7, 16  ;;  %v3643_v35 = vshrl.u32 %v9843_v29, 16  ;;  %v1352_v26 = vld [vmem:[#allocation2 + $0x6c] sm:$0x1]  ;;  %v7727_v19 = vcombine.low %v9791_v41, %v9843_v29  ;;  %v3585_v28 = vsel %vm9512_vm3, %v9799_v62, %v9820_v39  ;;  %v1238_v34 = vpop.permute.xlu1 %1237  ;;  %v1234_v41 = vpop.permute.xlu0 %1233 }
 0x29e   :  { %v3499_v2 = vsel %vm9501_vm2, %v7658_v25, %v3498_v47  ;;  %v3926_v33 = vld [vmem:[#allocation3 + $0x1c] sm:$0x1]  ;;  %v12096_v20 = vor.u32 %v9540_v59, %v9531_v38  ;;  %v9860_v57 = vrot.slane %v3998_v3, 4  ;;  %4577 = vrot.lane.b32.xlu1 %v7751_v42, %s8746_s7  ;;  %v3599_v24 = vsel %vm9512_vm3, %v3594_v10, %v3598_v45  ;;  %v2351_v39 = vld [vmem:[#allocation2 + $0x20] sm:$0xf] }
 0x29f   :  { %v9862_v22 = vrot.slane %v4001_v40, 5  ;;  %v3495_v62 = vsel %vm9501_vm2, %v7657_v49, %v3494_v43  ;;  %v2352_v0 = vld [vmem:[#allocation2 + $0x24] sm:$0x1]  ;;  %v1359_v38 = vsel %vm9054_vm5, %v1238_v34, %v1358_v1  ;;  %v3646_v59 = vshll.u32 %v9843_v29, 16  ;;  %4441 = vrot.lane.b32.xlu0 %v7727_v19, %s8745_s8  ;;  %v3145_v30 = vld [vmem:[#allocation3 + $0x74] sm:$0x1] }
 0x2a0   :  { %v3963_v11 = vrot.slane %v12096_v20, 4  ;;  %v1353_v48 = vsel %vm9054_vm5, %v1234_v41, %v1352_v26  ;;  %v3949_v47 = vrot.slane %v3948_v6, 4  ;;  %v2353_v14 = vld [vmem:[#allocation2 + $0x28] sm:$0xf]  ;;  %1360 = vst [vmem:[#allocation2 + $0x74] sm:$0x1] %v1359_v38  ;;  %v7719_v45 = vcombine.low %v3495_v62, %v3499_v2 }
 0x2a1   :  { %v9875_v10 = vrot.slane %v3643_v35, 4  ;;  %1354 = vst [vmem:[#allocation2 + $0x6c] sm:$0x1] %v1353_v48  ;;  %v3136_v58 = vld [vmem:[#allocation3 + $0x68] sm:$0xf]  ;;  %v3953_v49 = vrot.slane %v3951_v37, 5  ;;  %v7733_v25 = vcombine.low %v3585_v28, %v3599_v24  ;;  %v4004_v7 = vor.u32 %v9862_v22, %v9860_v57  ;;  %v3025_v3 = vpop.permute.xlu1 %3024  ;;  %v3019_v6 = vpop.permute.xlu0 %3018 }
 0x2a2   :  { %v3965_v43 = vshll.u32 %v3926_v33, 16  ;;  %v2408_v1 = vshrl.u32 %v2351_v39, 16  ;;  %v2411_v51 = vshll.u32 %v2351_v39, 16  ;;  %v2417_v8 = vshll.u32 %v2352_v0, 16  ;;  %1823 = vrot.lane.b32.xlu1 %v9806_v46, %s8746_s7  ;;  %v2354_v35 = vld [vmem:[#allocation2 + $0x2c] sm:$0x1] }
 0x2a3   :  { %v3954_v40 = vsel %vm9512_vm3, %v3949_v47, %v3953_v49  ;;  %v2422_v26 = vshrl.u32 %v2353_v14, 16  ;;  %v3174_v37 = vld [vmem:[#allocation3 + $0x10] sm:$0xf]  ;;  %v3146_v19 = vsel %vm9047_vm4, %v3025_v3, %v3145_v30  ;;  %2651 = vrot.lane.b32.xlu0 %v9833_v61, %s8729_s25  ;;  %v3137_v28 = vsel %vm9082_vm12, %v3019_v6, %v3136_v58  ;;  %v1343_v2 = vld [vmem:[#allocation2 + $0x60] sm:$0xf] }
 0x2a4   :  { %v3967_v42 = vrot.slane %v3965_v43, 5  ;;  %v2410_v33 = vrot.slane %v2408_v1, 4  ;;  %v2413_v46 = vrot.slane %v2411_v51, 5  ;;  %v3175_v20 = vld [vmem:[#allocation3 + $0x18] sm:$0xf]  ;;  %v2419_v24 = vrot.slane %v2417_v8, 5 }
 0x2a5   :  { %3147 = vst [vmem:[#allocation3 + $0x74] sm:$0x1] %v3146_v19  ;;  %3138 = vst [vmem:[#allocation3 + $0x68] sm:$0xf] %v3137_v28  ;;  %v3139_v34 = vld [vmem:[#allocation3 + $0x6c] sm:$0x1]  ;;  %v1228_v30 = vpop.permute.xlu1 %1227  ;;  %v3021_v47 = vpop.permute.xlu0 %3020 }
 0x2a6   :  { %v3968_v41 = vsel %vm9512_vm3, %v3963_v11, %v3967_v42  ;;  %v2424_v62 = vrot.slane %v2422_v26, 4  ;;  %v2425_v39 = vshll.u32 %v2353_v14, 16  ;;  %v2414_v38 = vor.u32 %v2413_v46, %v2410_v33  ;;  %4385 = vrot.lane.b32.xlu1 %v7719_v45, %s8743_s13  ;;  %v1346_v14 = vld [vmem:[#allocation2 + $0x64] sm:$0x1] }
 0x2a7   :  { %v7757_v0 = vcombine.low %v3954_v40, %v3968_v41  ;;  %v2431_v48 = vshll.u32 %v2354_v35, 16  ;;  %v3233_v61 = vshrl.u32 %v3174_v37, 16  ;;  %v3236_v49 = vshll.u32 %v3174_v37, 16  ;;  %4477 = vrot.lane.b32.xlu0 %v7733_v25, %s8729_s25  ;;  %v3927_v6 = vld [vmem:[#allocation3 + $0x24] sm:$0x1] }
 0x2a8   :  { %v2427_v58 = vrot.slane %v2425_v39, 5  ;;  %v3242_v43 = vshll.u32 %v9682_v56, 16  ;;  %v3247_v1 = vshrl.u32 %v3175_v20, 16  ;;  %v1344_v51 = vsel %vm9075_vm11, %v1228_v30, %v1343_v2  ;;  %v1337_v40 = vld [vmem:[#allocation2 + $0x58] sm:$0xf]  ;;  %v8248_v30 = vld [vmem:[#allocation15] sm:$0xff]  }
 0x2a9   :  { %v3140_v11 = vsel %vm9047_vm4, %v3021_v47, %v3139_v34  ;;  %v2415_v8 = vrot.slane %v2414_v38, 4  ;;  %v2433_v3 = vrot.slane %v2431_v48, 5  ;;  %1345 = vst [vmem:[#allocation2 + $0x60] sm:$0xf] %v1344_v51  ;;  %v3235_v42 = vrot.slane %v3233_v61, 4  ;;  %v1230_v28 = vpop.permute.xlu1 %1229  ;;  %v1224_v33 = vpop.permute.xlu0 %1223  ;;  %8090 = vmatprep.subr.bf16.mxu1 %v8248_v30 }
 0x2aa   :  { %3141 = vst [vmem:[#allocation3 + $0x6c] sm:$0x1] %v3140_v11  ;;  %v2428_v45 = vor.u32 %v2427_v58, %v2424_v62  ;;  %v3238_v35 = vrot.slane %v3236_v49, 5  ;;  %v3244_v56 = vrot.slane %v3242_v43, 5  ;;  %v3249_v37 = vrot.slane %v3247_v1, 4  ;;  %8091 = vmatpush3.bf16.msra.mxu1 %v8248_v30 }
 0x2ab   :  { %v2420_v26 = vsel %vm9512_vm3, %v2415_v8, %v2419_v24  ;;  %v3250_v19 = vshll.u32 %v3175_v20, 16  ;;  %v3256_v25 = vshll.u32 %v9525_v5, 16  ;;  %v3928_v34 = vld [vmem:[#allocation3 + $0x2c] sm:$0x1]  ;;  %v3976_v41 = vor.u32 %v9716_v52, %v9706_v16  ;;  %4613 = vrot.lane.b32.xlu0 %v7757_v0, %s8749_s18  ;;  %v3130_v48 = vld [vmem:[#allocation3 + $0x60] sm:$0xf] }
 0x2ac   :  { %v2429_v2 = vrot.slane %v2428_v45, 4  ;;  %v3239_v46 = vor.u32 %v3238_v35, %v3235_v42  ;;  %v3979_v62 = vshll.u32 %v3927_v6, 16  ;;  %v1347_v39 = vsel %vm9054_vm5, %v1230_v28, %v1346_v14  ;;  %v1340_v43 = vld [vmem:[#allocation2 + $0x5c] sm:$0x1]  ;;  %v3176_v1 = vld [vmem:[#allocation3 + $0x20] sm:$0xf] }
 0x2ad   :  { %v1338_v20 = vsel %vm9075_vm11, %v1224_v33, %v1337_v40  ;;  %v3252_v24 = vrot.slane %v3250_v19, 5  ;;  %v3258_v5 = vrot.slane %v3256_v25, 5  ;;  %1348 = vst [vmem:[#allocation2 + $0x64] sm:$0x1] %v1347_v39  ;;  %v3977_v16 = vrot.slane %v3976_v41, 4  ;;  %v3015_v14 = vpop.permute.xlu1 %3014  ;;  %v8250_v35 = vld [vmem:[#allocation15 + $0x8] sm:$0xff]  }
 0x2ae   :  { %v2434_v38 = vsel %vm9512_vm3, %v2429_v2, %v2433_v3  ;;  %1339 = vst [vmem:[#allocation2 + $0x58] sm:$0xf] %v1338_v20  ;;  %v3240_v61 = vrot.slane %v3239_v46, 4  ;;  %v3981_v52 = vrot.slane %v3979_v62, 5  ;;  %v3990_v0 = vor.u32 %v9824_v44, %v9816_v27  ;;  %v1226_v27 = vpop.permute.xlu0 %1225  ;;  %v3177_v44 = vld [vmem:[#allocation3 + $0x28] sm:$0xf]  ;;  %8092 = vmatprep.subr.bf16.mxu1 %v8250_v35 }
 0x2af   :  { %v7631_v47 = vcombine.low %v2420_v26, %v2434_v38  ;;  %v3253_v58 = vor.u32 %v3252_v24, %v3249_v37  ;;  %v3993_v49 = vshll.u32 %v3928_v34, 16  ;;  %v9915_v51 = vrot.slane %v4004_v7, 4  ;;  %v3133_v6 = vld [vmem:[#allocation3 + $0x64] sm:$0x1]  ;;  %v1407_v25 = vld [vmem:[#allocation2 + $0x3c] sm:$0x1]  ;;  %8093 = vmatpush3.bf16.msra.mxu1 %v8250_v35 }
 0x2b0   :  { %v9919_v11 = vrot.slane %v3646_v59, 5  ;;  %v3245_v8 = vsel %vm9512_vm3, %v3240_v61, %v3244_v56  ;;  %v3982_v3 = vsel %vm9512_vm3, %v3977_v16, %v3981_v52  ;;  %v3131_v57 = vsel %vm9082_vm12, %v3015_v14, %v3130_v48  ;;  %v9935_v28 = vld [vmem:[#allocation2 + $0x44] sm:$0x1]  ;;  %v3124_v2 = vld [vmem:[#allocation3 + $0x58] sm:$0xf] }
 0x2b1   :  { %2653 = vrot.lane.b32.xlu1 %v7631_v47, %s8729_s25  ;;  %v3254_v22 = vrot.slane %v3253_v58, 4  ;;  %v3991_v7 = vrot.slane %v3990_v0, 4  ;;  %v3995_v29 = vrot.slane %v3993_v49, 5  ;;  %3132 = vst [vmem:[#allocation3 + $0x60] sm:$0xf] %v3131_v57  ;;  %v1341_v59 = vsel %vm9054_vm5, %v1226_v27, %v1340_v43  ;;  %v3017_v34 = vpop.permute.xlu1 %3016  ;;  %v8251_v16 = vld [vmem:[#allocation18] sm:$0xff]  }
 0x2b2   :  { %v3261_v45 = vshrl.u32 %v3176_v1, 16  ;;  %v3264_v40 = vshll.u32 %v3176_v1, 16  ;;  %v3270_v42 = vshll.u32 %v9812_v32, 16  ;;  %1342 = vst [vmem:[#allocation2 + $0x5c] sm:$0x1] %v1341_v59  ;;  %v3275_v37 = vshrl.u32 %v3177_v44, 16  ;;  %v3011_v48 = vpop.permute.xlu0 %3010  ;;  %8118 = vmatprep.subr.bf16.mxu0 %v8251_v16 }
 0x2b3   :  { %v3259_v56 = vsel %vm9512_vm3, %v3254_v22, %v3258_v5  ;;  %v3996_v26 = vsel %vm9512_vm3, %v3991_v7, %v3995_v29  ;;  %v3278_v19 = vshll.u32 %v3177_v44, 16  ;;  %v1650_v32 = vld [vmem:[#allocation2 + $0x38] sm:$0xe]  ;;  %v1651_v39 = vld [vmem:[#allocation2 + $0x40] sm:$0xe]  ;;  %v3134_v20 = vsel %vm9047_vm4, %v3017_v34, %v3133_v6  ;;  %8119 = vmatpush3.bf16.msra.mxu0 %v8251_v16 }
 0x2b4   :  { %v7710_v33 = vcombine.low %v3245_v8, %v3259_v56  ;;  %v7758_v46 = vcombine.low %v3982_v3, %v3996_v26  ;;  %v3263_v41 = vrot.slane %v3261_v45, 4  ;;  %v3266_v62 = vrot.slane %v3264_v40, 5  ;;  %v3160_v61 = vld [vmem:[#allocation3 + $0x88] sm:$0xf]  ;;  %3135 = vst [vmem:[#allocation3 + $0x64] sm:$0x1] %v3134_v20 }
 0x2b5   :  { %v3272_v24 = vrot.slane %v3270_v42, 5  ;;  %v3277_v5 = vrot.slane %v3275_v37, 4  ;;  %v3280_v38 = vrot.slane %v3278_v19, 5  ;;  %v3284_v30 = vshll.u32 %v9822_v15, 16  ;;  %v1391_v0 = vld [vmem:[#allocation2 + $0x38] sm:$0xf]  ;;  %v3035_v22 = vpop.permute.xlu1 %3034 }
 0x2b6   :  { %4343 = vrot.lane.b32.xlu0 %v7710_v33, %s8748_s17  ;;  %4615 = vrot.lane.b32.xlu1 %v7758_v46, %s8749_s18  ;;  %v3267_v52 = vor.u32 %v3266_v62, %v3263_v41  ;;  %v1514_v47 = vshll.u32 %v1407_v25, 16  ;;  %v1528_v58 = vshll.u32 %v9935_v28, 16  ;;  %v7573_v43 = vrot.slane %v1650_v32, 9  ;;  %v8252_v8 = vld [vmem:[#allocation15 + $0x10] sm:$0xff]   ;;  %v1392_v7 = vld [vmem:[#allocation2 + $0x40] sm:$0xf]  ;;  %v3013_v34 = vpop.permute.xlu0 %3012 }
 0x2b7   :  { %v3281_v49 = vor.u32 %v3280_v38, %v3277_v5  ;;  %v1721_v1 = vrot.slane %v1407_v25, 5  ;;  %v7574_v14 = vrot.slane %v1651_v39, 9  ;;  %v3286_v27 = vrot.slane %v3284_v30, 5  ;;  %v9950_v45 = vld [vmem:[#allocation2 + $0x2c] sm:$0x1]  ;;  %8094 = vmatprep.subr.bf16.mxu1 %v8252_v8 }
 0x2b8   :  { %v3268_v3 = vrot.slane %v3267_v52, 4  ;;  %v1725_v44 = vrot.slane %v9935_v28, 5  ;;  %v3125_v57 = vsel %vm9082_vm12, %v3011_v48, %v3124_v2  ;;  %v3161_v59 = vsel %vm9082_vm12, %v3035_v22, %v3160_v61  ;;  %v9958_v26 = vld [vmem:[#allocation2 + $0x34] sm:$0x1]  ;;  %v1648_v37 = vld [vmem:[#allocation2 + $0x28] sm:$0xe]  ;;  %8095 = vmatpush3.bf16.msra.mxu1 %v8252_v8 }
 0x2b9   :  { %v3282_v15 = vrot.slane %v3281_v49, 4  ;;  %v1722_v29 = vsel %vm9501_vm2, %v7573_v43, %v1721_v1  ;;  %3126 = vst [vmem:[#allocation3 + $0x58] sm:$0xf] %v3125_v57  ;;  %v1505_v6 = vshrl.u32 %v1391_v0, 16  ;;  %3162 = vst [vmem:[#allocation3 + $0x88] sm:$0xf] %v3161_v59 }
 0x2ba   :  { %v3273_v40 = vsel %vm9512_vm3, %v3268_v3, %v3272_v24  ;;  %v1726_v42 = vsel %vm9501_vm2, %v7574_v14, %v1725_v44  ;;  %v1508_v35 = vshll.u32 %v1391_v0, 16  ;;  %v9956_v56 = vrot.slane %v1514_v47, 5  ;;  %v3127_v19 = vld [vmem:[#allocation3 + $0x5c] sm:$0x1]  ;;  %v1649_v46 = vld [vmem:[#allocation2 + $0x30] sm:$0xe]  ;;  %v3027_v24 = vpop.permute.xlu1 %3026 }
 0x2bb   :  { %v3287_v25 = vsel %vm9512_vm3, %v3282_v15, %v3286_v27  ;;  %v7602_v28 = vcombine.low %v1722_v29, %v1726_v42  ;;  %v1507_v2 = vrot.slane %v1505_v6, 4  ;;  %v1519_v33 = vshrl.u32 %v1392_v7, 16  ;;  %v3148_v41 = vld [vmem:[#allocation3 + $0x78] sm:$0xf]  ;;  %v2359_v5 = vld [vmem:[#allocation2 + $0x40] sm:$0xf] }
 0x2bc   :  { %v7711_v62 = vcombine.low %v3273_v40, %v3287_v25  ;;  %v1510_v32 = vrot.slane %v1508_v35, 5  ;;  %v1522_v39 = vshll.u32 %v1392_v7, 16  ;;  %v1530_v20 = vrot.slane %v1528_v58, 5  ;;  %v2360_v52 = vld [vmem:[#allocation2 + $0x44] sm:$0x1]  ;;  %v3023_v35 = vpop.permute.xlu0 %3022 }
 0x2bd   :  { %1869 = vrot.lane.b32.xlu0 %v7602_v28, %s8729_s25  ;;  %v1521_v38 = vrot.slane %v1519_v33, 4  ;;  %v1486_v48 = vshll.u32 %v9950_v45, 16  ;;  %v1500_v61 = vshll.u32 %v9958_v26, 16  ;;  %v7571_v16 = vrot.slane %v1648_v37, 9  ;;  %v3800_v43 = vld [vmem:[#allocation3 + $0x28] sm:$0xe] }
 0x2be   :  { %4345 = vrot.lane.b32.xlu1 %v7711_v62, %s8748_s17  ;;  %v1511_v30 = vor.u32 %v1510_v32, %v1507_v2  ;;  %v1524_v47 = vrot.slane %v1522_v39, 5  ;;  %v1713_v0 = vrot.slane %v9950_v45, 5  ;;  %v7572_v49 = vrot.slane %v1649_v46, 9  ;;  %v9972_v3 = vld [vmem:[#allocation3 + $0x2c] sm:$0x1] }
 0x2bf   :  { %v1717_v58 = vrot.slane %v9958_v26, 5  ;;  %v3128_v1 = vsel %vm9047_vm4, %v3013_v34, %v3127_v19  ;;  %v3149_v14 = vsel %vm9082_vm12, %v3027_v24, %v3148_v41  ;;  %v2464_v8 = vshrl.u32 %v2359_v5, 16  ;;  %v3142_v27 = vld [vmem:[#allocation3 + $0x70] sm:$0xf]  ;;  %v9976_v15 = vld [vmem:[#allocation3 + $0x34] sm:$0x1]  ;;  %v1252_v19 = vpop.permute.xlu1 %1251 }
 0x2c0   :  { %v1512_v44 = vrot.slane %v1511_v30, 4  ;;  %v1525_v57 = vor.u32 %v1524_v47, %v1521_v38  ;;  %v1714_v22 = vsel %vm9501_vm2, %v7571_v16, %v1713_v0  ;;  %3129 = vst [vmem:[#allocation3 + $0x5c] sm:$0x1] %v3128_v1  ;;  %3150 = vst [vmem:[#allocation3 + $0x78] sm:$0xf] %v3149_v14  ;;  %v2467_v7 = vshll.u32 %v2359_v5, 16 }
 0x2c1   :  { %v3801_v29 = vld [vmem:[#allocation3 + $0x30] sm:$0xe]  ;;  %v1718_v59 = vsel %vm9501_vm2, %v7572_v49, %v1717_v58  ;;  %v2466_v6 = vrot.slane %v2464_v8, 4  ;;  %v2473_v40 = vshll.u32 %v2360_v52, 16  ;;  %v7673_v42 = vrot.slane %v3800_v43, 9  ;;  %v8254_v43 = vld [vmem:[#allocation18 + $0x8] sm:$0xff]  }
 0x2c2   :  { %v1379_v37 = vld [vmem:[#allocation2 + $0x90] sm:$0xf]  ;;  %v1517_v25 = vsel %vm9512_vm3, %v1512_v44, %v9956_v56  ;;  %v1526_v28 = vrot.slane %v1525_v57, 4  ;;  %v7601_v2 = vcombine.low %v1714_v22, %v1718_v59  ;;  %v2469_v33 = vrot.slane %v2467_v7, 5  ;;  %v2356_v39 = vld [vmem:[#allocation2 + $0x34] sm:$0x1]  ;;  %8120 = vmatprep.subr.bf16.mxu0 %v8254_v43 }
 0x2c3   :  { %v2355_v46 = vld [vmem:[#allocation2 + $0x30] sm:$0xf]  ;;  %v2475_v34 = vrot.slane %v2473_v40, 5  ;;  %v3862_v41 = vrot.slane %v9972_v3, 5  ;;  %v7674_v62 = vrot.slane %v3801_v29, 9  ;;  %v3866_v32 = vrot.slane %v9976_v15, 5  ;;  %8121 = vmatpush3.bf16.msra.mxu0 %v8254_v43 }
 0x2c4   :  { %v1531_v24 = vsel %vm9512_vm3, %v1526_v28, %v1530_v20  ;;  %1867 = vrot.lane.b32.xlu0 %v7601_v2, %s8729_s25  ;;  %v2470_v5 = vor.u32 %v2469_v33, %v2466_v6  ;;  %v3143_v56 = vsel %vm9082_vm12, %v3023_v35, %v3142_v27  ;;  %v1380_v38 = vsel %vm9075_vm11, %v1252_v19, %v1379_v37  ;;  %v2357_v16 = vld [vmem:[#allocation2 + $0x38] sm:$0xf]  ;;  %v2358_v52 = vld [vmem:[#allocation2 + $0x3c] sm:$0x1]  ;;  %v3194_v49 = vld [vmem:[#allocation3 + $0x34] sm:$0x1] }
 0x2c5   :  { %v7594_v30 = vcombine.low %v1517_v25, %v1531_v24  ;;  %v3863_v47 = vsel %vm9501_vm2, %v7673_v42, %v3862_v41  ;;  %v3867_v0 = vsel %vm9501_vm2, %v7674_v62, %v3866_v32  ;;  %3144 = vst [vmem:[#allocation3 + $0x70] sm:$0xf] %v3143_v56  ;;  %1381 = vst [vmem:[#allocation2 + $0x90] sm:$0xf] %v1380_v38  ;;  %v2436_v20 = vshrl.u32 %v2355_v46, 16  ;;  %v8255_v44 = vld [vmem:[#allocation15 + $0x18] sm:$0xff]   ;;  %v1248_v62 = vpop.permute.xlu0 %1247 }
 0x2c6   :  { %v2471_v58 = vrot.slane %v2470_v5, 4  ;;  %v7743_v1 = vcombine.low %v3863_v47, %v3867_v0  ;;  %v2439_v14 = vshll.u32 %v2355_v46, 16  ;;  %v2445_v8 = vshll.u32 %v2356_v39, 16  ;;  %v3195_v27 = vld [vmem:[#allocation3 + $0x3c] sm:$0x1]  ;;  %v8257_v25 = vld [vmem:[#allocation18 + $0x10] sm:$0xff]   ;;  %8096 = vmatprep.subr.bf16.mxu1 %v8255_v44 }
 0x2c7   :  { %1829 = vrot.lane.b32.xlu1 %v7594_v30, %s8746_s7  ;;  %v2438_v57 = vrot.slane %v2436_v20, 4  ;;  %v2450_v22 = vshrl.u32 %v2357_v16, 16  ;;  %v2453_v7 = vshll.u32 %v2357_v16, 16  ;;  %v2459_v29 = vshll.u32 %v2358_v52, 16  ;;  %v3434_v59 = vld [vmem:[#allocation3 + $0x30] sm:$0xe]  ;;  %8097 = vmatpush3.bf16.msra.mxu1 %v8255_v44 }
 0x2c8   :  { %v1373_v6 = vld [vmem:[#allocation2 + $0x88] sm:$0xf]  ;;  %v2476_v40 = vsel %vm9512_vm3, %v2471_v58, %v2475_v34  ;;  %4521 = vrot.lane.b32.xlu0 %v7743_v1, %s8747_s28  ;;  %v2441_v42 = vrot.slane %v2439_v14, 5  ;;  %v2447_v35 = vrot.slane %v2445_v8, 5  ;;  %v3298_v37 = vshll.u32 %v3194_v49, 16  ;;  %v1254_v34 = vpop.permute.xlu1 %1253  ;;  %8122 = vmatprep.subr.bf16.mxu0 %v8257_v25  ;;  %v8260_v47 = vld [vmem:[#allocation18 + $0x18] sm:$0xff]  }
 0x2c9   :  { %v3435_v19 = vld [vmem:[#allocation3 + $0x38] sm:$0xe]  ;;  %v12097_v28 = vsel %vm9512_vm3, %v9495_v63, %v9497_v12  ;;  %v2452_v33 = vrot.slane %v2450_v22, 4  ;;  %v2455_v46 = vrot.slane %v2453_v7, 5  ;;  %v2461_v41 = vrot.slane %v2459_v29, 5  ;;  %v8258_v39 = vld [vmem:[#allocation15 + $0x20] sm:$0xff]   ;;  %8123 = vmatpush3.bf16.msra.mxu0 %v8257_v25 }
 0x2ca   :  { %v7633_v2 = vcombine.low %v2476_v40, %v12097_v28  ;;  %v1382_v32 = vld [vmem:[#allocation2 + $0x94] sm:$0x1]  ;;  %v2442_v24 = vor.u32 %v2441_v42, %v2438_v57  ;;  %v10005_v5 = vrot.slane %v3298_v37, 5  ;;  %v3312_v56 = vshll.u32 %v3195_v27, 16  ;;  %v1389_v16 = vld [vmem:[#allocation2 + $0x28] sm:$0xf]  ;;  %8098 = vmatprep.subr.bf16.mxu1 %v8258_v39  ;;  %8124 = vmatprep.subr.bf16.mxu0 %v8260_v47 }
 0x2cb   :  { %v7659_v38 = vrot.slane %v3434_v59, 9  ;;  %v2456_v63 = vor.u32 %v2455_v46, %v2452_v33  ;;  %v3502_v12 = vrot.slane %v3194_v49, 5  ;;  %v7660_v52 = vrot.slane %v3435_v19, 9  ;;  %v1390_v1 = vld [vmem:[#allocation2 + $0x30] sm:$0xf]  ;;  %8099 = vmatpush3.bf16.msra.mxu1 %v8258_v39  ;;  %v1250_v46 = vpop.permute.xlu0 %1249 }
 0x2cc   :  { %2657 = vrot.lane.b32.xlu1 %v7633_v2, %s8729_s25  ;;  %v3506_v30 = vrot.slane %v3195_v27, 5  ;;  %v2443_v0 = vrot.slane %v2442_v24, 4  ;;  %v10008_v20 = vrot.slane %v3312_v56, 5  ;;  %v1374_v43 = vsel %vm9075_vm11, %v1248_v62, %v1373_v6  ;;  %v1412_v44 = vld [vmem:[#allocation2 + $0x74] sm:$0x1]  ;;  %v8261_v28 = vld [vmem:[#allocation15 + $0x28] sm:$0xff]   ;;  %v3039_v56 = vpop.permute.xlu1 %3038 }
 0x2cd   :  { %v1383_v58 = vsel %vm9054_vm5, %v1254_v34, %v1382_v32  ;;  %v2457_v14 = vrot.slane %v2456_v63, 4  ;;  %v3503_v8 = vsel %vm9501_vm2, %v7659_v38, %v3502_v12  ;;  %1375 = vst [vmem:[#allocation2 + $0x88] sm:$0xf] %v1374_v43  ;;  %v1477_v27 = vshrl.u32 %v1389_v16, 16  ;;  %v1411_v59 = vld [vmem:[#allocation2 + $0x6c] sm:$0x1]  ;;  %8125 = vmatpush3.bf16.msra.mxu0 %v8260_v47  ;;  %8100 = vmatprep.subr.bf16.mxu1 %v8261_v28 }
 0x2ce   :  { %v3507_v49 = vsel %vm9501_vm2, %v7660_v52, %v3506_v30  ;;  %1384 = vst [vmem:[#allocation2 + $0x94] sm:$0x1] %v1383_v58  ;;  %v2448_v57 = vsel %vm9512_vm3, %v2443_v0, %v2447_v35  ;;  %v1480_v7 = vshll.u32 %v1389_v16, 16  ;;  %v10022_v29 = vrot.slane %v1486_v48, 5  ;;  %v1654_v6 = vld [vmem:[#allocation2 + $0x68] sm:$0xe] }
 0x2cf   :  { %v7720_v22 = vcombine.low %v3503_v8, %v3507_v49  ;;  %v2462_v40 = vsel %vm9512_vm3, %v2457_v14, %v2461_v41  ;;  %v1479_v42 = vrot.slane %v1477_v27, 4  ;;  %v1491_v37 = vshrl.u32 %v1390_v1, 16  ;;  %v1655_v25 = vld [vmem:[#allocation2 + $0x70] sm:$0xe]  ;;  %v1376_v33 = vld [vmem:[#allocation2 + $0x8c] sm:$0x1]  ;;  %8101 = vmatpush3.bf16.msra.mxu1 %v8261_v28 }
 0x2d0   :  { %v1494_v19 = vshll.u32 %v1390_v1, 16  ;;  %v7632_v2 = vcombine.low %v2448_v57, %v2462_v40  ;;  %v1482_v35 = vrot.slane %v1480_v7, 5  ;;  %v1502_v45 = vrot.slane %v1500_v61, 5  ;;  %v8263_v62 = vld [vmem:[#allocation18 + $0x20] sm:$0xff]   ;;  %v3166_v24 = vld [vmem:[#allocation3 + $0x90] sm:$0xf] }
 0x2d1   :  { %4387 = vrot.lane.b32.xlu0 %v7720_v22, %s8743_s13  ;;  %v1584_v48 = vshll.u32 %v1412_v44, 16  ;;  %v1493_v32 = vrot.slane %v1491_v37, 4  ;;  %v7577_v41 = vrot.slane %v1654_v6, 9  ;;  %v1737_v39 = vrot.slane %v1411_v59, 5  ;;  %8126 = vmatprep.subr.bf16.mxu0 %v8263_v62  ;;  %v1395_v1 = vld [vmem:[#allocation2 + $0x68] sm:$0xf] }
 0x2d2   :  { %v1496_v34 = vrot.slane %v1494_v19, 5  ;;  %2655 = vrot.lane.b32.xlu1 %v7632_v2, %s8729_s25  ;;  %v1483_v38 = vor.u32 %v1482_v35, %v1479_v42  ;;  %v7578_v63 = vrot.slane %v1655_v25, 9  ;;  %v1741_v26 = vrot.slane %v1412_v44, 5  ;;  %8127 = vmatpush3.bf16.msra.mxu0 %v8263_v62  ;;  %v1396_v44 = vld [vmem:[#allocation2 + $0x70] sm:$0xf] }
 0x2d3   :  { %v10030_v16 = vrot.slane %v1584_v48, 5  ;;  %v1738_v12 = vsel %vm9501_vm2, %v7577_v41, %v1737_v39  ;;  %v1570_v52 = vshll.u32 %v1411_v59, 16  ;;  %v1377_v30 = vsel %vm9054_vm5, %v1250_v46, %v1376_v33  ;;  %v940_v59 = vld [vmem:[#allocation2 + $0x80] sm:$0x1]  ;;  %v1410_v37 = vld [vmem:[#allocation2 + $0x64] sm:$0x1] }
 0x2d4   :  { %v1497_v61 = vor.u32 %v1496_v34, %v1493_v32  ;;  %v1484_v47 = vrot.slane %v1483_v38, 4  ;;  %v1742_v0 = vsel %vm9501_vm2, %v7578_v63, %v1741_v26  ;;  %1378 = vst [vmem:[#allocation2 + $0x8c] sm:$0x1] %v1377_v30  ;;  %v3167_v43 = vsel %vm9082_vm12, %v3039_v56, %v3166_v24  ;;  %v1653_v19 = vld [vmem:[#allocation2 + $0x60] sm:$0xe]  ;;  %v10061_v32 = vpop.permute.xlu0 %3036 }
 0x2d5   :  { %v3635_v58 = vor.u32 %v9831_v50, %v9826_v31  ;;  %v7604_v8 = vcombine.low %v1738_v12, %v1742_v0  ;;  %v10042_v49 = vrot.slane %v1570_v52, 5  ;;  %3168 = vst [vmem:[#allocation3 + $0x90] sm:$0xf] %v3167_v43  ;;  %v3638_v27 = vshll.u32 %v9972_v3, 16  ;;  %v2972_v50 = vld [vmem:[#allocation3 + $0x8c] sm:$0x1] }
 0x2d6   :  { %v1498_v14 = vrot.slane %v1497_v61, 4  ;;  %v1489_v57 = vsel %vm9512_vm3, %v1484_v47, %v10022_v29  ;;  %v3649_v7 = vor.u32 %v9919_v11, %v9875_v10  ;;  %v3652_v31 = vshll.u32 %v9976_v15, 16  ;;  %v1652_v35 = vld [vmem:[#allocation2 + $0x58] sm:$0xe]  ;;  %v1409_v33 = vld [vmem:[#allocation2 + $0x5c] sm:$0x1] }
 0x2d7   :  { %v3636_v22 = vrot.slane %v3635_v58, 4  ;;  %1873 = vrot.lane.b32.xlu1 %v7604_v8, %s8729_s25  ;;  %v3640_v40 = vrot.slane %v3638_v27, 5  ;;  %v1561_v3 = vshrl.u32 %v1395_v1, 16  ;;  %v1564_v42 = vshll.u32 %v1395_v1, 16  ;;  %v937_v38 = vld [vmem:[#allocation2 + $0x78] sm:$0x1]  ;;  %v1244_v27 = vpop.permute.xlu1 %1243 }
 0x2d8   :  { %v1503_v6 = vsel %vm9512_vm3, %v1498_v14, %v1502_v45  ;;  %v3650_v29 = vrot.slane %v3649_v7, 4  ;;  %v3654_v28 = vrot.slane %v3652_v31, 5  ;;  %v1575_v2 = vshrl.u32 %v1396_v44, 16  ;;  %v990_v63 = vld [vmem:[#allocation2 + $0x84] sm:$0x1] }
 0x2d9   :  { %v7593_v25 = vcombine.low %v1489_v57, %v1503_v6  ;;  %v3641_v10 = vsel %vm9512_vm3, %v3636_v22, %v3640_v40  ;;  %v1563_v11 = vrot.slane %v1561_v3, 4  ;;  %v1566_v15 = vrot.slane %v1564_v42, 5  ;;  %v1394_v30 = vld [vmem:[#allocation2 + $0x60] sm:$0xf]  ;;  %v987_v47 = vld [vmem:[#allocation2 + $0x7c] sm:$0x1] }
 0x2da   :  { %v1578_v48 = vshll.u32 %v1396_v44, 16  ;;  %v3655_v45 = vsel %vm9512_vm3, %v3650_v29, %v3654_v28  ;;  %v1577_v46 = vrot.slane %v1575_v2, 4  ;;  %v2973_v62 = vsel %vm9066_vm10, 0, %v2972_v50  ;;  %v1393_v14 = vld [vmem:[#allocation2 + $0x58] sm:$0xf]  ;;  %v8264_v8 = vld [vmem:[#allocation18 + $0x28] sm:$0xff]  }
 0x2db   :  { %1827 = vrot.lane.b32.xlu0 %v7593_v25, %s8746_s7  ;;  %v941_v34 = vsel %vm9054_vm5, 0, %v940_v59  ;;  %v7735_v41 = vcombine.low %v3641_v10, %v3655_v45  ;;  %v1567_v39 = vor.u32 %v1566_v15, %v1563_v11  ;;  %2974 = vst [vmem:[#allocation3 + $0x8c] sm:$0x1] %v2973_v62  ;;  %v1556_v56 = vshll.u32 %v1410_v37, 16  ;;  %v1416_v50 = vld [vmem:[#allocation2 + $0x94] sm:$0x1]  ;;  %8128 = vmatprep.subr.bf16.mxu0 %v8264_v8 }
 0x2dc   :  { %v1580_v24 = vrot.slane %v1578_v48, 5  ;;  %942 = vst [vmem:[#allocation2 + $0x80] sm:$0x1] %v941_v34  ;;  %v7575_v26 = vrot.slane %v1652_v35, 9  ;;  %v1729_v61 = vrot.slane %v1409_v33, 5  ;;  %v7576_v12 = vrot.slane %v1653_v19, 9  ;;  %8129 = vmatpush3.bf16.msra.mxu0 %v8264_v8 }
 0x2dd   :  { %v1733_v52 = vrot.slane %v1410_v37, 5  ;;  %v1568_v0 = vrot.slane %v1567_v39, 4  ;;  %v10065_v58 = vrot.slane %v1556_v56, 5  ;;  %v1542_v1 = vshll.u32 %v1409_v33, 16  ;;  %v1658_v59 = vld [vmem:[#allocation2 + $0x88] sm:$0xe]  ;;  %v1240_v37 = vpop.permute.xlu0 %1239 }
 0x2de   :  { %v1581_v43 = vor.u32 %v1580_v24, %v1577_v46  ;;  %v1730_v44 = vsel %vm9501_vm2, %v7575_v26, %v1729_v61  ;;  %v938_v22 = vsel %vm9054_vm5, 0, %v937_v38  ;;  %v991_v31 = vsel %vm9061_vm7, 0, %v990_v63  ;;  %v1659_v2 = vld [vmem:[#allocation2 + $0x90] sm:$0xe]  ;;  %v2920_v35 = vld [vmem:[#allocation3 + $0x80] sm:$0x1]  ;;  %v1246_v63 = vpop.permute.xlu1 %1245 }
 0x2df   :  { %4481 = vrot.lane.b32.xlu0 %v7735_v41, %s8729_s25  ;;  %v1734_v57 = vsel %vm9501_vm2, %v7576_v12, %v1733_v52  ;;  %v1573_v6 = vsel %vm9512_vm3, %v1568_v0, %v10042_v49  ;;  %v10079_v42 = vrot.slane %v1542_v1, 5  ;;  %939 = vst [vmem:[#allocation2 + $0x78] sm:$0x1] %v938_v22  ;;  %992 = vst [vmem:[#allocation2 + $0x84] sm:$0x1] %v991_v31  ;;  %v1533_v19 = vshrl.u32 %v1393_v14, 16 }
 0x2e0   :  { %v1582_v40 = vrot.slane %v1581_v43, 4  ;;  %v7603_v3 = vcombine.low %v1730_v44, %v1734_v57  ;;  %v1536_v25 = vshll.u32 %v1393_v14, 16  ;;  %v1547_v29 = vshrl.u32 %v1394_v30, 16  ;;  %v1415_v11 = vld [vmem:[#allocation2 + $0x8c] sm:$0x1] }
 0x2e1   :  { %v1550_v28 = vshll.u32 %v1394_v30, 16  ;;  %v988_v49 = vsel %vm9061_vm7, 0, %v987_v47  ;;  %v1640_v15 = vshll.u32 %v1416_v50, 16  ;;  %v7581_v48 = vrot.slane %v1658_v59, 9  ;;  %v2363_v38 = vld [vmem:[#allocation2 + $0x60] sm:$0xf]  ;;  %v1242_v44 = vpop.permute.xlu0 %1241 }
 0x2e2   :  { %v1587_v10 = vsel %vm9512_vm3, %v1582_v40, %v10030_v16  ;;  %v12099_v33 = vmov 0   ;;  %v3163_v46 = vld [vmem:[#allocation3 + $0x8c] sm:$0x1]  ;;  %v1535_v34 = vrot.slane %v1533_v19, 4  ;;  %v1538_v41 = vrot.slane %v1536_v25, 5 }
 0x2e3   :  { %5144 = vmatprep.subr.bf16.mxu0 %v12099_v33  ;;  %v7596_v45 = vcombine.low %v1573_v6, %v1587_v10  ;;  %v1367_v62 = vld [vmem:[#allocation2 + $0x80] sm:$0xf]  ;;  %1871 = vrot.lane.b32.xlu0 %v7603_v3, %s8729_s25  ;;  %989 = vst [vmem:[#allocation2 + $0x7c] sm:$0x1] %v988_v49  ;;  %v3164_v16 = vsel %vm9047_vm4, %v10061_v32, %v3163_v46  ;;  %v1549_v24 = vrot.slane %v1547_v29, 4  ;;  %v1552_v56 = vrot.slane %v1550_v28, 5 }
 0x2e4   :  { %v1368_v39 = vsel %vm9075_vm11, %v1244_v27, %v1367_v62  ;;  %3165 = vst [vmem:[#allocation3 + $0x8c] sm:$0x1] %v3164_v16  ;;  %v1539_v26 = vor.u32 %v1538_v41, %v1535_v34  ;;  %v10094_v61 = vrot.slane %v1640_v15, 5  ;;  %v1753_v12 = vrot.slane %v1415_v11, 5  ;;  %v2365_v30 = vld [vmem:[#allocation2 + $0x68] sm:$0xf]  ;;  %v3031_v41 = vpop.permute.xlu1 %3030 }
 0x2e5   :  { %1833 = vrot.lane.b32.xlu1 %v7596_v45, %s8746_s7  ;;  %1369 = vst [vmem:[#allocation2 + $0x80] sm:$0xf] %v1368_v39  ;;  %v7582_v52 = vrot.slane %v1659_v2, 9  ;;  %v1553_v47 = vor.u32 %v1552_v56, %v1549_v24  ;;  %v1757_v0 = vrot.slane %v1416_v50, 5  ;;  %v1626_v32 = vshll.u32 %v1415_v11, 16 }
 0x2e6   :  { %v2921_v43 = vsel %vm9047_vm4, 0, %v2920_v35  ;;  %v2364_v1 = vld [vmem:[#allocation2 + $0x64] sm:$0x1]  ;;  %v1361_v14 = vld [vmem:[#allocation2 + $0x78] sm:$0xf]  ;;  %v1540_v27 = vrot.slane %v1539_v26, 4  ;;  %v1754_v57 = vsel %vm9501_vm2, %v7581_v48, %v1753_v12  ;;  %v3029_v26 = vpop.permute.xlu0 %3028 }
 0x2e7   :  { %v1370_v8 = vld [vmem:[#allocation2 + $0x84] sm:$0x1]  ;;  %2922 = vst [vmem:[#allocation3 + $0x80] sm:$0x1] %v2921_v43  ;;  %v2492_v22 = vshrl.u32 %v2363_v38, 16  ;;  %v1362_v31 = vsel %vm9075_vm11, %v1240_v37, %v1361_v14  ;;  %v1554_v59 = vrot.slane %v1553_v47, 4  ;;  %v1758_v6 = vsel %vm9501_vm2, %v7582_v52, %v1757_v0 }
 0x2e8   :  { %v1371_v50 = vsel %vm9054_vm5, %v1246_v63, %v1370_v8  ;;  %v2366_v40 = vld [vmem:[#allocation2 + $0x6c] sm:$0x1]  ;;  %v2966_v3 = vld [vmem:[#allocation3 + $0x7c] sm:$0x1]  ;;  %1363 = vst [vmem:[#allocation2 + $0x78] sm:$0xf] %v1362_v31  ;;  %v1545_v19 = vsel %vm9512_vm3, %v1540_v27, %v10079_v42  ;;  %v7606_v25 = vcombine.low %v1754_v57, %v1758_v6 }
 0x2e9   :  { %1372 = vst [vmem:[#allocation2 + $0x84] sm:$0x1] %v1371_v50  ;;  %v10109_v29 = vrot.slane %v1626_v32, 5  ;;  %v2494_v28 = vrot.slane %v2492_v22, 4  ;;  %v2969_v37 = vld [vmem:[#allocation3 + $0x84] sm:$0x1]  ;;  %v1559_v35 = vsel %vm9512_vm3, %v1554_v59, %v10065_v58  ;;  %v3663_v50 = vor.u32 %v9765_v36, %v9754_v60 }
 0x2ea   :  { %v2975_v2 = vld [vmem:[#allocation3 + $0x94] sm:$0x1]  ;;  %v1364_v10 = vld [vmem:[#allocation2 + $0x7c] sm:$0x1]  ;;  %v2495_v49 = vshll.u32 %v2363_v38, 16  ;;  %v2501_v11 = vshll.u32 %v2364_v1, 16  ;;  %v7595_v48 = vcombine.low %v1545_v19, %v1559_v35  ;;  %1877 = vrot.lane.b32.xlu1 %v7606_v25, %s8729_s25  ;;  %v3033_v35 = vpop.permute.xlu1 %3032 }
 0x2eb   :  { %v2506_v15 = vshrl.u32 %v2365_v30, 16  ;;  %v1365_v45 = vsel %vm9054_vm5, %v1242_v44, %v1364_v10  ;;  %v2509_v42 = vshll.u32 %v2365_v30, 16  ;;  %v2515_v46 = vshll.u32 %v2366_v40, 16  ;;  %v2367_v62 = vld [vmem:[#allocation2 + $0x70] sm:$0xf]  ;;  %v3041_v10 = vpop.permute.xlu0 %3040 }
 0x2ec   :  { %v2368_v34 = vld [vmem:[#allocation2 + $0x74] sm:$0x1]  ;;  %1366 = vst [vmem:[#allocation2 + $0x7c] sm:$0x1] %v1365_v45  ;;  %v2497_v16 = vrot.slane %v2495_v49, 5  ;;  %v2503_v39 = vrot.slane %v2501_v11, 5  ;;  %1831 = vrot.lane.b32.xlu0 %v7595_v48, %s8746_s7 }
 0x2ed   :  { %v2508_v24 = vrot.slane %v2506_v15, 4  ;;  %v2967_v58 = vsel %vm9066_vm10, 0, %v2966_v3  ;;  %v1657_v56 = vld [vmem:[#allocation2 + $0x80] sm:$0xe]  ;;  %v2511_v38 = vrot.slane %v2509_v42, 5  ;;  %v2517_v63 = vrot.slane %v2515_v46, 5 }
 0x2ee   :  { %2968 = vst [vmem:[#allocation3 + $0x7c] sm:$0x1] %v2967_v58  ;;  %v2970_v12 = vsel %vm9066_vm10, 0, %v2969_v37  ;;  %v2976_v52 = vsel %vm9066_vm10, 0, %v2975_v2  ;;  %v10124_v30 = vld [vmem:[#allocation2 + $0x80] sm:$0xf]  ;;  %v2498_v0 = vor.u32 %v2497_v16, %v2494_v28 }
 0x2ef   :  { %v3154_v47 = vld [vmem:[#allocation3 + $0x80] sm:$0xf]  ;;  %2971 = vst [vmem:[#allocation3 + $0x84] sm:$0x1] %v2970_v12  ;;  %2977 = vst [vmem:[#allocation3 + $0x94] sm:$0x1] %v2976_v52  ;;  %v2512_v8 = vor.u32 %v2511_v38, %v2508_v24 }
 0x2f0   :  { %v7580_v32 = vrot.slane %v1657_v56, 9  ;;  %v2520_v43 = vshrl.u32 %v2367_v62, 16  ;;  %v2523_v1 = vshll.u32 %v2367_v62, 16  ;;  %v3155_v14 = vsel %vm9082_vm12, %v3031_v41, %v3154_v47  ;;  %v1414_v18 = vld [vmem:[#allocation2 + $0x84] sm:$0x1] }
 0x2f1   :  { %v2529_v27 = vshll.u32 %v2368_v34, 16  ;;  %v1603_v44 = vshrl.u32 %v10124_v30, 16  ;;  %3156 = vst [vmem:[#allocation3 + $0x80] sm:$0xf] %v3155_v14  ;;  %v2499_v57 = vrot.slane %v2498_v0, 4  ;;  %v2513_v59 = vrot.slane %v2512_v8, 4 }
 0x2f2   :  { %v1656_v22 = vld [vmem:[#allocation2 + $0x78] sm:$0xe]  ;;  %v2522_v31 = vrot.slane %v2520_v43, 4  ;;  %v1612_v6 = vshll.u32 %v1414_v18, 16  ;;  %v1749_v3 = vrot.slane %v1414_v18, 5  ;;  %v2525_v25 = vrot.slane %v2523_v1, 5 }
 0x2f3   :  { %v7579_v40 = vrot.slane %v1656_v22, 9  ;;  %v2369_v19 = vld [vmem:[#allocation2 + $0x78] sm:$0xf]  ;;  %v2504_v23 = vsel %vm9512_vm3, %v2499_v57, %v2503_v39  ;;  %v2531_v28 = vrot.slane %v2529_v27, 5  ;;  %v2518_v2 = vsel %vm9512_vm3, %v2513_v59, %v2517_v63  ;;  %v1413_v49 = vld [vmem:[#allocation2 + $0x7c] sm:$0x1] }
 0x2f4   :  { %v2534_v37 = vshrl.u32 %v2369_v19, 16  ;;  %v10135_v11 = vrot.slane %v1612_v6, 5  ;;  %v1750_v15 = vsel %vm9501_vm2, %v7580_v32, %v1749_v3  ;;  %v2537_v48 = vshll.u32 %v2369_v19, 16  ;;  %v1397_v45 = vld [vmem:[#allocation2 + $0x78] sm:$0xf] }
 0x2f5   :  { %v7634_v42 = vcombine.low %v2504_v23, %v2518_v2  ;;  %v3151_v46 = vld [vmem:[#allocation3 + $0x7c] sm:$0x1]  ;;  %v1745_v62 = vrot.slane %v1413_v49, 5  ;;  %v1598_v34 = vshll.u32 %v1413_v49, 16  ;;  %v2526_v16 = vor.u32 %v2525_v25, %v2522_v31  ;;  %v1399_v0 = vld [vmem:[#allocation2 + $0x88] sm:$0xf] }
 0x2f6   :  { %v2370_v41 = vld [vmem:[#allocation2 + $0x7c] sm:$0x1]  ;;  %v3152_v39 = vsel %vm9047_vm4, %v3029_v26, %v3151_v46  ;;  %v3157_v24 = vld [vmem:[#allocation3 + $0x84] sm:$0x1]  ;;  %v3169_v58 = vld [vmem:[#allocation3 + $0x94] sm:$0x1]  ;;  %v3677_v63 = vor.u32 %v9801_v4, %v9796_v54 }
 0x2f7   :  { %v2536_v56 = vrot.slane %v2534_v37, 4  ;;  %v2539_v38 = vrot.slane %v2537_v48, 5  ;;  %2659 = vrot.lane.b32.xlu0 %v7634_v42, %s8729_s25  ;;  %3153 = vst [vmem:[#allocation3 + $0x7c] sm:$0x1] %v3152_v39  ;;  %v3158_v12 = vsel %vm9047_vm4, %v3033_v35, %v3157_v24  ;;  %v3170_v52 = vsel %vm9047_vm4, %v3041_v10, %v3169_v58  ;;  %v1400_v22 = vld [vmem:[#allocation2 + $0x90] sm:$0xf] }
 0x2f8   :  { %v1746_v47 = vsel %vm9501_vm2, %v7579_v40, %v1745_v62  ;;  %v1600_v26 = vrot.slane %v1598_v34, 5  ;;  %3159 = vst [vmem:[#allocation3 + $0x84] sm:$0x1] %v3158_v12  ;;  %3171 = vst [vmem:[#allocation3 + $0x94] sm:$0x1] %v3170_v52  ;;  %v2527_v43 = vrot.slane %v2526_v16, 4 }
 0x2f9   :  { %v7605_v32 = vcombine.low %v1746_v47, %v1750_v15  ;;  %v2540_v1 = vor.u32 %v2539_v38, %v2536_v56  ;;  %v2543_v14 = vshll.u32 %v2370_v41, 16  ;;  %v1589_v8 = vshrl.u32 %v1397_v45, 16  ;;  %v3930_v40 = vld [vmem:[#allocation3 + $0x3c] sm:$0x1]  ;;  %v3929_v37 = vld [vmem:[#allocation3 + $0x34] sm:$0x1] }
 0x2fa   :  { %v1592_v27 = vshll.u32 %v1397_v45, 16  ;;  %v1605_v57 = vrot.slane %v1603_v44, 4  ;;  %v1606_v18 = vshll.u32 %v10124_v30, 16  ;;  %v2532_v9 = vsel %vm9512_vm3, %v2527_v43, %v2531_v28  ;;  %v2375_v10 = vld [vmem:[#allocation2 + $0x90] sm:$0xf] }
 0x2fb   :  { %v2541_v31 = vrot.slane %v2540_v1, 4  ;;  %v2545_v59 = vrot.slane %v2543_v14, 5  ;;  %v1617_v6 = vshrl.u32 %v1399_v0, 16  ;;  %1875 = vrot.lane.b32.xlu0 %v7605_v32, %s8729_s25  ;;  %v1591_v3 = vrot.slane %v1589_v8, 4  ;;  %v2376_v38 = vld [vmem:[#allocation2 + $0x94] sm:$0x1] }
 0x2fc   :  { %v1594_v19 = vrot.slane %v1592_v27, 5  ;;  %v1608_v23 = vrot.slane %v1606_v18, 5  ;;  %v1620_v25 = vshll.u32 %v1399_v0, 16  ;;  %v1631_v30 = vshrl.u32 %v1400_v22, 16  ;;  %v2377_v32 = vld [vmem:[#allocation2 + $0x98] sm:$0xf] }
 0x2fd   :  { %v2546_v44 = vsel %vm9512_vm3, %v2541_v31, %v2545_v59  ;;  %v1619_v2 = vrot.slane %v1617_v6, 4  ;;  %v1634_v35 = vshll.u32 %v1400_v22, 16  ;;  %v4007_v46 = vshll.u32 %v3929_v37, 16  ;;  %v2378_v43 = vld [vmem:[#allocation2 + $0x9c] sm:$0x1] }
 0x2fe   :  { %v7635_v49 = vcombine.low %v2532_v9, %v2546_v44  ;;  %v1595_v28 = vor.u32 %v1594_v19, %v1591_v3  ;;  %v1609_v15 = vor.u32 %v1608_v23, %v1605_v57  ;;  %v1622_v48 = vrot.slane %v1620_v25, 5  ;;  %v2371_v18 = vld [vmem:[#allocation2 + $0x80] sm:$0xf]  ;;  %v2373_v31 = vld [vmem:[#allocation2 + $0x88] sm:$0xf] }
 0x2ff   :  { %v1633_v45 = vrot.slane %v1631_v30, 4  ;;  %v1636_v42 = vrot.slane %v1634_v35, 5  ;;  %v4021_v62 = vshll.u32 %v3930_v40, 16  ;;  %v2576_v39 = vshrl.u32 %v2375_v10, 16  ;;  %v2372_v3 = vld [vmem:[#allocation2 + $0x84] sm:$0x1]  ;;  %v10175_v35 = vpop.permute.xlu0 %4381 }
 0x300   :  { %2661 = vrot.lane.b32.xlu1 %v7635_v49, %s8729_s25  ;;  %v1596_v34 = vrot.slane %v1595_v28, 4  ;;  %v1610_v41 = vrot.slane %v1609_v15, 4  ;;  %v1623_v16 = vor.u32 %v1622_v48, %v1619_v2  ;;  %v4009_v58 = vrot.slane %v4007_v46, 5  ;;  %v2374_v25 = vld [vmem:[#allocation2 + $0x8c] sm:$0x1] }
 0x301   :  { %v1637_v24 = vor.u32 %v1636_v42, %v1633_v45  ;;  %v4023_v56 = vrot.slane %v4021_v62, 5  ;;  %v2579_v12 = vshll.u32 %v2375_v10, 16  ;;  %v2578_v1 = vrot.slane %v2576_v39, 4  ;;  %v10178_v15 = vld [vmem:[#allocation3 + $0x3c] sm:$0x1]  ;;  %v10181_v45 = vpop.permute.xlu1 %4439 }
 0x302   :  { %v1601_v52 = vsel %vm9512_vm3, %v1596_v34, %v1600_v26  ;;  %v1615_v47 = vsel %vm9512_vm3, %v1610_v41, %v10135_v11  ;;  %v1624_v0 = vrot.slane %v1623_v16, 4  ;;  %v4010_v27 = vsel %vm9512_vm3, %v9915_v51, %v4009_v58  ;;  %v10183_v34 = vld [vmem:[#allocation3 + $0x44] sm:$0x1]  ;;  %v3811_v13 = vld [vmem:[#allocation3 + $0x90] sm:$0xe] }
 0x303   :  { %v7597_v14 = vcombine.low %v1601_v52, %v1615_v47  ;;  %v1638_v8 = vrot.slane %v1637_v24, 4  ;;  %v4024_v57 = vsel %vm9512_vm3, %v9781_v55, %v4023_v56  ;;  %v2581_v22 = vrot.slane %v2579_v12, 5  ;;  %v3178_v52 = vld [vmem:[#allocation3 + $0x30] sm:$0xf] }
 0x304   :  { %v1629_v26 = vsel %vm9512_vm3, %v1624_v0, %v10109_v29  ;;  %v7759_v11 = vcombine.low %v4010_v27, %v4024_v57  ;;  %v2585_v9 = vshll.u32 %v2376_v38, 16  ;;  %v2590_v51 = vshrl.u32 %v2377_v32, 16  ;;  %v8275_v57 = vld [vmem:[#allocation12 + $0x40] sm:$0xff]  }
 0x305   :  { %1835 = vrot.lane.b32.xlu0 %v7597_v14, %s8746_s7  ;;  %v1643_v59 = vsel %vm9512_vm3, %v1638_v8, %v10094_v61  ;;  %v2593_v6 = vshll.u32 %v2377_v32, 16  ;;  %v2599_v40 = vshll.u32 %v2378_v43, 16  ;;  %v2582_v19 = vor.u32 %v2581_v22, %v2578_v1  ;;  %v3179_v1 = vld [vmem:[#allocation3 + $0x38] sm:$0xf]  ;;  %v10199_v8 = vpop.permute.xlu0 %1865  ;;  %v10201_v27 = vpop.permute.xlu1 %4437  ;;  %7980 = vmatprep.subr.bf16.mxu1 %v8275_v57 }
 0x306   :  { %v7598_v55 = vcombine.low %v1629_v26, %v1643_v59  ;;  %v2587_v23 = vrot.slane %v2585_v9, 5  ;;  %v2548_v37 = vshrl.u32 %v2371_v18, 16  ;;  %v2592_v29 = vrot.slane %v2590_v51, 4  ;;  %v3802_v26 = vld [vmem:[#allocation3 + $0x38] sm:$0xe] }
 0x307   :  { %v2595_v44 = vrot.slane %v2593_v6, 5  ;;  %v2601_v2 = vrot.slane %v2599_v40, 5  ;;  %v2551_v30 = vshll.u32 %v2371_v18, 16  ;;  %v2583_v10 = vrot.slane %v2582_v19, 4  ;;  %v3803_v59 = vld [vmem:[#allocation3 + $0x40] sm:$0xe] }
 0x308   :  { %1837 = vrot.lane.b32.xlu1 %v7598_v55, %s8746_s7  ;;  %v2550_v49 = vrot.slane %v2548_v37, 4  ;;  %v2557_v61 = vshll.u32 %v2372_v3, 16  ;;  %v2562_v28 = vshrl.u32 %v2373_v31, 16  ;;  %v2565_v46 = vshll.u32 %v2373_v31, 16  ;;  %v10210_v55 = vld [vmem:[#allocation3 + $0x40] sm:$0xf] }
 0x309   :  { %4617 = vrot.lane.b32.xlu0 %v7759_v11, %s8749_s18  ;;  %v2596_v48 = vor.u32 %v2595_v44, %v2592_v29  ;;  %v2553_v42 = vrot.slane %v2551_v30, 5  ;;  %v2571_v62 = vshll.u32 %v2374_v25, 16  ;;  %v2588_v41 = vsel %vm9512_vm3, %v2583_v10, %v2587_v23  ;;  %v10212_v19 = vld [vmem:[#allocation3 + $0x48] sm:$0xf]  ;;  %v10216_v44 = vpop.permute.xlu0 %1863 }
 0x30a   :  { %v2559_v16 = vrot.slane %v2557_v61, 5  ;;  %v2564_v39 = vrot.slane %v2562_v28, 4  ;;  %v3664_v24 = vrot.slane %v3663_v50, 4  ;;  %v2567_v38 = vrot.slane %v2565_v46, 5  ;;  %v10218_v61 = vld [vmem:[#allocation3 + $0x54] sm:$0x1] }
 0x30b   :  { %v2597_v58 = vrot.slane %v2596_v48, 4  ;;  %v2554_v56 = vor.u32 %v2553_v42, %v2550_v49  ;;  %v2573_v12 = vrot.slane %v2571_v62, 5  ;;  %v3666_v47 = vshll.u32 %v10178_v15, 16  ;;  %v3436_v28 = vld [vmem:[#allocation3 + $0x50] sm:$0xe]  ;;  %v10223_v62 = vpop.permute.xlu1 %4573 }
 0x30c   :  { %v3678_v0 = vrot.slane %v3677_v63, 4  ;;  %v3680_v32 = vshll.u32 %v10183_v34, 16  ;;  %v3870_v43 = vrot.slane %v10178_v15, 5  ;;  %v2568_v50 = vor.u32 %v2567_v38, %v2564_v39 }
 0x30d   :  { %v2602_v60 = vsel %vm9512_vm3, %v2597_v58, %v2601_v2  ;;  %v2555_v36 = vrot.slane %v2554_v56, 4  ;;  %v3874_v14 = vrot.slane %v10183_v34, 5  ;;  %v3668_v54 = vrot.slane %v3666_v47, 5  ;;  %v10225_v34 = vld [vmem:[#allocation3 + $0x60] sm:$0xf] }
 0x30e   :  { %v7637_v18 = vcombine.low %v2588_v41, %v2602_v60  ;;  %v3682_v4 = vrot.slane %v3680_v32, 5  ;;  %v3289_v63 = vshrl.u32 %v3178_v52, 16  ;;  %v2569_v22 = vrot.slane %v2568_v50, 4  ;;  %v10234_v58 = vld [vmem:[#allocation3 + $0x5c] sm:$0x1] }
 0x30f   :  { %v2560_v11 = vsel %vm9512_vm3, %v2555_v36, %v2559_v16  ;;  %v3292_v9 = vshll.u32 %v3178_v52, 16  ;;  %v3303_v31 = vshrl.u32 %v3179_v1, 16  ;;  %v3669_v51 = vsel %vm9512_vm3, %v3664_v24, %v3668_v54  ;;  %v3437_v56 = vld [vmem:[#allocation3 + $0x58] sm:$0xe]  ;;  %v3931_v50 = vld [vmem:[#allocation3 + $0x44] sm:$0x1] }
 0x310   :  { %2665 = vrot.lane.b32.xlu1 %v7637_v18, %s8729_s25  ;;  %v3683_v6 = vsel %vm9512_vm3, %v3678_v0, %v3682_v4  ;;  %v3291_v40 = vrot.slane %v3289_v63, 4  ;;  %v3306_v3 = vshll.u32 %v3179_v1, 16  ;;  %v2574_v23 = vsel %vm9512_vm3, %v2569_v22, %v2573_v12  ;;  %v10236_v0 = vld [vmem:[#allocation3 + $0x58] sm:$0xf]  ;;  %v3932_v54 = vld [vmem:[#allocation3 + $0x4c] sm:$0x1]  ;;  %v10243_v4 = vpop.permute.xlu0 %4517 }
 0x311   :  { %v7736_v25 = vcombine.low %v3669_v51, %v3683_v6  ;;  %v3294_v37 = vrot.slane %v3292_v9, 5  ;;  %v3305_v29 = vrot.slane %v3303_v31, 4  ;;  %v7636_v2 = vcombine.low %v2560_v11, %v2574_v23  ;;  %v10252_v22 = vld [vmem:[#allocation3 + $0x5c] sm:$0x1] }
 0x312   :  { %v3308_v30 = vrot.slane %v3306_v3, 5  ;;  %v7675_v10 = vrot.slane %v3802_v26, 9  ;;  %v7676_v49 = vrot.slane %v3803_v59, 9  ;;  %v4026_v48 = vshrl.u32 %v10210_v55, 16 }
 0x313   :  { %v3295_v15 = vor.u32 %v3294_v37, %v3291_v40  ;;  %v4029_v42 = vshll.u32 %v10210_v55, 16  ;;  %v4040_v46 = vshrl.u32 %v10212_v19, 16  ;;  %2663 = vrot.lane.b32.xlu0 %v7636_v2, %s8729_s25  ;;  %v4043_v24 = vshll.u32 %v10212_v19, 16  ;;  %v10262_v37 = vld [vmem:[#allocation3 + $0x64] sm:$0x1] }
 0x314   :  { %4483 = vrot.lane.b32.xlu1 %v7736_v25, %s8729_s25  ;;  %v3309_v41 = vor.u32 %v3308_v30, %v3305_v29  ;;  %v3871_v16 = vsel %vm9501_vm2, %v7675_v10, %v3870_v43  ;;  %v3875_v39 = vsel %vm9501_vm2, %v7676_v49, %v3874_v14  ;;  %v4028_v52 = vrot.slane %v4026_v48, 4  ;;  %v3180_v48 = vld [vmem:[#allocation3 + $0x50] sm:$0xf] }
 0x315   :  { %v3296_v38 = vrot.slane %v3295_v15, 4  ;;  %v7744_v12 = vcombine.low %v3871_v16, %v3875_v39  ;;  %v4031_v47 = vrot.slane %v4029_v42, 5  ;;  %v4042_v1 = vrot.slane %v4040_v46, 4  ;;  %v10268_v39 = vpop.permute.xlu0 %4383 }
 0x316   :  { %v3310_v32 = vrot.slane %v3309_v41, 4  ;;  %v4045_v60 = vrot.slane %v4043_v24, 5  ;;  %v7661_v36 = vrot.slane %v3436_v28, 9  ;;  %v3510_v14 = vrot.slane %v10218_v61, 5 }
 0x317   :  { %v3301_v43 = vsel %vm9512_vm3, %v3296_v38, %v10005_v5  ;;  %v7662_v57 = vrot.slane %v3437_v56, 9  ;;  %v3514_v18 = vrot.slane %v10234_v58, 5  ;;  %v3685_v26 = vshrl.u32 %v10236_v0, 16 }
 0x318   :  { %v3315_v63 = vsel %vm9512_vm3, %v3310_v32, %v10008_v20  ;;  %4523 = vrot.lane.b32.xlu1 %v7744_v12, %s8747_s28  ;;  %v3688_v11 = vshll.u32 %v10236_v0, 16  ;;  %v3699_v5 = vshrl.u32 %v10225_v34, 16  ;;  %v3511_v31 = vsel %vm9501_vm2, %v7661_v36, %v3510_v14  ;;  %v10259_v20 = vpop.permute.xlu1 %4519  ;;  %v3181_v12 = vld [vmem:[#allocation3 + $0x58] sm:$0xf] }
 0x319   :  { %v7712_v9 = vcombine.low %v3301_v43, %v3315_v63  ;;  %v3515_v59 = vsel %vm9501_vm2, %v7662_v57, %v3514_v18  ;;  %v3702_v51 = vshll.u32 %v10225_v34, 16  ;;  %v4032_v40 = vor.u32 %v4031_v47, %v4028_v52  ;;  %v10281_v63 = vpop.permute.xlu0 %4575 }
 0x31a   :  { %v7721_v6 = vcombine.low %v3511_v31, %v3515_v59  ;;  %v4035_v3 = vshll.u32 %v3931_v50, 16  ;;  %v4046_v23 = vor.u32 %v4045_v60, %v4042_v1  ;;  %v4049_v25 = vshll.u32 %v3932_v54, 16  ;;  %v3805_v54 = vld [vmem:[#allocation3 + $0x60] sm:$0xe]  ;;  %12100 = vst [vmem:[#allocation74_spill] sm:$0xff] %v10281_v63 }
 0x31b   :  { %4347 = vrot.lane.b32.xlu0 %v7712_v9, %s8748_s17  ;;  %v3687_v29 = vrot.slane %v3685_v26, 4  ;;  %v3690_v2 = vrot.slane %v3688_v11, 5  ;;  %v3694_v30 = vshll.u32 %v10252_v22, 16  ;;  %v4033_v10 = vrot.slane %v4032_v40, 4  ;;  %v3804_v31 = vld [vmem:[#allocation3 + $0x58] sm:$0xe] }
 0x31c   :  { %4389 = vrot.lane.b32.xlu1 %v7721_v6, %s8743_s13  ;;  %v4037_v49 = vrot.slane %v4035_v3, 5  ;;  %v4047_v28 = vrot.slane %v4046_v23, 4  ;;  %v3701_v15 = vrot.slane %v3699_v5, 4  ;;  %v7752_v42 = vcombine.low %v10210_v55, %v10212_v19  ;;  %v10276_v19 = vpop.permute.xlu1 %4341  ;;  %v10290_v59 = vld [vmem:[#allocation3 + $0x60] sm:$0xf] }
 0x31d   :  { %v4051_v46 = vrot.slane %v4049_v25, 5  ;;  %v3691_v41 = vor.u32 %v3690_v2, %v3687_v29  ;;  %v3704_v16 = vrot.slane %v3702_v51, 5  ;;  %v3696_v56 = vrot.slane %v3694_v30, 5  ;;  %v3918_v25 = vld [vmem:[#allocation3 + $0x68] sm:$0xf]  ;;  %v10296_v30 = vpop.permute.xlu0 %4441 }
 0x31e   :  { %v4038_v24 = vsel %vm9512_vm3, %v4033_v10, %v4037_v49  ;;  %v3708_v38 = vshll.u32 %v10262_v37, 16  ;;  %v3317_v55 = vshrl.u32 %v3180_v48, 16  ;;  %v3320_v36 = vshll.u32 %v3180_v48, 16 }
 0x31f   :  { %4579 = vrot.lane.b32.xlu0 %v7752_v42, %s8746_s7  ;;  %v4052_v52 = vsel %vm9512_vm3, %v4047_v28, %v4051_v46  ;;  %v3692_v47 = vrot.slane %v3691_v41, 4  ;;  %v3705_v32 = vor.u32 %v3704_v16, %v3701_v15  ;;  %v3326_v50 = vshll.u32 %v10218_v61, 16  ;;  %v3438_v42 = vld [vmem:[#allocation3 + $0x60] sm:$0xe] }
 0x320   :  { %v7760_v1 = vcombine.low %v4038_v24, %v4052_v52  ;;  %v3710_v60 = vrot.slane %v3708_v38, 5  ;;  %v7729_v43 = vcombine.low %v10236_v0, %v10225_v34  ;;  %v3319_v57 = vrot.slane %v3317_v55, 4  ;;  %v10292_v51 = vpop.permute.xlu1 %4443  ;;  %v10307_v24 = vld [vmem:[#allocation3 + $0x64] sm:$0x1]  ;;  %v10309_v52 = vld [vmem:[#allocation3 + $0x6c] sm:$0x1] }
 0x321   :  { %v3706_v14 = vrot.slane %v3705_v32, 4  ;;  %v3331_v18 = vshrl.u32 %v3181_v12, 16  ;;  %v3697_v26 = vsel %vm9512_vm3, %v3692_v47, %v3696_v56  ;;  %v3322_v11 = vrot.slane %v3320_v36, 5  ;;  %12101 = vst [vmem:[#allocation75_spill] sm:$0xff] %v10292_v51  ;;  %v3439_v56 = vld [vmem:[#allocation3 + $0x68] sm:$0xe] }
 0x322   :  { %4619 = vrot.lane.b32.xlu1 %v7760_v1, %s8749_s18  ;;  %v3334_v5 = vshll.u32 %v3181_v12, 16  ;;  %v3340_v9 = vshll.u32 %v10234_v58, 16  ;;  %v3878_v61 = vrot.slane %v10252_v22, 5  ;;  %v3882_v34 = vrot.slane %v10262_v37, 5  ;;  %v3550_v47 = vld [vmem:[#allocation3 + $0x68] sm:$0xf] }
 0x323   :  { %4445 = vrot.lane.b32.xlu0 %v7729_v43, %s8745_s8  ;;  %v3333_v0 = vrot.slane %v3331_v18, 4  ;;  %v3711_v6 = vsel %vm9512_vm3, %v3706_v14, %v3710_v60  ;;  %v3323_v40 = vor.u32 %v3322_v11, %v3319_v57  ;;  %v3328_v3 = vrot.slane %v3326_v50, 5  ;;  %v3551_v50 = vld [vmem:[#allocation3 + $0x70] sm:$0xf]  ;;  %v2101_v51 = vld [vmem:[#allocation2 + $0x2c] sm:$0x1] }
 0x324   :  { %v3336_v23 = vrot.slane %v3334_v5, 5  ;;  %v7737_v58 = vcombine.low %v3697_v26, %v3711_v6  ;;  %v3342_v29 = vrot.slane %v3340_v9, 5  ;;  %v7677_v2 = vrot.slane %v3804_v31, 9  ;;  %v10311_v32 = vpop.permute.xlu1 %1825  ;;  %v10317_v26 = vpop.permute.xlu0 %2651 }
 0x325   :  { %v3324_v22 = vrot.slane %v3323_v40, 4  ;;  %v7678_v37 = vrot.slane %v3805_v54, 9  ;;  %v4054_v49 = vshrl.u32 %v10290_v59, 16  ;;  %v4057_v15 = vshll.u32 %v10290_v59, 16  ;;  %v3933_v54 = vld [vmem:[#allocation3 + $0x64] sm:$0x1] }
 0x326   :  { %v3337_v10 = vor.u32 %v3336_v23, %v3333_v0  ;;  %v3879_v28 = vsel %vm9501_vm2, %v7677_v2, %v3878_v61  ;;  %v4068_v48 = vshrl.u32 %v3918_v25, 16  ;;  %v4071_v36 = vshll.u32 %v3918_v25, 16  ;;  %v3934_v61 = vld [vmem:[#allocation3 + $0x6c] sm:$0x1] }
 0x327   :  { %4485 = vrot.lane.b32.xlu0 %v7737_v58, %s8729_s25  ;;  %v3329_v46 = vsel %vm9512_vm3, %v3324_v22, %v3328_v3  ;;  %v3883_v16 = vsel %vm9501_vm2, %v7678_v37, %v3882_v34  ;;  %v4056_v12 = vrot.slane %v4054_v49, 4  ;;  %v4059_v1 = vrot.slane %v4057_v15, 5  ;;  %v10324_v3 = vld [vmem:[#allocation3 + $0x6c] sm:$0x1]  ;;  %v10328_v37 = vld [vmem:[#allocation3 + $0x74] sm:$0x1] }
 0x328   :  { %v3338_v41 = vrot.slane %v3337_v10, 4  ;;  %v7745_v38 = vcombine.low %v3879_v28, %v3883_v16  ;;  %v4070_v60 = vrot.slane %v4068_v48, 4  ;;  %v7663_v14 = vrot.slane %v3438_v42, 9 }
 0x329   :  { %v3518_v57 = vrot.slane %v10307_v24, 5  ;;  %v7664_v18 = vrot.slane %v3439_v56, 9  ;;  %v4073_v11 = vrot.slane %v4071_v36, 5  ;;  %v3522_v5 = vrot.slane %v10309_v52, 5 }
 0x32a   :  { %v3343_v55 = vsel %vm9512_vm3, %v3338_v41, %v3342_v29  ;;  %v3713_v9 = vshrl.u32 %v3550_v47, 16  ;;  %v3716_v31 = vshll.u32 %v3550_v47, 16  ;;  %v7753_v34 = vcombine.low %v10290_v59, %v3918_v25  ;;  %v10330_v59 = vpop.permute.xlu1 %4479 }
 0x32b   :  { %v7713_v43 = vcombine.low %v3329_v46, %v3343_v55  ;;  %4525 = vrot.lane.b32.xlu0 %v7745_v38, %s8747_s28  ;;  %v3519_v0 = vsel %vm9501_vm2, %v7663_v14, %v3518_v57  ;;  %v3727_v6 = vshrl.u32 %v3551_v50, 16  ;;  %v3730_v40 = vshll.u32 %v3551_v50, 16  ;;  %v10335_v38 = vpop.permute.xlu0 %4477 }
 0x32c   :  { %v3523_v23 = vsel %vm9501_vm2, %v7664_v18, %v3522_v5  ;;  %v4060_v58 = vor.u32 %v4059_v1, %v4056_v12  ;;  %v4063_v29 = vshll.u32 %v3933_v54, 16  ;;  %v4074_v2 = vor.u32 %v4073_v11, %v4070_v60  ;;  %v2094_v60 = vld [vmem:[#allocation2 + $0x10] sm:$0xf]  ;;  %v2096_v18 = vld [vmem:[#allocation2 + $0x18] sm:$0xf] }
 0x32d   :  { %4349 = vrot.lane.b32.xlu1 %v7713_v43, %s8748_s17  ;;  %v7722_v22 = vcombine.low %v3519_v0, %v3523_v23  ;;  %v4077_v10 = vshll.u32 %v3934_v61, 16  ;;  %v3715_v49 = vrot.slane %v3713_v9, 4  ;;  %v3718_v28 = vrot.slane %v3716_v31, 5  ;;  %v2095_v11 = vld [vmem:[#allocation2 + $0x14] sm:$0x1] }
 0x32e   :  { %v4061_v25 = vrot.slane %v4060_v58, 4  ;;  %v4065_v15 = vrot.slane %v4063_v29, 5  ;;  %v4075_v48 = vrot.slane %v4074_v2, 4  ;;  %v3722_v42 = vshll.u32 %v10324_v3, 16  ;;  %v2097_v31 = vld [vmem:[#allocation2 + $0x1c] sm:$0x1]  ;;  %v10343_v0 = vpop.permute.xlu1 %4577 }
 0x32f   :  { %4391 = vrot.lane.b32.xlu0 %v7722_v22, %s8743_s13  ;;  %v4079_v46 = vrot.slane %v4077_v10, 5  ;;  %v3719_v41 = vor.u32 %v3718_v28, %v3715_v49  ;;  %v3729_v16 = vrot.slane %v3727_v6, 4  ;;  %v3732_v56 = vrot.slane %v3730_v40, 5  ;;  %12102 = vst [vmem:[#allocation76_spill] sm:$0xff] %v10343_v0  ;;  %v8329_v6 = vld [vmem:[#allocation2 + $0x20] sm:$0xf]  ;;  %v10350_v28 = vpop.permute.xlu0 %4613 }
 0x330   :  { %v4066_v12 = vsel %vm9512_vm3, %v4061_v25, %v4065_v15  ;;  %v3724_v55 = vrot.slane %v3722_v42, 5  ;;  %v3736_v1 = vshll.u32 %v10328_v37, 16  ;;  %v7730_v36 = vcombine.low %v3550_v47, %v3551_v50  ;;  %v8328_v50 = vld [vmem:[#allocation2 + $0x18] sm:$0xf]  ;;  %v3182_v49 = vld [vmem:[#allocation3 + $0x60] sm:$0xf] }
 0x331   :  { %4581 = vrot.lane.b32.xlu1 %v7753_v34, %s8746_s7  ;;  %v4080_v43 = vsel %vm9512_vm3, %v4075_v48, %v4079_v46  ;;  %v3720_v14 = vrot.slane %v3719_v41, 4  ;;  %v3733_v57 = vor.u32 %v3732_v56, %v3729_v16  ;;  %vm1879_vm4 = vcmask 261120   ;;  %v3183_v46 = vld [vmem:[#allocation3 + $0x68] sm:$0xf] }
 0x332   :  { %v7761_v54 = vcombine.low %v4066_v12, %v4080_v43  ;;  %v3738_v9 = vrot.slane %v3736_v1, 5  ;;  %v2151_v61 = vshrl.u32 %v2094_v60, 16  ;;  %v2154_v34 = vshll.u32 %v2094_v60, 16 }
 0x333   :  { %v3734_v5 = vrot.slane %v3733_v57, 4  ;;  %v3725_v47 = vsel %vm9512_vm3, %v3720_v14, %v3724_v55  ;;  %v7584_v40 = vcombine.low %v8328_v50, %v8329_v6  ;;  %v2165_v23 = vshrl.u32 %v2096_v18, 16  ;;  %v10367_v50 = vpop.permute.xlu0 %4343 }
 0x334   :  { %4621 = vrot.lane.b32.xlu0 %v7761_v54, %s8749_s18  ;;  %v2168_v58 = vshll.u32 %v2096_v18, 16  ;;  %v2153_v2 = vrot.slane %v2151_v61, 4  ;;  %v2156_v22 = vrot.slane %v2154_v34, 5  ;;  %v2160_v10 = vshll.u32 %v2095_v11, 16  ;;  %v10359_v54 = vpop.permute.xlu1 %1823 }
 0x335   :  { %4447 = vrot.lane.b32.xlu1 %v7730_v36, %s8745_s8  ;;  %v3739_v29 = vsel %vm9512_vm3, %v3734_v5, %v3738_v9  ;;  %v2167_v15 = vrot.slane %v2165_v23, 4  ;;  %v2174_v42 = vshll.u32 %v2097_v31, 16  ;;  %v3886_v41 = vrot.slane %v10324_v3, 5  ;;  %v3806_v36 = vld [vmem:[#allocation3 + $0x68] sm:$0xe] }
 0x336   :  { %v7738_v25 = vcombine.low %v3725_v47, %v3739_v29  ;;  %v2170_v48 = vrot.slane %v2168_v58, 5  ;;  %v3890_v16 = vrot.slane %v10328_v37, 5  ;;  %v2157_v56 = vor.u32 %v2156_v22, %v2153_v2  ;;  %v3807_v3 = vld [vmem:[#allocation3 + $0x70] sm:$0xe]  ;;  %v10369_v22 = vld [vmem:[#allocation3 + $0x78] sm:$0xf] }
 0x337   :  { %v1885_v12 = vsel %vm1879_vm4, %v7584_v40, %v10311_v32  ;;  %v3345_v55 = vshrl.u32 %v3182_v49, 16  ;;  %v3348_v1 = vshll.u32 %v3182_v49, 16  ;;  %v3354_v60 = vshll.u32 %v10307_v24, 16  ;;  %v10361_v31 = vld [vmem:[#allocation3 + $0x70] sm:$0xf] }
 0x338   :  { %v2171_v43 = vor.u32 %v2170_v48, %v2167_v15  ;;  %v3359_v14 = vshrl.u32 %v3183_v46, 16  ;;  %v3362_v57 = vshll.u32 %v3183_v46, 16  ;;  %v3368_v18 = vshll.u32 %v10309_v52, 16  ;;  %v10377_v48 = vld [vmem:[#allocation3 + $0x74] sm:$0x1] }
 0x339   :  { %4487 = vrot.lane.b32.xlu1 %v7738_v25, %s8729_s25  ;;  %v2162_v37 = vrot.slane %v2160_v10, 5  ;;  %v2176_v11 = vrot.slane %v2174_v42, 5  ;;  %v3347_v5 = vrot.slane %v3345_v55, 4  ;;  %v3350_v9 = vrot.slane %v3348_v1, 5  ;;  %v3440_v42 = vld [vmem:[#allocation3 + $0x70] sm:$0xe] }
 0x33a   :  { %v2158_v61 = vrot.slane %v2157_v56, 4  ;;  %v10365_v34 = vsel %vm1904_vm6, %v1885_v12, %v10199_v8  ;;  %v3361_v24 = vrot.slane %v3359_v14, 4  ;;  %v3364_v47 = vrot.slane %v3362_v57, 5  ;;  %v3441_v1 = vld [vmem:[#allocation3 + $0x78] sm:$0xe] }
 0x33b   :  { %v3351_v6 = vor.u32 %v3350_v9, %v3347_v5  ;;  %v3356_v52 = vrot.slane %v3354_v60, 5  ;;  %v7679_v40 = vrot.slane %v3806_v36, 9  ;;  %v7680_v23 = vrot.slane %v3807_v3, 9  ;;  %v10381_v60 = vpop.permute.xlu1 %4385  ;;  %v10387_v14 = vld [vmem:[#allocation3 + $0x7c] sm:$0x1] }
 0x33c   :  { %v2172_v58 = vrot.slane %v2171_v43, 4  ;;  %v3365_v29 = vor.u32 %v3364_v47, %v3361_v24  ;;  %v3370_v2 = vrot.slane %v3368_v18, 5  ;;  %v4082_v10 = vshrl.u32 %v10361_v31, 16  ;;  %v10395_v5 = vld [vmem:[#allocation3 + $0x78] sm:$0xf] }
 0x33d   :  { %v3352_v49 = vrot.slane %v3351_v6, 4  ;;  %v3887_v8 = vsel %vm9501_vm2, %v7679_v40, %v3886_v41  ;;  %v3891_v25 = vsel %vm9501_vm2, %v7680_v23, %v3890_v16  ;;  %v4085_v15 = vshll.u32 %v10361_v31, 16  ;;  %v10397_v9 = vld [vmem:[#allocation3 + $0x80] sm:$0xf]  ;;  %v3936_v40 = vld [vmem:[#allocation3 + $0x7c] sm:$0x1] }
 0x33e   :  { %v2163_v46 = vsel %vm9512_vm3, %v2158_v61, %v2162_v37  ;;  %v3366_v56 = vrot.slane %v3365_v29, 4  ;;  %v7746_v12 = vcombine.low %v3887_v8, %v3891_v25  ;;  %v4084_v55 = vrot.slane %v4082_v10, 4  ;;  %v10399_v61 = vpop.permute.xlu0 %1869  ;;  %v3808_v10 = vld [vmem:[#allocation3 + $0x78] sm:$0xe] }
 0x33f   :  { %v3357_v41 = vsel %vm9512_vm3, %v3352_v49, %v3356_v52  ;;  %v4087_v36 = vrot.slane %v4085_v15, 5  ;;  %v4096_v16 = vshrl.u32 %v10369_v22, 16  ;;  %v4099_v43 = vshll.u32 %v10369_v22, 16  ;;  %v3184_v49 = vld [vmem:[#allocation3 + $0x70] sm:$0xf] }
 0x340   :  { %v2177_v57 = vsel %vm9512_vm3, %v2172_v58, %v2176_v11  ;;  %v3371_v18 = vsel %vm9512_vm3, %v3366_v56, %v3370_v2  ;;  %4527 = vrot.lane.b32.xlu1 %v7746_v12, %s8747_s28  ;;  %v7665_v3 = vrot.slane %v3440_v42, 9  ;;  %v3526_v37 = vrot.slane %v10377_v48, 5  ;;  %v3935_v11 = vld [vmem:[#allocation3 + $0x74] sm:$0x1] }
 0x341   :  { %v10401_v24 = vcombine.low %v2163_v46, %v2177_v57  ;;  %v7714_v47 = vcombine.low %v3357_v41, %v3371_v18  ;;  %v4098_v6 = vrot.slane %v4096_v16, 4  ;;  %v4101_v52 = vrot.slane %v4099_v43, 5  ;;  %v10412_v46 = vld [vmem:[#allocation3 + $0x7c] sm:$0x1]  ;;  %v3809_v41 = vld [vmem:[#allocation3 + $0x80] sm:$0xe]  ;;  %v10418_v16 = vpop.permute.xlu1 %2653 }
 0x342   :  { %v7754_v23 = vcombine.low %v10361_v31, %v10369_v22  ;;  %v3527_v58 = vsel %vm9501_vm2, %v7665_v3, %v3526_v37  ;;  %v7666_v29 = vrot.slane %v3441_v1, 9  ;;  %v3530_v2 = vrot.slane %v10387_v14, 5  ;;  %v10416_v1 = vld [vmem:[#allocation3 + $0x84] sm:$0x1]  ;;  %v8330_v3 = vld [vmem:[#allocation2 + $0x8] sm:$0xf] }
 0x343   :  { %4351 = vrot.lane.b32.xlu0 %v7714_v47, %s8748_s17  ;;  %v4088_v42 = vor.u32 %v4087_v36, %v4084_v55  ;;  %v4091_v22 = vshll.u32 %v3935_v11, 16  ;;  %v4102_v56 = vor.u32 %v4101_v52, %v4098_v6  ;;  %v4105_v12 = vshll.u32 %v3936_v40, 16  ;;  %v8331_v55 = vld [vmem:[#allocation2 + $0x10] sm:$0xf]  ;;  %v10423_v6 = vpop.permute.xlu0 %1867 }
 0x344   :  { %v3531_v31 = vsel %vm9501_vm2, %v7666_v29, %v3530_v2  ;;  %v7731_v57 = vcombine.low %v10395_v5, %v10397_v9  ;;  %v7583_v36 = vcombine.low %v8330_v3, %v8331_v55  ;;  %v3894_v11 = vrot.slane %v10412_v46, 5  ;;  %v3185_v29 = vld [vmem:[#allocation3 + $0x78] sm:$0xf]  ;;  %v2091_v3 = vld [vmem:[#allocation2 + $0x4] sm:$0x1] }
 0x345   :  { %v7723_v43 = vcombine.low %v3527_v58, %v3531_v31  ;;  %v4089_v18 = vrot.slane %v4088_v42, 4  ;;  %v4093_v37 = vrot.slane %v4091_v22, 5  ;;  %v4103_v47 = vrot.slane %v4102_v56, 4  ;;  %v2092_v55 = vld [vmem:[#allocation2 + $0x8] sm:$0xf] }
 0x346   :  { %v4107_v15 = vrot.slane %v4105_v12, 5  ;;  %v7681_v52 = vrot.slane %v3808_v10, 9  ;;  %v7682_v40 = vrot.slane %v3809_v41, 9  ;;  %v3898_v58 = vrot.slane %v10416_v1, 5  ;;  %v2090_v12 = vld [vmem:[#allocation2] sm:$0xf] }
 0x347   :  { %4583 = vrot.lane.b32.xlu0 %v7754_v23, %s8746_s7  ;;  %4393 = vrot.lane.b32.xlu1 %v7723_v43, %s8743_s13  ;;  %v3373_v2 = vshrl.u32 %v3184_v49, 16  ;;  %v4094_v42 = vsel %vm9512_vm3, %v4089_v18, %v4093_v37  ;;  %v1882_v22 = vsel %vm1879_vm4, %v7583_v36, %v10359_v54  ;;  %v3376_v56 = vshll.u32 %v3184_v49, 16  ;;  %v8277_v36 = vld [vmem:[#allocation12] sm:$0xff]  }
 0x348   :  { %v4108_v31 = vsel %vm9512_vm3, %v4103_v47, %v4107_v15  ;;  %v3895_v10 = vsel %vm9501_vm2, %v7681_v52, %v3894_v11  ;;  %v3899_v41 = vsel %vm9501_vm2, %v7682_v40, %v3898_v58  ;;  %v3382_v18 = vshll.u32 %v10377_v48, 16  ;;  %v10439_v47 = vpop.permute.xlu1 %4615  ;;  %v8279_v58 = vld [vmem:[#allocation12 + $0x48] sm:$0xff]  }
 0x349   :  { %v7762_v23 = vcombine.low %v4094_v42, %v4108_v31  ;;  %v3375_v43 = vrot.slane %v3373_v2, 4  ;;  %v3378_v25 = vrot.slane %v3376_v56, 5  ;;  %v3387_v37 = vshrl.u32 %v3185_v29, 16  ;;  %12103 = vst [vmem:[#allocation77_spill] sm:$0xff] %v10439_v47  ;;  %v10447_v56 = vpop.permute.xlu0 %4521 }
 0x34a   :  { %v3390_v15 = vshll.u32 %v3185_v29, 16  ;;  %v7747_v49 = vcombine.low %v3895_v10, %v3899_v41  ;;  %v3396_v11 = vshll.u32 %v10387_v14, 16  ;;  %v1906_v52 = vsel %vm1904_vm6, %v1882_v22, %v10216_v44  ;;  %v2093_v29 = vld [vmem:[#allocation2 + $0xc] sm:$0x1] }
 0x34b   :  { %4449 = vrot.lane.b32.xlu0 %v7731_v57, %s8745_s8  ;;  %4623 = vrot.lane.b32.xlu1 %v7762_v23, %s8749_s18  ;;  %v2123_v40 = vshrl.u32 %v2090_v12, 16  ;;  %v3379_v2 = vor.u32 %v3378_v25, %v3375_v43  ;;  %v3389_v42 = vrot.slane %v3387_v37, 4  ;;  %v2126_v31 = vshll.u32 %v2090_v12, 16  ;;  %v8280_v25 = vld [vmem:[#allocation12 + $0x8] sm:$0xff]  }
 0x34c   :  { %v3392_v48 = vrot.slane %v3390_v15, 5  ;;  %8102 = vmatprep.mubr.msk.bf16.mxu1 %vm1976_vm8, %v1906_v52  ;;  %v3398_v57 = vrot.slane %v3396_v11, 5  ;;  %v2132_v23 = vshll.u32 %v2091_v3, 16  ;;  %v2137_v10 = vshrl.u32 %v2092_v55, 16  ;;  %v8282_v11 = vld [vmem:[#allocation12 + $0x50] sm:$0xff]  }
 0x34d   :  { %v2125_v8 = vrot.slane %v2123_v40, 4  ;;  %8103 = vmatmul.mubr.msk.bf16.vlgmr.msra.gmra.mrb[16].mxu1 %vm1976_vm8, %v10365_v34  ;;  %v3380_v14 = vrot.slane %v3379_v2, 4  ;;  %v2128_v22 = vrot.slane %v2126_v31, 5  ;;  %v2140_v41 = vshll.u32 %v2092_v55, 16  ;;  %v10453_v34 = vpop.permute.xlu1 %4345  ;;  %v3921_v31 = vld [vmem:[#allocation3 + $0x80] sm:$0xf] }
 0x34e   :  { %v3393_v44 = vor.u32 %v3392_v48, %v3389_v42  ;;  %7981 = vmatpush3.bf16.msra.mxu1 %v8277_v36  ;;  %v3758_v43 = vshll.u32 %v10397_v9, 16  ;;  %v3384_v12 = vrot.slane %v3382_v18, 5  ;;  %v2139_v37 = vrot.slane %v2137_v10, 4  ;;  %v8283_v10 = vld [vmem:[#allocation12 + $0x10] sm:$0xff]  }
 0x34f   :  { %4529 = vrot.lane.b32.xlu0 %v7747_v49, %s8747_s28  ;;  %v2146_v15 = vshll.u32 %v2093_v29, 16  ;;  %7982 = vmatprep.subr.bf16.mxu1 %v8279_v58  ;;  %v2129_v52 = vor.u32 %v2128_v22, %v2125_v8  ;;  %v2134_v40 = vrot.slane %v2132_v23, 5  ;;  %v2142_v21 = vrot.slane %v2140_v41, 5  ;;  %v10464_v23 = vpop.permute.xlu0 %4387 }
 0x350   :  { %v3394_v3 = vrot.slane %v3393_v44, 4  ;;  %v3385_v55 = vsel %vm9512_vm3, %v3380_v14, %v3384_v12  ;;  %v12104_v2 = vshrl.u32 %v10395_v5, 16  ;;  %v12105_v49 = vshll.u32 %v10395_v5, 16  ;;  %12106 = vst [vmem:[#allocation78_spill] sm:$0xff] %v10464_v23  ;;  %v3922_v5 = vld [vmem:[#allocation3 + $0x88] sm:$0xf] }
 0x351   :  { %v2148_v36 = vrot.slane %v2146_v15, 5  ;;  %v2130_v48 = vrot.slane %v2129_v52, 4  ;;  %v2143_v29 = vor.u32 %v2142_v21, %v2139_v37  ;;  %v3750_v8 = vshll.u32 %v10412_v46, 16  ;;  %v8285_v15 = vld [vmem:[#allocation12 + $0x58] sm:$0xff]  }
 0x352   :  { %v3743_v42 = vrot.slane %v12104_v2, 4  ;;  %v3746_v18 = vrot.slane %v12105_v49, 5  ;;  %v3399_v58 = vsel %vm9512_vm3, %v3394_v3, %v3398_v57  ;;  %7983 = vmatpush3.bf16.msra.mxu1 %v8280_v25  ;;  %v12107_v22 = vshrl.u32 %v10397_v9, 16  ;;  %v10474_v49 = vpop.permute.xlu1 %1829 }
 0x353   :  { %v7715_v14 = vcombine.low %v3385_v55, %v3399_v58  ;;  %v3760_v12 = vrot.slane %v3758_v43, 5  ;;  %7984 = vmatprep.subr.bf16.mxu1 %v8282_v11  ;;  %v2135_v57 = vsel %vm9512_vm3, %v2130_v48, %v2134_v40  ;;  %v2144_v21 = vrot.slane %v2143_v29, 4  ;;  %v8286_v40 = vld [vmem:[#allocation12 + $0x18] sm:$0xff]  }
 0x354   :  { %v3747_v44 = vor.u32 %v3746_v18, %v3743_v42  ;;  %v3757_v41 = vrot.slane %v12107_v22, 4  ;;  %v3752_v37 = vrot.slane %v3750_v8, 5  ;;  %v3764_v46 = vshll.u32 %v10416_v1, 16  ;;  %v3443_v42 = vld [vmem:[#allocation3 + $0x88] sm:$0xe] }
 0x355   :  { %4353 = vrot.lane.b32.xlu1 %v7715_v14, %s8748_s17  ;;  %v4110_v52 = vshrl.u32 %v3921_v31, 16  ;;  %v4113_v55 = vshll.u32 %v3921_v31, 16  ;;  %v2149_v9 = vsel %vm9512_vm3, %v2144_v21, %v2148_v36  ;;  %v4124_v2 = vshrl.u32 %v3922_v5, 16  ;;  %v3442_v48 = vld [vmem:[#allocation3 + $0x80] sm:$0xe]  ;;  %v8288_v8 = vld [vmem:[#allocation12 + $0x60] sm:$0xff]  }
 0x356   :  { %v3748_v25 = vrot.slane %v3747_v44, 4  ;;  %v3761_v3 = vor.u32 %v3760_v12, %v3757_v41  ;;  %v3766_v43 = vrot.slane %v3764_v46, 5  ;;  %v4127_v11 = vshll.u32 %v3922_v5, 16  ;;  %7985 = vmatpush3.bf16.msra.mxu1 %v8283_v10  ;;  %v3554_v29 = vld [vmem:[#allocation3 + $0x88] sm:$0xf]  ;;  %v10485_v12 = vpop.permute.xlu0 %1827 }
 0x357   :  { %v2670_v1 = vsel %vm1879_vm4, %v10401_v24, %v10311_v32  ;;  %v7622_v18 = vcombine.low %v2135_v57, %v2149_v9  ;;  %7986 = vmatprep.subr.bf16.mxu1 %v8285_v15  ;;  %v4112_v14 = vrot.slane %v4110_v52, 4  ;;  %v4115_v44 = vrot.slane %v4113_v55, 5  ;;  %v10481_v41 = vld [vmem:[#allocation3 + $0x84] sm:$0x1]  ;;  %v10483_v10 = vld [vmem:[#allocation3 + $0x8c] sm:$0x1] }
 0x358   :  { %v3762_v58 = vrot.slane %v3761_v3, 4  ;;  %v3753_v36 = vsel %vm9512_vm3, %v3748_v25, %v3752_v37  ;;  %v7755_v22 = vcombine.low %v3921_v31, %v3922_v5  ;;  %v4126_v15 = vrot.slane %v4124_v2, 4  ;;  %v3555_v21 = vld [vmem:[#allocation3 + $0x90] sm:$0xf]  ;;  %v10496_v3 = vld [vmem:[#allocation3 + $0x84] sm:$0x1] }
 0x359   :  { %v2668_v32 = vsel %vm1879_vm4, %v7622_v18, %v10359_v54  ;;  %v2686_v57 = vsel %vm1904_vm6, %v2670_v1, %v10418_v16  ;;  %v8273_v37 = vld [vmem:[#allocation12 + $0x80] sm:$0xff]   ;;  %v4129_v46 = vrot.slane %v4127_v11, 5  ;;  %v7667_v25 = vrot.slane %v3442_v48, 9  ;;  %12108 = vst [vmem:[#allocation79_spill] sm:$0xff] %v10496_v3  ;;  %v10505_v1 = vpop.permute.xlu1 %2657 }
 0x35a   :  { %v3767_v24 = vsel %vm9512_vm3, %v3762_v58, %v3766_v43  ;;  %v2684_v31 = vsel %vm1904_vm6, %v2668_v32, %v10317_v26  ;;  %4585 = vrot.lane.b32.xlu1 %v7755_v22, %s8746_s7  ;;  %v10498_v54 = vld [vmem:[#allocation3 + $0x8c] sm:$0x1]  ;;  %7987 = vmatpush3.bf16.msra.mxu1 %v8286_v40  ;;  %v3534_v52 = vrot.slane %v10481_v41, 5  ;;  %v7668_v16 = vrot.slane %v3443_v42, 9  ;;  %v8292_v40 = vld [vmem:[#allocation12 + $0x68] sm:$0xff]  }
 0x35b   :  { %v7739_v5 = vcombine.low %v3753_v36, %v3767_v24  ;;  %12109 = vst [vmem:[#allocation80_spill] sm:$0xff] %v10498_v54  ;;  %8130 = vmatprep.mubr.msk.bf16.mxu0 %vm1976_vm8, %v2684_v31  ;;  %v3538_v55 = vrot.slane %v10483_v10, 5  ;;  %v3769_v9 = vshrl.u32 %v3554_v29, 16  ;;  %7988 = vmatprep.subr.bf16.mxu1 %v8288_v8  ;;  %v8289_v26 = vld [vmem:[#allocation12 + $0x20] sm:$0xff]   ;;  %v3772_v43 = vshll.u32 %v3554_v29, 16  ;;  %v8274_v36 = vld [vmem:[#allocation12 + $0x88] sm:$0xff]   ;;  %v10518_v31 = vpop.permute.xlu0 %4481 }
 0x35c   :  { %8131 = vmatmul.mubr.msk.bf16.vlgmr.msra.gmra.mrb[0].mxu0 %vm1976_vm8, %v2686_v57  ;;  %v3783_v2 = vshrl.u32 %v3555_v21, 16  ;;  %v7732_v11 = vcombine.low %v3554_v29, %v3555_v21  ;;  %v3535_v18 = vsel %vm9501_vm2, %v7667_v25, %v3534_v52  ;;  %v3786_v58 = vshll.u32 %v3555_v21, 16  ;;  %v10511_v8 = vld [vmem:[#allocation3 + $0x8c] sm:$0x1]  ;;  %v10516_v57 = vld [vmem:[#allocation3 + $0x94] sm:$0x1] }
 0x35d   :  { %4489 = vrot.lane.b32.xlu0 %v7739_v5, %s8729_s25  ;;  %v3539_v42 = vsel %vm9501_vm2, %v7668_v16, %v3538_v55  ;;  %v4116_v48 = vor.u32 %v4115_v44, %v4112_v14  ;;  %5145 = vmatpush1.bf16.msra.mxu0 %v8273_v37  ;;  %v4119_v29 = vshll.u32 %v10496_v3, 16  ;;  %v4130_v32 = vor.u32 %v4129_v46, %v4126_v15  ;;  %v8294_v37 = vld [vmem:[#allocation12 + $0x28] sm:$0xff]   ;;  %v8296_v46 = vld [vmem:[#allocation12 + $0x70] sm:$0xff]   ;;  %v10564_v3 = vld [vmem:[#allocation3 + $0x24] sm:$0x1] }
 0x35e   :  { %v7724_v22 = vcombine.low %v3535_v18, %v3539_v42  ;;  %4451 = vrot.lane.b32.xlu1 %v7732_v11, %s8745_s8  ;;  %v4133_v24 = vshll.u32 %v10498_v54, 16  ;;  %5146 = vmatprep.subr.bf16.mxu0 %v12099_v33  ;;  %v3771_v14 = vrot.slane %v3769_v9, 4  ;;  %v3774_v44 = vrot.slane %v3772_v43, 5  ;;  %v10524_v42 = vld [vmem:[#allocation3 + $0x80] sm:$0xf] }
 0x35f   :  { %v4117_v21 = vrot.slane %v4116_v48, 4  ;;  %7989 = vmatpush3.bf16.msra.mxu1 %v8289_v26  ;;  %v4121_v5 = vrot.slane %v4119_v29, 5  ;;  %v4131_v25 = vrot.slane %v4130_v32, 4  ;;  %v3778_v15 = vshll.u32 %v10511_v8, 16  ;;  %12110 = vst [vmem:[#allocation81_spill] sm:$0xff] %v10524_v42  ;;  %v8278_v9 = vld [vmem:[#allocation12 + $0x90] sm:$0xff]   ;;  %v10538_v29 = vpop.permute.xlu1 %2655  ;;  %v10547_v43 = vpop.permute.xlu0 %1871 }
 0x360   :  { %v4135_v52 = vrot.slane %v4133_v24, 5  ;;  %7990 = vmatprep.subr.bf16.mxu1 %v8292_v40  ;;  %v3775_v16 = vor.u32 %v3774_v44, %v3771_v14  ;;  %v3785_v55 = vrot.slane %v3783_v2, 4  ;;  %v3788_v11 = vrot.slane %v3786_v58, 5  ;;  %v10526_v26 = vld [vmem:[#allocation3 + $0x14] sm:$0x1]  ;;  %v8297_v44 = vld [vmem:[#allocation12 + $0x30] sm:$0xff]  }
 0x361   :  { %4395 = vrot.lane.b32.xlu0 %v7724_v22, %s8743_s13  ;;  %v3792_v18 = vshll.u32 %v10516_v57, 16  ;;  %5147 = vmatpush1.bf16.msra.mxu0 %v8274_v36  ;;  %v10529_v48 = vld [vmem:[#allocation3 + $0x1c] sm:$0x1]  ;;  %v4122_v40 = vsel %vm9512_vm3, %v4117_v21, %v4121_v5  ;;  %v10536_v58 = vld [vmem:[#allocation3 + $0x88] sm:$0xf]  ;;  %v3780_v32 = vrot.slane %v3778_v15, 5  ;;  %v4703_v22 = vsel %vm296_vm0, %v10175_v35, %v10201_v27 }
 0x362   :  { %v4136_v2 = vsel %vm9512_vm3, %v4131_v25, %v4135_v52  ;;  %12111 = vst [vmem:[#allocation82_spill] sm:$0xff] %v10536_v58  ;;  %5148 = vmatprep.subr.bf16.mxu0 %v12099_v33  ;;  %v3789_v24 = vor.u32 %v3788_v11, %v3785_v55  ;;  %v3902_v21 = vrot.slane %v10511_v8, 5  ;;  %v3401_v5 = vshrl.u32 %v10524_v42, 16  ;;  %v3810_v52 = vld [vmem:[#allocation3 + $0x88] sm:$0xe] }
 0x363   :  { %v7763_v36 = vcombine.low %v4122_v40, %v4136_v2  ;;  %v3794_v14 = vrot.slane %v3792_v18, 5  ;;  %7991 = vmatpush3.bf16.msra.mxu1 %v8294_v37  ;;  %v3404_v25 = vshll.u32 %v10524_v42, 16  ;;  %v8299_v40 = vld [vmem:[#allocation12 + $0x78] sm:$0xff]   ;;  %v3776_v15 = vrot.slane %v3775_v16, 4  ;;  %v10562_v54 = vpop.permute.xlu1 %1873 }
 0x364   :  { %7992 = vmatprep.subr.bf16.mxu1 %v8296_v46  ;;  %v3790_v37 = vrot.slane %v3789_v24, 4  ;;  %v3410_v55 = vshll.u32 %v10481_v41, 16  ;;  %v3415_v11 = vshrl.u32 %v10536_v58, 16  ;;  %v8281_v27 = vld [vmem:[#allocation12 + $0x98] sm:$0xff]   ;;  %v3906_v8 = vrot.slane %v10516_v57, 5 }
 0x365   :  { %4625 = vrot.lane.b32.xlu0 %v7763_v36, %s8749_s18  ;;  %5149 = vmatpush1.bf16.msra.mxu0 %v8278_v9  ;;  %v3403_v18 = vrot.slane %v3401_v5, 4  ;;  %v3406_v2 = vrot.slane %v3404_v25, 5  ;;  %v3418_v7 = vshll.u32 %v10536_v58, 16  ;;  %v3781_v46 = vsel %vm9512_vm3, %v3776_v15, %v3780_v32  ;;  %v2104_v9 = vld [vmem:[#allocation2 + $0x38] sm:$0xf]  ;;  %v8300_v24 = vld [vmem:[#allocation12 + $0x38] sm:$0xff]  }
 0x366   :  { %5150 = vmatprep.subr.bf16.mxu0 %v12099_v33  ;;  %v3795_v16 = vsel %vm9512_vm3, %v3790_v37, %v3794_v14  ;;  %v3417_v41 = vrot.slane %v3415_v11, 4  ;;  %v3424_v36 = vshll.u32 %v10483_v10, 16  ;;  %v3412_v25 = vrot.slane %v3410_v55, 5  ;;  %v10560_v58 = vld [vmem:[#allocation2 + $0x3c] sm:$0x1]  ;;  %v8284_v37 = vld [vmem:[#allocation12 + $0xa0] sm:$0xff]  }
 0x367   :  { %7993 = vmatpush3.bf16.msra.mxu1 %v8297_v44  ;;  %v7740_v57 = vcombine.low %v3781_v46, %v3795_v16  ;;  %v3407_v5 = vor.u32 %v3406_v2, %v3403_v18  ;;  %v3420_v42 = vrot.slane %v3418_v7, 5  ;;  %v10569_v14 = vsel %vm1904_vm6, %v4703_v22, %v10335_v38  ;;  %v2103_v15 = vld [vmem:[#allocation2 + $0x34] sm:$0x1]  ;;  %v10572_v2 = vpop.permute.xlu0 %1831  ;;  %v8335_v22 = vld [vmem:[#allocation2 + $0x38] sm:$0xf] }
 0x368   :  { %7994 = vmatprep.subr.bf16.mxu1 %v8299_v40  ;;  %v7683_v10 = vrot.slane %v3810_v52, 9  ;;  %v7684_v44 = vrot.slane %v3811_v13, 9  ;;  %v3426_v11 = vrot.slane %v3424_v36, 5  ;;  %v2221_v18 = vshrl.u32 %v2104_v9, 16  ;;  %v2102_v40 = vld [vmem:[#allocation2 + $0x30] sm:$0xf] }
 0x369   :  { %5151 = vmatpush1.bf16.msra.mxu0 %v8281_v27  ;;  %4491 = vrot.lane.b32.xlu1 %v7740_v57, %s8729_s25  ;;  %v3408_v7 = vrot.slane %v3407_v5, 4  ;;  %v3421_v55 = vor.u32 %v3420_v42, %v3417_v41  ;;  %v8336_v52 = vld [vmem:[#allocation2 + $0x40] sm:$0xf]  ;;  %v2224_v46 = vshll.u32 %v2104_v9, 16  ;;  %v3923_v16 = vld [vmem:[#allocation3 + $0x90] sm:$0xf] }
 0x36a   :  { %5152 = vmatprep.subr.bf16.mxu0 %v12099_v33  ;;  %v3903_v38 = vsel %vm9501_vm2, %v7683_v10, %v3902_v21  ;;  %v3907_v13 = vsel %vm9501_vm2, %v7684_v44, %v3906_v8  ;;  %v7586_v27 = vcombine.low %v8335_v22, %v8336_v52  ;;  %v2223_v57 = vrot.slane %v2221_v18, 4  ;;  %v3924_v5 = vld [vmem:[#allocation3 + $0x98] sm:$0xf] }
 0x36b   :  { %7995 = vmatpush3.bf16.msra.mxu1 %v8300_v24  ;;  %v3413_v42 = vsel %vm9512_vm3, %v3408_v7, %v3412_v25  ;;  %v3422_v41 = vrot.slane %v3421_v55, 4  ;;  %v7748_v36 = vcombine.low %v3903_v38, %v3907_v13  ;;  %v2216_v32 = vshll.u32 %v2103_v15, 16  ;;  %v8287_v8 = vld [vmem:[#allocation12 + $0xa8] sm:$0xff]   ;;  %v10587_v7 = vpop.permute.xlu1 %1833 }
 0x36c   :  { %v2226_v0 = vrot.slane %v2224_v46, 5  ;;  %v2230_v21 = vshll.u32 %v10560_v58, 16  ;;  %v2207_v10 = vshrl.u32 %v2102_v40, 16  ;;  %v2210_v9 = vshll.u32 %v2102_v40, 16  ;;  %v10585_v25 = vld [vmem:[#allocation3 + $0x94] sm:$0x1]  ;;  %v10592_v46 = vpop.permute.xlu0 %2659 }
 0x36d   :  { %5153 = vmatpush1.bf16.msra.mxu0 %v8284_v37  ;;  %v3427_v44 = vsel %vm9512_vm3, %v3422_v41, %v3426_v11  ;;  %4531 = vrot.lane.b32.xlu1 %v7748_v36, %s8747_s28  ;;  %v4138_v24 = vshrl.u32 %v3923_v16, 16  ;;  %v4141_v22 = vshll.u32 %v3923_v16, 16  ;;  %12112 = vst [vmem:[#allocation83_spill] sm:$0xff] %v10585_v25  ;;  %v4152_v18 = vshrl.u32 %v3924_v5, 16  ;;  %v10590_v37 = vld [vmem:[#allocation3 + $0x9c] sm:$0x1] }
 0x36e   :  { %5154 = vmatprep.subr.bf16.mxu0 %v12099_v33  ;;  %v7716_v15 = vcombine.low %v3413_v42, %v3427_v44  ;;  %v2227_v55 = vor.u32 %v2226_v0, %v2223_v57  ;;  %v2209_v58 = vrot.slane %v2207_v10, 4  ;;  %12113 = vst [vmem:[#allocation84_spill] sm:$0xff] %v10590_v37  ;;  %v2212_v38 = vrot.slane %v2210_v9, 5  ;;  %v8290_v42 = vld [vmem:[#allocation12 + $0xb0] sm:$0xff]  }
 0x36f   :  { %v4140_v13 = vrot.slane %v4138_v24, 4  ;;  %v4143_v11 = vrot.slane %v4141_v22, 5  ;;  %v4155_v52 = vshll.u32 %v3924_v5, 16  ;;  %v2218_v40 = vrot.slane %v2216_v32, 5  ;;  %v2098_v9 = vld [vmem:[#allocation2 + $0x20] sm:$0xf]  ;;  %v10597_v22 = vpop.permute.xlu1 %1877 }
 0x370   :  { %4355 = vrot.lane.b32.xlu0 %v7716_v15, %s8748_s17  ;;  %v2228_v41 = vrot.slane %v2227_v55, 4  ;;  %v4154_v36 = vrot.slane %v4152_v18, 4  ;;  %v4147_v47 = vshll.u32 %v10585_v25, 16  ;;  %v2213_v0 = vor.u32 %v2212_v38, %v2209_v58  ;;  %v2099_v24 = vld [vmem:[#allocation2 + $0x24] sm:$0x1] }
 0x371   :  { %5155 = vmatpush1.bf16.msra.mxu0 %v8287_v8  ;;  %v4157_v57 = vrot.slane %v4155_v52, 5  ;;  %v4144_v10 = vor.u32 %v4143_v11, %v4140_v13  ;;  %v4161_v44 = vshll.u32 %v10590_v37, 16  ;;  %v2232_v23 = vrot.slane %v2230_v21, 5  ;;  %v2100_v8 = vld [vmem:[#allocation2 + $0x28] sm:$0xf]  ;;  %v10604_v11 = vpop.permute.xlu0 %1875 }
 0x372   :  { %5156 = vmatprep.subr.bf16.mxu0 %v12099_v33  ;;  %v10602_v32 = vsel %vm1879_vm4, %v7586_v27, %v10474_v49  ;;  %v7756_v15 = vcombine.low %v3923_v16, %v3924_v5  ;;  %v4149_v55 = vrot.slane %v4147_v47, 5  ;;  %v2214_v18 = vrot.slane %v2213_v0, 4  ;;  %v8295_v27 = vld [vmem:[#allocation12 + $0xb8] sm:$0xff]  }
 0x373   :  { %v4145_v58 = vrot.slane %v4144_v10, 4  ;;  %v4158_v38 = vor.u32 %v4157_v57, %v4154_v36  ;;  %v4163_v13 = vrot.slane %v4161_v44, 5  ;;  %v2233_v52 = vsel %vm9512_vm3, %v2228_v41, %v2232_v23  ;;  %v10613_v0 = vpop.permute.xlu1 %2661  ;;  %v8337_v41 = vld [vmem:[#allocation2 + $0x28] sm:$0xf]  ;;  %v8338_v57 = vld [vmem:[#allocation2 + $0x30] sm:$0xf] }
 0x374   :  { %4587 = vrot.lane.b32.xlu0 %v7756_v15, %s8746_s7  ;;  %v2179_v21 = vshrl.u32 %v2098_v9, 16  ;;  %v2182_v63 = vshll.u32 %v2098_v9, 16  ;;  %v2188_v37 = vshll.u32 %v2099_v24, 16  ;;  %v2219_v47 = vsel %vm9512_vm3, %v2214_v18, %v2218_v40  ;;  %v2110_v18 = vld [vmem:[#allocation2 + $0x60] sm:$0xf] }
 0x375   :  { %5157 = vmatpush1.bf16.msra.mxu0 %v8290_v42  ;;  %v4150_v16 = vsel %vm9512_vm3, %v4145_v58, %v4149_v55  ;;  %v4159_v5 = vrot.slane %v4158_v38, 4  ;;  %v2193_v36 = vshrl.u32 %v2100_v8, 16  ;;  %v7625_v23 = vcombine.low %v2219_v47, %v2233_v52  ;;  %v2111_v47 = vld [vmem:[#allocation2 + $0x64] sm:$0x1]  ;;  %v2112_v25 = vld [vmem:[#allocation2 + $0x68] sm:$0xf] }
 0x376   :  { %5158 = vmatprep.subr.bf16.mxu0 %v12099_v33  ;;  %v7585_v10 = vcombine.low %v8337_v41, %v8338_v57  ;;  %v2181_v44 = vrot.slane %v2179_v21, 4  ;;  %v2184_v9 = vrot.slane %v2182_v63, 5  ;;  %v2196_v40 = vshll.u32 %v2100_v8, 16  ;;  %v8298_v21 = vld [vmem:[#allocation12 + $0xc0] sm:$0xff]  }
 0x377   :  { %v4164_v42 = vsel %vm9512_vm3, %v4159_v5, %v4163_v13  ;;  %v2195_v24 = vrot.slane %v2193_v36, 4  ;;  %v2202_v15 = vshll.u32 %v2101_v51, 16  ;;  %v2674_v55 = vsel %vm1879_vm4, %v7625_v23, %v10474_v49  ;;  %v2113_v5 = vld [vmem:[#allocation2 + $0x6c] sm:$0x1]  ;;  %v10628_v49 = vpop.permute.xlu0 %1835 }
 0x378   :  { %v7764_v58 = vcombine.low %v4150_v16, %v4164_v42  ;;  %v2185_v38 = vor.u32 %v2184_v9, %v2181_v44  ;;  %v1888_v52 = vsel %vm1879_vm4, %v7585_v10, %v10485_v12  ;;  %v10624_v63 = vsel %vm1904_vm6, %v2674_v55, %v10505_v1  ;;  %v8340_v44 = vld [vmem:[#allocation2 + $0x70] sm:$0xf] }
 0x379   :  { %5159 = vmatpush1.bf16.msra.mxu0 %v8295_v27  ;;  %v2190_v13 = vrot.slane %v2188_v37, 5  ;;  %v2198_v8 = vrot.slane %v2196_v40, 5  ;;  %v1910_v51 = vsel %vm1904_vm6, %v1888_v52, %v10423_v6  ;;  %v2204_v36 = vrot.slane %v2202_v15, 5  ;;  %v8339_v6 = vld [vmem:[#allocation2 + $0x68] sm:$0xf] }
 0x37a   :  { %5160 = vmatprep.subr.bf16.mxu0 %v12099_v33  ;;  %4627 = vrot.lane.b32.xlu1 %v7764_v58, %s8749_s18  ;;  %v2186_v16 = vrot.slane %v2185_v38, 4  ;;  %v2263_v27 = vshrl.u32 %v2110_v18, 16  ;;  %v2266_v23 = vshll.u32 %v2110_v18, 16  ;;  %v2272_v41 = vshll.u32 %v2111_v47, 16  ;;  %v10633_v10 = vpop.permute.xlu1 %1837  ;;  %v8301_v58 = vld [vmem:[#allocation12 + $0xc8] sm:$0xff]  }
 0x37b   :  { %8106 = vmatprep.mubr.msk.bf16.mxu1 %vm1976_vm8, %v1910_v51  ;;  %v2199_v1 = vor.u32 %v2198_v8, %v2195_v24  ;;  %v2277_v37 = vshrl.u32 %v2112_v25, 16  ;;  %v2280_v57 = vshll.u32 %v2112_v25, 16  ;;  %v7588_v9 = vcombine.low %v8339_v6, %v8340_v44  ;;  %v2106_v24 = vld [vmem:[#allocation2 + $0x50] sm:$0xf] }
 0x37c   :  { %v2265_v42 = vrot.slane %v2263_v27, 4  ;;  %v2268_v40 = vrot.slane %v2266_v23, 5  ;;  %v2286_v55 = vshll.u32 %v2113_v5, 16  ;;  %v2191_v15 = vsel %vm9512_vm3, %v2186_v16, %v2190_v13  ;;  %v2107_v27 = vld [vmem:[#allocation2 + $0x54] sm:$0x1] }
 0x37d   :  { %5161 = vmatpush1.bf16.msra.mxu0 %v8298_v21  ;;  %v2200_v38 = vrot.slane %v2199_v1, 4  ;;  %v2279_v52 = vrot.slane %v2277_v37, 4  ;;  %v2282_v18 = vrot.slane %v2280_v57, 5  ;;  %v2274_v47 = vrot.slane %v2272_v41, 5  ;;  %v2108_v5 = vld [vmem:[#allocation2 + $0x58] sm:$0xf]  ;;  %v10646_v41 = vpop.permute.xlu0 %4617 }
 0x37e   :  { %5162 = vmatprep.subr.bf16.mxu0 %v12099_v33  ;;  %v2269_v25 = vor.u32 %v2268_v40, %v2265_v42  ;;  %v2288_v8 = vrot.slane %v2286_v55, 5  ;;  %v1912_v51 = vsel %vm1904_vm6, %v10602_v32, %v10399_v61  ;;  %v1897_v13 = vsel %vm1879_vm4, %v7588_v9, %v10587_v7  ;;  %v8341_v16 = vld [vmem:[#allocation2 + $0x60] sm:$0xf]  ;;  %v8342_v1 = vld [vmem:[#allocation2 + $0x58] sm:$0xf] }
 0x37f   :  { %v2205_v21 = vsel %vm9512_vm3, %v2200_v38, %v2204_v36  ;;  %v2283_v23 = vor.u32 %v2282_v18, %v2279_v52  ;;  %8107 = vmatmul.mubr.msk.bf16.gmra.mrb[20].mxu1 %vm1976_vm8, %v1912_v51  ;;  %v7587_v37 = vcombine.low %v8342_v1, %v8341_v16  ;;  %v2235_v44 = vshrl.u32 %v2106_v24, 16  ;;  %v8303_v32 = vld [vmem:[#allocation12 + $0xd0] sm:$0xff]  }
 0x380   :  { %v7624_v57 = vcombine.low %v2191_v15, %v2205_v21  ;;  %v2270_v6 = vrot.slane %v2269_v25, 4  ;;  %v2238_v61 = vshll.u32 %v2106_v24, 16  ;;  %v2109_v40 = vld [vmem:[#allocation2 + $0x5c] sm:$0x1]  ;;  %v2244_v36 = vshll.u32 %v2107_v27, 16 }
 0x381   :  { %5163 = vmatpush1.bf16.msra.mxu0 %v8301_v58  ;;  %v2284_v42 = vrot.slane %v2283_v23, 4  ;;  %v2249_v55 = vshrl.u32 %v2108_v5, 16  ;;  %v2252_v38 = vshll.u32 %v2108_v5, 16  ;;  %v2237_v18 = vrot.slane %v2235_v44, 4  ;;  %v2114_v24 = vld [vmem:[#allocation2 + $0x70] sm:$0xf] }
 0x382   :  { %v10648_v52 = vpop.permute.xlu1 %2665  ;;  %5164 = vmatprep.subr.bf16.mxu0 %v12099_v33  ;;  %v2672_v9 = vsel %vm1879_vm4, %v7624_v57, %v10485_v12  ;;  %v2275_v15 = vsel %vm9512_vm3, %v2270_v6, %v2274_v47  ;;  %v2240_v25 = vrot.slane %v2238_v61, 5  ;;  %v2246_v27 = vrot.slane %v2244_v36, 5  ;;  %v8343_v16 = vld [vmem:[#allocation2 + $0x80] sm:$0xf]  ;;  %v2115_v57 = vld [vmem:[#allocation2 + $0x74] sm:$0x1] }
 0x383   :  { %v2688_v58 = vsel %vm1904_vm6, %v2672_v9, %v10538_v29  ;;  %v2289_v51 = vsel %vm9512_vm3, %v2284_v42, %v2288_v8  ;;  %v2251_v5 = vrot.slane %v2249_v55, 4  ;;  %v2254_v23 = vrot.slane %v2252_v38, 5  ;;  %v8344_v8 = vld [vmem:[#allocation2 + $0x78] sm:$0xf]  ;;  %v2117_v36 = vld [vmem:[#allocation2 + $0x7c] sm:$0x1] }
 0x384   :  { %8134 = vmatprep.mubr.msk.bf16.mxu0 %vm1976_vm8, %v2688_v58  ;;  %v7627_v33 = vcombine.low %v2275_v15, %v2289_v51  ;;  %v2241_v21 = vor.u32 %v2240_v25, %v2237_v18  ;;  %v2258_v12 = vshll.u32 %v2109_v40, 16  ;;  %v1894_v47 = vsel %vm1879_vm4, %v7587_v37, %v10572_v2  ;;  %v2116_v6 = vld [vmem:[#allocation2 + $0x78] sm:$0xf]  ;;  %v2118_v38 = vld [vmem:[#allocation2 + $0x80] sm:$0xf] }
 0x385   :  { %5165 = vmatpush1.bf16.msra.mxu0 %v8303_v32  ;;  %v1916_v29 = vsel %vm1904_vm6, %v1897_v13, %v10562_v54  ;;  %v7589_v1 = vcombine.low %v8344_v8, %v8343_v16  ;;  %v2291_v44 = vshrl.u32 %v2114_v24, 16  ;;  %v10666_v61 = vpop.permute.xlu0 %2663  ;;  %v2255_v40 = vor.u32 %v2254_v23, %v2251_v5  ;;  %v2119_v58 = vld [vmem:[#allocation2 + $0x84] sm:$0x1]  ;;  %v8345_v23 = vld [vmem:[#allocation2 + $0x88] sm:$0xf] }
 0x386   :  { %8135 = vmatmul.mubr.msk.bf16.gmra.mrb[4].mxu0 %vm1976_vm8, %v10624_v63  ;;  %v2678_v32 = vsel %vm1879_vm4, %v7627_v33, %v10587_v7  ;;  %v2242_v42 = vrot.slane %v2241_v21, 4  ;;  %v2260_v63 = vrot.slane %v2258_v12, 5  ;;  %v1914_v37 = vsel %vm1904_vm6, %v1894_v47, %v10547_v43  ;;  %v10674_v9 = vpop.permute.xlu1 %4483  ;;  %v8346_v12 = vld [vmem:[#allocation2 + $0x90] sm:$0xf] }
 0x387   :  { %v2694_v54 = vsel %vm1904_vm6, %v2678_v32, %v10613_v0  ;;  %v2293_v13 = vrot.slane %v2291_v44, 4  ;;  %v2294_v55 = vshll.u32 %v2114_v24, 16  ;;  %v2256_v18 = vrot.slane %v2255_v40, 4  ;;  %8110 = vmatprep.mubr.msk.bf16.mxu1 %vm1976_vm8, %v1914_v37  ;;  %v2120_v24 = vld [vmem:[#allocation2 + $0x88] sm:$0xf] }
 0x388   :  { %v2247_v15 = vsel %vm9512_vm3, %v2242_v42, %v2246_v27  ;;  %v2300_v7 = vshll.u32 %v2115_v57, 16  ;;  %v2305_v25 = vshrl.u32 %v2116_v6, 16  ;;  %8111 = vmatmul.mubr.msk.bf16.gmra.mrb[24].mxu1 %vm1976_vm8, %v1916_v29  ;;  %v2308_v51 = vshll.u32 %v2116_v6, 16  ;;  %v2121_v37 = vld [vmem:[#allocation2 + $0x8c] sm:$0x1] }
 0x389   :  { %v2296_v43 = vrot.slane %v2294_v55, 5  ;;  %v2314_v5 = vshll.u32 %v2117_v36, 16  ;;  %v1900_v0 = vsel %vm1879_vm4, %v7589_v1, %v10628_v49  ;;  %v2261_v33 = vsel %vm9512_vm3, %v2256_v18, %v2260_v63 }
 0x38a   :  { %v2302_v21 = vrot.slane %v2300_v7, 5  ;;  %v2307_v27 = vrot.slane %v2305_v25, 4  ;;  %v7590_v47 = vcombine.low %v8345_v23, %v8346_v12  ;;  %v7626_v16 = vcombine.low %v2247_v15, %v2261_v33  ;;  %v10688_v18 = vpop.permute.xlu1 %4523  ;;  %v4165_v33 = vld [vmem:[#allocation3 + $0x10] sm:$0xe] }
 0x38b   :  { %v2297_v8 = vor.u32 %v2296_v43, %v2293_v13  ;;  %v2310_v57 = vrot.slane %v2308_v51, 5  ;;  %v2316_v44 = vrot.slane %v2314_v5, 5  ;;  %v2319_v6 = vshrl.u32 %v2118_v38, 16 }
 0x38c   :  { %v2322_v32 = vshll.u32 %v2118_v38, 16  ;;  %v2328_v42 = vshll.u32 %v2119_v58, 16  ;;  %v2333_v40 = vshrl.u32 %v2120_v24, 16  ;;  %v2676_v1 = vsel %vm1879_vm4, %v7626_v16, %v10572_v2 }
 0x38d   :  { %v10684_v29 = vpop.permute.xlu0 %4347  ;;  %v2298_v36 = vrot.slane %v2297_v8, 4  ;;  %v2311_v63 = vor.u32 %v2310_v57, %v2307_v27  ;;  %v2336_v55 = vshll.u32 %v2120_v24, 16  ;;  %v2692_v13 = vsel %vm1904_vm6, %v2676_v1, %v10592_v46  ;;  %v4166_v27 = vld [vmem:[#allocation3 + $0x18] sm:$0xe] }
 0x38e   :  { %v2321_v15 = vrot.slane %v2319_v6, 4  ;;  %v2324_v7 = vrot.slane %v2322_v32, 5  ;;  %v2330_v25 = vrot.slane %v2328_v42, 5  ;;  %8138 = vmatprep.mubr.msk.bf16.mxu0 %vm1976_vm8, %v2692_v13  ;;  %v2335_v43 = vrot.slane %v2333_v40, 4  ;;  %v10711_v6 = vpop.permute.xlu1 %4389  ;;  %v8348_v42 = vld [vmem:[#allocation3] sm:$0xf] }
 0x38f   :  { %v2303_v38 = vsel %vm9512_vm3, %v2298_v36, %v2302_v21  ;;  %v2312_v58 = vrot.slane %v2311_v63, 4  ;;  %v2338_v2 = vrot.slane %v2336_v55, 5  ;;  %8139 = vmatmul.mubr.msk.bf16.gmra.mrb[8].mxu0 %vm1976_vm8, %v2694_v54  ;;  %v2342_v5 = vshll.u32 %v2121_v37, 16  ;;  %v8349_v40 = vld [vmem:[#allocation3 + $0x8] sm:$0xf] }
 0x390   :  { %v2325_v51 = vor.u32 %v2324_v7, %v2321_v15  ;;  %v1903_v24 = vsel %vm1879_vm4, %v7590_v47, %v10633_v10  ;;  %v1918_v46 = vsel %vm1904_vm6, %v1900_v0, %v10604_v11  ;;  %v4736_v11 = vsel %vm4734_vm9, %v10569_v14, %v10243_v4  ;;  %v4167_v37 = vld [vmem:[#allocation3 + $0x20] sm:$0xe]  ;;  %v4168_v14 = vld [vmem:[#allocation3 + $0x28] sm:$0xe] }
 0x391   :  { %v2317_v23 = vsel %vm9512_vm3, %v2312_v58, %v2316_v44  ;;  %v2339_v12 = vor.u32 %v2338_v2, %v2335_v43  ;;  %8114 = vmatprep.mubr.msk.bf16.mxu1 %vm1976_vm8, %v1918_v46  ;;  %v1920_v21 = vsel %vm1904_vm6, %v1903_v24, %v10597_v22  ;;  %v10705_v54 = vpop.permute.xlu0 %4579  ;;  %v2344_v47 = vrot.slane %v2342_v5, 5  ;;  %v8347_v22 = vld [vmem:[#allocation3 + $0x2c] sm:$0x1] }
 0x392   :  { %v7628_v16 = vcombine.low %v2303_v38, %v2317_v23  ;;  %v2326_v8 = vrot.slane %v2325_v51, 4  ;;  %8115 = vmatmul.mubr.msk.bf16.gmra.mrb[28].mxu1 %vm1976_vm8, %v1920_v21  ;;  %vm4653_vm10 = vcmask 392192   ;;  %v7685_v57 = vrot.slane %v4165_v33, 9 }
 0x393   :  { %v2340_v0 = vrot.slane %v2339_v12, 4  ;;  %5079 = vmatprep.mubr.bf16.mxu1 %v4736_v11  ;;  %v7686_v44 = vrot.slane %v4166_v27, 9  ;;  %v4227_v32 = vrot.slane %v8347_v22, 5  ;;  %v7701_v1 = vcombine.low %v8348_v42, %v8349_v40  ;;  %v4169_v11 = vld [vmem:[#allocation3 + $0x30] sm:$0xe] }
 0x394   :  { %v2680_v36 = vsel %vm1879_vm4, %v7628_v16, %v10628_v49  ;;  %v2331_v63 = vsel %vm9512_vm3, %v2326_v8, %v2330_v25  ;;  %v12114_v15 = vrot.slane %v10526_v26, 5  ;;  %v12115_v38 = vrot.slane %v10529_v48, 5  ;;  %v10751_v33 = vpop.permute.xlu1 %4619  ;;  %v8353_v22 = vld [vmem:[#allocation3 + $0x20] sm:$0xf]  ;;  %v4180_v40 = vld [vmem:[#allocation3 + $0x98] sm:$0xe] }
 0x395   :  { %v2345_v55 = vsel %vm9512_vm3, %v2340_v0, %v2344_v47  ;;  %v2696_v13 = vsel %vm1904_vm6, %v2680_v36, %v10666_v61  ;;  %v4656_v25 = vsel %vm4653_vm10, %v7701_v1, %v10276_v19  ;;  %v4705_v58 = vsel %vm296_vm0, %v10268_v39, %v10181_v45  ;;  %v10737_v48 = vpop.permute.xlu0 %4445 }
 0x396   :  { %v4216_v7 = vsel %vm9501_vm2, %v7685_v57, %v12114_v15  ;;  %v4220_v49 = vsel %vm9501_vm2, %v7686_v44, %v12115_v38  ;;  %v7629_v43 = vcombine.low %v2331_v63, %v2345_v55  ;;  %8142 = vmatprep.mubr.msk.bf16.mxu0 %vm1976_vm8, %v2696_v13  ;;  %v4721_v26 = vsel %vm1904_vm6, %v4705_v58, %v10330_v59  ;;  %v8352_v57 = vld [vmem:[#allocation3 + $0x34] sm:$0x1]  ;;  %v12118_v38 = vld [vmem:[#allocation84_spill] sm:$0xff] }
 0x397   :  { %v7765_v61 = vcombine.low %v4216_v7, %v4220_v49  ;;  %v7687_v2 = vrot.slane %v4167_v37, 9  ;;  %v7688_v51 = vrot.slane %v4168_v14, 9  ;;  %v4679_v19 = vsel %vm1976_vm8, %v4656_v25, %v10175_v35  ;;  %v12117_v13 = vld [vmem:[#allocation83_spill] sm:$0xff]  ;;  %v12119_v25 = vld [vmem:[#allocation74_spill] sm:$0xff] }
 0x398   :  { %v2682_v5 = vsel %vm1879_vm4, %v7629_v43, %v10633_v10  ;;  %v12116_v24 = vrot.slane %v10564_v3, 5  ;;  %v4739_v10 = vsel %vm4734_vm9, %v4721_v26, %v10259_v20  ;;  %v8351_v3 = vld [vmem:[#allocation3 + $0x18] sm:$0xf]  ;;  %v4707_v12 = vsel %vm296_vm0, %v10381_v60, %v10296_v30  ;;  %v12120_v43 = vld [vmem:[#allocation75_spill] sm:$0xff]  ;;  %v4172_v26 = vld [vmem:[#allocation3 + $0x48] sm:$0xe] }
 0x399   :  { %v2698_v45 = vsel %vm1904_vm6, %v2682_v5, %v10648_v52  ;;  %v4228_v59 = vsel %vm9501_vm2, %v7688_v51, %v4227_v32  ;;  %v8350_v52 = vld [vmem:[#allocation3 + $0x10] sm:$0xf]  ;;  %v10757_v23 = vpop.permute.xlu0 %4485  ;;  %vm4775_vm12 = vcmask 654336   ;;  %v4723_v16 = vsel %vm1904_vm6, %v4707_v12, %v10518_v31  ;;  %v4170_v31 = vld [vmem:[#allocation3 + $0x38] sm:$0xe] }
 0x39a   :  { %v4224_v46 = vsel %vm9501_vm2, %v7687_v2, %v12116_v24  ;;  %8143 = vmatmul.mubr.msk.bf16.gmra.mrb[12].mxu0 %vm1976_vm8, %v2698_v45  ;;  %5080 = vmatmul.mubr.bf16.vlgmr.msra.gmra.mrb[32].mxu1 %v4679_v19  ;;  %v7702_v27 = vcombine.low %v8350_v52, %v8351_v3  ;;  %v4760_v47 = vsel %vm1879_vm4, %v10243_v4, %v10223_v62  ;;  %v4231_v44 = vrot.slane %v8352_v57, 5  ;;  %v8354_v32 = vld [vmem:[#allocation3 + $0x28] sm:$0xf]  ;;  %v8356_v52 = vld [vmem:[#allocation3 + $0x44] sm:$0x1] }
 0x39b   :  { %v7766_v35 = vcombine.low %v4224_v46, %v4228_v59  ;;  %7801 = vmatprep.mubr.msk.bf16.mxu0 %vm4653_vm10, %v7765_v61  ;;  %5087 = vmatprep.mubr.bf16.mxu1 %v4739_v10  ;;  %v4777_v0 = vsel %vm4775_vm12, %v4760_v47, %v10350_v28  ;;  %v7703_v42 = vcombine.low %v8353_v22, %v8354_v32  ;;  %v7689_v62 = vrot.slane %v4169_v11, 9  ;;  %v4179_v28 = vld [vmem:[#allocation3 + $0x90] sm:$0xe]  ;;  %v12121_v61 = vld [vmem:[#allocation78_spill] sm:$0xff]  ;;  %v8359_v47 = vld [vmem:[#allocation3 + $0x38] sm:$0xf] }
 0x39c   :  { %v4659_v21 = vsel %vm4653_vm10, %v7702_v27, %v10367_v50  ;;  %v4742_v50 = vsel %vm4734_vm9, %v4723_v16, %v10447_v56  ;;  %v7690_v37 = vrot.slane %v4170_v31, 9  ;;  %v7699_v55 = vrot.slane %v4179_v28, 9  ;;  %v8357_v12 = vld [vmem:[#allocation3 + $0x4c] sm:$0x1]  ;;  %v8358_v16 = vld [vmem:[#allocation3 + $0x30] sm:$0xf] }
 0x39d   :  { %v4682_v30 = vsel %vm1976_vm8, %v4659_v21, %v10268_v39  ;;  %v10778_v4 = vpop.permute.xlu0 %4525  ;;  %v8355_v39 = vld [vmem:[#allocation3 + $0x3c] sm:$0x1]  ;;  %v4662_v36 = vsel %vm4653_vm10, %v7703_v42, %v10453_v34  ;;  %v4232_v63 = vsel %vm9501_vm2, %v7689_v62, %v4231_v44  ;;  %v4271_v15 = vrot.slane %v12117_v13, 5 }
 0x39e   :  { %v4235_v1 = vrot.slane %v8355_v39, 5  ;;  %v7700_v7 = vrot.slane %v4180_v40, 9  ;;  %v4275_v49 = vrot.slane %v12118_v38, 5  ;;  %v4762_v58 = vsel %vm1879_vm4, %v10259_v20, %v12119_v25  ;;  %v12122_v20 = vld [vmem:[#allocation77_spill] sm:$0xff]  ;;  %v12123_v31 = vld [vmem:[#allocation76_spill] sm:$0xff] }
 0x39f   :  { %v10766_v8 = vpop.permute.xlu1 %4349  ;;  %v4709_v34 = vsel %vm296_vm0, %v12121_v61, %v12120_v43  ;;  %v10800_v5 = vsel %vm9501_vm2, %v7699_v55, %v4271_v15  ;;  %v4780_v45 = vsel %vm4775_vm12, %v4762_v58, %v12122_v20  ;;  %v4685_v46 = vsel %vm1976_vm8, %v4662_v36, %v10381_v60  ;;  %v4173_v39 = vld [vmem:[#allocation3 + $0x60] sm:$0xe]  ;;  %v8363_v55 = vld [vmem:[#allocation3 + $0x6c] sm:$0x1]  ;;  %v4176_v20 = vld [vmem:[#allocation3 + $0x78] sm:$0xe] }
 0x3a0   :  { %v4725_v2 = vsel %vm1904_vm6, %v4709_v34, %v10674_v9  ;;  %v4236_v51 = vsel %vm9501_vm2, %v7690_v37, %v4235_v1  ;;  %v10804_v19 = vsel %vm9501_vm2, %v7700_v7, %v4275_v49  ;;  %v4171_v9 = vld [vmem:[#allocation3 + $0x40] sm:$0xe]  ;;  %v4239_v3 = vrot.slane %v8356_v52, 5  ;;  %v8360_v1 = vld [vmem:[#allocation3 + $0x64] sm:$0x1] }
 0x3a1   :  { %v7767_v24 = vcombine.low %v4232_v63, %v4236_v51  ;;  %v10810_v59 = vpop.permute.xlu0 %4391  ;;  %v7772_v10 = vcombine.low %v10800_v5, %v10804_v19  ;;  %v7692_v27 = vrot.slane %v4172_v26, 9  ;;  %v4243_v21 = vrot.slane %v8357_v12, 5  ;;  %v8362_v63 = vld [vmem:[#allocation3 + $0x58] sm:$0xf]  ;;  %v4175_v51 = vld [vmem:[#allocation3 + $0x70] sm:$0xe] }
 0x3a2   :  { %5177 = vmatmul.mubr.bf16.vlgmr.msra.gmra.mrb[16].mxu0 %v4777_v0  ;;  %5088 = vmatmul.mubr.bf16.gmra.mrb[36].mxu1 %v4682_v30  ;;  %v7704_v11 = vcombine.low %v8358_v16, %v8359_v47  ;;  %v7691_v0 = vrot.slane %v4171_v9, 9  ;;  %v4764_v22 = vsel %vm1879_vm4, %v10447_v56, %v12123_v31  ;;  %v4711_v32 = vsel %vm296_vm0, %v10711_v6, %v10737_v48  ;;  %v4174_v48 = vld [vmem:[#allocation3 + $0x68] sm:$0xe] }
 0x3a3   :  { %7802 = vmatprep.mubr.msk.bf16.mxu0 %vm4653_vm10, %v7766_v35  ;;  %5095 = vmatprep.mubr.bf16.mxu1 %v4742_v50  ;;  %v10784_v14 = vpop.permute.xlu1 %4581  ;;  %v4745_v35 = vsel %vm4734_vm9, %v4725_v2, %v10688_v18  ;;  %v4244_v44 = vsel %vm9501_vm2, %v7692_v27, %v4243_v21  ;;  %v4727_v42 = vsel %vm1904_vm6, %v4711_v32, %v10757_v23  ;;  %v4247_v36 = vrot.slane %v8360_v1, 5  ;;  %v8361_v23 = vld [vmem:[#allocation3 + $0x50] sm:$0xf]  ;;  %v8366_v9 = vld [vmem:[#allocation3 + $0x68] sm:$0xf] }
 0x3a4   :  { %v4665_v30 = vsel %vm4653_vm10, %v7704_v11, %v10684_v29  ;;  %v4240_v57 = vsel %vm9501_vm2, %v7691_v0, %v4239_v3  ;;  %v4783_v29 = vsel %vm4775_vm12, %v4764_v22, %v10646_v41  ;;  %v4748_v56 = vsel %vm4734_vm9, %v4727_v42, %v10778_v4  ;;  %v8367_v27 = vld [vmem:[#allocation3 + $0x74] sm:$0x1]  ;;  %v4178_v32 = vld [vmem:[#allocation3 + $0x88] sm:$0xe]  ;;  %v8368_v1 = vld [vmem:[#allocation3 + $0x70] sm:$0xf] }
 0x3a5   :  { %v7768_v62 = vcombine.low %v4240_v57, %v4244_v44  ;;  %v4688_v28 = vsel %vm1976_vm8, %v4665_v30, %v12121_v61  ;;  %v7705_v41 = vcombine.low %v8361_v23, %v8362_v63  ;;  %v7693_v37 = vrot.slane %v4173_v39, 9  ;;  %v4177_v57 = vld [vmem:[#allocation3 + $0x80] sm:$0xe]  ;;  %v12124_v44 = vld [vmem:[#allocation79_spill] sm:$0xff] }
 0x3a6   :  { %v4622_v50 = vpop.permute.xlu0 %4621  ;;  %v4251_v13 = vrot.slane %v8363_v55, 5  ;;  %v7694_v49 = vrot.slane %v4174_v48, 9  ;;  %v4766_v58 = vsel %vm1879_vm4, %v10688_v18, %v10705_v54  ;;  %v8364_v54 = vld [vmem:[#allocation3 + $0x7c] sm:$0x1]  ;;  %v7696_v52 = vrot.slane %v4176_v20, 9 }
 0x3a7   :  { %v4448_v60 = vpop.permute.xlu1 %4447  ;;  %v4668_v7 = vsel %vm4653_vm10, %v7705_v41, %v10766_v8  ;;  %v4248_v38 = vsel %vm9501_vm2, %v7693_v37, %v4247_v36  ;;  %v4786_v8 = vsel %vm4775_vm12, %v4766_v58, %v10751_v33  ;;  %v7695_v33 = vrot.slane %v4175_v51, 9  ;;  %v8369_v36 = vld [vmem:[#allocation3 + $0x78] sm:$0xf]  ;;  %v12127_v51 = vld [vmem:[#allocation81_spill] sm:$0xff] }
 0x3a8   :  { %v4713_v43 = vsel %vm296_vm0, %v10810_v59, %v4448_v60  ;;  %v4252_v61 = vsel %vm9501_vm2, %v7694_v49, %v4251_v13  ;;  %v4691_v2 = vsel %vm1976_vm8, %v4668_v7, %v10711_v6  ;;  %v4255_v12 = vrot.slane %v8367_v27, 5  ;;  %v5318_v27 = vld [vmem:[#allocation4 + $0x14] sm:$0x1] }
 0x3a9   :  { %v7769_v26 = vcombine.low %v4248_v38, %v4252_v61  ;;  %v4768_v60 = vsel %vm1879_vm4, %v10778_v4, %v10784_v14  ;;  %v4263_v31 = vrot.slane %v12124_v44, 5  ;;  %v7697_v4 = vrot.slane %v4177_v57, 9  ;;  %v12125_v14 = vld [vmem:[#allocation80_spill] sm:$0xff]  ;;  %v5324_v57 = vld [vmem:[#allocation4 + $0x24] sm:$0x1] }
 0x3aa   :  { %5185 = vmatmul.mubr.bf16.gmra.mrb[20].mxu0 %v4780_v45  ;;  %5096 = vmatmul.mubr.bf16.gmra.mrb[40].mxu1 %v4685_v46  ;;  %v4259_v45 = vrot.slane %v8364_v54, 5  ;;  %v8365_v46 = vld [vmem:[#allocation3 + $0x60] sm:$0xf]  ;;  %v4256_v16 = vsel %vm9501_vm2, %v7695_v33, %v4255_v12  ;;  %v4789_v11 = vsel %vm4775_vm12, %v4768_v60, %v4622_v50  ;;  %v4267_v42 = vrot.slane %v12125_v14, 5  ;;  %v5273_v60 = vld [vmem:[#allocation4 + $0x18] sm:$0x1] }
 0x3ab   :  { %7803 = vmatprep.mubr.msk.bf16.mxu0 %vm4653_vm10, %v7767_v24  ;;  %5103 = vmatprep.mubr.bf16.mxu1 %v4745_v35  ;;  %v4488_v40 = vpop.permute.xlu1 %4487  ;;  %v7706_v35 = vcombine.low %v8365_v46, %v8366_v9  ;;  %v7698_v50 = vrot.slane %v4178_v32, 9  ;;  %v7707_v48 = vcombine.low %v8368_v1, %v8369_v36  ;;  %v5267_v46 = vld [vmem:[#allocation4 + $0x8] sm:$0x1]  ;;  %v5315_v9 = vld [vmem:[#allocation4 + $0xc] sm:$0x1]  ;;  %v5325_v44 = vsel %vm9061_vm7, 0, %v5324_v57 }
 0x3ac   :  { %v4729_v34 = vsel %vm1904_vm6, %v4713_v43, %v4488_v40  ;;  %v4260_v21 = vsel %vm9501_vm2, %v7696_v52, %v4259_v45  ;;  %v5268_v33 = vsel %vm9054_vm5, 0, %v5267_v46  ;;  %5326 = vst [vmem:[#allocation4 + $0x24] sm:$0x1] %v5325_v44  ;;  %v5282_v14 = vld [vmem:[#allocation4 + $0x30] sm:$0x1] }
 0x3ad   :  { %v7770_v0 = vcombine.low %v4256_v16, %v4260_v21  ;;  %5269 = vst [vmem:[#allocation4 + $0x8] sm:$0x1] %v5268_v33  ;;  %v5319_v21 = vsel %vm9061_vm7, 0, %v5318_v27  ;;  %v5321_v16 = vld [vmem:[#allocation4 + $0x1c] sm:$0x1] }
 0x3ae   :  { %5320 = vst [vmem:[#allocation4 + $0x14] sm:$0x1] %v5319_v21  ;;  %v5336_v1 = vld [vmem:[#allocation4 + $0x44] sm:$0x1]  ;;  %v5306_v46 = vld [vmem:[#allocation4 + $0x80] sm:$0x1] }
 0x3af   :  { %v5337_v36 = vsel %vm9061_vm7, 0, %v5336_v1  ;;  %v5307_v33 = vsel %vm9054_vm5, 0, %v5306_v46 }
 0x3b0   :  { %5338 = vst [vmem:[#allocation4 + $0x44] sm:$0x1] %v5337_v36  ;;  %5308 = vst [vmem:[#allocation4 + $0x80] sm:$0x1] %v5307_v33 }
 0x3b2   :  { %5193 = vmatmul.mubr.bf16.gmra.mrb[24].mxu0 %v4783_v29  ;;  %5104 = vmatmul.mubr.bf16.gmra.mrb[44].mxu1 %v4688_v28  ;;  %v4528_v25 = vpop.permute.xlu1 %4527  ;;  %v4264_v29 = vsel %vm9501_vm2, %v7697_v4, %v4263_v31  ;;  %v5279_v31 = vld [vmem:[#allocation4 + $0x28] sm:$0x1] }
 0x3b3   :  { %7804 = vmatprep.mubr.msk.bf16.mxu0 %vm4653_vm10, %v7768_v62  ;;  %5111 = vmatprep.mubr.bf16.mxu1 %v4748_v56  ;;  %v4751_v18 = vsel %vm4734_vm9, %v4729_v34, %v4528_v25  ;;  %v5280_v32 = vsel %vm9054_vm5, 0, %v5279_v31 }
 0x3b4   :  { %5281 = vst [vmem:[#allocation4 + $0x28] sm:$0x1] %v5280_v32 }
 0x3b5   :  { %v4352_v15 = vpop.permute.xlu0 %4351 }
 0x3b6   :  { %v4671_v6 = vsel %vm4653_vm10, %v7706_v35, %v4352_v15 }
 0x3b7   :  { %v4694_v30 = vsel %vm1976_vm8, %v4671_v6, %v10810_v59  ;;  %v4268_v59 = vsel %vm9501_vm2, %v7698_v50, %v4267_v42  ;;  %v5270_v6 = vld [vmem:[#allocation4 + $0x10] sm:$0x1]  ;;  %v5330_v42 = vld [vmem:[#allocation4 + $0x34] sm:$0x1] }
 0x3b8   :  { %v7771_v56 = vcombine.low %v4264_v29, %v4268_v59  ;;  %v5271_v12 = vsel %vm9054_vm5, 0, %v5270_v6  ;;  %v5283_v29 = vsel %vm9054_vm5, 0, %v5282_v14  ;;  %v5331_v50 = vsel %vm9061_vm7, 0, %v5330_v42  ;;  %v5309_v6 = vld [vmem:[#allocation4 + $0x88] sm:$0x1] }
 0x3b9   :  { %v4584_v24 = vpop.permute.xlu0 %4583  ;;  %v4394_v3 = vpop.permute.xlu1 %4393  ;;  %5272 = vst [vmem:[#allocation4 + $0x10] sm:$0x1] %v5271_v12  ;;  %5284 = vst [vmem:[#allocation4 + $0x30] sm:$0x1] %v5283_v29  ;;  %v5310_v27 = vsel %vm9054_vm5, 0, %v5309_v6 }
 0x3ba   :  { %5201 = vmatmul.mubr.bf16.gmra.mrb[28].mxu0 %v4786_v8  ;;  %5112 = vmatmul.mubr.bf16.gmra.mrb[48].mxu1 %v4691_v2  ;;  %v4770_v28 = vsel %vm1879_vm4, %v4528_v25, %v4584_v24  ;;  %v12126_v2 = vld [vmem:[#allocation82_spill] sm:$0xff]  ;;  %5332 = vst [vmem:[#allocation4 + $0x34] sm:$0x1] %v5331_v50  ;;  %5311 = vst [vmem:[#allocation4 + $0x88] sm:$0x1] %v5310_v27 }
 0x3bb   :  { %7805 = vmatprep.mubr.msk.bf16.mxu0 %vm4653_vm10, %v7769_v26  ;;  %5119 = vmatprep.mubr.bf16.mxu1 %v4751_v18  ;;  %v7708_v20 = vcombine.low %v12127_v51, %v12126_v2  ;;  %v5300_v2 = vld [vmem:[#allocation4 + $0x70] sm:$0x1]  ;;  %v5348_v51 = vld [vmem:[#allocation4 + $0x74] sm:$0x1]  ;;  %v5357_v12 = vld [vmem:[#allocation4 + $0x8c] sm:$0x1] }
 0x3bc   :  { %v5358_v21 = vsel %vm9061_vm7, 0, %v5357_v12 }
 0x3bd   :  { %v4450_v47 = vpop.permute.xlu0 %4449  ;;  %v4624_v22 = vpop.permute.xlu1 %4623  ;;  %5359 = vst [vmem:[#allocation4 + $0x8c] sm:$0x1] %v5358_v21 }
 0x3be   :  { %v4792_v39 = vsel %vm4775_vm12, %v4770_v28, %v4624_v22  ;;  %v4715_v23 = vsel %vm296_vm0, %v4394_v3, %v4450_v47  ;;  %v5274_v47 = vsel %vm9054_vm5, 0, %v5273_v60  ;;  %v5327_v22 = vld [vmem:[#allocation4 + $0x2c] sm:$0x1]  ;;  %v5333_v28 = vld [vmem:[#allocation4 + $0x3c] sm:$0x1] }
 0x3bf   :  { %5275 = vst [vmem:[#allocation4 + $0x18] sm:$0x1] %v5274_v47  ;;  %v5328_v4 = vsel %vm9061_vm7, 0, %v5327_v22  ;;  %v5312_v60 = vld [vmem:[#allocation4 + $0x90] sm:$0x1] }
 0x3c0   :  { %5329 = vst [vmem:[#allocation4 + $0x2c] sm:$0x1] %v5328_v4  ;;  %v5313_v47 = vsel %vm9054_vm5, 0, %v5312_v60 }
 0x3c1   :  { %v4530_v62 = vpop.permute.xlu0 %4529  ;;  %5314 = vst [vmem:[#allocation4 + $0x90] sm:$0x1] %v5313_v47  ;;  %v5587_v47 = vld [vmem:[#allocation4 + $0x8] sm:$0xf] }
 0x3c2   :  { %5209 = vmatmul.mubr.bf16.gmra.mrb[32].mxu0 %v4789_v11  ;;  %5120 = vmatmul.mubr.bf16.gmra.mrb[52].mxu1 %v4694_v30  ;;  %v5322_v11 = vsel %vm9061_vm7, 0, %v5321_v16  ;;  %v5360_v16 = vld [vmem:[#allocation4 + $0x94] sm:$0x1] }
 0x3c3   :  { %7806 = vmatprep.mubr.msk.bf16.mxu0 %vm4653_vm10, %v7770_v0  ;;  %5323 = vst [vmem:[#allocation4 + $0x1c] sm:$0x1] %v5322_v11  ;;  %v5276_v0 = vld [vmem:[#allocation4 + $0x20] sm:$0x1]  ;;  %v5361_v11 = vsel %vm9061_vm7, 0, %v5360_v16 }
 0x3c4   :  { %v5277_v30 = vsel %vm9054_vm5, 0, %v5276_v0  ;;  %5362 = vst [vmem:[#allocation4 + $0x94] sm:$0x1] %v5361_v11 }
 0x3c5   :  { %5278 = vst [vmem:[#allocation4 + $0x20] sm:$0x1] %v5277_v30 }
 0x3c7   :  { %v4354_v40 = vpop.permute.xlu1 %4353 }
 0x3c8   :  { %v4674_v63 = vsel %vm4653_vm10, %v7707_v48, %v4354_v40  ;;  %v5334_v40 = vsel %vm9061_vm7, 0, %v5333_v28 }
 0x3c9   :  { %v4697_v15 = vsel %vm1976_vm8, %v4674_v63, %v4394_v3  ;;  %v5316_v3 = vsel %vm9061_vm7, 0, %v5315_v9  ;;  %5335 = vst [vmem:[#allocation4 + $0x3c] sm:$0x1] %v5334_v40  ;;  %v5339_v63 = vld [vmem:[#allocation4 + $0x5c] sm:$0x1] }
 0x3ca   :  { %5217 = vmatmul.mubr.bf16.gmra.mrb[36].mxu0 %v4792_v39  ;;  %5317 = vst [vmem:[#allocation4 + $0xc] sm:$0x1] %v5316_v3  ;;  %v5288_v39 = vld [vmem:[#allocation4 + $0x40] sm:$0x1]  ;;  %v5354_v9 = vld [vmem:[#allocation4 + $0x84] sm:$0x1] }
 0x3cb   :  { %7807 = vmatprep.mubr.msk.bf16.mxu0 %vm4653_vm10, %v7771_v56  ;;  %v5289_v56 = vsel %vm9054_vm5, 0, %v5288_v39  ;;  %v5355_v3 = vsel %vm9061_vm7, 0, %v5354_v9 }
 0x3cc   :  { %v4586_v55 = vpop.permute.xlu1 %4585  ;;  %5290 = vst [vmem:[#allocation4 + $0x40] sm:$0x1] %v5289_v56  ;;  %5356 = vst [vmem:[#allocation4 + $0x84] sm:$0x1] %v5355_v3 }
 0x3cd   :  { %v4772_v49 = vsel %vm1879_vm4, %v4530_v62, %v4586_v55  ;;  %v5340_v55 = vsel %vm9061_vm7, 0, %v5339_v63 }
 0x3ce   :  { %5341 = vst [vmem:[#allocation4 + $0x5c] sm:$0x1] %v5340_v55 }
 0x3cf   :  { %v4490_v41 = vpop.permute.xlu0 %4489 }
 0x3d0   :  { %v4731_v37 = vsel %vm1904_vm6, %v4715_v23, %v4490_v41  ;;  %v4452_v38 = vpop.permute.xlu1 %4451  ;;  %v5291_v23 = vld [vmem:[#allocation4 + $0x58] sm:$0x1] }
 0x3d1   :  { %v4754_v13 = vsel %vm4734_vm9, %v4731_v37, %v4530_v62  ;;  %v5285_v62 = vld [vmem:[#allocation4 + $0x38] sm:$0x1]  ;;  %v5292_v37 = vsel %vm9054_vm5, 0, %v5291_v23  ;;  %v5590_v11 = vld [vmem:[#allocation4 + $0xc] sm:$0x1] }
 0x3d2   :  { %5127 = vmatprep.mubr.bf16.mxu1 %v4754_v13  ;;  %v5286_v59 = vsel %vm9054_vm5, 0, %v5285_v62  ;;  %5293 = vst [vmem:[#allocation4 + $0x58] sm:$0x1] %v5292_v37 }
 0x3d3   :  { %v4396_v7 = vpop.permute.xlu0 %4395  ;;  %5128 = vmatmul.mubr.bf16.gmra.mrb[56].mxu1 %v4697_v15  ;;  %5287 = vst [vmem:[#allocation4 + $0x38] sm:$0x1] %v5286_v59 }
 0x3d4   :  { %v4717_v61 = vsel %vm296_vm0, %v4396_v7, %v4452_v38  ;;  %v5342_v38 = vld [vmem:[#allocation4 + $0x64] sm:$0x1] }
 0x3d7   :  { %v4626_v25 = vpop.permute.xlu0 %4625 }
 0x3d8   :  { %v4795_v58 = vsel %vm4775_vm12, %v4772_v49, %v4626_v25  ;;  %v5343_v25 = vsel %vm9061_vm7, 0, %v5342_v38 }
 0x3d9   :  { %5225 = vmatmul.mubr.bf16.gmra.mrb[40].mxu0 %v4795_v58  ;;  %5344 = vst [vmem:[#allocation4 + $0x64] sm:$0x1] %v5343_v25  ;;  %v5297_v58 = vld [vmem:[#allocation4 + $0x68] sm:$0x1] }
 0x3da   :  { %7808 = vmatprep.mubr.msk.bf16.mxu0 %vm4653_vm10, %v7772_v10 }
 0x3db   :  { %v4492_v43 = vpop.permute.xlu1 %4491 }
 0x3dc   :  { %v4733_v34 = vsel %vm1904_vm6, %v4717_v61, %v4492_v43  ;;  %v5345_v43 = vld [vmem:[#allocation4 + $0x6c] sm:$0x1]  ;;  %v5298_v61 = vsel %vm9054_vm5, 0, %v5297_v58 }
 0x3dd   :  { %5299 = vst [vmem:[#allocation4 + $0x68] sm:$0x1] %v5298_v61 }
 0x3df   :  { %v4532_v8 = vpop.permute.xlu1 %4531 }
 0x3e0   :  { %v4757_v26 = vsel %vm4734_vm9, %v4733_v34, %v4532_v8  ;;  %v5346_v34 = vsel %vm9061_vm7, 0, %v5345_v43 }
 0x3e1   :  { %5135 = vmatprep.mubr.bf16.mxu1 %v4757_v26  ;;  %5347 = vst [vmem:[#allocation4 + $0x6c] sm:$0x1] %v5346_v34 }
 0x3e2   :  { %v4356_v18 = vpop.permute.xlu0 %4355 }
 0x3e3   :  { %v4677_v54 = vsel %vm4653_vm10, %v7708_v20, %v4356_v18  ;;  %v5301_v18 = vsel %vm9054_vm5, 0, %v5300_v2 }
 0x3e4   :  { %v4700_v45 = vsel %vm1976_vm8, %v4677_v54, %v4396_v7  ;;  %v5294_v7 = vld [vmem:[#allocation4 + $0x60] sm:$0x1]  ;;  %v5349_v54 = vsel %vm9061_vm7, 0, %v5348_v51  ;;  %5302 = vst [vmem:[#allocation4 + $0x70] sm:$0x1] %v5301_v18 }
 0x3e5   :  { %5136 = vmatmul.mubr.bf16.gmra.mrb[60].mxu1 %v4700_v45  ;;  %v5295_v49 = vsel %vm9054_vm5, 0, %v5294_v7  ;;  %5350 = vst [vmem:[#allocation4 + $0x74] sm:$0x1] %v5349_v54 }
 0x3e6   :  { %v4588_v5 = vpop.permute.xlu0 %4587  ;;  %5296 = vst [vmem:[#allocation4 + $0x60] sm:$0x1] %v5295_v49  ;;  %v11023_v49 = vld [vmem:[#allocation14] ss:$0 sm:$0xff] }
 0x3e7   :  { %v4774_v19 = vsel %vm1879_vm4, %v4532_v8, %v4588_v5  ;;  %v5303_v5 = vld [vmem:[#allocation4 + $0x78] sm:$0x1] }
 0x3ec   :  { %v4628_v10 = vpop.permute.xlu1 %4627 }
 0x3ed   :  { %v4798_v24 = vsel %vm4775_vm12, %v4774_v19, %v4628_v10  ;;  %v5351_v19 = vld [vmem:[#allocation4 + $0x7c] sm:$0x1]  ;;  %v5304_v10 = vsel %vm9054_vm5, 0, %v5303_v5 }
 0x3ee   :  { %5233 = vmatmul.mubr.bf16.gmra.mrb[44].mxu0 %v4798_v24  ;;  %v5352_v24 = vsel %vm9061_vm7, 0, %v5351_v19  ;;  %5305 = vst [vmem:[#allocation4 + $0x78] sm:$0x1] %v5304_v10  ;;  %vm445_vm7 = vcmask 122880  }
 0x3ef   :  { %5353 = vst [vmem:[#allocation4 + $0x7c] sm:$0x1] %v5352_v24 }
 0x420   :  { %v10929_v48 = vpop.f32.mrb[16].mxu1 }
 0x421   :  { %v10931_v41 = vpop.f32.mrb[17].mxu1 }
 0x422   :  { %v10937_v13 = vpop.f32.mrb[18].mxu1 }
 0x423   :  { %v10939_v15 = vpop.f32.mrb[19].mxu1 }
 0x42f   :  { %v10949_v8 = vpop.f32.mrb[0].mxu0 }
 0x430   :  { %v10951_v26 = vpop.f32.mrb[1].mxu0 }
 0x431   :  { %v10953_v20 = vpop.f32.mrb[2].mxu0 }
 0x432   :  { %12130 = vst [vmem:[#allocation83_spill] sm:$0xff] %v10953_v20  ;;  %v10959_v45 = vpop.f32.mrb[3].mxu0 }
 0x433   :  { %12131 = vst [vmem:[#allocation84_spill] sm:$0xff] %v10959_v45 }
 0x452   :  { %v10977_v0 = vpop.f32.mrb[20].mxu1 }
 0x453   :  { %v10979_v30 = vpop.f32.mrb[21].mxu1 }
 0x454   :  { %v10981_v57 = vpop.f32.mrb[22].mxu1 }
 0x455   :  { %v10983_v44 = vpop.f32.mrb[23].mxu1 }
 0x459   :  { %v10985_v31 = vpop.f32.mrb[4].mxu0 }
 0x45a   :  { %12132 = vst [vmem:[#allocation74_spill] sm:$0xff] %v10985_v31  ;;  %v10987_v22 = vpop.f32.mrb[5].mxu0 }
 0x45b   :  { %v10989_v32 = vpop.f32.mrb[6].mxu0  ;;  %v10993_v52 = vpop.f32.mrb[24].mxu1 }
 0x45c   :  { %12133 = vst [vmem:[#allocation75_spill] sm:$0xff] %v10989_v32  ;;  %v10991_v4 = vpop.f32.mrb[7].mxu0  ;;  %v10995_v14 = vpop.f32.mrb[25].mxu1 }
 0x45d   :  { %12134 = vst [vmem:[#allocation78_spill] sm:$0xff] %v10991_v4  ;;  %v10997_v42 = vpop.f32.mrb[26].mxu1  ;;  %v5629_v4 = vld [vmem:[#allocation4 + $0x40] sm:$0xf] }
 0x45e   :  { %v10999_v29 = vpop.f32.mrb[27].mxu1 }
 0x462   :  { %v11001_v50 = vpop.f32.mrb[8].mxu0 }
 0x463   :  { %12135 = vst [vmem:[#allocation77_spill] sm:$0xff] %v11001_v50  ;;  %v11003_v62 = vpop.f32.mrb[9].mxu0 }
 0x464   :  { %12136 = vst [vmem:[#allocation76_spill] sm:$0xff] %v11003_v62  ;;  %v11005_v28 = vpop.f32.mrb[10].mxu0 }
 0x465   :  { %12137 = vst [vmem:[#allocation79_spill] sm:$0xff] %v11005_v28  ;;  %v11007_v59 = vpop.f32.mrb[28].mxu1  ;;  %v11009_v40 = vpop.f32.mrb[11].mxu0 }
 0x466   :  { %12138 = vst [vmem:[#allocation80_spill] sm:$0xff] %v11009_v40  ;;  %v11011_v39 = vpop.f32.mrb[29].mxu1 }
 0x467   :  { %v11013_v56 = vpop.f32.mrb[30].mxu1 }
 0x468   :  { %v11015_v1 = vpop.f32.mrb[31].mxu1 }
 0x46d   :  { %v11017_v36 = vpop.f32.mrb[12].mxu0  ;;  %v7996_v23 = vpop.f32.mrb[32].mxu1 }
 0x46e   :  { %12139 = vst [vmem:[#allocation82_spill] sm:$0xff] %v11017_v36  ;;  %v11019_v63 = vpop.f32.mrb[13].mxu0  ;;  %v7997_v37 = vpop.f32.mrb[33].mxu1 }
 0x46f   :  { %12140 = vst [vmem:[#allocation81_spill] sm:$0xff] %v11019_v63  ;;  %v11021_v55 = vpop.f32.mrb[14].mxu0  ;;  %v7998_v7 = vadd.f32 %v7997_v37, %v7996_v23  ;;  %v7999_v38 = vpop.f32.mrb[34].mxu1 }
 0x470   :  { %12141 = vst [vmem:[#allocation39_spill] sm:$0xff] %v11021_v55  ;;  %v11025_v25 = vpop.f32.mrb[15].mxu0  ;;  %v8000_v58 = vpop.f32.mrb[35].mxu1 }
 0x471   :  { %12142 = vst [vmem:[#allocation40_spill] sm:$0xff] %v11025_v25  ;;  %v8001_v43 = vadd.f32 %v8000_v58, %v7999_v38  ;;  %v5082_v61 = vadd.f32 %v7998_v7, %v11023_v49  ;;  %v5596_v25 = vld [vmem:[#allocation4 + $0x14] sm:$0x1] }
 0x473   :  { %v5085_v34 = vadd.f32 %v8001_v43, %v11023_v49 }
 0x475   :  { %v5178_v2 = vpop.f32.mrb[16].mxu0  ;;  %v8002_v51 = vpop.f32.mrb[36].mxu1 }
 0x476   :  { %v5179_v18 = vadd.f32 %v5178_v2, %v5082_v61  ;;  %v5180_v54 = vpop.f32.mrb[17].mxu0  ;;  %v8003_v5 = vpop.f32.mrb[37].mxu1 }
 0x477   :  { %v5181_v19 = vpop.f32.mrb[18].mxu0  ;;  %v8004_v10 = vadd.f32 %v8003_v5, %v8002_v51  ;;  %v8005_v24 = vpop.f32.mrb[38].mxu1 }
 0x478   :  { %v5241_v46 = vmax.f32 %v5179_v18, 0.0  ;;  %v5182_v9 = vadd.f32 %v5181_v19, %v5085_v34  ;;  %v5183_v33 = vpop.f32.mrb[19].mxu0  ;;  %v8006_v3 = vpop.f32.mrb[39].mxu1  ;;  %v5593_v18 = vld [vmem:[#allocation4 + $0x10] sm:$0xf] }
 0x479   :  { %v8007_v6 = vadd.f32 %v8006_v3, %v8005_v24  ;;  %v5090_v21 = vadd.f32 %v8004_v10, %v11023_v49  ;;  %v6650_v10 = vld [vmem:[#allocation4 + $0x48] sm:$0xf] }
 0x47a   :  { %v7927_v27 = vpack.c.bf16 %v5241_v46, %v5241_v46  ;;  %v5242_v12 = vmax.f32 %v5182_v9, 0.0 }
 0x47b   :  { %v5093_v7 = vadd.f32 %v8007_v6, %v11023_v49 }
 0x47c   :  { %v5428_v60 = vshrl.u32 %v7927_v27, 16  ;;  %v7928_v16 = vpack.c.bf16 %v5242_v12, %v5242_v12  ;;  %v5431_v58 = vshll.u32 %v7927_v27, 16 }
 0x47d   :  { %v5186_v23 = vpop.f32.mrb[20].mxu0  ;;  %v8008_v37 = vpop.f32.mrb[40].mxu1 }
 0x47e   :  { %v5430_v38 = vrot.slane %v5428_v60, 7  ;;  %v5436_v43 = vshrl.u32 %v7928_v16, 16  ;;  %v5187_v61 = vadd.f32 %v5186_v23, %v5090_v21  ;;  %v5188_v34 = vpop.f32.mrb[21].mxu0  ;;  %v8009_v2 = vpop.f32.mrb[41].mxu1  ;;  %v5439_v51 = vshll.u32 %v7928_v16, 16 }
 0x47f   :  { %v5189_v54 = vpop.f32.mrb[22].mxu0  ;;  %v8010_v5 = vadd.f32 %v8009_v2, %v8008_v37  ;;  %v8011_v19 = vpop.f32.mrb[42].mxu1  ;;  %v6651_v21 = vld [vmem:[#allocation4 + $0x4c] sm:$0x1]  ;;  %v6767_v23 = vshrl.u32 %v6650_v10, 16 }
 0x480   :  { %v5433_v24 = vor.u32 %v5431_v58, %v5430_v38  ;;  %v5434_v46 = vrot.slane %v5430_v38, 4  ;;  %v5438_v9 = vrot.slane %v5436_v43, 7  ;;  %v5243_v33 = vmax.f32 %v5187_v61, 0.0  ;;  %v5191_v3 = vpop.f32.mrb[23].mxu0  ;;  %v8012_v12 = vpop.f32.mrb[43].mxu1 }
 0x481   :  { %v5190_v6 = vadd.f32 %v5189_v54, %v5093_v7  ;;  %v8013_v60 = vadd.f32 %v8012_v12, %v8011_v19  ;;  %v5098_v27 = vadd.f32 %v8010_v5, %v11023_v49  ;;  %v6770_v5 = vshll.u32 %v6650_v10, 16 }
 0x482   :  { %v5588_v16 = vsel %vm9075_vm11, %v5433_v24, %v5587_v47  ;;  %v5591_v37 = vsel %vm9054_vm5, %v5434_v46, %v5590_v11  ;;  %v5441_v2 = vor.u32 %v5439_v51, %v5438_v9  ;;  %v5442_v58 = vrot.slane %v5438_v9, 4  ;;  %v5599_v46 = vld [vmem:[#allocation4 + $0x18] sm:$0xf]  ;;  %v5602_v9 = vld [vmem:[#allocation4 + $0x1c] sm:$0x1] }
 0x483   :  { %5589 = vst [vmem:[#allocation4 + $0x8] sm:$0xf] %v5588_v16  ;;  %5592 = vst [vmem:[#allocation4 + $0xc] sm:$0x1] %v5591_v37  ;;  %v7929_v38 = vpack.c.bf16 %v5243_v33, %v5243_v33  ;;  %v5244_v43 = vmax.f32 %v5190_v6, 0.0  ;;  %v5101_v61 = vadd.f32 %v8013_v60, %v11023_v49  ;;  %v6776_v19 = vshll.u32 %v6651_v21, 16 }
 0x484   :  { %v5594_v7 = vsel %vm9075_vm11, %v5441_v2, %v5593_v18  ;;  %v5597_v54 = vsel %vm9054_vm5, %v5442_v58, %v5596_v25  ;;  %v11041_v6 = vrot.slane %v6767_v23, 4  ;;  %v11043_v60 = vrot.slane %v6770_v5, 5  ;;  %v5605_v23 = vld [vmem:[#allocation4 + $0x20] sm:$0xf]  ;;  %v5608_v5 = vld [vmem:[#allocation4 + $0x24] sm:$0x1] }
 0x485   :  { %5595 = vst [vmem:[#allocation4 + $0x10] sm:$0xf] %v5594_v7  ;;  %5598 = vst [vmem:[#allocation4 + $0x14] sm:$0x1] %v5597_v54  ;;  %v5444_v47 = vshrl.u32 %v7929_v38, 16  ;;  %v7930_v11 = vpack.c.bf16 %v5244_v43, %v5244_v43  ;;  %v5194_v51 = vpop.f32.mrb[24].mxu0 }
 0x486   :  { %v8014_v24 = vpop.f32.mrb[44].mxu1  ;;  %v5195_v33 = vadd.f32 %v5194_v51, %v5098_v27  ;;  %v5196_v3 = vpop.f32.mrb[25].mxu0  ;;  %v5447_v16 = vshll.u32 %v7929_v38, 16  ;;  %v11045_v55 = vrot.slane %v6776_v19, 5 }
 0x487   :  { %v8015_v12 = vpop.f32.mrb[45].mxu1  ;;  %v5446_v18 = vrot.slane %v5444_v47, 7  ;;  %v5452_v25 = vshrl.u32 %v7930_v11, 16  ;;  %v5197_v10 = vpop.f32.mrb[26].mxu0  ;;  %v5455_v2 = vshll.u32 %v7930_v11, 16 }
 0x488   :  { %v8016_v21 = vadd.f32 %v8015_v12, %v8014_v24  ;;  %v8017_v37 = vpop.f32.mrb[46].mxu1  ;;  %v5245_v58 = vmax.f32 %v5195_v33, 0.0  ;;  %v5198_v43 = vadd.f32 %v5197_v10, %v5101_v61  ;;  %v5199_v7 = vpop.f32.mrb[27].mxu0 }
 0x489   :  { %v8018_v54 = vpop.f32.mrb[47].mxu1  ;;  %v5449_v27 = vor.u32 %v5447_v16, %v5446_v18  ;;  %v5450_v51 = vrot.slane %v5446_v18, 4  ;;  %v5454_v3 = vrot.slane %v5452_v25, 7 }
 0x48a   :  { %v8019_v36 = vadd.f32 %v8018_v54, %v8017_v37  ;;  %v7931_v40 = vpack.c.bf16 %v5245_v58, %v5245_v58  ;;  %v5246_v47 = vmax.f32 %v5198_v43, 0.0  ;;  %v5106_v38 = vadd.f32 %v8016_v21, %v11023_v49  ;;  %v5683_v28 = vld [vmem:[#allocation4 + $0x8] sm:$0xf]  ;;  %v11055_v10 = vld [vmem:[#allocation4 + $0xc] sm:$0x1] }
 0x48b   :  { %v5600_v61 = vsel %vm9075_vm11, %v5449_v27, %v5599_v46  ;;  %v5603_v19 = vsel %vm9054_vm5, %v5450_v51, %v5602_v9  ;;  %v5457_v24 = vor.u32 %v5455_v2, %v5454_v3  ;;  %v5458_v33 = vrot.slane %v5454_v3, 4  ;;  %v5611_v37 = vld [vmem:[#allocation4 + $0x28] sm:$0xf]  ;;  %v5614_v58 = vld [vmem:[#allocation4 + $0x2c] sm:$0x1] }
 0x48c   :  { %5601 = vst [vmem:[#allocation4 + $0x18] sm:$0xf] %v5600_v61  ;;  %5604 = vst [vmem:[#allocation4 + $0x1c] sm:$0x1] %v5603_v19  ;;  %v5460_v12 = vshrl.u32 %v7931_v40, 16  ;;  %v5463_v18 = vshll.u32 %v7931_v40, 16  ;;  %v7932_v16 = vpack.c.bf16 %v5246_v47, %v5246_v47  ;;  %v5109_v25 = vadd.f32 %v8019_v36, %v11023_v49 }
 0x48d   :  { %v5606_v21 = vsel %vm9075_vm11, %v5457_v24, %v5605_v23  ;;  %v5609_v46 = vsel %vm9054_vm5, %v5458_v33, %v5608_v5  ;;  %v5202_v9 = vpop.f32.mrb[28].mxu0  ;;  %v8020_v2 = vpop.f32.mrb[48].mxu1  ;;  %v5716_v43 = vshrl.u32 %v5683_v28, 16  ;;  %v5719_v7 = vshll.u32 %v5683_v28, 16 }
 0x48e   :  { %5607 = vst [vmem:[#allocation4 + $0x20] sm:$0xf] %v5606_v21  ;;  %5610 = vst [vmem:[#allocation4 + $0x24] sm:$0x1] %v5609_v46  ;;  %v5462_v40 = vrot.slane %v5460_v12, 7  ;;  %v5468_v54 = vshrl.u32 %v7932_v16, 16  ;;  %v5203_v36 = vadd.f32 %v5202_v9, %v5106_v38 }
 0x48f   :  { %v5471_v27 = vshll.u32 %v7932_v16, 16  ;;  %v5204_v51 = vpop.f32.mrb[29].mxu0  ;;  %v8021_v3 = vpop.f32.mrb[49].mxu1  ;;  %v5718_v19 = vrot.slane %v5716_v43, 4  ;;  %v5721_v24 = vrot.slane %v5719_v7, 5  ;;  %v5725_v5 = vshll.u32 %v11055_v10, 16 }
 0x490   :  { %v5205_v47 = vpop.f32.mrb[30].mxu0  ;;  %v8022_v61 = vadd.f32 %v8021_v3, %v8020_v2  ;;  %v8023_v23 = vpop.f32.mrb[50].mxu1  ;;  %v5465_v33 = vor.u32 %v5463_v18, %v5462_v40  ;;  %v5466_v11 = vrot.slane %v5462_v40, 4  ;;  %v5470_v63 = vrot.slane %v5468_v54, 7  ;;  %v5617_v46 = vld [vmem:[#allocation4 + $0x30] sm:$0xf] }
 0x491   :  { %v5247_v32 = vmax.f32 %v5203_v36, 0.0  ;;  %v5207_v28 = vpop.f32.mrb[31].mxu0  ;;  %v8024_v21 = vpop.f32.mrb[51].mxu1  ;;  %v5620_v12 = vld [vmem:[#allocation4 + $0x34] sm:$0x1]  ;;  %v5206_v50 = vadd.f32 %v5205_v47, %v5109_v25  ;;  %v5722_v51 = vor.u32 %v5721_v24, %v5718_v19  ;;  %v8308_v19 = vld [vmem:[#allocation21] sm:$0xff]  }
 0x492   :  { %v8025_v16 = vadd.f32 %v8024_v21, %v8023_v23  ;;  %v5114_v38 = vadd.f32 %v8022_v61, %v11023_v49  ;;  %v5684_v9 = vld [vmem:[#allocation4 + $0x10] sm:$0xf]  ;;  %v5612_v2 = vsel %vm9075_vm11, %v5465_v33, %v5611_v37  ;;  %v5615_v43 = vsel %vm9054_vm5, %v5466_v11, %v5614_v58  ;;  %v11068_v25 = vld [vmem:[#allocation4 + $0x14] sm:$0x1]  ;;  %v5623_v24 = vld [vmem:[#allocation4 + $0x38] sm:$0xf]  ;;  %8146 = vmatprep.subr.bf16.mxu1 %v8308_v19 }
 0x493   :  { %v5473_v18 = vor.u32 %v5471_v27, %v5470_v63  ;;  %v5474_v7 = vrot.slane %v5470_v63, 4  ;;  %5613 = vst [vmem:[#allocation4 + $0x28] sm:$0xf] %v5612_v2  ;;  %5616 = vst [vmem:[#allocation4 + $0x2c] sm:$0x1] %v5615_v43  ;;  %v7933_v40 = vpack.c.bf16 %v5247_v32, %v5247_v32  ;;  %v5248_v54 = vmax.f32 %v5206_v50, 0.0  ;;  %8147 = vmatpush3.bf16.msra.mxu1 %v8308_v19 }
 0x494   :  { %v5117_v36 = vadd.f32 %v8025_v16, %v11023_v49  ;;  %v11070_v3 = vrot.slane %v5722_v51, 4  ;;  %v11076_v61 = vrot.slane %v5725_v5, 5  ;;  %v5730_v11 = vshrl.u32 %v5684_v9, 16  ;;  %v5939_v16 = vld [vmem:[#allocation4 + $0x8] sm:$0xe] }
 0x495   :  { %v5618_v47 = vsel %vm9075_vm11, %v5473_v18, %v5617_v46  ;;  %v5621_v37 = vsel %vm9054_vm5, %v5474_v7, %v5620_v12  ;;  %v5476_v63 = vshrl.u32 %v7933_v40, 16  ;;  %v5479_v32 = vshll.u32 %v7933_v40, 16  ;;  %v5210_v58 = vpop.f32.mrb[32].mxu0  ;;  %v8026_v27 = vpop.f32.mrb[52].mxu1  ;;  %v5626_v40 = vld [vmem:[#allocation4 + $0x3c] sm:$0x1] }
 0x496   :  { %5619 = vst [vmem:[#allocation4 + $0x30] sm:$0xf] %v5618_v47  ;;  %5622 = vst [vmem:[#allocation4 + $0x34] sm:$0x1] %v5621_v37  ;;  %v7934_v50 = vpack.c.bf16 %v5248_v54, %v5248_v54  ;;  %v5733_v23 = vshll.u32 %v5684_v9, 16  ;;  %v5211_v33 = vadd.f32 %v5210_v58, %v5114_v38  ;;  %v5212_v28 = vpop.f32.mrb[33].mxu0  ;;  %v5728_v21 = vsel %vm9512_vm3, %v11070_v3, %v11076_v61 }
 0x497   :  { %v5732_v5 = vrot.slane %v5730_v11, 4  ;;  %v5739_v46 = vshll.u32 %v11068_v25, 16  ;;  %v8027_v12 = vpop.f32.mrb[53].mxu1  ;;  %v5478_v51 = vrot.slane %v5476_v63, 7  ;;  %v5213_v18 = vpop.f32.mrb[34].mxu0  ;;  %v7825_v31 = vrot.slane %v5939_v16, 9 }
 0x498   :  { %v5484_v2 = vshrl.u32 %v7934_v50, 16  ;;  %v5487_v43 = vshll.u32 %v7934_v50, 16  ;;  %v5735_v7 = vrot.slane %v5733_v23, 5  ;;  %v8029_v9 = vpop.f32.mrb[54].mxu1  ;;  %v5249_v38 = vmax.f32 %v5211_v33, 0.0  ;;  %v5215_v58 = vpop.f32.mrb[35].mxu0 }
 0x499   :  { %v5214_v54 = vadd.f32 %v5213_v18, %v5117_v36  ;;  %v5741_v47 = vrot.slane %v5739_v46, 5  ;;  %v8028_v37 = vadd.f32 %v8027_v12, %v8026_v27  ;;  %v8030_v28 = vpop.f32.mrb[55].mxu1  ;;  %v5481_v3 = vor.u32 %v5479_v32, %v5478_v51  ;;  %v5632_v63 = vld [vmem:[#allocation4 + $0x44] sm:$0x1]  ;;  %v5940_v23 = vld [vmem:[#allocation4 + $0x10] sm:$0xe] }
 0x49a   :  { %v5482_v61 = vrot.slane %v5478_v51, 4  ;;  %v5486_v11 = vrot.slane %v5484_v2, 7  ;;  %v5736_v20 = vor.u32 %v5735_v7, %v5732_v5  ;;  %v7935_v62 = vpack.c.bf16 %v5249_v38, %v5249_v38  ;;  %v5635_v38 = vld [vmem:[#allocation4 + $0x58] sm:$0xf] }
 0x49b   :  { %v5250_v50 = vmax.f32 %v5214_v54, 0.0  ;;  %v8031_v45 = vadd.f32 %v8030_v28, %v8029_v9  ;;  %v5624_v33 = vsel %vm9075_vm11, %v5481_v3, %v5623_v24  ;;  %v5989_v2 = vrot.slane %v11055_v10, 5  ;;  %v5638_v54 = vld [vmem:[#allocation4 + $0x5c] sm:$0x1] }
 0x49c   :  { %v5627_v36 = vsel %vm9054_vm5, %v5482_v61, %v5626_v40  ;;  %v5489_v27 = vor.u32 %v5487_v43, %v5486_v11  ;;  %v5490_v46 = vrot.slane %v5486_v11, 4  ;;  %5625 = vst [vmem:[#allocation4 + $0x38] sm:$0xf] %v5624_v33  ;;  %v5492_v32 = vshrl.u32 %v7935_v62, 16  ;;  %v8309_v33 = vld [vmem:[#allocation21 + $0x8] sm:$0xff]  }
 0x49d   :  { %5628 = vst [vmem:[#allocation4 + $0x3c] sm:$0x1] %v5627_v36  ;;  %v5495_v19 = vshll.u32 %v7935_v62, 16  ;;  %v7936_v12 = vpack.c.bf16 %v5250_v50, %v5250_v50  ;;  %v5737_v5 = vrot.slane %v5736_v20, 4  ;;  %v7826_v24 = vrot.slane %v5940_v23, 9  ;;  %v5218_v18 = vpop.f32.mrb[36].mxu0  ;;  %8148 = vmatprep.subr.bf16.mxu1 %v8309_v33 }
 0x49e   :  { %v5630_v51 = vsel %vm9075_vm11, %v5489_v27, %v5629_v4  ;;  %v5633_v16 = vsel %vm9054_vm5, %v5490_v46, %v5632_v63  ;;  %v5494_v43 = vrot.slane %v5492_v32, 7  ;;  %v5220_v40 = vpop.f32.mrb[37].mxu0  ;;  %v5685_v20 = vld [vmem:[#allocation4 + $0x18] sm:$0xf]  ;;  %v5990_v58 = vsel %vm9501_vm2, %v7825_v31, %v5989_v2  ;;  %v5641_v50 = vld [vmem:[#allocation4 + $0x60] sm:$0xf]  ;;  %8149 = vmatpush3.bf16.msra.mxu1 %v8309_v33 }
 0x49f   :  { %5631 = vst [vmem:[#allocation4 + $0x40] sm:$0xf] %v5630_v51  ;;  %5634 = vst [vmem:[#allocation4 + $0x44] sm:$0x1] %v5633_v16  ;;  %v5500_v7 = vshrl.u32 %v7936_v12, 16  ;;  %v5503_v9 = vshll.u32 %v7936_v12, 16  ;;  %v5742_v62 = vsel %vm9512_vm3, %v5737_v5, %v5741_v47  ;;  %v5122_v28 = vadd.f32 %v8028_v37, %v11023_v49 }
 0x4a0   :  { %v7849_v4 = vcombine.low %v5728_v21, %v5742_v62  ;;  %v5993_v10 = vrot.slane %v11068_v25, 5  ;;  %v5221_v3 = vpop.f32.mrb[38].mxu0  ;;  %v5497_v61 = vor.u32 %v5495_v19, %v5494_v43  ;;  %v5498_v11 = vrot.slane %v5494_v43, 4  ;;  %v5644_v36 = vld [vmem:[#allocation4 + $0x64] sm:$0x1] }
 0x4a1   :  { %v5502_v63 = vrot.slane %v5500_v7, 7  ;;  %v5125_v23 = vadd.f32 %v8031_v45, %v11023_v49  ;;  %v5223_v47 = vpop.f32.mrb[39].mxu0  ;;  %v5219_v31 = vadd.f32 %v5218_v18, %v5122_v28  ;;  %v11102_v27 = vld [vmem:[#allocation4 + $0x1c] sm:$0x1]  ;;  %v5744_v25 = vshrl.u32 %v5685_v20, 16 }
 0x4a2   :  { %6115 = vrot.lane.b32.xlu0 %v7849_v4, %s8746_s7  ;;  %v5994_v21 = vsel %vm9501_vm2, %v7826_v24, %v5993_v10  ;;  %v5747_v37 = vshll.u32 %v5685_v20, 16  ;;  %v5636_v46 = vsel %vm9075_vm11, %v5497_v61, %v5635_v38  ;;  %v5639_v32 = vsel %vm9054_vm5, %v5498_v11, %v5638_v54  ;;  %v5686_v12 = vld [vmem:[#allocation4 + $0x20] sm:$0xf]  ;;  %v11108_v2 = vld [vmem:[#allocation4 + $0x24] sm:$0x1] }
 0x4a3   :  { %v5505_v45 = vor.u32 %v5503_v9, %v5502_v63  ;;  %v5506_v19 = vrot.slane %v5502_v63, 4  ;;  %5637 = vst [vmem:[#allocation4 + $0x58] sm:$0xf] %v5636_v46  ;;  %5640 = vst [vmem:[#allocation4 + $0x5c] sm:$0x1] %v5639_v32  ;;  %v7857_v5 = vcombine.low %v5990_v58, %v5994_v21  ;;  %v5251_v51 = vmax.f32 %v5219_v31, 0.0 }
 0x4a4   :  { %v5222_v16 = vadd.f32 %v5221_v3, %v5125_v23  ;;  %v5746_v24 = vrot.slane %v5744_v25, 4  ;;  %v5749_v9 = vrot.slane %v5747_v37, 5  ;;  %v5753_v62 = vshll.u32 %v11102_v27, 16  ;;  %v5941_v61 = vld [vmem:[#allocation4 + $0x18] sm:$0xe] }
 0x4a5   :  { %v5642_v18 = vsel %vm9075_vm11, %v5505_v45, %v5641_v50  ;;  %v5645_v43 = vsel %vm9054_vm5, %v5506_v19, %v5644_v36  ;;  %v7937_v40 = vpack.c.bf16 %v5251_v51, %v5251_v51  ;;  %v5758_v38 = vshrl.u32 %v5686_v12, 16  ;;  %v5942_v21 = vld [vmem:[#allocation4 + $0x20] sm:$0xe]  ;;  %v5647_v45 = vld [vmem:[#allocation4 + $0x68] sm:$0xf] }
 0x4a6   :  { %v8032_v7 = vpop.f32.mrb[56].mxu1  ;;  %5643 = vst [vmem:[#allocation4 + $0x60] sm:$0xf] %v5642_v18  ;;  %5646 = vst [vmem:[#allocation4 + $0x64] sm:$0x1] %v5645_v43  ;;  %6155 = vrot.lane.b32.xlu0 %v7857_v5, %s8729_s25  ;;  %v5252_v20 = vmax.f32 %v5222_v16, 0.0  ;;  %v5750_v58 = vor.u32 %v5749_v9, %v5746_v24  ;;  %v12144_v11 = vor.u32 %v11043_v60, %v11041_v6 }
 0x4a7   :  { %v5761_v54 = vshll.u32 %v5686_v12, 16  ;;  %v8033_v4 = vpop.f32.mrb[57].mxu1  ;;  %v5767_v10 = vshll.u32 %v11108_v2, 16  ;;  %v5508_v50 = vshrl.u32 %v7937_v40, 16  ;;  %v5755_v47 = vrot.slane %v5753_v62, 5 }
 0x4a8   :  { %v8034_v28 = vadd.f32 %v8033_v4, %v8032_v7  ;;  %v8035_v3 = vpop.f32.mrb[58].mxu1  ;;  %v11120_v63 = vrot.slane %v12144_v11, 4  ;;  %v7938_v23 = vpack.c.bf16 %v5252_v20, %v5252_v20  ;;  %v5760_v33 = vrot.slane %v5758_v38, 4  ;;  %v5650_v51 = vld [vmem:[#allocation4 + $0x6c] sm:$0x1] }
 0x4a9   :  { %v8036_v36 = vpop.f32.mrb[59].mxu1  ;;  %v5511_v31 = vshll.u32 %v7937_v40, 16  ;;  %v5751_v25 = vrot.slane %v5750_v58, 4  ;;  %v5763_v37 = vrot.slane %v5761_v54, 5  ;;  %v5510_v32 = vrot.slane %v5508_v50, 7 }
 0x4aa   :  { %v8037_v46 = vadd.f32 %v8036_v36, %v8035_v3  ;;  %v5516_v19 = vshrl.u32 %v7938_v23, 16  ;;  %v5519_v12 = vshll.u32 %v7938_v23, 16  ;;  %v5769_v5 = vrot.slane %v5767_v10, 5  ;;  %v5653_v40 = vld [vmem:[#allocation4 + $0x70] sm:$0xf] }
 0x4ab   :  { %v5764_v16 = vor.u32 %v5763_v37, %v5760_v33  ;;  %v7827_v6 = vrot.slane %v5941_v61, 9  ;;  %v5997_v60 = vrot.slane %v11102_v27, 5  ;;  %v7828_v24 = vrot.slane %v5942_v21, 9  ;;  %v5656_v20 = vld [vmem:[#allocation4 + $0x74] sm:$0x1] }
 0x4ac   :  { %v5513_v18 = vor.u32 %v5511_v31, %v5510_v32  ;;  %v5514_v43 = vrot.slane %v5510_v32, 4  ;;  %v5518_v7 = vrot.slane %v5516_v19, 7  ;;  %v6001_v9 = vrot.slane %v11108_v2, 5  ;;  %v5226_v62 = vpop.f32.mrb[40].mxu0  ;;  %v5687_v50 = vld [vmem:[#allocation4 + $0x28] sm:$0xf] }
 0x4ad   :  { %v5756_v38 = vsel %vm9512_vm3, %v5751_v25, %v5755_v47  ;;  %v5765_v54 = vrot.slane %v5764_v16, 4  ;;  %v5130_v4 = vadd.f32 %v8034_v28, %v11023_v49  ;;  %v5228_v58 = vpop.f32.mrb[41].mxu0  ;;  %v5133_v10 = vadd.f32 %v8037_v46, %v11023_v49  ;;  %v5688_v36 = vld [vmem:[#allocation4 + $0x30] sm:$0xf]  ;;  %v11136_v21 = vld [vmem:[#allocation4 + $0x2c] sm:$0x1] }
 0x4ae   :  { %v5648_v27 = vsel %vm9075_vm11, %v5513_v18, %v5647_v45  ;;  %v5651_v3 = vsel %vm9054_vm5, %v5514_v43, %v5650_v51  ;;  %v5521_v61 = vor.u32 %v5519_v12, %v5518_v7  ;;  %v5522_v2 = vrot.slane %v5518_v7, 4  ;;  %v5229_v11 = vpop.f32.mrb[42].mxu0  ;;  %v8310_v25 = vld [vmem:[#allocation21 + $0x10] sm:$0xff]  }
 0x4af   :  { %5649 = vst [vmem:[#allocation4 + $0x68] sm:$0xf] %v5648_v27  ;;  %5652 = vst [vmem:[#allocation4 + $0x6c] sm:$0x1] %v5651_v3  ;;  %v5770_v23 = vsel %vm9512_vm3, %v5765_v54, %v5769_v5  ;;  %v6002_v28 = vsel %vm9501_vm2, %v7828_v24, %v6001_v9  ;;  %v5227_v47 = vadd.f32 %v5226_v62, %v5130_v4  ;;  %v5231_v31 = vpop.f32.mrb[43].mxu0  ;;  %v5772_v51 = vshrl.u32 %v5687_v50, 16 }
 0x4b0   :  { %v5230_v33 = vadd.f32 %v5229_v11, %v5133_v10  ;;  %v5654_v37 = vsel %vm9075_vm11, %v5521_v61, %v5653_v40  ;;  %v5657_v46 = vsel %vm9054_vm5, %v5522_v2, %v5656_v20  ;;  %v7850_v32 = vcombine.low %v5756_v38, %v5770_v23  ;;  %v5704_v5 = vld [vmem:[#allocation4 + $0x34] sm:$0x1]  ;;  %8150 = vmatprep.subr.bf16.mxu1 %v8310_v25  ;;  %v5943_v9 = vld [vmem:[#allocation4 + $0x28] sm:$0xe]  ;;  %v5944_v20 = vld [vmem:[#allocation4 + $0x30] sm:$0xe] }
 0x4b1   :  { %v5998_v45 = vsel %vm9501_vm2, %v7827_v6, %v5997_v60  ;;  %5655 = vst [vmem:[#allocation4 + $0x70] sm:$0xf] %v5654_v37  ;;  %5658 = vst [vmem:[#allocation4 + $0x74] sm:$0x1] %v5657_v46  ;;  %v5253_v19 = vmax.f32 %v5227_v47, 0.0  ;;  %v5775_v16 = vshll.u32 %v5687_v50, 16  ;;  %8151 = vmatpush3.bf16.msra.mxu1 %v8310_v25 }
 0x4b2   :  { %v5254_v12 = vmax.f32 %v5230_v33, 0.0  ;;  %6117 = vrot.lane.b32.xlu1 %v7850_v32, %s8746_s7  ;;  %v7858_v24 = vcombine.low %v5998_v45, %v6002_v28  ;;  %v5781_v18 = vshll.u32 %v11136_v21, 16  ;;  %v5786_v43 = vshrl.u32 %v5688_v36, 16  ;;  %v8312_v38 = vld [vmem:[#allocation21 + $0x18] sm:$0xff]   ;;  %v11146_v27 = vld [vmem:[#allocation4 + $0x38] sm:$0xf] }
 0x4b3   :  { %v5789_v7 = vshll.u32 %v5688_v36, 16  ;;  %v7939_v62 = vpack.c.bf16 %v5253_v19, %v5253_v19  ;;  %v5774_v6 = vrot.slane %v5772_v51, 4  ;;  %v5777_v60 = vrot.slane %v5775_v16, 5  ;;  %8152 = vmatprep.subr.bf16.mxu1 %v8312_v38  ;;  %v8313_v50 = vld [vmem:[#allocation21 + $0x20] sm:$0xff]   ;;  %v5659_v23 = vld [vmem:[#allocation4 + $0x78] sm:$0xf] }
 0x4b4   :  { %v7940_v40 = vpack.c.bf16 %v5254_v12, %v5254_v12  ;;  %v5783_v54 = vrot.slane %v5781_v18, 5  ;;  %v5788_v4 = vrot.slane %v5786_v43, 4  ;;  %v5795_v10 = vshll.u32 %v5704_v5, 16  ;;  %v5662_v28 = vld [vmem:[#allocation4 + $0x7c] sm:$0x1] }
 0x4b5   :  { %v5791_v58 = vrot.slane %v5789_v7, 5  ;;  %v5524_v3 = vshrl.u32 %v7939_v62, 16  ;;  %v5527_v61 = vshll.u32 %v7939_v62, 16  ;;  %v5778_v47 = vor.u32 %v5777_v60, %v5774_v6  ;;  %8153 = vmatpush3.bf16.msra.mxu1 %v8312_v38  ;;  %v5665_v46 = vld [vmem:[#allocation4 + $0x80] sm:$0xf] }
 0x4b6   :  { %v5532_v2 = vshrl.u32 %v7940_v40, 16  ;;  %v5535_v11 = vshll.u32 %v7940_v40, 16  ;;  %6157 = vrot.lane.b32.xlu1 %v7858_v24, %s8729_s25  ;;  %v7829_v36 = vrot.slane %v5943_v9, 9  ;;  %v6005_v31 = vrot.slane %v11136_v21, 5  ;;  %8154 = vmatprep.subr.bf16.mxu1 %v8313_v50  ;;  %v5668_v19 = vld [vmem:[#allocation4 + $0x84] sm:$0x1] }
 0x4b7   :  { %v5792_v33 = vor.u32 %v5791_v58, %v5788_v4  ;;  %v5526_v25 = vrot.slane %v5524_v3, 7  ;;  %v7830_v32 = vrot.slane %v5944_v20, 9  ;;  %v6009_v45 = vrot.slane %v5704_v5, 5  ;;  %v8315_v40 = vld [vmem:[#allocation21 + $0x28] sm:$0xff]   ;;  %v5690_v38 = vld [vmem:[#allocation4 + $0x40] sm:$0xf] }
 0x4b8   :  { %v5534_v37 = vrot.slane %v5532_v2, 7  ;;  %v5779_v12 = vrot.slane %v5778_v47, 4  ;;  %v5797_v16 = vrot.slane %v5795_v10, 5  ;;  %v5800_v24 = vshrl.u32 %v11146_v27, 16  ;;  %v8038_v9 = vpop.f32.mrb[60].mxu1 }
 0x4b9   :  { %v5793_v51 = vrot.slane %v5792_v33, 4  ;;  %v5529_v18 = vor.u32 %v5527_v61, %v5526_v25  ;;  %v5530_v43 = vrot.slane %v5526_v25, 4  ;;  %v6006_v5 = vsel %vm9501_vm2, %v7829_v36, %v6005_v31  ;;  %v8039_v20 = vpop.f32.mrb[61].mxu1  ;;  %v5705_v4 = vld [vmem:[#allocation4 + $0x3c] sm:$0x1]  ;;  %8155 = vmatpush3.bf16.msra.mxu1 %v8313_v50 }
 0x4ba   :  { %v5537_v7 = vor.u32 %v5535_v11, %v5534_v37  ;;  %v5538_v62 = vrot.slane %v5534_v37, 4  ;;  %v5784_v21 = vsel %vm9512_vm3, %v5779_v12, %v5783_v54  ;;  %v6010_v60 = vsel %vm9501_vm2, %v7830_v32, %v6009_v45  ;;  %v8041_v61 = vpop.f32.mrb[62].mxu1  ;;  %v5706_v2 = vld [vmem:[#allocation4 + $0x44] sm:$0x1]  ;;  %v5945_v11 = vld [vmem:[#allocation4 + $0x38] sm:$0xe]  ;;  %8156 = vmatprep.subr.bf16.mxu1 %v8315_v40 }
 0x4bb   :  { %v5798_v6 = vsel %vm9512_vm3, %v5793_v51, %v5797_v16  ;;  %v5660_v58 = vsel %vm9075_vm11, %v5529_v18, %v5659_v23  ;;  %v5663_v10 = vsel %vm9054_vm5, %v5530_v43, %v5662_v28  ;;  %v8040_v47 = vadd.f32 %v8039_v20, %v8038_v9  ;;  %v8042_v23 = vpop.f32.mrb[63].mxu1  ;;  %v5691_v51 = vld [vmem:[#allocation4 + $0x58] sm:$0xf] }
 0x4bc   :  { %v5666_v54 = vsel %vm9075_vm11, %v5537_v7, %v5665_v46  ;;  %v5669_v3 = vsel %vm9054_vm5, %v5538_v62, %v5668_v19  ;;  %5661 = vst [vmem:[#allocation4 + $0x78] sm:$0xf] %v5660_v58  ;;  %5664 = vst [vmem:[#allocation4 + $0x7c] sm:$0x1] %v5663_v10  ;;  %v7851_v50 = vcombine.low %v5784_v21, %v5798_v6  ;;  %v5802_v33 = vrot.slane %v5800_v24, 4 }
 0x4bd   :  { %5667 = vst [vmem:[#allocation4 + $0x80] sm:$0xf] %v5666_v54  ;;  %5670 = vst [vmem:[#allocation4 + $0x84] sm:$0x1] %v5669_v3  ;;  %v5803_v28 = vshll.u32 %v11146_v27, 16  ;;  %v8043_v36 = vadd.f32 %v8042_v23, %v8041_v61  ;;  %v5809_v31 = vshll.u32 %v5705_v4, 16  ;;  %v7859_v32 = vcombine.low %v6006_v5, %v6010_v60  ;;  %8157 = vmatpush3.bf16.msra.mxu1 %v8315_v40 }
 0x4be   :  { %v5814_v25 = vshrl.u32 %v5690_v38, 16  ;;  %v5817_v37 = vshll.u32 %v5690_v38, 16  ;;  %v5946_v46 = vld [vmem:[#allocation4 + $0x40] sm:$0xe]  ;;  %6119 = vrot.lane.b32.xlu0 %v7851_v50, %s8746_s7  ;;  %v5823_v19 = vshll.u32 %v5706_v2, 16  ;;  %v7831_v12 = vrot.slane %v5945_v11, 9 }
 0x4bf   :  { %v5805_v45 = vrot.slane %v5803_v28, 5  ;;  %v5138_v16 = vadd.f32 %v8040_v47, %v11023_v49  ;;  %v5811_v18 = vrot.slane %v5809_v31, 5  ;;  %v11170_v7 = vld [vmem:[#allocation4 + $0x60] sm:$0xf]  ;;  %v5141_v62 = vadd.f32 %v8043_v36, %v11023_v49  ;;  %v5707_v5 = vld [vmem:[#allocation4 + $0x5c] sm:$0x1] }
 0x4c0   :  { %v5816_v43 = vrot.slane %v5814_v25, 4  ;;  %v5819_v24 = vrot.slane %v5817_v37, 5  ;;  %v6013_v9 = vrot.slane %v5705_v4, 5  ;;  %v7832_v21 = vrot.slane %v5946_v46, 9  ;;  %v5947_v31 = vld [vmem:[#allocation4 + $0x58] sm:$0xe] }
 0x4c1   :  { %v5806_v27 = vor.u32 %v5805_v45, %v5802_v33  ;;  %v6017_v20 = vrot.slane %v5706_v2, 5  ;;  %v5828_v60 = vshrl.u32 %v5691_v51, 16  ;;  %v5831_v38 = vshll.u32 %v5691_v51, 16  ;;  %v5234_v40 = vpop.f32.mrb[44].mxu0  ;;  %v5708_v2 = vld [vmem:[#allocation4 + $0x64] sm:$0x1] }
 0x4c2   :  { %v5820_v6 = vor.u32 %v5819_v24, %v5816_v43  ;;  %6159 = vrot.lane.b32.xlu0 %v7859_v32, %s8729_s25  ;;  %v5825_v10 = vrot.slane %v5823_v19, 5  ;;  %v6014_v54 = vsel %vm9501_vm2, %v7831_v12, %v6013_v9  ;;  %v5842_v3 = vshrl.u32 %v11170_v7, 16  ;;  %v5236_v11 = vpop.f32.mrb[45].mxu0  ;;  %v5948_v19 = vld [vmem:[#allocation4 + $0x60] sm:$0xe] }
 0x4c3   :  { %v5807_v58 = vrot.slane %v5806_v27, 4  ;;  %v5235_v61 = vadd.f32 %v5234_v40, %v5138_v16  ;;  %v6018_v4 = vsel %vm9501_vm2, %v7832_v21, %v6017_v20  ;;  %v5830_v50 = vrot.slane %v5828_v60, 4  ;;  %v5237_v23 = vpop.f32.mrb[46].mxu0  ;;  %v11184_v21 = vld [vmem:[#allocation4 + $0x68] sm:$0xf] }
 0x4c4   :  { %v5821_v49 = vrot.slane %v5820_v6, 4  ;;  %v7860_v33 = vcombine.low %v6014_v54, %v6018_v4  ;;  %v5833_v28 = vrot.slane %v5831_v38, 5  ;;  %v5837_v36 = vshll.u32 %v5707_v5, 16  ;;  %v5239_v32 = vpop.f32.mrb[47].mxu0  ;;  %v5671_v54 = vld [vmem:[#allocation4 + $0x88] sm:$0xf] }
 0x4c5   :  { %v5812_v47 = vsel %vm9512_vm3, %v5807_v58, %v5811_v18  ;;  %v5255_v25 = vmax.f32 %v5235_v61, 0.0  ;;  %v5238_v46 = vadd.f32 %v5237_v23, %v5141_v62  ;;  %v5844_v45 = vrot.slane %v5842_v3, 4  ;;  %v5674_v3 = vld [vmem:[#allocation4 + $0x8c] sm:$0x1] }
 0x4c6   :  { %v5826_v37 = vsel %vm9512_vm3, %v5821_v49, %v5825_v10  ;;  %v5834_v51 = vor.u32 %v5833_v28, %v5830_v50  ;;  %v5845_v16 = vshll.u32 %v11170_v7, 16  ;;  %v5851_v43 = vshll.u32 %v5708_v2, 16  ;;  %v5709_v49 = vld [vmem:[#allocation4 + $0x6c] sm:$0x1]  ;;  %v11194_v28 = vld [vmem:[#allocation4 + $0x70] sm:$0xf] }
 0x4c7   :  { %v7852_v12 = vcombine.low %v5812_v47, %v5826_v37  ;;  %v7941_v24 = vpack.c.bf16 %v5255_v25, %v5255_v25  ;;  %v5256_v18 = vmax.f32 %v5238_v46, 0.0  ;;  %v7833_v27 = vrot.slane %v5947_v31, 9  ;;  %v5677_v25 = vld [vmem:[#allocation4 + $0x90] sm:$0xf] }
 0x4c8   :  { %v6021_v9 = vrot.slane %v5707_v5, 5  ;;  %v5835_v6 = vrot.slane %v5834_v51, 4  ;;  %v5839_v20 = vrot.slane %v5837_v36, 5  ;;  %v5847_v60 = vrot.slane %v5845_v16, 5 }
 0x4c9   :  { %6121 = vrot.lane.b32.xlu1 %v7852_v12, %s8746_s7  ;;  %v7834_v62 = vrot.slane %v5948_v19, 9  ;;  %v5540_v38 = vshrl.u32 %v7941_v24, 16  ;;  %v5543_v40 = vshll.u32 %v7941_v24, 16  ;;  %v7942_v58 = vpack.c.bf16 %v5256_v18, %v5256_v18  ;;  %v5680_v12 = vld [vmem:[#allocation4 + $0x94] sm:$0x1] }
 0x4ca   :  { %v5853_v10 = vrot.slane %v5851_v43, 5  ;;  %v5848_v61 = vor.u32 %v5847_v60, %v5844_v45  ;;  %v11189_v11 = vsel %vm9501_vm2, %v7833_v27, %v6021_v9  ;;  %v6025_v5 = vrot.slane %v5708_v2, 5  ;;  %v5710_v24 = vld [vmem:[#allocation4 + $0x74] sm:$0x1] }
 0x4cb   :  { %v5856_v4 = vshrl.u32 %v11184_v21, 16  ;;  %v5542_v50 = vrot.slane %v5540_v38, 7  ;;  %v5548_v47 = vshrl.u32 %v7942_v58, 16  ;;  %v5840_v23 = vsel %vm9512_vm3, %v5835_v6, %v5839_v20 }
 0x4cc   :  { %v5859_v36 = vshll.u32 %v11184_v21, 16  ;;  %v5551_v31 = vshll.u32 %v7942_v58, 16  ;;  %v5849_v37 = vrot.slane %v5848_v61, 4  ;;  %v6026_v2 = vsel %vm9501_vm2, %v7834_v62, %v6025_v5  ;;  %v5950_v62 = vld [vmem:[#allocation4 + $0x70] sm:$0xe] }
 0x4cd   :  { %6161 = vrot.lane.b32.xlu1 %v7860_v33, %s8729_s25  ;;  %v5858_v46 = vrot.slane %v5856_v4, 4  ;;  %v5545_v32 = vor.u32 %v5543_v40, %v5542_v50  ;;  %v5546_v45 = vrot.slane %v5542_v50, 4  ;;  %v5550_v19 = vrot.slane %v5548_v47, 7  ;;  %v5949_v33 = vld [vmem:[#allocation4 + $0x68] sm:$0xe] }
 0x4ce   :  { %v5865_v51 = vshll.u32 %v5709_v49, 16  ;;  %v5854_v16 = vsel %vm9512_vm3, %v5849_v37, %v5853_v10  ;;  %v7861_v43 = vcombine.low %v11189_v11, %v6026_v2  ;;  %v5861_v18 = vrot.slane %v5859_v36, 5  ;;  %v11209_v61 = vld [vmem:[#allocation4 + $0x78] sm:$0xf]  ;;  %v5711_v4 = vld [vmem:[#allocation4 + $0x7c] sm:$0x1] }
 0x4cf   :  { %v5870_v27 = vshrl.u32 %v11194_v28, 16  ;;  %v5672_v9 = vsel %vm9075_vm11, %v5545_v32, %v5671_v54  ;;  %v5675_v6 = vsel %vm9054_vm5, %v5546_v45, %v5674_v3  ;;  %v5553_v20 = vor.u32 %v5551_v31, %v5550_v19  ;;  %v11216_v31 = vld [vmem:[#allocation4 + $0x80] sm:$0xf]  ;;  %v5712_v45 = vld [vmem:[#allocation4 + $0x84] sm:$0x1] }
 0x4d0   :  { %v5554_v60 = vrot.slane %v5550_v19, 4  ;;  %5673 = vst [vmem:[#allocation4 + $0x88] sm:$0xf] %v5672_v9  ;;  %5676 = vst [vmem:[#allocation4 + $0x8c] sm:$0x1] %v5675_v6  ;;  %v7853_v38 = vcombine.low %v5840_v23, %v5854_v16  ;;  %v5862_v40 = vor.u32 %v5861_v18, %v5858_v46  ;;  %v5873_v10 = vshll.u32 %v11194_v28, 16 }
 0x4d1   :  { %v5872_v58 = vrot.slane %v5870_v27, 4  ;;  %v5678_v11 = vsel %vm9075_vm11, %v5553_v20, %v5677_v25  ;;  %v5879_v5 = vshll.u32 %v5710_v24, 16  ;;  %v7835_v3 = vrot.slane %v5949_v33, 9  ;;  %v6636_v20 = vld [vmem:[#allocation4 + $0x10] sm:$0xf] }
 0x4d2   :  { %v5681_v54 = vsel %vm9054_vm5, %v5554_v60, %v5680_v12  ;;  %5679 = vst [vmem:[#allocation4 + $0x90] sm:$0xf] %v5678_v11  ;;  %6123 = vrot.lane.b32.xlu0 %v7853_v38, %s8746_s7  ;;  %v5863_v50 = vrot.slane %v5862_v40, 4  ;;  %v5875_v47 = vrot.slane %v5873_v10, 5  ;;  %v6029_v23 = vrot.slane %v5709_v49, 5 }
 0x4d3   :  { %5682 = vst [vmem:[#allocation4 + $0x94] sm:$0x1] %v5681_v54  ;;  %v7836_v36 = vrot.slane %v5950_v62, 9  ;;  %v5867_v37 = vrot.slane %v5865_v51, 5  ;;  %v6033_v2 = vrot.slane %v5710_v24, 5  ;;  %v5884_v34 = vshrl.u32 %v11209_v61, 16 }
 0x4d4   :  { %v5887_v35 = vshll.u32 %v11209_v61, 16  ;;  %v5876_v25 = vor.u32 %v5875_v47, %v5872_v58  ;;  %v5881_v46 = vrot.slane %v5879_v5, 5  ;;  %v6030_v32 = vsel %vm9501_vm2, %v7835_v3, %v6029_v23  ;;  %v5951_v12 = vld [vmem:[#allocation4 + $0x78] sm:$0xe]  ;;  %v5952_v24 = vld [vmem:[#allocation4 + $0x80] sm:$0xe] }
 0x4d5   :  { %v5893_v19 = vshll.u32 %v5711_v4, 16  ;;  %v6034_v49 = vsel %vm9501_vm2, %v7836_v36, %v6033_v2  ;;  %v5886_v16 = vrot.slane %v5884_v34, 4  ;;  %v5898_v51 = vshrl.u32 %v11216_v31, 16  ;;  %v6637_v58 = vld [vmem:[#allocation4 + $0x14] sm:$0x1]  ;;  %v8320_v36 = vld [vmem:[#allocation24] sm:$0xff]  }
 0x4d6   :  { %v5889_v18 = vrot.slane %v5887_v35, 5  ;;  %6163 = vrot.lane.b32.xlu0 %v7861_v43, %s8729_s25  ;;  %v5868_v27 = vsel %vm9512_vm3, %v5863_v50, %v5867_v37  ;;  %v5877_v33 = vrot.slane %v5876_v25, 4  ;;  %v7862_v9 = vcombine.low %v6030_v32, %v6034_v49  ;;  %v6638_v43 = vld [vmem:[#allocation4 + $0x18] sm:$0xf]  ;;  %v6639_v34 = vld [vmem:[#allocation4 + $0x1c] sm:$0x1]  ;;  %8174 = vmatprep.subr.bf16.mxu0 %v8320_v36 }
 0x4d7   :  { %v5901_v6 = vshll.u32 %v11216_v31, 16  ;;  %v5900_v62 = vrot.slane %v5898_v51, 4  ;;  %v5907_v38 = vshll.u32 %v5712_v45, 16  ;;  %v7837_v40 = vrot.slane %v5951_v12, 9  ;;  %v11236_v49 = vld [vmem:[#allocation4 + $0x88] sm:$0xf]  ;;  %8175 = vmatpush3.bf16.msra.mxu0 %v8320_v36 }
 0x4d8   :  { %v5890_v60 = vor.u32 %v5889_v18, %v5886_v16  ;;  %v5882_v10 = vsel %vm9512_vm3, %v5877_v33, %v5881_v46  ;;  %v6037_v54 = vrot.slane %v5711_v4, 5  ;;  %v7838_v5 = vrot.slane %v5952_v24, 9  ;;  %v11240_v51 = vld [vmem:[#allocation4 + $0x8c] sm:$0x1] }
 0x4d9   :  { %v5903_v11 = vrot.slane %v5901_v6, 5  ;;  %v7854_v3 = vcombine.low %v5868_v27, %v5882_v10  ;;  %v5895_v50 = vrot.slane %v5893_v19, 5  ;;  %v6041_v23 = vrot.slane %v5712_v45, 5 }
 0x4da   :  { %v5891_v47 = vrot.slane %v5890_v60, 4  ;;  %v5909_v2 = vrot.slane %v5907_v38, 5  ;;  %v6669_v35 = vshrl.u32 %v6636_v20, 16  ;;  %v6672_v25 = vshll.u32 %v6636_v20, 16  ;;  %v11242_v20 = vld [vmem:[#allocation4 + $0x90] sm:$0xf] }
 0x4db   :  { %v5904_v37 = vor.u32 %v5903_v11, %v5900_v62  ;;  %6125 = vrot.lane.b32.xlu1 %v7854_v3, %s8746_s7  ;;  %v6038_v32 = vsel %vm9501_vm2, %v7837_v40, %v6037_v54  ;;  %v6042_v4 = vsel %vm9501_vm2, %v7838_v5, %v6041_v23  ;;  %v6678_v46 = vshll.u32 %v6637_v58, 16  ;;  %v6644_v58 = vld [vmem:[#allocation4 + $0x30] sm:$0xf]  ;;  %v11249_v5 = vld [vmem:[#allocation4 + $0x94] sm:$0x1]  ;;  %v8322_v3 = vld [vmem:[#allocation24 + $0x8] sm:$0xff]  }
 0x4dc   :  { %v6683_v12 = vshrl.u32 %v6638_v43, 16  ;;  %v5896_v45 = vsel %vm9512_vm3, %v5891_v47, %v5895_v50  ;;  %v6671_v16 = vrot.slane %v6669_v35, 4  ;;  %v6674_v18 = vrot.slane %v6672_v25, 5  ;;  %v6646_v25 = vld [vmem:[#allocation4 + $0x38] sm:$0xf]  ;;  %8176 = vmatprep.subr.bf16.mxu0 %v8322_v3 }
 0x4dd   :  { %v5905_v19 = vrot.slane %v5904_v37, 4  ;;  %v7863_v24 = vcombine.low %v6038_v32, %v6042_v4  ;;  %v6686_v33 = vshll.u32 %v6638_v43, 16  ;;  %v6692_v6 = vshll.u32 %v6639_v34, 16  ;;  %v6645_v37 = vld [vmem:[#allocation4 + $0x34] sm:$0x1]  ;;  %v8323_v32 = vld [vmem:[#allocation24 + $0x10] sm:$0xff]   ;;  %8177 = vmatpush3.bf16.msra.mxu0 %v8322_v3 }
 0x4de   :  { %v6685_v27 = vrot.slane %v6683_v12, 4  ;;  %v6675_v62 = vor.u32 %v6674_v18, %v6671_v16  ;;  %v5912_v38 = vshrl.u32 %v11236_v49, 16  ;;  %v5915_v40 = vshll.u32 %v11236_v49, 16  ;;  %8178 = vmatprep.subr.bf16.mxu0 %v8323_v32 }
 0x4df   :  { %v5910_v60 = vsel %vm9512_vm3, %v5905_v19, %v5909_v2  ;;  %6165 = vrot.lane.b32.xlu1 %v7862_v9, %s8729_s25  ;;  %v6680_v11 = vrot.slane %v6678_v46, 5  ;;  %v6688_v54 = vrot.slane %v6686_v33, 5  ;;  %v5921_v43 = vshll.u32 %v11240_v51, 16  ;;  %v6647_v33 = vld [vmem:[#allocation4 + $0x3c] sm:$0x1] }
 0x4e0   :  { %v7855_v10 = vcombine.low %v5896_v45, %v5910_v60  ;;  %v6676_v47 = vrot.slane %v6675_v62, 4  ;;  %v5914_v50 = vrot.slane %v5912_v38, 4  ;;  %v5917_v23 = vrot.slane %v5915_v40, 5  ;;  %v5953_v40 = vld [vmem:[#allocation4 + $0x88] sm:$0xe] }
 0x4e1   :  { %v5926_v36 = vshrl.u32 %v11242_v20, 16  ;;  %v6689_v2 = vor.u32 %v6688_v54, %v6685_v27  ;;  %v6694_v34 = vrot.slane %v6692_v6, 5  ;;  %v5923_v35 = vrot.slane %v5921_v43, 5  ;;  %8179 = vmatpush3.bf16.msra.mxu0 %v8323_v32 }
 0x4e2   :  { %6127 = vrot.lane.b32.xlu0 %v7855_v10, %s8746_s7  ;;  %v5929_v9 = vshll.u32 %v11242_v20, 16  ;;  %v5918_v4 = vor.u32 %v5917_v23, %v5914_v50  ;;  %v5935_v12 = vshll.u32 %v11249_v5, 16  ;;  %v6725_v45 = vshrl.u32 %v6644_v58, 16  ;;  %v5954_v50 = vld [vmem:[#allocation4 + $0x90] sm:$0xe] }
 0x4e3   :  { %v5928_v46 = vrot.slane %v5926_v36, 4  ;;  %v6681_v19 = vsel %vm9512_vm3, %v6676_v47, %v6680_v11  ;;  %v6690_v16 = vrot.slane %v6689_v2, 4  ;;  %v6728_v27 = vshll.u32 %v6644_v58, 16  ;;  %v8324_v11 = vld [vmem:[#allocation24 + $0x18] sm:$0xff]  }
 0x4e4   :  { %v5931_v18 = vrot.slane %v5929_v9, 5  ;;  %v5919_v6 = vrot.slane %v5918_v4, 4  ;;  %v6727_v60 = vrot.slane %v6725_v45, 4  ;;  %v6734_v62 = vshll.u32 %v6645_v37, 16  ;;  %8180 = vmatprep.subr.bf16.mxu0 %v8324_v11 }
 0x4e5   :  { %v6739_v38 = vshrl.u32 %v6646_v25, 16  ;;  %v6695_v10 = vsel %vm9512_vm3, %v6690_v16, %v6694_v34  ;;  %v6730_v43 = vrot.slane %v6728_v27, 5  ;;  %v6742_v3 = vshll.u32 %v6646_v25, 16  ;;  %v6640_v16 = vld [vmem:[#allocation4 + $0x20] sm:$0xf]  ;;  %8181 = vmatpush3.bf16.msra.mxu0 %v8324_v11 }
 0x4e6   :  { %6167 = vrot.lane.b32.xlu0 %v7863_v24, %s8729_s25  ;;  %v5932_v54 = vor.u32 %v5931_v18, %v5928_v46  ;;  %v7888_v47 = vcombine.low %v6681_v19, %v6695_v10  ;;  %v5924_v58 = vsel %vm9512_vm3, %v5919_v6, %v5923_v35  ;;  %v5937_v23 = vrot.slane %v5935_v12, 5  ;;  %v6652_v24 = vld [vmem:[#allocation4 + $0x60] sm:$0xf]  ;;  %v6653_v18 = vld [vmem:[#allocation4 + $0x64] sm:$0x1] }
 0x4e7   :  { %v6741_v36 = vrot.slane %v6739_v38, 4  ;;  %v6731_v2 = vor.u32 %v6730_v43, %v6727_v60  ;;  %v6744_v9 = vrot.slane %v6742_v3, 5  ;;  %v6748_v4 = vshll.u32 %v6647_v33, 16  ;;  %v6654_v27 = vld [vmem:[#allocation4 + $0x68] sm:$0xf] }
 0x4e8   :  { %v5933_v37 = vrot.slane %v5932_v54, 4  ;;  %v7839_v45 = vrot.slane %v5953_v40, 9  ;;  %v6045_v34 = vrot.slane %v11240_v51, 5  ;;  %v7840_v46 = vrot.slane %v5954_v50, 9  ;;  %v6655_v51 = vld [vmem:[#allocation4 + $0x6c] sm:$0x1] }
 0x4e9   :  { %v6049_v25 = vrot.slane %v11249_v5, 5  ;;  %v6732_v12 = vrot.slane %v6731_v2, 4  ;;  %v6736_v32 = vrot.slane %v6734_v62, 5  ;;  %v6745_v19 = vor.u32 %v6744_v9, %v6741_v36  ;;  %v8326_v5 = vld [vmem:[#allocation24 + $0x20] sm:$0xff]   ;;  %v8327_v9 = vld [vmem:[#allocation24 + $0x28] sm:$0xff]  }
 0x4ea   :  { %6940 = vrot.lane.b32.xlu0 %v7888_v47, %s8729_s25  ;;  %v5938_v35 = vsel %vm9512_vm3, %v5933_v37, %v5937_v23  ;;  %v6750_v6 = vrot.slane %v6748_v4, 5  ;;  %v6046_v60 = vsel %vm9501_vm2, %v7839_v45, %v6045_v34  ;;  %v6781_v38 = vshrl.u32 %v6652_v24, 16  ;;  %8182 = vmatprep.subr.bf16.mxu0 %v8326_v5  ;;  %v6642_v37 = vld [vmem:[#allocation4 + $0x28] sm:$0xf]  ;;  %v6660_v34 = vld [vmem:[#allocation4 + $0x80] sm:$0xf] }
 0x4eb   :  { %v7856_v33 = vcombine.low %v5924_v58, %v5938_v35  ;;  %v6737_v40 = vsel %vm9512_vm3, %v6732_v12, %v6736_v32  ;;  %v6746_v10 = vrot.slane %v6745_v19, 4  ;;  %v6050_v54 = vsel %vm9501_vm2, %v7840_v46, %v6049_v25  ;;  %v6641_v58 = vld [vmem:[#allocation4 + $0x24] sm:$0x1]  ;;  %8183 = vmatpush3.bf16.msra.mxu0 %v8326_v5  ;;  %v6643_v35 = vld [vmem:[#allocation4 + $0x2c] sm:$0x1] }
 0x4ec   :  { %v6784_v62 = vshll.u32 %v6652_v24, 16  ;;  %v6783_v43 = vrot.slane %v6781_v38, 4  ;;  %v6790_v3 = vshll.u32 %v6653_v18, 16  ;;  %v6795_v50 = vshrl.u32 %v6654_v27, 16  ;;  %8184 = vmatprep.subr.bf16.mxu0 %v8327_v9  ;;  %v6661_v38 = vld [vmem:[#allocation4 + $0x84] sm:$0x1] }
 0x4ed   :  { %6129 = vrot.lane.b32.xlu1 %v7856_v33, %s8746_s7  ;;  %v6798_v47 = vshll.u32 %v6654_v27, 16  ;;  %v6751_v11 = vsel %vm9512_vm3, %v6746_v10, %v6750_v6  ;;  %v6804_v36 = vshll.u32 %v6655_v51, 16  ;;  %v6697_v2 = vshrl.u32 %v6640_v16, 16 }
 0x4ee   :  { %v6786_v23 = vrot.slane %v6784_v62, 5  ;;  %v7890_v4 = vcombine.low %v6737_v40, %v6751_v11  ;;  %v7864_v17 = vcombine.low %v6046_v60, %v6050_v54  ;;  %v6797_v45 = vrot.slane %v6795_v50, 4 }
 0x4ef   :  { %v6800_v24 = vrot.slane %v6798_v47, 5  ;;  %v6792_v25 = vrot.slane %v6790_v3, 5  ;;  %v6699_v12 = vrot.slane %v6697_v2, 4  ;;  %v6700_v32 = vshll.u32 %v6640_v16, 16  ;;  %8185 = vmatpush3.bf16.msra.mxu0 %v8327_v9  ;;  %v6663_v47 = vld [vmem:[#allocation4 + $0x8c] sm:$0x1] }
 0x4f0   :  { %v6787_v46 = vor.u32 %v6786_v23, %v6783_v43  ;;  %6944 = vrot.lane.b32.xlu0 %v7890_v4, %s8729_s25  ;;  %v6706_v18 = vshll.u32 %v6641_v58, 16  ;;  %v6711_v27 = vshrl.u32 %v6642_v37, 16  ;;  %v6714_v33 = vshll.u32 %v6642_v37, 16  ;;  %v6662_v43 = vld [vmem:[#allocation4 + $0x88] sm:$0xf] }
 0x4f1   :  { %6169 = vrot.lane.b32.xlu1 %v7864_v17, %s8729_s25  ;;  %v6801_v19 = vor.u32 %v6800_v24, %v6797_v45  ;;  %v6806_v60 = vrot.slane %v6804_v36, 5  ;;  %v6702_v51 = vrot.slane %v6700_v32, 5  ;;  %v6837_v40 = vshrl.u32 %v6660_v34, 16  ;;  %v6648_v2 = vld [vmem:[#allocation4 + $0x40] sm:$0xf] }
 0x4f2   :  { %v6788_v6 = vrot.slane %v6787_v46, 4  ;;  %v6713_v10 = vrot.slane %v6711_v27, 4  ;;  %v6716_v54 = vrot.slane %v6714_v33, 5  ;;  %v6720_v62 = vshll.u32 %v6643_v35, 16  ;;  %v6656_v33 = vld [vmem:[#allocation4 + $0x70] sm:$0xf] }
 0x4f3   :  { %v6802_v5 = vrot.slane %v6801_v19, 4  ;;  %v6703_v3 = vor.u32 %v6702_v51, %v6699_v12  ;;  %v6708_v50 = vrot.slane %v6706_v18, 5  ;;  %v6839_v58 = vrot.slane %v6837_v40, 4 }
 0x4f4   :  { %v6793_v16 = vsel %vm9512_vm3, %v6788_v6, %v6792_v25  ;;  %v6717_v23 = vor.u32 %v6716_v54, %v6713_v10  ;;  %v6840_v36 = vshll.u32 %v6660_v34, 16  ;;  %v6846_v37 = vshll.u32 %v6661_v38, 16  ;;  %v6649_v25 = vld [vmem:[#allocation4 + $0x44] sm:$0x1]  ;;  %v6657_v54 = vld [vmem:[#allocation4 + $0x74] sm:$0x1] }
 0x4f5   :  { %v6807_v11 = vsel %vm9512_vm3, %v6802_v5, %v6806_v60  ;;  %v6704_v17 = vrot.slane %v6703_v3, 4  ;;  %v6851_v45 = vshrl.u32 %v6662_v43, 16  ;;  %v6854_v24 = vshll.u32 %v6662_v43, 16 }
 0x4f6   :  { %v7892_v4 = vcombine.low %v6793_v16, %v6807_v11  ;;  %v6718_v46 = vrot.slane %v6717_v23, 4  ;;  %v6722_v9 = vrot.slane %v6720_v62, 5  ;;  %v6842_v35 = vrot.slane %v6840_v36, 5  ;;  %v6658_v62 = vld [vmem:[#allocation4 + $0x78] sm:$0xf] }
 0x4f7   :  { %v6860_v32 = vshll.u32 %v6663_v47, 16  ;;  %v6848_v12 = vrot.slane %v6846_v37, 5  ;;  %v6853_v19 = vrot.slane %v6851_v45, 4  ;;  %v6856_v18 = vrot.slane %v6854_v24, 5  ;;  %v6664_v45 = vld [vmem:[#allocation4 + $0x90] sm:$0xf] }
 0x4f8   :  { %6948 = vrot.lane.b32.xlu0 %v7892_v4, %s8729_s25  ;;  %v6753_v27 = vshrl.u32 %v6648_v2, 16  ;;  %v6709_v34 = vsel %vm9512_vm3, %v6704_v17, %v6708_v50  ;;  %v6723_v6 = vsel %vm9512_vm3, %v6718_v46, %v6722_v9  ;;  %v6843_v60 = vor.u32 %v6842_v35, %v6839_v58  ;;  %v6659_v58 = vld [vmem:[#allocation4 + $0x7c] sm:$0x1] }
 0x4f9   :  { %v6756_v51 = vshll.u32 %v6648_v2, 16  ;;  %v7889_v38 = vcombine.low %v6709_v34, %v6723_v6  ;;  %v6857_v40 = vor.u32 %v6856_v18, %v6853_v19  ;;  %v6762_v10 = vshll.u32 %v6649_v25, 16  ;;  %v6666_v25 = vld [vmem:[#allocation4 + $0x98] sm:$0xf] }
 0x4fa   :  { %v6755_v5 = vrot.slane %v6753_v27, 4  ;;  %v6844_v43 = vrot.slane %v6843_v60, 4  ;;  %v6862_v16 = vrot.slane %v6860_v32, 5  ;;  %v6809_v47 = vshrl.u32 %v6656_v33, 16  ;;  %v6665_v32 = vld [vmem:[#allocation4 + $0x94] sm:$0x1] }
 0x4fb   :  { %v6758_v3 = vrot.slane %v6756_v51, 5  ;;  %6942 = vrot.lane.b32.xlu1 %v7889_v38, %s8729_s25  ;;  %v6858_v11 = vrot.slane %v6857_v40, 4  ;;  %v6764_v23 = vrot.slane %v6762_v10, 5  ;;  %v6779_v50 = vsel %vm9512_vm3, %v11120_v63, %v11045_v55  ;;  %v6667_v60 = vld [vmem:[#allocation4 + $0x9c] sm:$0x1] }
 0x4fc   :  { %v6812_v36 = vshll.u32 %v6656_v33, 16  ;;  %v6811_v2 = vrot.slane %v6809_v47, 4  ;;  %v6818_v4 = vshll.u32 %v6657_v54, 16  ;;  %v6823_v17 = vshrl.u32 %v6658_v62, 16 }
 0x4fd   :  { %v6759_v37 = vor.u32 %v6758_v3, %v6755_v5  ;;  %v6849_v24 = vsel %vm9512_vm3, %v6844_v43, %v6848_v12  ;;  %v6863_v46 = vsel %vm9512_vm3, %v6858_v11, %v6862_v16  ;;  %v6826_v35 = vshll.u32 %v6658_v62, 16 }
 0x4fe   :  { %v6814_v9 = vrot.slane %v6812_v36, 5  ;;  %v7894_v19 = vcombine.low %v6849_v24, %v6863_v46  ;;  %v6825_v55 = vrot.slane %v6823_v17, 4  ;;  %v6832_v63 = vshll.u32 %v6659_v58, 16  ;;  %v12145_v36 = vld [vmem:[#allocation43_spill] sm:$0xff] }
 0x4ff   :  { %v6760_v18 = vrot.slane %v6759_v37, 4  ;;  %v6828_v33 = vrot.slane %v6826_v35, 5  ;;  %v6865_v34 = vshrl.u32 %v6664_v45, 16  ;;  %v6868_v6 = vshll.u32 %v6664_v45, 16 }
 0x500   :  { %v6815_v27 = vor.u32 %v6814_v9, %v6811_v2  ;;  %6952 = vrot.lane.b32.xlu0 %v7894_v19, %s8729_s25  ;;  %v6874_v51 = vshll.u32 %v6665_v32, 16  ;;  %v6879_v38 = vshrl.u32 %v6666_v25, 16  ;;  %v6882_v16 = vshll.u32 %v6666_v25, 16 }
 0x501   :  { %v6765_v12 = vsel %vm9512_vm3, %v6760_v18, %v6764_v23  ;;  %v6829_v10 = vor.u32 %v6828_v33, %v6825_v55  ;;  %v6867_v54 = vrot.slane %v6865_v34, 4  ;;  %v6870_v62 = vrot.slane %v6868_v6, 5  ;;  %v12147_v18 = vld [vmem:[#allocation59_spill] sm:$0xff]  ;;  %v12151_v34 = vld [vmem:[#allocation45_spill] sm:$0xff]  ;;  %v8370_v6 = vld [vmem:[#allocation4 + $0x8] sm:$0xf] }
 0x502   :  { %v7891_v40 = vcombine.low %v6765_v12, %v6779_v50  ;;  %v6816_v5 = vrot.slane %v6815_v27, 4  ;;  %v6881_v43 = vrot.slane %v6879_v38, 4  ;;  %v6820_v3 = vrot.slane %v6818_v4, 5  ;;  %v12146_v4 = vld [vmem:[#allocation42_spill] sm:$0xff]  ;;  %v12148_v55 = vld [vmem:[#allocation51_spill] sm:$0xff] }
 0x503   :  { %v6830_v47 = vrot.slane %v6829_v10, 4  ;;  %v6834_v11 = vrot.slane %v6832_v63, 5  ;;  %v6888_v58 = vshll.u32 %v6667_v60, 16  ;;  %v6871_v23 = vor.u32 %v6870_v62, %v6867_v54  ;;  %v12149_v63 = vld [vmem:[#allocation48_spill] sm:$0xff]  ;;  %v12150_v27 = vld [vmem:[#allocation54_spill] sm:$0xff]  ;;  %v12154_v54 = vld [vmem:[#allocation61_spill] sm:$0xff] }
 0x504   :  { %6946 = vrot.lane.b32.xlu1 %v7891_v40, %s8729_s25  ;;  %494 = vrot.lane.b32.xlu0 %v12145_v36, %s8745_s8  ;;  %v6884_v37 = vrot.slane %v6882_v16, 5  ;;  %v6821_v50 = vsel %vm9512_vm3, %v6816_v5, %v6820_v3  ;;  %v6876_v17 = vrot.slane %v6874_v51, 5  ;;  %v8371_v12 = vld [vmem:[#allocation4 + $0x10] sm:$0xf]  ;;  %v12152_v51 = vld [vmem:[#allocation53_spill] sm:$0xff]  ;;  %v12153_v5 = vld [vmem:[#allocation64_spill] sm:$0xff] }
 0x505   :  { %v6835_v2 = vsel %vm9512_vm3, %v6830_v47, %v6834_v11  ;;  %v6872_v24 = vrot.slane %v6871_v23, 4  ;;  %v6890_v9 = vrot.slane %v6888_v58, 5  ;;  %v7841_v60 = vcombine.low %v8370_v6, %v8371_v12  ;;  %v12155_v62 = vld [vmem:[#allocation52_spill] sm:$0xff]  ;;  %v12157_v3 = vld [vmem:[#allocation49_spill] sm:$0xff] }
 0x506   :  { %v7893_v45 = vcombine.low %v6821_v50, %v6835_v2  ;;  %v6885_v46 = vor.u32 %v6884_v37, %v6881_v43  ;;  %v11339_v43 = vld [vmem:[#allocation17] ss:$0 sm:$0xff]  ;;  %v12156_v16 = vld [vmem:[#allocation60_spill] sm:$0xff]  ;;  %v12158_v58 = vld [vmem:[#allocation57_spill] sm:$0xff]  ;;  %vm435_vm5 = vcmask 123904  }
 0x507   :  { %v6877_v35 = vsel %vm9512_vm3, %v6872_v24, %v6876_v17  ;;  %v2028_v47 = vadd.f32 %v11339_v43, %v10931_v41  ;;  %v2036_v36 = vadd.f32 %v10929_v48, %v11339_v43  ;;  %v8372_v23 = vld [vmem:[#allocation4 + $0x18] sm:$0xf]  ;;  %v8373_v37 = vld [vmem:[#allocation4 + $0x20] sm:$0xf]  ;;  %v2044_v24 = vadd.f32 %v11339_v43, %v10979_v30  ;;  %v12160_v48 = vld [vmem:[#allocation58_spill] sm:$0xff] }
 0x508   :  { %6950 = vrot.lane.b32.xlu1 %v7893_v45, %s8729_s25  ;;  %498 = vrot.lane.b32.xlu0 %v12146_v4, %s8745_s8  ;;  %v6886_v32 = vrot.slane %v6885_v46, 4  ;;  %v7842_v50 = vcombine.low %v8372_v23, %v8373_v37  ;;  %v12159_v41 = vld [vmem:[#allocation56_spill] sm:$0xff]  ;;  %v8750_v46 = vmov 0.0   ;;  %v2031_v30 = vadd.f32 %v11339_v43, %v10939_v15  ;;  %v8374_v4 = vld [vmem:[#allocation4 + $0x28] sm:$0xf] }
 0x509   :  { %434 = vst.msk [vmem:[#allocation5] sm:$0xff] %vm296_vm0, %v8750_v46  ;;  %437 = vst.msk [vmem:[#allocation5 + $0xa0] sm:$0xff] %vm296_vm0, %v8750_v46  ;;  %v8377_v6 = vld [vmem:[#allocation4 + $0x40] sm:$0xf] }
 0x50a   :  { %v6891_v25 = vsel %vm9512_vm3, %v6886_v32, %v6890_v9  ;;  %440 = vst.msk [vmem:[#allocation5 + $0x90] sm:$0xff] %vm296_vm0, %v8750_v46  ;;  %442 = vst.msk [vmem:[#allocation5 + $0x130] sm:$0xff] %vm296_vm0, %v8750_v46  ;;  %v2052_v9 = vadd.f32 %v10977_v0, %v11339_v43  ;;  %v2060_v0 = vadd.f32 %v11339_v43, %v10995_v14 }
 0x50b   :  { %v7895_v19 = vcombine.low %v6877_v35, %v6891_v25  ;;  %436 = vst.msk [vmem:[#allocation5 + $0x8] sm:$0x3] %vm435_vm5, %v8750_v46  ;;  %438 = vst.msk [vmem:[#allocation5 + $0xa8] sm:$0x3] %vm435_vm5, %v8750_v46  ;;  %v8375_v35 = vld [vmem:[#allocation4 + $0x30] sm:$0xf]  ;;  %v2039_v25 = vadd.f32 %v10937_v13, %v11339_v43  ;;  %v2047_v14 = vadd.f32 %v11339_v43, %v10983_v44 }
 0x50c   :  { %502 = vrot.lane.b32.xlu0 %v12147_v18, %s8745_s8  ;;  %446 = vst.msk [vmem:[#allocation5 + $0x10] sm:$0x1] %vm445_vm7, %v8750_v46  ;;  %447 = vst.msk [vmem:[#allocation5 + $0x20] sm:$0x1] %vm445_vm7, %v8750_v46  ;;  %v7843_v32 = vcombine.low %v8374_v4, %v8375_v35  ;;  %v2076_v13 = vadd.f32 %v11339_v43, %v11011_v39  ;;  %v2084_v44 = vadd.f32 %v11007_v59, %v11339_v43  ;;  %v11438_v39 = vld [vmem:[#allocation20] ss:$0 sm:$0xff] }
 0x50d   :  { %6954 = vrot.lane.b32.xlu1 %v7895_v19, %s8729_s25  ;;  %462 = vst.msk [vmem:[#allocation5 + $0x19] sm:$0x1] %vm445_vm7, %v8750_v46  ;;  %463 = vst.msk [vmem:[#allocation5 + $0x29] sm:$0x1] %vm445_vm7, %v8750_v46  ;;  %v2805_v59 = vadd.f32 %v11438_v39, %v10951_v26  ;;  %v12162_v4 = vld [vmem:[#allocation84_spill] sm:$0xff] }
 0x50e   :  { %441 = vst.msk [vmem:[#allocation5 + $0x98] sm:$0x3] %vm435_vm5, %v8750_v46  ;;  %443 = vst.msk [vmem:[#allocation5 + $0x138] sm:$0x3] %vm435_vm5, %v8750_v46  ;;  %v2808_v35 = vadd.f32 %v11438_v39, %v12162_v4 }
 0x50f   :  { %448 = vst.msk [vmem:[#allocation5 + $0x30] sm:$0x1] %vm445_vm7, %v8750_v46  ;;  %449 = vst.msk [vmem:[#allocation5 + $0x40] sm:$0x1] %vm445_vm7, %v8750_v46 }
 0x510   :  { %506 = vrot.lane.b32.xlu0 %v12148_v55, %s8745_s8  ;;  %450 = vst.msk [vmem:[#allocation5 + $0x50] sm:$0x1] %vm445_vm7, %v8750_v46  ;;  %451 = vst.msk [vmem:[#allocation5 + $0x60] sm:$0x1] %vm445_vm7, %v8750_v46 }
 0x511   :  { %496 = vrot.lane.b32.xlu1 %v12149_v63, %s8745_s8  ;;  %452 = vst.msk [vmem:[#allocation5 + $0x70] sm:$0x1] %vm445_vm7, %v8750_v46  ;;  %453 = vst.msk [vmem:[#allocation5 + $0x80] sm:$0x1] %vm445_vm7, %v8750_v46  ;;  %v2068_v63 = vadd.f32 %v10993_v52, %v11339_v43  ;;  %v8376_v52 = vld [vmem:[#allocation4 + $0x38] sm:$0xf] }
 0x512   :  { %454 = vst.msk [vmem:[#allocation5 + $0xb0] sm:$0x1] %vm445_vm7, %v8750_v46  ;;  %455 = vst.msk [vmem:[#allocation5 + $0xc0] sm:$0x1] %vm445_vm7, %v8750_v46  ;;  %v7844_v12 = vcombine.low %v8376_v52, %v8377_v6 }
 0x513   :  { %456 = vst.msk [vmem:[#allocation5 + $0xd0] sm:$0x1] %vm445_vm7, %v8750_v46  ;;  %457 = vst.msk [vmem:[#allocation5 + $0xe0] sm:$0x1] %vm445_vm7, %v8750_v46 }
 0x514   :  { %512 = vrot.lane.b32.xlu0 %v12150_v27, %s8745_s8  ;;  %v11323_v33 = vpop.permute.xlu0 %6115  ;;  %458 = vst.msk [vmem:[#allocation5 + $0xf0] sm:$0x1] %vm445_vm7, %v8750_v46  ;;  %459 = vst.msk [vmem:[#allocation5 + $0x100] sm:$0x1] %vm445_vm7, %v8750_v46 }
 0x515   :  { %500 = vrot.lane.b32.xlu1 %v12151_v34, %s8745_s8  ;;  %v6173_v38 = vsel %vm1879_vm4, %v7841_v60, %v11323_v33  ;;  %460 = vst.msk [vmem:[#allocation5 + $0x110] sm:$0x1] %vm445_vm7, %v8750_v46  ;;  %461 = vst.msk [vmem:[#allocation5 + $0x120] sm:$0x1] %vm445_vm7, %v8750_v46  ;;  %v2055_v34 = vadd.f32 %v10981_v57, %v11339_v43 }
 0x516   :  { %464 = vst.msk [vmem:[#allocation5 + $0x39] sm:$0x1] %vm445_vm7, %v8750_v46  ;;  %465 = vst.msk [vmem:[#allocation5 + $0x49] sm:$0x1] %vm445_vm7, %v8750_v46 }
 0x517   :  { %466 = vst.msk [vmem:[#allocation5 + $0x59] sm:$0x1] %vm445_vm7, %v8750_v46  ;;  %467 = vst.msk [vmem:[#allocation5 + $0x69] sm:$0x1] %vm445_vm7, %v8750_v46 }
 0x518   :  { %516 = vrot.lane.b32.xlu0 %v12152_v51, %s8745_s8  ;;  %v6156_v40 = vpop.permute.xlu0 %6155  ;;  %468 = vst.msk [vmem:[#allocation5 + $0x79] sm:$0x1] %vm445_vm7, %v8750_v46  ;;  %469 = vst.msk [vmem:[#allocation5 + $0x89] sm:$0x1] %vm445_vm7, %v8750_v46 }
 0x519   :  { %504 = vrot.lane.b32.xlu1 %v12153_v5, %s8745_s8  ;;  %v6196_v10 = vsel %vm1904_vm6, %v6173_v38, %v6156_v40  ;;  %470 = vst.msk [vmem:[#allocation5 + $0xb9] sm:$0x1] %vm445_vm7, %v8750_v46  ;;  %471 = vst.msk [vmem:[#allocation5 + $0xc9] sm:$0x1] %vm445_vm7, %v8750_v46  ;;  %v2063_v38 = vadd.f32 %v11339_v43, %v10999_v29  ;;  %v6379_v40 = vld [vmem:[#allocation4] sm:$0xf]  ;;  %v2071_v5 = vadd.f32 %v10997_v42, %v11339_v43 }
 0x51a   :  { %8158 = vmatprep.mubr.msk.bf16.mxu1 %vm1976_vm8, %v6196_v10  ;;  %472 = vst.msk [vmem:[#allocation5 + $0xd9] sm:$0x1] %vm445_vm7, %v8750_v46  ;;  %473 = vst.msk [vmem:[#allocation5 + $0xe9] sm:$0x1] %vm445_vm7, %v8750_v46  ;;  %v6381_v10 = vld [vmem:[#allocation4 + $0x8] sm:$0xf]  ;;  %v2813_v29 = vadd.f32 %v10949_v8, %v11438_v39  ;;  %v2079_v42 = vadd.f32 %v11339_v43, %v11015_v1  ;;  %v2821_v8 = vadd.f32 %v11438_v39, %v10987_v22 }
 0x51b   :  { %474 = vst.msk [vmem:[#allocation5 + $0xf9] sm:$0x1] %vm445_vm7, %v8750_v46  ;;  %475 = vst.msk [vmem:[#allocation5 + $0x109] sm:$0x1] %vm445_vm7, %v8750_v46  ;;  %v2087_v1 = vadd.f32 %v11013_v56, %v11339_v43  ;;  %v7846_v43 = vcombine.low %v11184_v21, %v11194_v28  ;;  %v12164_v21 = vld [vmem:[#allocation83_spill] sm:$0xff] }
 0x51c   :  { %520 = vrot.lane.b32.xlu0 %v12154_v54, %s8745_s8  ;;  %476 = vst.msk [vmem:[#allocation5 + $0x119] sm:$0x1] %vm445_vm7, %v8750_v46  ;;  %477 = vst.msk [vmem:[#allocation5 + $0x129] sm:$0x1] %vm445_vm7, %v8750_v46  ;;  %v2816_v28 = vadd.f32 %v12164_v21, %v11438_v39  ;;  %v12172_v21 = vld [vmem:[#allocation39_spill] sm:$0xff] }
 0x51d   :  { %510 = vrot.lane.b32.xlu1 %v12155_v62, %s8745_s8  ;;  %v6412_v62 = vshrl.u32 %v6379_v40, 16 }
 0x520   :  { %508 = vrot.lane.b32.xlu0 %v12156_v16, %s8745_s8  ;;  %v6415_v16 = vshll.u32 %v6379_v40, 16  ;;  %v6389_v40 = vld [vmem:[#allocation4 + $0x28] sm:$0xf] }
 0x521   :  { %514 = vrot.lane.b32.xlu1 %v12157_v3, %s8745_s8  ;;  %v6426_v3 = vshrl.u32 %v6381_v10, 16 }
 0x524   :  { %7172 = vrot.lane.b32.xlu0 %v2028_v47, %s8746_s7  ;;  %v11348_v11 = vpop.permute.xlu1 %6117  ;;  %v6429_v47 = vshll.u32 %v6381_v10, 16 }
 0x525   :  { %518 = vrot.lane.b32.xlu1 %v12158_v58, %s8745_s8  ;;  %v6176_v2 = vsel %vm1879_vm4, %v7842_v50, %v11348_v11  ;;  %v8378_v58 = vld [vmem:[#allocation4 + $0x58] sm:$0xf]  ;;  %v6414_v50 = vrot.slane %v6412_v62, 4 }
 0x526   :  { %v7845_v26 = vcombine.low %v8378_v58, %v11170_v7  ;;  %v6431_v7 = vrot.slane %v6429_v47, 5  ;;  %v6386_v58 = vld [vmem:[#allocation4 + $0x1c] sm:$0x1] }
 0x528   :  { %7176 = vrot.lane.b32.xlu0 %v2036_v36, %s8746_s7  ;;  %v6158_v17 = vpop.permute.xlu1 %6157 }
 0x529   :  { %522 = vrot.lane.b32.xlu1 %v12159_v41, %s8745_s8  ;;  %v6198_v45 = vsel %vm1904_vm6, %v6176_v2, %v6158_v17  ;;  %v6417_v2 = vrot.slane %v6415_v16, 5  ;;  %v6428_v17 = vrot.slane %v6426_v3, 4  ;;  %v6380_v41 = vld [vmem:[#allocation4 + $0x4] sm:$0x1]  ;;  %v7847_v16 = vcombine.low %v11209_v61, %v11216_v31 }
 0x52a   :  { %8159 = vmatmul.mubr.msk.bf16.vlgmr.msra.gmra.mrb[64].mxu1 %vm1976_vm8, %v6198_v45  ;;  %v6385_v45 = vld [vmem:[#allocation4 + $0x18] sm:$0xf] }
 0x52b   :  { %v6457_v56 = vshll.u32 %v6385_v45, 16 }
 0x52c   :  { %7180 = vrot.lane.b32.xlu0 %v2044_v24, %s8746_s7  ;;  %v6382_v24 = vld [vmem:[#allocation4 + $0xc] sm:$0x1] }
 0x52d   :  { %524 = vrot.lane.b32.xlu1 %v12160_v48, %s8745_s8  ;;  %v12161_v48 = vld [vmem:[#allocation74_spill] sm:$0xff] }
 0x52e   :  { %v2829_v46 = vadd.f32 %v12161_v48, %v11438_v39  ;;  %v12168_v48 = vld [vmem:[#allocation81_spill] sm:$0xff] }
 0x530   :  { %7184 = vrot.lane.b32.xlu0 %v2052_v9, %s8746_s7  ;;  %v11407_v15 = vpop.permute.xlu0 %6119  ;;  %v6418_v9 = vor.u32 %v6417_v2, %v6414_v50 }
 0x531   :  { %7174 = vrot.lane.b32.xlu1 %v2031_v30, %s8746_s7  ;;  %v6179_v19 = vsel %vm1879_vm4, %v7843_v32, %v11407_v15  ;;  %v6421_v30 = vshll.u32 %v6380_v41, 16  ;;  %v6454_v32 = vshrl.u32 %v6385_v45, 16  ;;  %v12167_v45 = vld [vmem:[#allocation75_spill] sm:$0xff] }
 0x534   :  { %7188 = vrot.lane.b32.xlu0 %v2060_v0, %s8746_s7  ;;  %v6160_v18 = vpop.permute.xlu0 %6159  ;;  %v6432_v0 = vor.u32 %v6431_v7, %v6428_v17 }
 0x535   :  { %7178 = vrot.lane.b32.xlu1 %v2039_v25, %s8746_s7  ;;  %v6200_v55 = vsel %vm1904_vm6, %v6179_v19, %v6160_v18  ;;  %v6435_v25 = vshll.u32 %v6382_v24, 16  ;;  %v12163_v19 = vld [vmem:[#allocation76_spill] sm:$0xff]  ;;  %v2832_v24 = vadd.f32 %v12167_v45, %v11438_v39 }
 0x536   :  { %8162 = vmatprep.mubr.msk.bf16.mxu1 %vm1976_vm8, %v6200_v55  ;;  %v2837_v18 = vadd.f32 %v11438_v39, %v12163_v19  ;;  %v6383_v55 = vld [vmem:[#allocation4 + $0x10] sm:$0xf]  ;;  %v6433_v52 = vrot.slane %v6432_v0, 4 }
 0x537   :  { %v12169_v19 = vld [vmem:[#allocation79_spill] sm:$0xff] }
 0x538   :  { %7192 = vrot.lane.b32.xlu0 %v2068_v63, %s8746_s7 }
 0x539   :  { %7182 = vrot.lane.b32.xlu1 %v2047_v14, %s8746_s7 }
 0x53b   :  { %v11428_v27 = vpop.permute.xlu1 %6121 }
 0x53c   :  { %7196 = vrot.lane.b32.xlu0 %v2076_v13, %s8746_s7  ;;  %v6182_v60 = vsel %vm1879_vm4, %v7844_v12, %v11428_v27  ;;  %v6419_v13 = vrot.slane %v6418_v9, 4  ;;  %v6456_v12 = vrot.slane %v6454_v32, 4  ;;  %v6388_v9 = vld [vmem:[#allocation4 + $0x24] sm:$0x1] }
 0x53d   :  { %7186 = vrot.lane.b32.xlu1 %v2055_v34, %s8746_s7  ;;  %v6423_v34 = vrot.slane %v6421_v30, 5 }
 0x53f   :  { %v6162_v51 = vpop.permute.xlu1 %6161  ;;  %v6424_v3 = vsel %vm9512_vm3, %v6419_v13, %v6423_v34  ;;  %v6390_v13 = vld [vmem:[#allocation4 + $0x2c] sm:$0x1]  ;;  %v6393_v34 = vld [vmem:[#allocation4 + $0x38] sm:$0xf] }
 0x540   :  { %v6202_v57 = vsel %vm1904_vm6, %v6182_v60, %v6162_v51  ;;  %7200 = vrot.lane.b32.xlu0 %v2084_v44, %s8746_s7  ;;  %v6459_v44 = vrot.slane %v6457_v56, 5  ;;  %v6387_v60 = vld [vmem:[#allocation4 + $0x20] sm:$0xf] }
 0x541   :  { %8163 = vmatmul.mubr.msk.bf16.gmra.mrb[68].mxu1 %vm1976_vm8, %v6202_v57  ;;  %7190 = vrot.lane.b32.xlu1 %v2063_v38, %s8746_s7  ;;  %v6437_v38 = vrot.slane %v6435_v25, 5  ;;  %v6440_v57 = vshrl.u32 %v6383_v55, 16 }
 0x543   :  { %v6438_v47 = vsel %vm9512_vm3, %v6433_v52, %v6437_v38  ;;  %v6442_v17 = vrot.slane %v6440_v57, 4  ;;  %v6395_v38 = vld [vmem:[#allocation4 + $0x50] sm:$0xf] }
 0x544   :  { %7236 = vrot.lane.b32.xlu0 %v2805_v59, %s8729_s25  ;;  %v11451_v54 = vpop.permute.xlu0 %6123  ;;  %v6443_v59 = vshll.u32 %v6383_v55, 16  ;;  %v7880_v31 = vcombine.low %v6424_v3, %v6438_v47  ;;  %v12170_v55 = vld [vmem:[#allocation80_spill] sm:$0xff]  ;;  %v6510_v3 = vshrl.u32 %v6393_v34, 16  ;;  %v6513_v47 = vshll.u32 %v6393_v34, 16 }
 0x545   :  { %7194 = vrot.lane.b32.xlu1 %v2071_v5, %s8746_s7  ;;  %v6185_v36 = vsel %vm1879_vm4, %v7845_v26, %v11451_v54  ;;  %v12165_v5 = vld [vmem:[#allocation78_spill] sm:$0xff]  ;;  %v6384_v26 = vld [vmem:[#allocation4 + $0x14] sm:$0x1] }
 0x546   :  { %v2824_v10 = vadd.f32 %v11438_v39, %v12165_v5  ;;  %v6445_v7 = vrot.slane %v6443_v59, 5  ;;  %v6449_v41 = vshll.u32 %v6384_v26, 16  ;;  %v6957_v4 = vsel %vm1879_vm4, %v7880_v31, %v11323_v33  ;;  %v12171_v33 = vld [vmem:[#allocation82_spill] sm:$0xff] }
 0x547   :  { %v6477_v59 = vshll.u32 %v6388_v9, 16  ;;  %v6524_v26 = vshrl.u32 %v6395_v38, 16  ;;  %v6512_v45 = vrot.slane %v6510_v3, 4  ;;  %v6398_v9 = vld [vmem:[#allocation4 + $0x5c] sm:$0x1] }
 0x548   :  { %7240 = vrot.lane.b32.xlu0 %v2813_v29, %s8729_s25  ;;  %v6164_v23 = vpop.permute.xlu0 %6163  ;;  %v12166_v29 = vld [vmem:[#allocation77_spill] sm:$0xff] }
 0x549   :  { %7198 = vrot.lane.b32.xlu1 %v2079_v42, %s8746_s7  ;;  %v6204_v37 = vsel %vm1904_vm6, %v6185_v36, %v6164_v23  ;;  %v2845_v62 = vadd.f32 %v12166_v29, %v11438_v39  ;;  %v6468_v42 = vshrl.u32 %v6387_v60, 16  ;;  %v6471_v36 = vshll.u32 %v6387_v60, 16  ;;  %v6392_v60 = vld [vmem:[#allocation4 + $0x34] sm:$0x1] }
 0x54a   :  { %8166 = vmatprep.mubr.msk.bf16.mxu1 %vm1976_vm8, %v6204_v37  ;;  %v6460_v23 = vor.u32 %v6459_v44, %v6456_v12  ;;  %v6485_v37 = vshll.u32 %v6389_v40, 16  ;;  %v6451_v44 = vrot.slane %v6449_v41, 5 }
 0x54b   :  { %v6470_v30 = vrot.slane %v6468_v42, 4  ;;  %v6473_v0 = vrot.slane %v6471_v36, 5  ;;  %v6527_v42 = vshll.u32 %v6395_v38, 16  ;;  %v7848_v36 = vcombine.low %v11236_v49, %v11242_v20 }
 0x54c   :  { %7244 = vrot.lane.b32.xlu0 %v2821_v8, %s8729_s25  ;;  %v6482_v8 = vshrl.u32 %v6389_v40, 16  ;;  %v6487_v56 = vrot.slane %v6485_v37, 5 }
 0x54d   :  { %7202 = vrot.lane.b32.xlu1 %v2087_v1, %s8746_s7  ;;  %v11471_v22 = vpop.permute.xlu1 %6125  ;;  %v6463_v1 = vshll.u32 %v6386_v58, 16  ;;  %v6474_v57 = vor.u32 %v6473_v0, %v6470_v30  ;;  %v6526_v30 = vrot.slane %v6524_v26, 4  ;;  %v6529_v0 = vrot.slane %v6527_v42, 5 }
 0x54e   :  { %v6188_v63 = vsel %vm1879_vm4, %v7846_v43, %v11471_v22  ;;  %v6484_v32 = vrot.slane %v6482_v8, 4  ;;  %v6391_v43 = vld [vmem:[#allocation4 + $0x30] sm:$0xf]  ;;  %v6505_v8 = vshll.u32 %v6392_v60, 16 }
 0x54f   :  { %v6465_v12 = vrot.slane %v6463_v1, 5  ;;  %v6496_v40 = vshrl.u32 %v6391_v43, 16  ;;  %v6499_v5 = vshll.u32 %v6391_v43, 16  ;;  %v6401_v43 = vld [vmem:[#allocation4 + $0x68] sm:$0xf] }
 0x550   :  { %7248 = vrot.lane.b32.xlu0 %v2829_v46, %s8729_s25  ;;  %v2853_v46 = vadd.f32 %v11438_v39, %v12168_v48  ;;  %v6396_v48 = vld [vmem:[#allocation4 + $0x54] sm:$0x1]  ;;  %v6566_v60 = vshrl.u32 %v6401_v43, 16  ;;  %v6569_v38 = vshll.u32 %v6401_v43, 16 }
 0x551   :  { %7238 = vrot.lane.b32.xlu1 %v2808_v35, %s8729_s25  ;;  %v6166_v14 = vpop.permute.xlu1 %6165  ;;  %v11515_v35 = vrot.slane %v6460_v23, 4  ;;  %v6491_v23 = vshll.u32 %v6390_v13, 16  ;;  %v6405_v13 = vld [vmem:[#allocation4 + $0x78] sm:$0xf] }
 0x552   :  { %v6206_v6 = vsel %vm1904_vm6, %v6188_v63, %v6166_v14  ;;  %v2840_v63 = vadd.f32 %v11438_v39, %v12170_v55  ;;  %v6446_v14 = vor.u32 %v6445_v7, %v6442_v17  ;;  %v6394_v17 = vld [vmem:[#allocation4 + $0x3c] sm:$0x1]  ;;  %v6498_v7 = vrot.slane %v6496_v40, 4 }
 0x553   :  { %8167 = vmatmul.mubr.msk.bf16.gmra.mrb[72].mxu1 %vm1976_vm8, %v6206_v6  ;;  %v2861_v6 = vadd.f32 %v12171_v33, %v11438_v39  ;;  %v6594_v40 = vshrl.u32 %v6405_v13, 16 }
 0x554   :  { %v11489_v51 = vpop.permute.xlu0 %6127  ;;  %7252 = vrot.lane.b32.xlu0 %v2837_v18, %s8729_s25  ;;  %v2848_v18 = vadd.f32 %v12169_v19, %v11438_v39  ;;  %v6447_v58 = vrot.slane %v6446_v14, 4  ;;  %v11549_v14 = vrot.slane %v6505_v8, 5  ;;  %v6568_v8 = vrot.slane %v6566_v60, 4 }
 0x555   :  { %7242 = vrot.lane.b32.xlu1 %v2816_v28, %s8729_s25  ;;  %v6191_v50 = vsel %vm1879_vm4, %v7847_v16, %v11489_v51  ;;  %v11527_v28 = vadd.f32 %v12172_v21, %v11438_v39  ;;  %v6488_v16 = vor.u32 %v6487_v56, %v6484_v32  ;;  %v6533_v21 = vshll.u32 %v6396_v48, 16  ;;  %v6407_v48 = vld [vmem:[#allocation4 + $0x80] sm:$0xf] }
 0x556   :  { %v6452_v20 = vsel %vm9512_vm3, %v6447_v58, %v6451_v44  ;;  %v6530_v44 = vor.u32 %v6529_v0, %v6526_v30 }
 0x557   :  { %v6489_v41 = vrot.slane %v6488_v16, 4  ;;  %v6535_v58 = vrot.slane %v6533_v21, 5 }
 0x558   :  { %v6168_v2 = vpop.permute.xlu0 %6167  ;;  %7256 = vrot.lane.b32.xlu0 %v2845_v62, %s8729_s25  ;;  %v6466_v62 = vsel %vm9512_vm3, %v11515_v35, %v6465_v12  ;;  %v6519_v35 = vshll.u32 %v6394_v17, 16  ;;  %v6399_v12 = vld [vmem:[#allocation4 + $0x60] sm:$0xf] }
 0x559   :  { %v6208_v61 = vsel %vm1904_vm6, %v6191_v50, %v6168_v2  ;;  %7246 = vrot.lane.b32.xlu1 %v2824_v10, %s8729_s25  ;;  %v6397_v10 = vld [vmem:[#allocation4 + $0x58] sm:$0xf]  ;;  %v6475_v2 = vrot.slane %v6474_v57, 4  ;;  %v7881_v55 = vcombine.low %v6452_v20, %v6466_v62  ;;  %v6552_v16 = vshrl.u32 %v6399_v12, 16 }
 0x55a   :  { %8170 = vmatprep.mubr.msk.bf16.mxu1 %vm1976_vm8, %v6208_v61  ;;  %v6538_v37 = vshrl.u32 %v6397_v10, 16  ;;  %v6541_v50 = vshll.u32 %v6397_v10, 16  ;;  %v6501_v61 = vrot.slane %v6499_v5, 5  ;;  %v6521_v57 = vrot.slane %v6519_v35, 5  ;;  %v6406_v35 = vld [vmem:[#allocation4 + $0x7c] sm:$0x1] }
 0x55b   :  { %v6597_v5 = vshll.u32 %v6405_v13, 16  ;;  %v6555_v3 = vshll.u32 %v6399_v12, 16 }
 0x55c   :  { %v6941_v25 = vpop.permute.xlu0 %6940  ;;  %7260 = vrot.lane.b32.xlu0 %v2853_v46, %s8729_s25  ;;  %v6479_v46 = vrot.slane %v6477_v59, 5  ;;  %v6540_v32 = vrot.slane %v6538_v37, 4  ;;  %v6543_v56 = vrot.slane %v6541_v50, 5  ;;  %v6571_v37 = vrot.slane %v6569_v38, 5 }
 0x55d   :  { %v6973_v52 = vsel %vm1904_vm6, %v6957_v4, %v6941_v25  ;;  %7250 = vrot.lane.b32.xlu1 %v2832_v24, %s8729_s25  ;;  %v6515_v24 = vrot.slane %v6513_v47, 5  ;;  %v6493_v4 = vrot.slane %v6491_v23, 5  ;;  %v12173_v25 = vld [vmem:[#allocation40_spill] sm:$0xff] }
 0x55e   :  { %8186 = vmatprep.mubr.msk.bf16.mxu0 %vm1976_vm8, %v6973_v52  ;;  %v2856_v19 = vadd.f32 %v11438_v39, %v12173_v25  ;;  %v6480_v52 = vsel %vm9512_vm3, %v6475_v2, %v6479_v46  ;;  %v6403_v39 = vld [vmem:[#allocation4 + $0x70] sm:$0xf]  ;;  %v6544_v59 = vor.u32 %v6543_v56, %v6540_v32  ;;  %v6959_v2 = vsel %vm1879_vm4, %v7881_v55, %v11348_v11  ;;  %v6400_v11 = vld [vmem:[#allocation4 + $0x64] sm:$0x1]  ;;  %v6402_v46 = vld [vmem:[#allocation4 + $0x6c] sm:$0x1] }
 0x55f   :  { %v11531_v29 = vpop.permute.xlu1 %6129  ;;  %v6494_v33 = vsel %vm9512_vm3, %v6489_v41, %v6493_v4  ;;  %v6580_v26 = vshrl.u32 %v6403_v39, 16  ;;  %v6583_v42 = vshll.u32 %v6403_v39, 16  ;;  %v6404_v4 = vld [vmem:[#allocation4 + $0x74] sm:$0x1]  ;;  %v6611_v55 = vshll.u32 %v6407_v48, 16 }
 0x560   :  { %7264 = vrot.lane.b32.xlu0 %v2861_v6, %s8729_s25  ;;  %v6194_v31 = vsel %vm1879_vm4, %v7848_v36, %v11531_v29  ;;  %v6516_v6 = vor.u32 %v6515_v24, %v6512_v45  ;;  %v7882_v10 = vcombine.low %v6480_v52, %v6494_v33  ;;  %v6531_v36 = vrot.slane %v6530_v44, 4 }
 0x561   :  { %7254 = vrot.lane.b32.xlu1 %v2840_v63, %s8729_s25  ;;  %v6502_v63 = vor.u32 %v6501_v61, %v6498_v7  ;;  %v6545_v17 = vrot.slane %v6544_v59, 4  ;;  %v6596_v7 = vrot.slane %v6594_v40, 4  ;;  %v6599_v61 = vrot.slane %v6597_v5, 5 }
 0x562   :  { %v6945_v34 = vpop.permute.xlu0 %6944  ;;  %v6517_v47 = vrot.slane %v6516_v6, 4  ;;  %v6961_v41 = vsel %vm1879_vm4, %v7882_v10, %v11407_v15  ;;  %v6554_v45 = vrot.slane %v6552_v16, 4  ;;  %v6557_v24 = vrot.slane %v6555_v3, 5 }
 0x563   :  { %v6170_v1 = vpop.permute.xlu1 %6169  ;;  %v6503_v62 = vrot.slane %v6502_v63, 4  ;;  %v6585_v30 = vrot.slane %v6583_v42, 5  ;;  %v6977_v0 = vsel %vm1904_vm6, %v6961_v41, %v6945_v34  ;;  %v6572_v15 = vor.u32 %v6571_v37, %v6568_v8  ;;  %v6410_v42 = vld [vmem:[#allocation4 + $0x8c] sm:$0x1] }
 0x564   :  { %v6210_v49 = vsel %vm1904_vm6, %v6194_v31, %v6170_v1  ;;  %v6409_v31 = vld [vmem:[#allocation4 + $0x88] sm:$0xf]  ;;  %v6522_v20 = vsel %vm9512_vm3, %v6517_v47, %v6521_v57  ;;  %v6600_v25 = vor.u32 %v6599_v61, %v6596_v7  ;;  %v6558_v13 = vor.u32 %v6557_v24, %v6554_v45  ;;  %v6408_v7 = vld [vmem:[#allocation4 + $0x84] sm:$0x1] }
 0x565   :  { %8171 = vmatmul.mubr.msk.bf16.gmra.mrb[76].mxu1 %vm1976_vm8, %v6210_v49  ;;  %7258 = vrot.lane.b32.xlu1 %v2848_v18, %s8729_s25  ;;  %v6547_v18 = vshll.u32 %v6398_v9, 16  ;;  %v6582_v9 = vrot.slane %v6580_v26, 4  ;;  %v6622_v32 = vshrl.u32 %v6409_v31, 16  ;;  %v6625_v56 = vshll.u32 %v6409_v31, 16 }
 0x566   :  { %v6508_v63 = vsel %vm9512_vm3, %v6503_v62, %v11549_v14  ;;  %v6561_v34 = vshll.u32 %v6400_v11, 16  ;;  %v6575_v52 = vshll.u32 %v6402_v46, 16  ;;  %v6589_v12 = vshll.u32 %v6404_v4, 16 }
 0x567   :  { %v6549_v23 = vrot.slane %v6547_v18, 5  ;;  %v7883_v6 = vcombine.low %v6508_v63, %v6522_v20  ;;  %v6586_v21 = vor.u32 %v6585_v30, %v6582_v9  ;;  %v6603_v44 = vshll.u32 %v6406_v35, 16 }
 0x568   :  { %v6573_v60 = vrot.slane %v6572_v15, 4  ;;  %v6624_v38 = vrot.slane %v6622_v32, 4  ;;  %v6627_v39 = vrot.slane %v6625_v56, 5  ;;  %v6601_v59 = vrot.slane %v6600_v25, 4 }
 0x569   :  { %7262 = vrot.lane.b32.xlu1 %v2856_v19, %s8729_s25  ;;  %v6550_v43 = vsel %vm9512_vm3, %v6545_v17, %v6549_v23  ;;  %v6608_v19 = vshrl.u32 %v6407_v48, 16  ;;  %v6963_v57 = vsel %vm1879_vm4, %v7883_v6, %v11428_v27  ;;  %v6613_v5 = vrot.slane %v6611_v55, 5  ;;  %v558_v27 = vld [vmem:[#allocation5] sm:$0xff] }
 0x56a   :  { %v6949_v50 = vpop.permute.xlu0 %6948  ;;  %v6559_v62 = vrot.slane %v6558_v13, 4  ;;  %v6577_v16 = vrot.slane %v6575_v52, 5  ;;  %v6605_v26 = vrot.slane %v6603_v44, 5  ;;  %v574_v23 = vld [vmem:[#allocation5 + $0x1] sm:$0xff]  ;;  %v6563_v8 = vrot.slane %v6561_v34, 5 }
 0x56b   :  { %v6610_v40 = vrot.slane %v6608_v19, 4  ;;  %v6628_v37 = vor.u32 %v6627_v39, %v6624_v38  ;;  %v6631_v31 = vshll.u32 %v6410_v42, 16  ;;  %v590_v45 = vadd.f32 %v574_v23, %v558_v27 }
 0x56c   :  { %v6606_v17 = vsel %vm9512_vm3, %v6601_v59, %v6605_v26  ;;  %v6617_v11 = vshll.u32 %v6408_v7, 16 }
 0x56d   :  { %7266 = vrot.lane.b32.xlu1 %v11527_v28, %s8729_s25  ;;  %v6943_v1 = vpop.permute.xlu1 %6942  ;;  %v6536_v28 = vsel %vm9512_vm3, %v6531_v36, %v6535_v58  ;;  %v6587_v58 = vrot.slane %v6586_v21, 4  ;;  %v6614_v61 = vor.u32 %v6613_v5, %v6610_v40  ;;  %v6629_v46 = vrot.slane %v6628_v37, 4  ;;  %s8751_s25 = smov [#allocation29]  }
 0x56e   :  { %v6975_v49 = vsel %vm1904_vm6, %v6959_v2, %v6943_v1  ;;  %v7884_v18 = vcombine.low %v6536_v28, %v6550_v43  ;;  %v6591_v2 = vrot.slane %v6589_v12, 5  ;;  %v6633_v28 = vrot.slane %v6631_v31, 5  ;;  %s7513_s11 = sshll.u32 %s8751_s25, 4  ;;  %s7514_s11 = int_to_ptr.vmem [resolvable:$true] %s7513_s11 }
 0x56f   :  { %8187 = vmatmul.mubr.msk.bf16.vlgmr.msra.gmra.mrb[48].mxu0 %vm1976_vm8, %v6975_v49  ;;  %v606_v49 = vld [vmem:[#allocation5 + $0x2] sm:$0xff]  ;;  %v6615_v30 = vrot.slane %v6614_v61, 4  ;;  %v6619_v25 = vrot.slane %v6617_v11, 5  ;;  %s8687_s3 = scalar_lea.vmem %s7514_s11, 4096  ;;  %p8692_p1 = scmp.lt.s32.totalorder %s7514_s11, %s7514_s11 }
 0x570   :  { %8190 = vmatprep.mubr.msk.bf16.mxu0 %vm1976_vm8, %v6977_v0  ;;  %v6965_v14 = vsel %vm1879_vm4, %v7884_v18, %v11451_v54  ;;  %v6578_v54 = vsel %vm9512_vm3, %v6573_v60, %v6577_v16  ;;  %v6592_v48 = vsel %vm9512_vm3, %v6587_v58, %v6591_v2  ;;  %v622_v35 = vadd.f32 %v606_v49, %v590_v45  ;;  %v582_v58 = vld [vmem:[#allocation5 + $0xa1] sm:$0xff]  ;;  %v11625_v49 = vld [vmem:[#allocation27] ss:$0 sm:$0xff]  ;;  %p8688_p0 = scmp.ne.s32.totalorder %s7514_s11, %s8687_s3  ;;  %p8693_p2 = scmp.lt.s32.totalorder %s8687_s3, %s8687_s3 }
 0x571   :  { %v6981_v36 = vsel %vm1904_vm6, %v6965_v14, %v6949_v50  ;;  %v6564_v50 = vsel %vm9512_vm3, %v6559_v62, %v6563_v8  ;;  %v7886_v20 = vcombine.low %v6592_v48, %v6606_v17  ;;  %v614_v48 = vld [vmem:[#allocation5 + $0xa2] sm:$0xff] }
 0x572   :  { %v6953_v33 = vpop.permute.xlu0 %6952  ;;  %v7885_v24 = vcombine.low %v6564_v50, %v6578_v54  ;;  %p8694_p3 = por %p8693_p2, %p8692_p1 }
 0x573   :  { %v6969_v0 = vsel %vm1879_vm4, %v7886_v20, %v11489_v51  ;;  %v6620_v51 = vsel %vm9512_vm3, %v6615_v30, %v6619_v25 }
 0x574   :  { %v6967_v9 = vsel %vm1879_vm4, %v7885_v24, %v11471_v22  ;;  %v6985_v32 = vsel %vm1904_vm6, %v6969_v0, %v6953_v33  ;;  %v6634_v22 = vsel %vm9512_vm3, %v6629_v46, %v6633_v28  ;;  %p8695_p4 = pnand %p8694_p3, %p8688_p0 }
 0x575   :  { %v7887_v63 = vcombine.low %v6620_v51, %v6634_v22 }
 0x576   :  { %v6947_v10 = vpop.permute.xlu1 %6946  ;;  %v495_v47 = vpop.permute.xlu0 %494 }
 0x577   :  { %v6979_v3 = vsel %vm1904_vm6, %v6963_v57, %v6947_v10  ;;  %542 = vst.msk [vmem:[#allocation5 + $0x11] sm:$0xff] %vm296_vm0, %v495_v47  ;;  %v6971_v52 = vsel %vm1879_vm4, %v7887_v63, %v11531_v29  ;;  %v566_v10 = vld [vmem:[#allocation5 + $0xa0] sm:$0xff] }
 0x578   :  { %8191 = vmatmul.mubr.msk.bf16.gmra.mrb[52].mxu0 %vm1976_vm8, %v6979_v3  ;;  %v598_v61 = vadd.f32 %v582_v58, %v566_v10 }
 0x579   :  { %8194 = vmatprep.mubr.msk.bf16.mxu0 %vm1976_vm8, %v6981_v36 }
 0x57a   :  { %v6951_v1 = vpop.permute.xlu1 %6950  ;;  %v499_v41 = vpop.permute.xlu0 %498  ;;  %v630_v51 = vadd.f32 %v614_v48, %v598_v61 }
 0x57b   :  { %544 = vst.msk [vmem:[#allocation5 + $0x31] sm:$0xff] %vm296_vm0, %v499_v41  ;;  %v6983_v15 = vsel %vm1904_vm6, %v6967_v9, %v6951_v1 }
 0x57e   :  { %v503_v4 = vpop.permute.xlu0 %502  ;;  %v638_v43 = vld [vmem:[#allocation5 + $0x10] sm:$0xff] }
 0x57f   :  { %v6955_v56 = vpop.permute.xlu1 %6954  ;;  %546 = vst.msk [vmem:[#allocation5 + $0x51] sm:$0xff] %vm296_vm0, %v503_v4  ;;  %v654_v55 = vadd.f32 %v638_v43, %v622_v35  ;;  %v670_v34 = vld [vmem:[#allocation5 + $0x11] sm:$0xff] }
 0x580   :  { %8195 = vmatmul.mubr.msk.bf16.gmra.mrb[56].mxu0 %vm1976_vm8, %v6983_v15  ;;  %v6987_v33 = vsel %vm1904_vm6, %v6971_v52, %v6955_v56  ;;  %v591_v12 = vadd.f32 %v670_v34, %v638_v43  ;;  %v702_v60 = vld [vmem:[#allocation5 + $0x12] sm:$0xff] }
 0x581   :  { %8198 = vmatprep.mubr.msk.bf16.mxu0 %vm1976_vm8, %v6985_v32  ;;  %v686_v21 = vadd.f32 %v670_v34, %v654_v55 }
 0x582   :  { %v507_v19 = vpop.permute.xlu0 %506  ;;  %v736_v53 = vld [vmem:[#allocation5 + $0x30] sm:$0xff]  ;;  %v623_v57 = vadd.f32 %v702_v60, %v591_v12 }
 0x583   :  { %v497_v13 = vpop.permute.xlu1 %496  ;;  %548 = vst.msk [vmem:[#allocation5 + $0x71] sm:$0xff] %vm296_vm0, %v507_v19  ;;  %v768_v18 = vld [vmem:[#allocation5 + $0x31] sm:$0xff]  ;;  %v718_v39 = vadd.f32 %v702_v60, %v686_v21 }
 0x584   :  { %543 = vst.msk [vmem:[#allocation5 + $0x21] sm:$0xff] %vm296_vm0, %v497_v13  ;;  %v593_v59 = vadd.f32 %v768_v18, %v736_v53  ;;  %v800_v42 = vld [vmem:[#allocation5 + $0x32] sm:$0xff] }
 0x586   :  { %v513_v6 = vpop.permute.xlu0 %512  ;;  %v738_v3 = vld [vmem:[#allocation5 + $0x50] sm:$0xff]  ;;  %v625_v54 = vadd.f32 %v800_v42, %v593_v59 }
 0x587   :  { %v501_v44 = vpop.permute.xlu1 %500  ;;  %551 = vst.msk [vmem:[#allocation5 + $0xc1] sm:$0xff] %vm296_vm0, %v513_v6  ;;  %v11616_v47 = vld [vmem:[#allocation5 + $0x51] sm:$0xff] }
 0x588   :  { %8199 = vmatmul.mubr.msk.bf16.gmra.mrb[60].mxu0 %vm1976_vm8, %v6987_v33  ;;  %545 = vst.msk [vmem:[#allocation5 + $0x41] sm:$0xff] %vm296_vm0, %v501_v44  ;;  %v595_v7 = vadd.f32 %v11616_v47, %v738_v3  ;;  %v802_v20 = vld [vmem:[#allocation5 + $0x52] sm:$0xff] }
 0x58a   :  { %v517_v38 = vpop.permute.xlu0 %516  ;;  %v11621_v45 = vld [vmem:[#allocation5 + $0x70] sm:$0xff]  ;;  %v627_v22 = vadd.f32 %v802_v20, %v595_v7 }
 0x58b   :  { %v505_v29 = vpop.permute.xlu1 %504  ;;  %553 = vst.msk [vmem:[#allocation5 + $0xe1] sm:$0xff] %vm296_vm0, %v517_v38  ;;  %v735_v40 = vld [vmem:[#allocation5 + $0x20] sm:$0xff]  ;;  %v11623_v24 = vld [vmem:[#allocation5 + $0x71] sm:$0xff] }
 0x58c   :  { %v767_v5 = vld [vmem:[#allocation5 + $0x21] sm:$0xff]  ;;  %547 = vst.msk [vmem:[#allocation5 + $0x61] sm:$0xff] %vm296_vm0, %v505_v29  ;;  %v751_v14 = vadd.f32 %v735_v40, %v718_v39  ;;  %v655_v62 = vadd.f32 %v735_v40, %v623_v57  ;;  %v597_v19 = vadd.f32 %v11623_v24, %v11621_v45  ;;  %v804_v57 = vld [vmem:[#allocation5 + $0x72] sm:$0xff] }
 0x58d   :  { %v592_v16 = vadd.f32 %v767_v5, %v735_v40  ;;  %v799_v26 = vld [vmem:[#allocation5 + $0x22] sm:$0xff] }
 0x58e   :  { %v521_v36 = vpop.permute.xlu0 %520  ;;  %v783_v27 = vadd.f32 %v767_v5, %v751_v14  ;;  %v687_v23 = vadd.f32 %v767_v5, %v655_v62  ;;  %v11627_v4 = vld [vmem:[#allocation5 + $0xc0] sm:$0xff]  ;;  %v629_v10 = vadd.f32 %v804_v57, %v597_v19 }
 0x58f   :  { %v624_v8 = vadd.f32 %v799_v26, %v592_v16  ;;  %v511_v37 = vpop.permute.xlu1 %510  ;;  %555 = vst.msk [vmem:[#allocation5 + $0x101] sm:$0xff] %vm296_vm0, %v521_v36  ;;  %v737_v2 = vld [vmem:[#allocation5 + $0x40] sm:$0xff] }
 0x590   :  { %v769_v17 = vld [vmem:[#allocation5 + $0x41] sm:$0xff]  ;;  %550 = vst.msk [vmem:[#allocation5 + $0xb1] sm:$0xff] %vm296_vm0, %v511_v37  ;;  %v815_v50 = vadd.f32 %v799_v26, %v783_v27  ;;  %v719_v31 = vadd.f32 %v799_v26, %v687_v23  ;;  %v657_v41 = vadd.f32 %v737_v2, %v625_v54 }
 0x591   :  { %v656_v1 = vadd.f32 %v736_v53, %v624_v8  ;;  %v594_v11 = vadd.f32 %v769_v17, %v737_v2  ;;  %v801_v28 = vld [vmem:[#allocation5 + $0x42] sm:$0xff] }
 0x592   :  { %v509_v46 = vpop.permute.xlu0 %508  ;;  %v831_v9 = vmul.f32 0.11111111, %v815_v50  ;;  %v752_v30 = vadd.f32 %v736_v53, %v719_v31  ;;  %v689_v15 = vadd.f32 %v769_v17, %v657_v41  ;;  %v11629_v35 = vld [vmem:[#allocation5 + $0xc1] sm:$0xff] }
 0x593   :  { %v688_v0 = vadd.f32 %v768_v18, %v656_v1  ;;  %v515_v32 = vpop.permute.xlu1 %514  ;;  %549 = vst.msk [vmem:[#allocation5 + $0x81] sm:$0xff] %vm296_vm0, %v509_v46  ;;  %v626_v56 = vadd.f32 %v801_v28, %v594_v11  ;;  %v739_v43 = vld [vmem:[#allocation5 + $0x60] sm:$0xff]  ;;  %v600_v21 = vadd.f32 %v11629_v35, %v11627_v4 }
 0x594   :  { %v771_v25 = vld [vmem:[#allocation5 + $0x61] sm:$0xff]  ;;  %552 = vst.msk [vmem:[#allocation5 + $0xd1] sm:$0xff] %vm296_vm0, %v515_v32  ;;  %v854_v55 = vadd.f32 %v11625_v49, %v831_v9  ;;  %v784_v63 = vadd.f32 %v768_v18, %v752_v30  ;;  %v721_v34 = vadd.f32 %v801_v28, %v689_v15  ;;  %v659_v33 = vadd.f32 %v739_v43, %v627_v22 }
 0x595   :  { %v720_v13 = vadd.f32 %v800_v42, %v688_v0  ;;  %v658_v52 = vadd.f32 %v738_v3, %v626_v56  ;;  %v596_v6 = vadd.f32 %v771_v25, %v739_v43  ;;  %v803_v39 = vld [vmem:[#allocation5 + $0x62] sm:$0xff] }
 0x596   :  { %v870_v12 = vmax.f32 %v854_v55, 0.0  ;;  %v11638_v44 = vpop.permute.xlu0 %7172  ;;  %v816_v53 = vadd.f32 %v800_v42, %v784_v63  ;;  %v754_v38 = vadd.f32 %v738_v3, %v721_v34  ;;  %v691_v18 = vadd.f32 %v771_v25, %v659_v33  ;;  %v11644_v3 = vld [vmem:[#allocation5 + $0xc2] sm:$0xff] }
 0x597   :  { %v753_v60 = vadd.f32 %v737_v2, %v720_v13  ;;  %v519_v59 = vpop.permute.xlu1 %518  ;;  %v690_v29 = vadd.f32 %v11616_v47, %v658_v52  ;;  %v628_v40 = vadd.f32 %v803_v39, %v596_v6  ;;  %v646_v5 = vld [vmem:[#allocation5 + $0xb0] sm:$0xff]  ;;  %v632_v23 = vadd.f32 %v11644_v3, %v600_v21  ;;  %v11655_v48 = vld [vmem:[#allocation5 + $0xe0] sm:$0xff] }
 0x598   :  { %554 = vst.msk [vmem:[#allocation5 + $0xf1] sm:$0xff] %vm296_vm0, %v519_v59  ;;  %7364 = vrot.lane.b32.xlu0 %v870_v12, %s8746_s7  ;;  %v832_v14 = vmul.f32 0.11111111, %v816_v53  ;;  %v786_v16 = vadd.f32 %v11616_v47, %v754_v38  ;;  %v662_v58 = vadd.f32 %v646_v5, %v630_v51  ;;  %v678_v26 = vld [vmem:[#allocation5 + $0xb1] sm:$0xff]  ;;  %v723_v36 = vadd.f32 %v803_v39, %v691_v18  ;;  %v11658_v0 = vld [vmem:[#allocation5 + $0xe1] sm:$0xff] }
 0x599   :  { %v785_v62 = vadd.f32 %v769_v17, %v753_v60  ;;  %v722_v42 = vadd.f32 %v802_v20, %v690_v29  ;;  %v660_v27 = vadd.f32 %v11621_v45, %v628_v40  ;;  %v710_v1 = vld [vmem:[#allocation5 + $0xb2] sm:$0xff]  ;;  %v599_v11 = vadd.f32 %v678_v26, %v646_v5 }
 0x59a   :  { %v11648_v8 = vpop.permute.xlu0 %7176  ;;  %v855_v54 = vadd.f32 %v11625_v49, %v832_v14  ;;  %v818_v2 = vadd.f32 %v802_v20, %v786_v16  ;;  %v741_v7 = vld [vmem:[#allocation5 + $0x80] sm:$0xff]  ;;  %v694_v17 = vadd.f32 %v678_v26, %v662_v58  ;;  %v756_v50 = vadd.f32 %v11621_v45, %v723_v36  ;;  %v742_v29 = vld [vmem:[#allocation5 + $0x90] sm:$0xff] }
 0x59b   :  { %v817_v37 = vadd.f32 %v801_v28, %v785_v62  ;;  %v523_v61 = vpop.permute.xlu1 %522  ;;  %v755_v47 = vadd.f32 %v739_v43, %v722_v42  ;;  %v692_v31 = vadd.f32 %v11623_v24, %v660_v27  ;;  %v11653_v41 = vld [vmem:[#allocation5 + $0xd0] sm:$0xff]  ;;  %v661_v32 = vadd.f32 %v741_v7, %v629_v10  ;;  %v773_v34 = vld [vmem:[#allocation5 + $0x81] sm:$0xff] }
 0x59c   :  { %556 = vst.msk [vmem:[#allocation5 + $0x111] sm:$0xff] %vm296_vm0, %v523_v61  ;;  %v871_v46 = vmax.f32 %v855_v54, 0.0  ;;  %v834_v30 = vmul.f32 0.11111111, %v818_v2  ;;  %v726_v20 = vadd.f32 %v710_v1, %v694_v17  ;;  %v788_v15 = vadd.f32 %v11623_v24, %v756_v50  ;;  %v680_v12 = vld [vmem:[#allocation5 + $0xd1] sm:$0xff]  ;;  %v805_v59 = vld [vmem:[#allocation5 + $0x82] sm:$0xff] }
 0x59d   :  { %v833_v9 = vmul.f32 0.11111111, %v817_v37  ;;  %v787_v28 = vadd.f32 %v771_v25, %v755_v47  ;;  %v724_v45 = vadd.f32 %v804_v57, %v692_v31  ;;  %v664_v19 = vadd.f32 %v11653_v41, %v632_v23  ;;  %v774_v5 = vld [vmem:[#allocation5 + $0x91] sm:$0xff]  ;;  %v809_v42 = vld [vmem:[#allocation5 + $0xe2] sm:$0xff] }
 0x59e   :  { %7366 = vrot.lane.b32.xlu1 %v871_v46, %s8746_s7  ;;  %v11662_v56 = vpop.permute.xlu0 %7180  ;;  %v857_v22 = vadd.f32 %v11625_v49, %v834_v30  ;;  %v759_v51 = vadd.f32 %v11627_v4, %v726_v20  ;;  %v820_v13 = vadd.f32 %v804_v57, %v788_v15  ;;  %v602_v24 = vadd.f32 %v11658_v0, %v11655_v48  ;;  %v712_v26 = vld [vmem:[#allocation5 + $0xd2] sm:$0xff] }
 0x59f   :  { %v856_v43 = vadd.f32 %v11625_v49, %v833_v9  ;;  %v525_v55 = vpop.permute.xlu1 %524  ;;  %v819_v63 = vadd.f32 %v803_v39, %v787_v28  ;;  %v757_v25 = vadd.f32 %v741_v7, %v724_v45  ;;  %v693_v21 = vadd.f32 %v773_v34, %v661_v32  ;;  %v11681_v36 = vld [vmem:[#allocation5 + $0xf0] sm:$0xff] }
 0x5a0   :  { %557 = vst.msk [vmem:[#allocation5 + $0x121] sm:$0xff] %vm296_vm0, %v525_v55  ;;  %v873_v33 = vmax.f32 %v857_v22, 0.0  ;;  %v791_v6 = vadd.f32 %v11629_v35, %v759_v51  ;;  %v836_v60 = vmul.f32 0.11111111, %v820_v13  ;;  %v696_v39 = vadd.f32 %v680_v12, %v664_v19  ;;  %v806_v61 = vld [vmem:[#allocation5 + $0x92] sm:$0xff] }
 0x5a1   :  { %v872_v52 = vmax.f32 %v856_v43, 0.0  ;;  %v835_v53 = vmul.f32 0.11111111, %v819_v63  ;;  %v789_v38 = vadd.f32 %v773_v34, %v757_v25  ;;  %v725_v40 = vadd.f32 %v805_v59, %v693_v21  ;;  %v682_v20 = vld [vmem:[#allocation5 + $0xf1] sm:$0xff] }
 0x5a2   :  { %7370 = vrot.lane.b32.xlu1 %v873_v33, %s8746_s7  ;;  %v11674_v57 = vpop.permute.xlu0 %7184  ;;  %v823_v18 = vadd.f32 %v11644_v3, %v791_v6  ;;  %v631_v10 = vadd.f32 %v710_v1, %v599_v11  ;;  %v859_v16 = vadd.f32 %v11625_v49, %v836_v60  ;;  %v728_v54 = vadd.f32 %v712_v26, %v696_v39  ;;  %v714_v63 = vld [vmem:[#allocation5 + $0xf2] sm:$0xff]  ;;  %v11706_v33 = vld [vmem:[#allocation5 + $0x100] sm:$0xff] }
 0x5a3   :  { %7368 = vrot.lane.b32.xlu0 %v872_v52, %s8746_s7  ;;  %v11677_v14 = vpop.permute.xlu1 %7174  ;;  %v858_v62 = vadd.f32 %v11625_v49, %v835_v53  ;;  %v821_v58 = vadd.f32 %v805_v59, %v789_v38  ;;  %v758_v23 = vadd.f32 %v742_v29, %v725_v40  ;;  %v634_v37 = vadd.f32 %v809_v42, %v602_v24 }
 0x5a4   :  { %v839_v27 = vmul.f32 0.11111111, %v823_v18  ;;  %v875_v7 = vmax.f32 %v859_v16, 0.0  ;;  %v663_v47 = vadd.f32 %v11627_v4, %v631_v10  ;;  %v761_v1 = vadd.f32 %v11655_v48, %v728_v54 }
 0x5a5   :  { %v874_v2 = vmax.f32 %v858_v62, 0.0  ;;  %v837_v17 = vmul.f32 0.11111111, %v821_v58  ;;  %v790_v31 = vadd.f32 %v774_v5, %v758_v23  ;;  %v666_v11 = vadd.f32 %v11681_v36, %v634_v37 }
 0x5a6   :  { %v11684_v50 = vpop.permute.xlu0 %7188  ;;  %7374 = vrot.lane.b32.xlu1 %v875_v7, %s8746_s7  ;;  %v695_v30 = vadd.f32 %v11629_v35, %v663_v47  ;;  %v862_v4 = vadd.f32 %v11625_v49, %v839_v27  ;;  %v793_v15 = vadd.f32 %v11658_v0, %v761_v1  ;;  %v601_v22 = vadd.f32 %v680_v12, %v11653_v41 }
 0x5a7   :  { %7372 = vrot.lane.b32.xlu0 %v874_v2, %s8746_s7  ;;  %v11690_v46 = vpop.permute.xlu1 %7178  ;;  %v860_v9 = vadd.f32 %v11625_v49, %v837_v17  ;;  %v822_v28 = vadd.f32 %v806_v61, %v790_v31  ;;  %v698_v43 = vadd.f32 %v682_v20, %v666_v11  ;;  %v603_v13 = vadd.f32 %v682_v20, %v11681_v36  ;;  %v748_v17 = vld [vmem:[#allocation5 + $0x110] sm:$0xff]  ;;  %v12174_v11 = vld [vmem:[#allocation46_spill] sm:$0xff] }
 0x5a8   :  { %v727_v32 = vadd.f32 %v11644_v3, %v695_v30  ;;  %v825_v55 = vadd.f32 %v809_v42, %v793_v15  ;;  %v633_v24 = vadd.f32 %v712_v26, %v601_v22  ;;  %v878_v21 = vmax.f32 %v862_v4, 0.0  ;;  %v12175_v22 = vld [vmem:[#allocation44_spill] sm:$0xff] }
 0x5a9   :  { %v876_v45 = vmax.f32 %v860_v9, 0.0  ;;  %v838_v19 = vmul.f32 0.11111111, %v822_v28  ;;  %v730_v34 = vadd.f32 %v714_v63, %v698_v43  ;;  %v635_v6 = vadd.f32 %v714_v63, %v603_v13 }
 0x5aa   :  { %v11698_v51 = vpop.permute.xlu0 %7192  ;;  %v760_v25 = vadd.f32 %v727_v32, %v11653_v41  ;;  %v841_v52 = vmul.f32 0.11111111, %v825_v55  ;;  %v665_v38 = vadd.f32 %v11655_v48, %v633_v24  ;;  %v11713_v41 = vld [vmem:[#allocation5 + $0x101] sm:$0xff]  ;;  %v7412_v9 = vsel %vm1879_vm4, %v12174_v11, %v11638_v44  ;;  %v812_v32 = vld [vmem:[#allocation5 + $0x112] sm:$0xff] }
 0x5ab   :  { %7376 = vrot.lane.b32.xlu0 %v876_v45, %s8746_s7  ;;  %v11702_v35 = vpop.permute.xlu1 %7182  ;;  %v861_v3 = vadd.f32 %v11625_v49, %v838_v19  ;;  %v763_v60 = vadd.f32 %v11706_v33, %v730_v34  ;;  %v667_v18 = vadd.f32 %v11706_v33, %v635_v6  ;;  %v11722_v48 = vld [vmem:[#allocation5 + $0x102] sm:$0xff]  ;;  %v7414_v19 = vsel %vm1879_vm4, %v12175_v22, %v11648_v8 }
 0x5ac   :  { %v792_v53 = vadd.f32 %v760_v25, %v680_v12  ;;  %v864_v39 = vadd.f32 %v11625_v49, %v841_v52  ;;  %v697_v10 = vadd.f32 %v11658_v0, %v665_v38  ;;  %v12185_v22 = vld [vmem:[#allocation70_spill] sm:$0xff] }
 0x5ad   :  { %v877_v59 = vmax.f32 %v861_v3, 0.0  ;;  %v795_v12 = vadd.f32 %v11713_v41, %v763_v60  ;;  %v699_v62 = vadd.f32 %v11713_v41, %v667_v18  ;;  %v12176_v3 = vld [vmem:[#allocation62_spill] sm:$0xff]  ;;  %v12177_v60 = vld [vmem:[#allocation55_spill] sm:$0xff] }
 0x5ae   :  { %v11710_v29 = vpop.permute.xlu0 %7196  ;;  %v824_v5 = vadd.f32 %v792_v53, %v712_v26  ;;  %v880_v16 = vmax.f32 %v864_v39, 0.0  ;;  %v729_v23 = vadd.f32 %v809_v42, %v697_v10  ;;  %v780_v42 = vld [vmem:[#allocation5 + $0x111] sm:$0xff]  ;;  %v7416_v52 = vsel %vm1879_vm4, %v12176_v3, %v11662_v56  ;;  %v12178_v39 = vld [vmem:[#allocation50_spill] sm:$0xff]  ;;  %v12179_v10 = vld [vmem:[#allocation69_spill] sm:$0xff] }
 0x5af   :  { %7380 = vrot.lane.b32.xlu0 %v878_v21, %s8746_s7  ;;  %v11717_v40 = vpop.permute.xlu1 %7186  ;;  %7378 = vrot.lane.b32.xlu1 %v877_v59, %s8746_s7  ;;  %v827_v27 = vadd.f32 %v11722_v48, %v795_v12  ;;  %v731_v37 = vadd.f32 %v11722_v48, %v699_v62  ;;  %v7418_v38 = vsel %vm1879_vm4, %v12177_v60, %v11674_v57  ;;  %v12180_v57 = vld [vmem:[#allocation47_spill] sm:$0xff] }
 0x5b0   :  { %v840_v58 = vmul.f32 0.11111111, %v824_v5  ;;  %v762_v7 = vadd.f32 %v729_v23, %v11681_v36  ;;  %v7413_v18 = vsel %vm1879_vm4, %v12178_v39, %v11677_v14  ;;  %v7420_v62 = vsel %vm1879_vm4, %v12179_v10, %v11684_v50 }
 0x5b1   :  { %v843_v2 = vmul.f32 0.11111111, %v827_v27  ;;  %v764_v61 = vadd.f32 %v748_v17, %v731_v37  ;;  %v604_v37 = vadd.f32 %v11713_v41, %v11706_v33  ;;  %v12183_v33 = vld [vmem:[#allocation71_spill] sm:$0xff] }
 0x5b2   :  { %v11726_v54 = vpop.permute.xlu0 %7200  ;;  %v863_v0 = vadd.f32 %v11625_v49, %v840_v58  ;;  %v794_v1 = vadd.f32 %v762_v7, %v682_v20  ;;  %v7415_v58 = vsel %vm1879_vm4, %v12180_v57, %v11690_v46  ;;  %v12182_v7 = vld [vmem:[#allocation65_spill] sm:$0xff]  ;;  %v7424_v41 = vsel %vm1879_vm4, %v12183_v33, %v11710_v29 }
 0x5b3   :  { %7384 = vrot.lane.b32.xlu0 %v880_v16, %s8746_s7  ;;  %v11730_v26 = vpop.permute.xlu1 %7190  ;;  %v866_v31 = vadd.f32 %v11625_v49, %v843_v2  ;;  %v796_v4 = vadd.f32 %v780_v42, %v764_v61  ;;  %v7417_v61 = vsel %vm1879_vm4, %v12182_v7, %v11702_v35  ;;  %v7426_v29 = vsel %vm1879_vm4, %v12185_v22, %v11726_v54  ;;  %v12188_v54 = vld [vmem:[#allocation73_spill] sm:$0xff]  ;;  %v750_v22 = vld [vmem:[#allocation5 + $0x130] sm:$0xff] }
 0x5b4   :  { %v879_v47 = vmax.f32 %v863_v0, 0.0  ;;  %v826_v45 = vadd.f32 %v794_v1, %v714_v63  ;;  %v12181_v0 = vld [vmem:[#allocation66_spill] sm:$0xff] }
 0x5b5   :  { %v882_v28 = vmax.f32 %v866_v31, 0.0  ;;  %v828_v43 = vadd.f32 %v812_v32, %v796_v4  ;;  %v7422_v2 = vsel %vm1879_vm4, %v12181_v0, %v11698_v51  ;;  %v636_v31 = vadd.f32 %v11722_v48, %v604_v37  ;;  %v749_v7 = vld [vmem:[#allocation5 + $0x120] sm:$0xff] }
 0x5b6   :  { %v7237_v30 = vpop.permute.xlu0 %7236  ;;  %7382 = vrot.lane.b32.xlu1 %v879_v47, %s8746_s7  ;;  %v842_v20 = vmul.f32 0.11111111, %v826_v45  ;;  %v605_v45 = vadd.f32 %v780_v42, %v748_v17 }
 0x5b7   :  { %v7195_v15 = vpop.permute.xlu1 %7194  ;;  %v11740_v36 = vsel %vm1904_vm6, %v7412_v9, %v7237_v30  ;;  %7388 = vrot.lane.b32.xlu0 %v882_v28, %s8746_s7  ;;  %v844_v44 = vmul.f32 0.11111111, %v828_v43  ;;  %v668_v11 = vadd.f32 %v748_v17, %v636_v31  ;;  %v12184_v9 = vld [vmem:[#allocation63_spill] sm:$0xff] }
 0x5b8   :  { %v865_v13 = vadd.f32 %v11625_v49, %v842_v20  ;;  %v7419_v30 = vsel %vm1879_vm4, %v12184_v9, %v11717_v40  ;;  %v637_v20 = vadd.f32 %v812_v32, %v605_v45 }
 0x5b9   :  { %v867_v24 = vadd.f32 %v11625_v49, %v844_v44  ;;  %v700_v28 = vadd.f32 %v780_v42, %v668_v11  ;;  %v12186_v44 = vld [vmem:[#allocation68_spill] sm:$0xff]  ;;  %v12187_v42 = vld [vmem:[#allocation67_spill] sm:$0xff] }
 0x5ba   :  { %v7241_v55 = vpop.permute.xlu0 %7240  ;;  %v881_v63 = vmax.f32 %v865_v13, 0.0  ;;  %v7421_v40 = vsel %vm1879_vm4, %v12186_v44, %v11730_v26  ;;  %v782_v44 = vld [vmem:[#allocation5 + $0x131] sm:$0xff] }
 0x5bb   :  { %v7199_v25 = vpop.permute.xlu1 %7198  ;;  %v11748_v34 = vsel %vm1904_vm6, %v7414_v19, %v7241_v55  ;;  %v883_v53 = vmax.f32 %v867_v24, 0.0  ;;  %v732_v43 = vadd.f32 %v812_v32, %v700_v28 }
 0x5bc   :  { %7386 = vrot.lane.b32.xlu1 %v881_v63, %s8746_s7  ;;  %v7423_v63 = vsel %vm1879_vm4, %v12187_v42, %v7195_v15  ;;  %v7425_v3 = vsel %vm1879_vm4, %v12188_v54, %v7199_v25  ;;  %v814_v42 = vld [vmem:[#allocation5 + $0x132] sm:$0xff] }
 0x5be   :  { %v7245_v6 = vpop.permute.xlu0 %7244 }
 0x5bf   :  { %v7203_v21 = vpop.permute.xlu1 %7202  ;;  %v11756_v8 = vsel %vm1904_vm6, %v7416_v52, %v7245_v6  ;;  %v12189_v6 = vld [vmem:[#allocation72_spill] sm:$0xff] }
 0x5c0   :  { %7390 = vrot.lane.b32.xlu1 %v883_v53, %s8746_s7  ;;  %v7427_v53 = vsel %vm1879_vm4, %v12189_v6, %v7203_v21 }
 0x5c2   :  { %v7249_v59 = vpop.permute.xlu0 %7248 }
 0x5c3   :  { %v7239_v56 = vpop.permute.xlu1 %7238  ;;  %v11766_v5 = vsel %vm1904_vm6, %v7418_v38, %v7249_v59  ;;  %v11837_v59 = vld [vmem:[#allocation23] ss:$0 sm:$0xff] }
 0x5c4   :  { %v11769_v12 = vsel %vm1904_vm6, %v7413_v18, %v7239_v56 }
 0x5c6   :  { %v7253_v16 = vpop.permute.xlu0 %7252 }
 0x5c7   :  { %v7243_v27 = vpop.permute.xlu1 %7242  ;;  %v11778_v14 = vsel %vm1904_vm6, %v7420_v62, %v7253_v16 }
 0x5c8   :  { %v11781_v23 = vsel %vm1904_vm6, %v7415_v58, %v7243_v27 }
 0x5ca   :  { %v7257_v50 = vpop.permute.xlu0 %7256 }
 0x5cb   :  { %v7247_v46 = vpop.permute.xlu1 %7246  ;;  %v11792_v47 = vsel %vm1904_vm6, %v7422_v2, %v7257_v50 }
 0x5cc   :  { %v11796_v1 = vsel %vm1904_vm6, %v7417_v61, %v7247_v46  ;;  %v669_v61 = vadd.f32 %v749_v7, %v637_v20  ;;  %v781_v46 = vld [vmem:[#allocation5 + $0x121] sm:$0xff]  ;;  %v765_v20 = vadd.f32 %v749_v7, %v732_v43 }
 0x5ce   :  { %v7261_v51 = vpop.permute.xlu0 %7260  ;;  %v701_v11 = vadd.f32 %v781_v46, %v669_v61 }
 0x5cf   :  { %v7251_v35 = vpop.permute.xlu1 %7250  ;;  %v11805_v4 = vsel %vm1904_vm6, %v7424_v41, %v7261_v51 }
 0x5d0   :  { %v11808_v48 = vsel %vm1904_vm6, %v7419_v30, %v7251_v35  ;;  %v813_v35 = vld [vmem:[#allocation5 + $0x122] sm:$0xff] }
 0x5d1   :  { %v733_v28 = vadd.f32 %v813_v35, %v701_v11 }
 0x5d2   :  { %v7265_v19 = vpop.permute.xlu0 %7264 }
 0x5d3   :  { %v7255_v55 = vpop.permute.xlu1 %7254  ;;  %v11817_v13 = vsel %vm1904_vm6, %v7426_v29, %v7265_v19  ;;  %v766_v19 = vadd.f32 %v750_v22, %v733_v28 }
 0x5d4   :  { %v11820_v17 = vsel %vm1904_vm6, %v7421_v40, %v7255_v55  ;;  %v797_v40 = vadd.f32 %v781_v46, %v765_v20 }
 0x5d5   :  { %v798_v55 = vadd.f32 %v782_v44, %v766_v19 }
 0x5d7   :  { %v7259_v32 = vpop.permute.xlu1 %7258 }
 0x5d8   :  { %v11825_v24 = vsel %vm1904_vm6, %v7423_v63, %v7259_v32  ;;  %v829_v63 = vadd.f32 %v813_v35, %v797_v40  ;;  %v830_v32 = vadd.f32 %v814_v42, %v798_v55 }
 0x5db   :  { %v7263_v52 = vpop.permute.xlu1 %7262 }
 0x5dc   :  { %v11830_v26 = vsel %vm1904_vm6, %v7425_v3, %v7263_v52 }
 0x5df   :  { %v7267_v60 = vpop.permute.xlu1 %7266 }
 0x5e0   :  { %v11835_v38 = vsel %vm1904_vm6, %v7427_v53, %v7267_v60  ;;  %v845_v53 = vmul.f32 0.11111111, %v829_v63 }
 0x5fd   :  { %v8160_v15 = vpop.f32.mrb[64].mxu1 }
 0x5fe   :  { %v6325_v39 = vadd.f32 %v8160_v15, %v11837_v59  ;;  %v6316_v18 = vpop.f32.mrb[65].mxu1 }
 0x5ff   :  { %v8161_v56 = vpop.f32.mrb[66].mxu1  ;;  %v6317_v62 = vadd.f32 %v11837_v59, %v6316_v18  ;;  %v846_v18 = vmul.f32 0.11111111, %v830_v32 }
 0x600   :  { %v6328_v25 = vadd.f32 %v8161_v56, %v11837_v59  ;;  %v6319_v10 = vpop.f32.mrb[67].mxu1  ;;  %7304 = vrot.lane.b32.xlu0 %v6325_v39, %s8743_s13 }
 0x601   :  { %v6320_v21 = vadd.f32 %v11837_v59, %v6319_v10 }
 0x602   :  { %7306 = vrot.lane.b32.xlu1 %v6328_v25, %s8743_s13 }
 0x604   :  { %7300 = vrot.lane.b32.xlu0 %v6317_v62, %s8743_s13  ;;  %v868_v62 = vadd.f32 %v11625_v49, %v845_v53 }
 0x606   :  { %7302 = vrot.lane.b32.xlu1 %v6320_v21, %s8743_s13  ;;  %v869_v21 = vadd.f32 %v11625_v49, %v846_v18 }
 0x60a   :  { %v7365_v3 = vpop.permute.xlu0 %7364 }
 0x610   :  { %v7367_v60 = vpop.permute.xlu1 %7366 }
 0x614   :  { %v8164_v16 = vpop.f32.mrb[68].mxu1 }
 0x615   :  { %v6341_v57 = vadd.f32 %v8164_v16, %v11837_v59  ;;  %v6332_v58 = vpop.f32.mrb[69].mxu1  ;;  %v7369_v25 = vpop.permute.xlu0 %7368 }
 0x616   :  { %v8165_v27 = vpop.f32.mrb[70].mxu1  ;;  %v6333_v2 = vadd.f32 %v11837_v59, %v6332_v58  ;;  %v7371_v16 = vpop.permute.xlu1 %7370  ;;  %v884_v58 = vmax.f32 %v868_v62, 0.0 }
 0x617   :  { %7312 = vrot.lane.b32.xlu0 %v6341_v57, %s8743_s13  ;;  %v6344_v37 = vadd.f32 %v8165_v27, %v11837_v59  ;;  %v6335_v0 = vpop.f32.mrb[71].mxu1  ;;  %v11872_v57 = vld [vmem:[#allocation26] ss:$0 sm:$0xff] }
 0x618   :  { %v6336_v50 = vadd.f32 %v11837_v59, %v6335_v0  ;;  %v885_v0 = vmax.f32 %v869_v21, 0.0 }
 0x619   :  { %7314 = vrot.lane.b32.xlu1 %v6344_v37, %s8743_s13  ;;  %v7373_v27 = vpop.permute.xlu0 %7372 }
 0x61b   :  { %7308 = vrot.lane.b32.xlu0 %v6333_v2, %s8743_s13 }
 0x61d   :  { %7310 = vrot.lane.b32.xlu1 %v6336_v50, %s8743_s13 }
 0x626   :  { %v8168_v31 = vpop.f32.mrb[72].mxu1 }
 0x627   :  { %v6357_v33 = vadd.f32 %v8168_v31, %v11837_v59  ;;  %v6348_v41 = vpop.f32.mrb[73].mxu1  ;;  %v7375_v31 = vpop.permute.xlu1 %7374 }
 0x628   :  { %v8169_v51 = vpop.f32.mrb[74].mxu1  ;;  %v6349_v45 = vadd.f32 %v11837_v59, %v6348_v41 }
 0x629   :  { %v6360_v9 = vadd.f32 %v8169_v51, %v11837_v59  ;;  %v6351_v30 = vpop.f32.mrb[75].mxu1  ;;  %7320 = vrot.lane.b32.xlu0 %v6357_v33, %s8743_s13  ;;  %v7377_v51 = vpop.permute.xlu0 %7376 }
 0x62a   :  { %v6352_v29 = vadd.f32 %v11837_v59, %v6351_v30 }
 0x62b   :  { %7322 = vrot.lane.b32.xlu1 %v6360_v9, %s8743_s13  ;;  %v7379_v30 = vpop.permute.xlu1 %7378 }
 0x62d   :  { %7316 = vrot.lane.b32.xlu0 %v6349_v45, %s8743_s13  ;;  %v7381_v40 = vpop.permute.xlu0 %7380 }
 0x62f   :  { %7318 = vrot.lane.b32.xlu1 %v6352_v29, %s8743_s13  ;;  %v7383_v32 = vpop.permute.xlu1 %7382 }
 0x631   :  { %v7385_v53 = vpop.permute.xlu0 %7384 }
 0x638   :  { %v8172_v54 = vpop.f32.mrb[76].mxu1 }
 0x639   :  { %v6373_v52 = vadd.f32 %v8172_v54, %v11837_v59  ;;  %v6364_v6 = vpop.f32.mrb[77].mxu1 }
 0x63a   :  { %v8173_v43 = vpop.f32.mrb[78].mxu1  ;;  %v6365_v10 = vadd.f32 %v11837_v59, %v6364_v6 }
 0x63b   :  { %v6376_v15 = vadd.f32 %v8173_v43, %v11837_v59  ;;  %v6367_v39 = vpop.f32.mrb[79].mxu1  ;;  %7328 = vrot.lane.b32.xlu0 %v6373_v52, %s8743_s13 }
 0x63c   :  { %v6368_v56 = vadd.f32 %v11837_v59, %v6367_v39 }
 0x63d   :  { %7330 = vrot.lane.b32.xlu1 %v6376_v15, %s8743_s13 }
 0x63f   :  { %7324 = vrot.lane.b32.xlu0 %v6365_v10, %s8743_s13 }
 0x641   :  { %7326 = vrot.lane.b32.xlu1 %v6368_v56, %s8743_s13  ;;  %v7387_v56 = vpop.permute.xlu1 %7386 }
 0x642   :  { %v8188_v37 = vpop.f32.mrb[48].mxu0 }
 0x643   :  { %7392 = vrot.lane.b32.xlu0 %v884_v58, %s8746_s7  ;;  %v7102_v59 = vadd.f32 %v8188_v37, %v11872_v57  ;;  %v7093_v2 = vpop.f32.mrb[49].mxu0 }
 0x644   :  { %v7094_v50 = vadd.f32 %v11872_v57, %v7093_v2  ;;  %v8189_v7 = vpop.f32.mrb[50].mxu0 }
 0x645   :  { %7394 = vrot.lane.b32.xlu1 %v885_v0, %s8746_s7  ;;  %v7462_v49 = vsel %vm1879_vm4, %v7102_v59, %v7369_v25  ;;  %v7105_v61 = vadd.f32 %v8189_v7, %v11872_v57  ;;  %v7096_v46 = vpop.f32.mrb[51].mxu0  ;;  %v7389_v59 = vpop.permute.xlu0 %7388 }
 0x646   :  { %7481 = vst.msk [vmem:[#allocation29 + $0x28] sm:$0xff] %vm4653_vm10, %v7462_v49  ;;  %v7460_v11 = vsel %vm1879_vm4, %v7094_v50, %v7365_v3  ;;  %v7097_v33 = vadd.f32 %v11872_v57, %v7096_v46 }
 0x647   :  { %7477 = vst.msk [vmem:[#allocation29 + $0x8] sm:$0xff] %vm4653_vm10, %v7460_v11  ;;  %v7463_v41 = vsel %vm1879_vm4, %v7105_v61, %v7371_v16  ;;  %v7391_v61 = vpop.permute.xlu1 %7390 }
 0x648   :  { %7483 = vst.msk [vmem:[#allocation29 + $0x38] sm:$0xff] %vm4653_vm10, %v7463_v41  ;;  %v7461_v9 = vsel %vm1879_vm4, %v7097_v33, %v7367_v60 }
 0x649   :  { %7479 = vst.msk [vmem:[#allocation29 + $0x18] sm:$0xff] %vm4653_vm10, %v7461_v9 }
 0x64b   :  { %v8192_v35 = vpop.f32.mrb[52].mxu0 }
 0x64c   :  { %v7118_v28 = vadd.f32 %v8192_v35, %v11872_v57  ;;  %v7109_v45 = vpop.f32.mrb[53].mxu0 }
 0x64d   :  { %v7110_v22 = vadd.f32 %v11872_v57, %v7109_v45  ;;  %v8193_v20 = vpop.f32.mrb[54].mxu0 }
 0x64e   :  { %v7466_v29 = vsel %vm1879_vm4, %v7118_v28, %v7377_v51  ;;  %v7121_v19 = vadd.f32 %v8193_v20, %v11872_v57  ;;  %v7112_v44 = vpop.f32.mrb[55].mxu0 }
 0x64f   :  { %7489 = vst.msk [vmem:[#allocation29 + $0x68] sm:$0xff] %vm4653_vm10, %v7466_v29  ;;  %v7464_v55 = vsel %vm1879_vm4, %v7110_v22, %v7373_v27  ;;  %v7113_v42 = vadd.f32 %v11872_v57, %v7112_v44 }
 0x650   :  { %7485 = vst.msk [vmem:[#allocation29 + $0x48] sm:$0xff] %vm4653_vm10, %v7464_v55  ;;  %v7467_v63 = vsel %vm1879_vm4, %v7121_v19, %v7379_v30 }
 0x651   :  { %7491 = vst.msk [vmem:[#allocation29 + $0x78] sm:$0xff] %vm4653_vm10, %v7467_v63  ;;  %v7465_v54 = vsel %vm1879_vm4, %v7113_v42, %v7375_v31 }
 0x652   :  { %7487 = vst.msk [vmem:[#allocation29 + $0x58] sm:$0xff] %vm4653_vm10, %v7465_v54 }
 0x653   :  { %v8196_v3 = vpop.f32.mrb[56].mxu0 }
 0x654   :  { %v7134_v52 = vadd.f32 %v8196_v3, %v11872_v57  ;;  %v7125_v6 = vpop.f32.mrb[57].mxu0 }
 0x655   :  { %v7126_v43 = vadd.f32 %v11872_v57, %v7125_v6  ;;  %v8197_v60 = vpop.f32.mrb[58].mxu0 }
 0x656   :  { %v7470_v15 = vsel %vm1879_vm4, %v7134_v52, %v7385_v53  ;;  %v7137_v39 = vadd.f32 %v8197_v60, %v11872_v57  ;;  %v7128_v18 = vpop.f32.mrb[59].mxu0 }
 0x657   :  { %7497 = vst.msk [vmem:[#allocation29 + $0xa8] sm:$0xff] %vm4653_vm10, %v7470_v15  ;;  %v7468_v25 = vsel %vm1879_vm4, %v7126_v43, %v7381_v40  ;;  %v7129_v10 = vadd.f32 %v11872_v57, %v7128_v18 }
 0x658   :  { %7493 = vst.msk [vmem:[#allocation29 + $0x88] sm:$0xff] %vm4653_vm10, %v7468_v25  ;;  %v7471_v62 = vsel %vm1879_vm4, %v7137_v39, %v7387_v56 }
 0x659   :  { %7499 = vst.msk [vmem:[#allocation29 + $0xb8] sm:$0xff] %vm4653_vm10, %v7471_v62  ;;  %v7469_v21 = vsel %vm1879_vm4, %v7129_v10, %v7383_v32 }
 0x65a   :  { %7495 = vst.msk [vmem:[#allocation29 + $0x98] sm:$0xff] %vm4653_vm10, %v7469_v21 }
 0x65b   :  { %v8200_v16 = vpop.f32.mrb[60].mxu0 }
 0x65c   :  { %v11914_v58 = vadd.f32 %v8200_v16, %v11872_v57  ;;  %v7141_v27 = vpop.f32.mrb[61].mxu0 }
 0x65d   :  { %v7142_v37 = vadd.f32 %v11872_v57, %v7141_v27  ;;  %v8201_v0 = vpop.f32.mrb[62].mxu0 }
 0x65e   :  { %v11918_v2 = vadd.f32 %v8201_v0, %v11872_v57  ;;  %v7144_v50 = vpop.f32.mrb[63].mxu0 }
 0x65f   :  { %v7472_v7 = vsel %vm1879_vm4, %v7142_v37, %v7389_v59  ;;  %v7145_v49 = vadd.f32 %v11872_v57, %v7144_v50 }
 0x660   :  { %7501 = vst.msk [vmem:[#allocation29 + $0xc8] sm:$0xff] %vm4653_vm10, %v7472_v7 }
 0x661   :  { %v7473_v46 = vsel %vm1879_vm4, %v7145_v49, %v7391_v61 }
 0x662   :  { %7503 = vst.msk [vmem:[#allocation29 + $0xd8] sm:$0xff] %vm4653_vm10, %v7473_v46 }
 0x672   :  { %v7305_v31 = vpop.permute.xlu0 %7304 }
 0x673   :  { %v7446_v11 = vsel %vm1976_vm8, %v11748_v34, %v7305_v31 }
 0x674   :  { %7480 = vst [vmem:[#allocation29 + $0x20] sm:$0xff] %v7446_v11  ;;  %v7307_v33 = vpop.permute.xlu1 %7306 }
 0x675   :  { %v7447_v41 = vsel %vm1976_vm8, %v11781_v23, %v7307_v33 }
 0x676   :  { %7482 = vst [vmem:[#allocation29 + $0x30] sm:$0xff] %v7447_v41  ;;  %v7301_v51 = vpop.permute.xlu0 %7300 }
 0x677   :  { %v7444_v57 = vsel %vm1976_vm8, %v11740_v36, %v7301_v51 }
 0x678   :  { %7476 = vst [vmem:[#allocation29] sm:$0xff] %v7444_v57  ;;  %v7303_v9 = vpop.permute.xlu1 %7302 }
 0x679   :  { %v7445_v30 = vsel %vm1976_vm8, %v11769_v12, %v7303_v9 }
 0x67a   :  { %7478 = vst [vmem:[#allocation29 + $0x10] sm:$0xff] %v7445_v30 }
 0x689   :  { %v7313_v35 = vpop.permute.xlu0 %7312 }
 0x68a   :  { %v7450_v34 = vsel %vm1976_vm8, %v11766_v5, %v7313_v35 }
 0x68b   :  { %7488 = vst [vmem:[#allocation29 + $0x60] sm:$0xff] %v7450_v34  ;;  %v7315_v28 = vpop.permute.xlu1 %7314 }
 0x68c   :  { %v7451_v23 = vsel %vm1976_vm8, %v11808_v48, %v7315_v28 }
 0x68d   :  { %v7309_v45 = vpop.permute.xlu0 %7308  ;;  %7490 = vst [vmem:[#allocation29 + $0x70] sm:$0xff] %v7451_v23 }
 0x68e   :  { %v7448_v36 = vsel %vm1976_vm8, %v11756_v8, %v7309_v45 }
 0x68f   :  { %7484 = vst [vmem:[#allocation29 + $0x40] sm:$0xff] %v7448_v36  ;;  %v7311_v22 = vpop.permute.xlu1 %7310 }
 0x690   :  { %v7449_v12 = vsel %vm1976_vm8, %v11796_v1, %v7311_v22 }
 0x691   :  { %7486 = vst [vmem:[#allocation29 + $0x50] sm:$0xff] %v7449_v12 }
 0x69b   :  { %v7321_v20 = vpop.permute.xlu0 %7320 }
 0x69c   :  { %v7454_v5 = vsel %vm1976_vm8, %v11792_v47, %v7321_v20 }
 0x69d   :  { %7496 = vst [vmem:[#allocation29 + $0xa0] sm:$0xff] %v7454_v5  ;;  %v7323_v29 = vpop.permute.xlu1 %7322 }
 0x69e   :  { %v7455_v48 = vsel %vm1976_vm8, %v11825_v24, %v7323_v29 }
 0x69f   :  { %7498 = vst [vmem:[#allocation29 + $0xb0] sm:$0xff] %v7455_v48  ;;  %v7317_v19 = vpop.permute.xlu0 %7316 }
 0x6a0   :  { %v7452_v8 = vsel %vm1976_vm8, %v11778_v14, %v7317_v19 }
 0x6a1   :  { %7492 = vst [vmem:[#allocation29 + $0x80] sm:$0xff] %v7452_v8  ;;  %v7319_v44 = vpop.permute.xlu1 %7318 }
 0x6a2   :  { %v7453_v1 = vsel %vm1976_vm8, %v11820_v17, %v7319_v44 }
 0x6a3   :  { %7494 = vst [vmem:[#allocation29 + $0x90] sm:$0xff] %v7453_v1 }
 0x6ad   :  { %v7329_v40 = vpop.permute.xlu0 %7328 }
 0x6ae   :  { %v7458_v47 = vsel %vm1976_vm8, %v11817_v13, %v7329_v40 }
 0x6af   :  { %7504 = vst [vmem:[#allocation29 + $0xe0] sm:$0xff] %v7458_v47  ;;  %v7331_v55 = vpop.permute.xlu1 %7330 }
 0x6b0   :  { %v7459_v24 = vsel %vm1976_vm8, %v11835_v38, %v7331_v55 }
 0x6b1   :  { %7506 = vst [vmem:[#allocation29 + $0xf0] sm:$0xff] %v7459_v24  ;;  %v7325_v42 = vpop.permute.xlu0 %7324 }
 0x6b2   :  { %v7456_v14 = vsel %vm1976_vm8, %v11805_v4, %v7325_v42 }
 0x6b3   :  { %7500 = vst [vmem:[#allocation29 + $0xc0] sm:$0xff] %v7456_v14  ;;  %v7327_v63 = vpop.permute.xlu1 %7326 }
 0x6b4   :  { %v7457_v17 = vsel %vm1976_vm8, %v11830_v26, %v7327_v63 }
 0x6b5   :  { %7502 = vst [vmem:[#allocation29 + $0xd0] sm:$0xff] %v7457_v17  ;;  %v7393_v32 = vpop.permute.xlu0 %7392 }
 0x6b6   :  { %v7474_v13 = vsel %vm1879_vm4, %v11914_v58, %v7393_v32 }
 0x6b7   :  { %7505 = vst.msk [vmem:[#allocation29 + $0xe8] sm:$0xff] %vm4653_vm10, %v7474_v13  ;;  %v7395_v38 = vpop.permute.xlu1 %7394 }
 0x6b8   :  { %v7475_v54 = vsel %vm1879_vm4, %v11918_v2, %v7395_v38 }
 0x6b9   :  { %7507 = vst.msk [vmem:[#allocation29 + $0xf8] sm:$0xff] %vm4653_vm10, %v7475_v54 }
 0x6ba   :  { %8698 = shalt.err (!%p8695_p4)
}
 0x6bb   :  { %s8699_s2 = scalar_lea.hbm %s11990_s14, 4096 }
 0x6bc   :  { %p8700_p5 = scmp.ne.s32.totalorder %s11990_s14, %s8699_s2  ;;  %p8703_p6 = scmp.lt.u32.totalorder %s8699_s2, %s11990_s14 }
 0x6be   :  { %p8705_p7 = pnand %p8703_p6, %p8700_p5 }
 0x6c0   :  { %8708 = shalt.err (!%p8705_p7)
}
 0x6c1   :  { %s8752_s5 = smov 256  }
 0x6c2   :  { %7519 = dma.vmem_to_hbm [thread:$0]  %s7514_s11, 4096, %s11990_s14, [#allocation8], %s8752_s5, %s8752_s5, %s8745_s8  }
 0x6c3   :  { %8725 = dma.done.wait [#allocation8], 4096  }
 0x6c4   :  { %8726 = vsyncadd [#allocation8], 4294963200 }
 0x6c5   :  { %7523 = vsyncpa [#allocation7], 1 }
 0x6c6   :  { %7524 = vsyncpa [#allocation10], 1 }
 0x6c7   :  { %7525 = vsyncpa [#allocation13], 1 }
 0x6c8   :  { %7526 = vsyncpa [#allocation16], 1 }
 0x6c9   :  { %7527 = vsyncpa [#allocation19], 1 }
 0x6ca   :  { %7528 = vsyncpa [#allocation22], 1 }
 0x6cb   :  { %7529 = vsyncpa [#allocation25], 1 }
 0x6cc   :  { %7530 = vsyncpa [#allocation28], 1 }
 0x6cd   :  { %7531 = vsyncpa [#allocation8], 1 }

</bundles_post_ra>
